<compile_context>
chip_gen: v6e
topology: v6e:2x2x1
jax: 0.10.0
libtpu: 0.0.40
codegen_flags: <defaults>
</compile_context>

<pallas_src>
import math

import numpy as np
import jax
import jax.numpy as jnp
from jax.experimental import pallas as pl
from jax.experimental.pallas import tpu as pltpu

# ---------------- hyper-parameters consistent with UViTSinoSlice -------------
IMG_SIZE = 33            # img_size (small; 33 % 4 != 0 like 641 % 4 != 0)
PATCH_SIZE = 4
IN_CHANS = 1
OUT_CHANS = 1
EMBED_DIM = 32
DEPTH = 4                # -> 2 in_blocks, 1 mid_block, 2 out_blocks (skip)
NUM_HEADS = 4
MLP_RATIO = 4.0
NUM_CLASSES = 640        # > 0  -> label_emb (Linear(2, D)), extras = 2
EXTRAS = 2

PADDING = (PATCH_SIZE - IMG_SIZE % PATCH_SIZE) // 2 + 1      # = 2
NUM_PATCHES = IMG_SIZE // PATCH_SIZE + 1                     # = 9
SEQ_LEN = EXTRAS + NUM_PATCHES                               # = 11
MLP_HIDDEN = int(EMBED_DIM * MLP_RATIO)                      # = 128
HEAD_DIM = EMBED_DIM // NUM_HEADS                            # = 8
DEC_DIM = PATCH_SIZE * OUT_CHANS // IN_CHANS                 # = 4

N_IN_BLOCKS = DEPTH // 2                                     # = 2
N_BLOCKS = 2 * N_IN_BLOCKS + 1                               # = 5
ATTN_SCALE = HEAD_DIM ** (-0.5)
NEG_INF = -1e30


# ---------------- in-kernel math helpers -------------------------------------
def _layernorm(x, g, b, eps=1e-5):
    mu = jnp.mean(x, axis=-1, keepdims=True)
    xc = x - mu
    var = jnp.mean(xc * xc, axis=-1, keepdims=True)
    return xc * jax.lax.rsqrt(var + eps) * g + b


def _erf(x):
    # Abramowitz & Stegun 7.1.26 polynomial erf (max abs err ~1.5e-7),
    # built only from Mosaic-supported elementwise ops.
    a1, a2, a3, a4, a5 = (0.254829592, -0.284496736, 1.421413741,
                          -1.453152027, 1.061405429)
    p = 0.3275911
    ax = jnp.abs(x)
    t = 1.0 / (1.0 + p * ax)
    poly = ((((a5 * t + a4) * t + a3) * t + a2) * t + a1) * t
    y = 1.0 - poly * jnp.exp(-ax * ax)
    return jnp.where(x >= 0, y, -y)


def _gelu(x):
    # matches torch.nn.GELU(approximate='none') up to the erf-poly tolerance
    return 0.5 * x * (1.0 + _erf(x * 0.7071067811865476))


# ---------------- fused transformer kernel -----------------------------------
def _fused_kernel(tok_ref, bias_ref,
                  n1g_ref, n1b_ref, wq_ref, wk_ref, wv_ref, wo_ref, pb_ref,
                  n2g_ref, n2b_ref, f1w_ref, f1b_ref, f2w_ref, f2b_ref,
                  swx_ref, sws_ref, sb_ref,
                  ng_ref, nb_ref, dw_ref, db_ref,
                  out_ref):
    x = tok_ref[...]                # (N, D)   N = B * SEQ_LEN
    bias = bias_ref[...]            # (N, N)   0 within batch, -1e30 across

    skips = []
    for bi in range(N_BLOCKS):      # static unroll over the 5 blocks
        # --- skip_linear for out-blocks: cat([x, skip]) @ W == x@Wx + s@Ws ---
        if bi > N_IN_BLOCKS:
            si = bi - N_IN_BLOCKS - 1
            s = skips.pop()
            x = (jnp.dot(x, swx_ref[si], preferred_element_type=jnp.float32)
                 + jnp.dot(s, sws_ref[si], preferred_element_type=jnp.float32)
                 + sb_ref[si])

        # --- attention branch: x = x + proj(MHA(norm1(x))) -------------------
        h = _layernorm(x, n1g_ref[bi], n1b_ref[bi])
        acc = None
        for hh in range(NUM_HEADS):              # static unroll over heads
            wi = bi * NUM_HEADS + hh
            qh = jnp.dot(h, wq_ref[wi], preferred_element_type=jnp.float32)
            kh = jnp.dot(h, wk_ref[wi], preferred_element_type=jnp.float32)
            vh = jnp.dot(h, wv_ref[wi], preferred_element_type=jnp.float32)
            logits = jax.lax.dot_general(
                qh, kh, (((1,), (1,)), ((), ())),
                preferred_element_type=jnp.float32) * ATTN_SCALE
            logits = logits + bias               # block-diagonal batch mask
            logits = logits - jnp.max(logits, axis=-1, keepdims=True)
            e = jnp.exp(logits)
            inv = pl.reciprocal(jnp.sum(e, axis=-1, keepdims=True), approx=True)
            attn = e * inv
            oh = jnp.dot(attn, vh, preferred_element_type=jnp.float32)
            # concat-over-heads + proj == sum_h oh @ proj_w[h*hd:(h+1)*hd]
            c = jnp.dot(oh, wo_ref[wi], preferred_element_type=jnp.float32)
            acc = c if acc is None else acc + c
        x = x + acc + pb_ref[bi]

        # --- mlp branch: x = x + fc2(gelu(fc1(norm2(x)))) ---------------------
        h2 = _layernorm(x, n2g_ref[bi], n2b_ref[bi])
        hid = jnp.dot(h2, f1w_ref[bi], preferred_element_type=jnp.float32) + f1b_ref[bi]
        hid = _gelu(hid)
        x = x + jnp.dot(hid, f2w_ref[bi], preferred_element_type=jnp.float32) + f2b_ref[bi]

        if bi < N_IN_BLOCKS:
            skips.append(x)

    # --- final LayerNorm + decoder_pred ---------------------------------------
    h = _layernorm(x, ng_ref[...], nb_ref[...])
    out_ref[...] = (jnp.dot(h, dw_ref[...], preferred_element_type=jnp.float32)
                    + db_ref[...])


def fused_transformer(tokens, attn_bias, pk):
    N = tokens.shape[0]
    return pl.pallas_call(
        _fused_kernel,
        out_shape=jax.ShapeDtypeStruct((N, DEC_DIM), jnp.float32),
    )(tokens, attn_bias,
      pk["n1_g"], pk["n1_b"], pk["wq"], pk["wk"], pk["wv"], pk["wo"], pk["proj_b"],
      pk["n2_g"], pk["n2_b"], pk["fc1_w"], pk["fc1_b"], pk["fc2_w"], pk["fc2_b"],
      pk["skip_wx"], pk["skip_ws"], pk["skip_b"],
      pk["norm_g"], pk["norm_b"], pk["dec_w"], pk["dec_b"])


# ---------------- glue: sinusoidal timestep embedding -------------------------
def timestep_embedding(timesteps, dim, max_period=10000.0):
    half = dim // 2
    freqs = jnp.exp(-math.log(max_period)
                    * jnp.arange(half, dtype=jnp.float32) / half)
    args = timesteps[:, None].astype(jnp.float32) * freqs[None]
    return jnp.concatenate([jnp.cos(args), jnp.sin(args)], axis=-1)  # dim even


# ---------------- full forward -------------------------------------------------
def uvit_forward(pk, x, timesteps, view):
    B = x.shape[0]

    # patch_embed: Conv1d(kernel=stride=PATCH_SIZE, padding=PADDING) as
    # non-overlapping patch extraction + tiny matmul (XLA glue).
    xp = jnp.pad(x, ((0, 0), (0, 0), (PADDING, PADDING)))
    xp = xp[:, :, :NUM_PATCHES * PATCH_SIZE]
    patches = xp.reshape(B, IN_CHANS, NUM_PATCHES, PATCH_SIZE)
    patches = patches.transpose(0, 2, 1, 3).reshape(B, NUM_PATCHES,
                                                    IN_CHANS * PATCH_SIZE)
    pe = jnp.einsum("bpk,kd->bpd", patches, pk["patch_w"]) + pk["patch_b"]

    # time token (time_embed == nn.Identity since mlp_time_embed=False)
    tt = timestep_embedding(timesteps, EMBED_DIM)[:, None, :]
    # label token (view is not None, extras == 2)
    le = (view @ pk["label_w"] + pk["label_b"])[:, None, :]

    tokens = jnp.concatenate([le, tt, pe], axis=1) + pk["pos_embed"]  # (B,T,D)
    tokens = tokens.reshape(B * SEQ_LEN, EMBED_DIM)

    # block-diagonal additive attention bias (compile-time constant per B)
    rows = np.arange(B * SEQ_LEN) // SEQ_LEN
    attn_bias = jnp.asarray(
        np.where(rows[:, None] == rows[None, :], 0.0, NEG_INF), jnp.float32)

    dec = fused_transformer(tokens, attn_bias, pk)                    # (B*T, 4)

    out = dec.reshape(B, SEQ_LEN, DEC_DIM)[:, EXTRAS:, :]
    out = out.reshape(B, OUT_CHANS, NUM_PATCHES * PATCH_SIZE)
    off = (NUM_PATCHES * PATCH_SIZE - IMG_SIZE) // 2   # matches PyTorch crop
    return out[:, :, off:off + IMG_SIZE]


# ---------------- parameter packing (host-side, once) --------------------------
def pack_params(p):
    """Stack the per-block weights and pre-split per-head q/k/v/proj so the
    fused kernel only ever does 2-D matmuls with static leading-index loads."""
    D, H, hd, Dh = EMBED_DIM, NUM_HEADS, HEAD_DIM, MLP_HIDDEN
    blocks = list(p["in_blocks"]) + [p["mid_block"]] + list(p["out_blocks"])

    def heads_in(w2d):                    # (D, D) -> (H, D, hd)  [column split]
        return w2d.reshape(D, H, hd).transpose(1, 0, 2)

    def qkv_part(b, which):               # which: 0=q, 1=k, 2=v
        return heads_in(b["qkv_w"][:, which * D:(which + 1) * D])

    def stack_heads(fn):                   # -> (N_BLOCKS*H, D, hd)
        return jnp.stack([fn(b) for b in blocks]).reshape(N_BLOCKS * H, D, hd)

    packed = {
        # preamble / epilogue params (used in XLA glue)
        "patch_w": p["patch_w"], "patch_b": p["patch_b"],
        "label_w": p["label_w"], "label_b": p["label_b"],
        "pos_embed": p["pos_embed"],
        # stacked block params (kernel-resident)
        "n1_g": jnp.stack([b["n1_g"].reshape(1, D) for b in blocks]),
        "n1_b": jnp.stack([b["n1_b"].reshape(1, D) for b in blocks]),
        "wq": stack_heads(lambda b: qkv_part(b, 0)),
        "wk": stack_heads(lambda b: qkv_part(b, 1)),
        "wv": stack_heads(lambda b: qkv_part(b, 2)),
        "wo": jnp.stack([b["proj_w"].reshape(H, hd, D) for b in blocks]
                        ).reshape(N_BLOCKS * H, hd, D),
        "proj_b": jnp.stack([b["proj_b"].reshape(1, D) for b in blocks]),
        "n2_g": jnp.stack([b["n2_g"].reshape(1, D) for b in blocks]),
        "n2_b": jnp.stack([b["n2_b"].reshape(1, D) for b in blocks]),
        "fc1_w": jnp.stack([b["fc1_w"] for b in blocks]),
        "fc1_b": jnp.stack([b["fc1_b"].reshape(1, Dh) for b in blocks]),
        "fc2_w": jnp.stack([b["fc2_w"] for b in blocks]),
        "fc2_b": jnp.stack([b["fc2_b"].reshape(1, D) for b in blocks]),
        "skip_wx": jnp.stack([b["skip_w"][:D, :] for b in p["out_blocks"]]),
        "skip_ws": jnp.stack([b["skip_w"][D:, :] for b in p["out_blocks"]]),
        "skip_b": jnp.stack([b["skip_b"].reshape(1, D) for b in p["out_blocks"]]),
        # final norm + decoder
        "norm_g": p["norm_g"].reshape(1, D),
        "norm_b": p["norm_b"].reshape(1, D),
        "dec_w": p["dec_w"],
        "dec_b": p["dec_b"].reshape(1, DEC_DIM),
    }
    return packed


# ---------------- deterministic parameter init ---------------------------------
def init_params(key):
    def nrm(k, shape):
        return 0.02 * jax.random.normal(k, shape, jnp.float32)

    n_blocks = DEPTH // 2
    keys = jax.random.split(key, 5 + 2 * n_blocks + 1)
    ki = iter(keys)

    def block_params(k, skip):
        ks = jax.random.split(k, 5)
        p = {
            "n1_g": jnp.ones((EMBED_DIM,), jnp.float32),
            "n1_b": jnp.zeros((EMBED_DIM,), jnp.float32),
            "qkv_w": nrm(ks[0], (EMBED_DIM, 3 * EMBED_DIM)),   # qkv_bias=False
            "proj_w": nrm(ks[1], (EMBED_DIM, EMBED_DIM)),
            "proj_b": jnp.zeros((EMBED_DIM,), jnp.float32),
            "n2_g": jnp.ones((EMBED_DIM,), jnp.float32),
            "n2_b": jnp.zeros((EMBED_DIM,), jnp.float32),
            "fc1_w": nrm(ks[2], (EMBED_DIM, MLP_HIDDEN)),
            "fc1_b": jnp.zeros((MLP_HIDDEN,), jnp.float32),
            "fc2_w": nrm(ks[3], (MLP_HIDDEN, EMBED_DIM)),
            "fc2_b": jnp.zeros((EMBED_DIM,), jnp.float32),
        }
        if skip:
            p["skip_w"] = nrm(ks[4], (2 * EMBED_DIM, EMBED_DIM))
            p["skip_b"] = jnp.zeros((EMBED_DIM,), jnp.float32)
        return p

    return {
        "patch_w": nrm(next(ki), (IN_CHANS * PATCH_SIZE, EMBED_DIM)),
        "patch_b": jnp.zeros((EMBED_DIM,), jnp.float32),
        "label_w": nrm(next(ki), (2, EMBED_DIM)),
        "label_b": jnp.zeros((EMBED_DIM,), jnp.float32),
        "pos_embed": nrm(next(ki), (1, SEQ_LEN, EMBED_DIM)),
        "norm_g": jnp.ones((EMBED_DIM,), jnp.float32),
        "norm_b": jnp.zeros((EMBED_DIM,), jnp.float32),
        "dec_w": nrm(next(ki), (EMBED_DIM, DEC_DIM)),
        "dec_b": jnp.zeros((DEC_DIM,), jnp.float32),
        "in_blocks": [block_params(next(ki), False) for _ in range(n_blocks)],
        "mid_block": block_params(next(ki), False),
        "out_blocks": [block_params(next(ki), True) for _ in range(n_blocks)],
    }


if __name__ == "__main__":
    key = jax.random.PRNGKey(0)
    kp, kx, kt, kv = jax.random.split(key, 4)
    params = init_params(kp)
    packed = pack_params(params)        # host-side, once (not per forward)

    x = jax.random.normal(kx, (2, IN_CHANS, IMG_SIZE), jnp.float32)
    timesteps = jax.random.uniform(kt, (2,), jnp.float32, 0.0, 1000.0)
    view = jax.random.normal(kv, (2, 2), jnp.float32)

    out = jax.jit(uvit_forward)(packed, x, timesteps, view)
    out = jax.block_until_ready(out)

    assert out.shape == (2, OUT_CHANS, IMG_SIZE), out.shape
    assert bool(jnp.all(jnp.isfinite(out)))
    print("KERNEL_OK")
</pallas_src>

<mosaic_0001>
module attributes {stable_mosaic.version = 11 : i64} {
  func.func @_fused_kernel(%arg0: memref<22x32xf32, #tpu.memory_space<vmem>>, %arg1: memref<22x22xf32, #tpu.memory_space<vmem>>, %arg2: memref<5x1x32xf32, #tpu.memory_space<vmem>>, %arg3: memref<5x1x32xf32, #tpu.memory_space<vmem>>, %arg4: memref<20x32x8xf32, #tpu.memory_space<vmem>>, %arg5: memref<20x32x8xf32, #tpu.memory_space<vmem>>, %arg6: memref<20x32x8xf32, #tpu.memory_space<vmem>>, %arg7: memref<20x8x32xf32, #tpu.memory_space<vmem>>, %arg8: memref<5x1x32xf32, #tpu.memory_space<vmem>>, %arg9: memref<5x1x32xf32, #tpu.memory_space<vmem>>, %arg10: memref<5x1x32xf32, #tpu.memory_space<vmem>>, %arg11: memref<5x32x128xf32, #tpu.memory_space<vmem>>, %arg12: memref<5x1x128xf32, #tpu.memory_space<vmem>>, %arg13: memref<5x128x32xf32, #tpu.memory_space<vmem>>, %arg14: memref<5x1x32xf32, #tpu.memory_space<vmem>>, %arg15: memref<2x32x32xf32, #tpu.memory_space<vmem>>, %arg16: memref<2x32x32xf32, #tpu.memory_space<vmem>>, %arg17: memref<2x1x32xf32, #tpu.memory_space<vmem>>, %arg18: memref<1x32xf32, #tpu.memory_space<vmem>>, %arg19: memref<1x32xf32, #tpu.memory_space<vmem>>, %arg20: memref<32x4xf32, #tpu.memory_space<vmem>>, %arg21: memref<1x4xf32, #tpu.memory_space<vmem>>, %arg22: memref<22x4xf32, #tpu.memory_space<vmem>>) attributes {dimension_semantics = [], scalar_prefetch = 0 : i64, scratch_operands = 0 : i64, tpu.core_type = #tpu.core_type<tc>} {
    %c0 = arith.constant 0 : index
    %c0_0 = arith.constant 0 : index
    %0 = vector.load %arg0[%c0, %c0_0] : memref<22x32xf32, #tpu.memory_space<vmem>>, vector<22x32xf32>
    %c0_1 = arith.constant 0 : index
    %c0_2 = arith.constant 0 : index
    %1 = vector.load %arg1[%c0_1, %c0_2] : memref<22x22xf32, #tpu.memory_space<vmem>>, vector<22x22xf32>
    %c0_3 = arith.constant 0 : index
    %c0_4 = arith.constant 0 : index
    %c0_5 = arith.constant 0 : index
    %2 = vector.load %arg2[%c0_3, %c0_4, %c0_5] : memref<5x1x32xf32, #tpu.memory_space<vmem>>, vector<1x1x32xf32>
    %3 = vector.shape_cast %2 : vector<1x1x32xf32> to vector<1x32xf32>
    %c0_6 = arith.constant 0 : index
    %c0_7 = arith.constant 0 : index
    %c0_8 = arith.constant 0 : index
    %4 = vector.load %arg3[%c0_6, %c0_7, %c0_8] : memref<5x1x32xf32, #tpu.memory_space<vmem>>, vector<1x1x32xf32>
    %5 = vector.shape_cast %4 : vector<1x1x32xf32> to vector<1x32xf32>
    %cst = arith.constant dense<0.000000e+00> : vector<22xf32>
    %6 = vector.multi_reduction <add>, %0, %cst [1] : vector<22x32xf32> to vector<22xf32>
    %7 = vector.shape_cast %6 : vector<22xf32> to vector<22x1xf32>
    %cst_9 = arith.constant 3.200000e+01 : f32
    %8 = vector.broadcast %cst_9 : f32 to vector<22x1xf32>
    %9 = arith.divf %7, %8 : vector<22x1xf32>
    %10 = vector.broadcast %9 : vector<22x1xf32> to vector<22x32xf32>
    %11 = arith.subf %0, %10 : vector<22x32xf32>
    %12 = arith.mulf %11, %11 : vector<22x32xf32>
    %cst_10 = arith.constant dense<0.000000e+00> : vector<22xf32>
    %13 = vector.multi_reduction <add>, %12, %cst_10 [1] : vector<22x32xf32> to vector<22xf32>
    %14 = vector.shape_cast %13 : vector<22xf32> to vector<22x1xf32>
    %cst_11 = arith.constant 3.200000e+01 : f32
    %15 = vector.broadcast %cst_11 : f32 to vector<22x1xf32>
    %16 = arith.divf %14, %15 : vector<22x1xf32>
    %cst_12 = arith.constant 9.99999974E-6 : f32
    %17 = vector.broadcast %cst_12 : f32 to vector<22x1xf32>
    %18 = arith.addf %16, %17 : vector<22x1xf32>
    %19 = math.rsqrt %18 : vector<22x1xf32>
    %20 = vector.broadcast %19 : vector<22x1xf32> to vector<22x32xf32>
    %21 = arith.mulf %11, %20 : vector<22x32xf32>
    %22 = vector.broadcast %3 : vector<1x32xf32> to vector<22x32xf32>
    %23 = arith.mulf %21, %22 : vector<22x32xf32>
    %24 = vector.broadcast %5 : vector<1x32xf32> to vector<22x32xf32>
    %25 = arith.addf %23, %24 : vector<22x32xf32>
    %c0_13 = arith.constant 0 : index
    %c0_14 = arith.constant 0 : index
    %c0_15 = arith.constant 0 : index
    %26 = vector.load %arg4[%c0_13, %c0_14, %c0_15] : memref<20x32x8xf32, #tpu.memory_space<vmem>>, vector<1x32x8xf32>
    %27 = vector.shape_cast %26 : vector<1x32x8xf32> to vector<32x8xf32>
    %cst_16 = arith.constant dense<0.000000e+00> : vector<22x8xf32>
    %28 = tpu.matmul %25, %27, %cst_16 {dimension_numbers = #tpu.dot_dimension_numbers<[1], [0], [0], [1], [0, 0, 1, 1], [], []>} : vector<22x32xf32>, vector<32x8xf32>, vector<22x8xf32> -> vector<22x8xf32>
    %c0_17 = arith.constant 0 : index
    %c0_18 = arith.constant 0 : index
    %c0_19 = arith.constant 0 : index
    %29 = vector.load %arg5[%c0_17, %c0_18, %c0_19] : memref<20x32x8xf32, #tpu.memory_space<vmem>>, vector<1x32x8xf32>
    %30 = vector.shape_cast %29 : vector<1x32x8xf32> to vector<32x8xf32>
    %cst_20 = arith.constant dense<0.000000e+00> : vector<22x8xf32>
    %31 = tpu.matmul %25, %30, %cst_20 {dimension_numbers = #tpu.dot_dimension_numbers<[1], [0], [0], [1], [0, 0, 1, 1], [], []>} : vector<22x32xf32>, vector<32x8xf32>, vector<22x8xf32> -> vector<22x8xf32>
    %c0_21 = arith.constant 0 : index
    %c0_22 = arith.constant 0 : index
    %c0_23 = arith.constant 0 : index
    %32 = vector.load %arg6[%c0_21, %c0_22, %c0_23] : memref<20x32x8xf32, #tpu.memory_space<vmem>>, vector<1x32x8xf32>
    %33 = vector.shape_cast %32 : vector<1x32x8xf32> to vector<32x8xf32>
    %cst_24 = arith.constant dense<0.000000e+00> : vector<22x8xf32>
    %34 = tpu.matmul %25, %33, %cst_24 {dimension_numbers = #tpu.dot_dimension_numbers<[1], [0], [0], [1], [0, 0, 1, 1], [], []>} : vector<22x32xf32>, vector<32x8xf32>, vector<22x8xf32> -> vector<22x8xf32>
    %cst_25 = arith.constant dense<0.000000e+00> : vector<22x22xf32>
    %35 = tpu.matmul %28, %31, %cst_25 {dimension_numbers = #tpu.dot_dimension_numbers<[1], [1], [0], [0], [0, 0, 1, 0], [], []>} : vector<22x8xf32>, vector<22x8xf32>, vector<22x22xf32> -> vector<22x22xf32>
    %cst_26 = arith.constant 0.353553385 : f32
    %36 = vector.broadcast %cst_26 : f32 to vector<22x22xf32>
    %37 = arith.mulf %35, %36 : vector<22x22xf32>
    %38 = arith.addf %37, %1 : vector<22x22xf32>
    %cst_27 = arith.constant dense<0xFF800000> : vector<22xf32>
    %39 = vector.multi_reduction <maximumf>, %38, %cst_27 [1] : vector<22x22xf32> to vector<22xf32>
    %40 = vector.shape_cast %39 : vector<22xf32> to vector<22x1xf32>
    %41 = vector.broadcast %40 : vector<22x1xf32> to vector<22x22xf32>
    %42 = arith.subf %38, %41 : vector<22x22xf32>
    %43 = math.exp %42 : vector<22x22xf32>
    %cst_28 = arith.constant dense<0.000000e+00> : vector<22xf32>
    %44 = vector.multi_reduction <add>, %43, %cst_28 [1] : vector<22x22xf32> to vector<22xf32>
    %45 = vector.shape_cast %44 : vector<22xf32> to vector<22x1xf32>
    %46 = tpu.reciprocal %45 {approx = true} : vector<22x1xf32> -> vector<22x1xf32>
    %47 = vector.broadcast %46 : vector<22x1xf32> to vector<22x22xf32>
    %48 = arith.mulf %43, %47 : vector<22x22xf32>
    %cst_29 = arith.constant dense<0.000000e+00> : vector<22x8xf32>
    %49 = tpu.matmul %48, %34, %cst_29 {dimension_numbers = #tpu.dot_dimension_numbers<[1], [0], [0], [1], [0, 0, 1, 1], [], []>} : vector<22x22xf32>, vector<22x8xf32>, vector<22x8xf32> -> vector<22x8xf32>
    %c0_30 = arith.constant 0 : index
    %c0_31 = arith.constant 0 : index
    %c0_32 = arith.constant 0 : index
    %50 = vector.load %arg7[%c0_30, %c0_31, %c0_32] : memref<20x8x32xf32, #tpu.memory_space<vmem>>, vector<1x8x32xf32>
    %51 = vector.shape_cast %50 : vector<1x8x32xf32> to vector<8x32xf32>
    %cst_33 = arith.constant dense<0.000000e+00> : vector<22x32xf32>
    %52 = tpu.matmul %49, %51, %cst_33 {dimension_numbers = #tpu.dot_dimension_numbers<[1], [0], [0], [1], [0, 0, 1, 1], [], []>} : vector<22x8xf32>, vector<8x32xf32>, vector<22x32xf32> -> vector<22x32xf32>
    %c1 = arith.constant 1 : index
    %c0_34 = arith.constant 0 : index
    %c0_35 = arith.constant 0 : index
    %53 = vector.load %arg4[%c1, %c0_34, %c0_35] : memref<20x32x8xf32, #tpu.memory_space<vmem>>, vector<1x32x8xf32>
    %54 = vector.shape_cast %53 : vector<1x32x8xf32> to vector<32x8xf32>
    %cst_36 = arith.constant dense<0.000000e+00> : vector<22x8xf32>
    %55 = tpu.matmul %25, %54, %cst_36 {dimension_numbers = #tpu.dot_dimension_numbers<[1], [0], [0], [1], [0, 0, 1, 1], [], []>} : vector<22x32xf32>, vector<32x8xf32>, vector<22x8xf32> -> vector<22x8xf32>
    %c1_37 = arith.constant 1 : index
    %c0_38 = arith.constant 0 : index
    %c0_39 = arith.constant 0 : index
    %56 = vector.load %arg5[%c1_37, %c0_38, %c0_39] : memref<20x32x8xf32, #tpu.memory_space<vmem>>, vector<1x32x8xf32>
    %57 = vector.shape_cast %56 : vector<1x32x8xf32> to vector<32x8xf32>
    %cst_40 = arith.constant dense<0.000000e+00> : vector<22x8xf32>
    %58 = tpu.matmul %25, %57, %cst_40 {dimension_numbers = #tpu.dot_dimension_numbers<[1], [0], [0], [1], [0, 0, 1, 1], [], []>} : vector<22x32xf32>, vector<32x8xf32>, vector<22x8xf32> -> vector<22x8xf32>
    %c1_41 = arith.constant 1 : index
    %c0_42 = arith.constant 0 : index
    %c0_43 = arith.constant 0 : index
    %59 = vector.load %arg6[%c1_41, %c0_42, %c0_43] : memref<20x32x8xf32, #tpu.memory_space<vmem>>, vector<1x32x8xf32>
    %60 = vector.shape_cast %59 : vector<1x32x8xf32> to vector<32x8xf32>
    %cst_44 = arith.constant dense<0.000000e+00> : vector<22x8xf32>
    %61 = tpu.matmul %25, %60, %cst_44 {dimension_numbers = #tpu.dot_dimension_numbers<[1], [0], [0], [1], [0, 0, 1, 1], [], []>} : vector<22x32xf32>, vector<32x8xf32>, vector<22x8xf32> -> vector<22x8xf32>
    %cst_45 = arith.constant dense<0.000000e+00> : vector<22x22xf32>
    %62 = tpu.matmul %55, %58, %cst_45 {dimension_numbers = #tpu.dot_dimension_numbers<[1], [1], [0], [0], [0, 0, 1, 0], [], []>} : vector<22x8xf32>, vector<22x8xf32>, vector<22x22xf32> -> vector<22x22xf32>
    %cst_46 = arith.constant 0.353553385 : f32
    %63 = vector.broadcast %cst_46 : f32 to vector<22x22xf32>
    %64 = arith.mulf %62, %63 : vector<22x22xf32>
    %65 = arith.addf %64, %1 : vector<22x22xf32>
    %cst_47 = arith.constant dense<0xFF800000> : vector<22xf32>
    %66 = vector.multi_reduction <maximumf>, %65, %cst_47 [1] : vector<22x22xf32> to vector<22xf32>
    %67 = vector.shape_cast %66 : vector<22xf32> to vector<22x1xf32>
    %68 = vector.broadcast %67 : vector<22x1xf32> to vector<22x22xf32>
    %69 = arith.subf %65, %68 : vector<22x22xf32>
    %70 = math.exp %69 : vector<22x22xf32>
    %cst_48 = arith.constant dense<0.000000e+00> : vector<22xf32>
    %71 = vector.multi_reduction <add>, %70, %cst_48 [1] : vector<22x22xf32> to vector<22xf32>
    %72 = vector.shape_cast %71 : vector<22xf32> to vector<22x1xf32>
    %73 = tpu.reciprocal %72 {approx = true} : vector<22x1xf32> -> vector<22x1xf32>
    %74 = vector.broadcast %73 : vector<22x1xf32> to vector<22x22xf32>
    %75 = arith.mulf %70, %74 : vector<22x22xf32>
    %cst_49 = arith.constant dense<0.000000e+00> : vector<22x8xf32>
    %76 = tpu.matmul %75, %61, %cst_49 {dimension_numbers = #tpu.dot_dimension_numbers<[1], [0], [0], [1], [0, 0, 1, 1], [], []>} : vector<22x22xf32>, vector<22x8xf32>, vector<22x8xf32> -> vector<22x8xf32>
    %c1_50 = arith.constant 1 : index
    %c0_51 = arith.constant 0 : index
    %c0_52 = arith.constant 0 : index
    %77 = vector.load %arg7[%c1_50, %c0_51, %c0_52] : memref<20x8x32xf32, #tpu.memory_space<vmem>>, vector<1x8x32xf32>
    %78 = vector.shape_cast %77 : vector<1x8x32xf32> to vector<8x32xf32>
    %cst_53 = arith.constant dense<0.000000e+00> : vector<22x32xf32>
    %79 = tpu.matmul %76, %78, %cst_53 {dimension_numbers = #tpu.dot_dimension_numbers<[1], [0], [0], [1], [0, 0, 1, 1], [], []>} : vector<22x8xf32>, vector<8x32xf32>, vector<22x32xf32> -> vector<22x32xf32>
    %80 = arith.addf %52, %79 : vector<22x32xf32>
    %c2 = arith.constant 2 : index
    %c0_54 = arith.constant 0 : index
    %c0_55 = arith.constant 0 : index
    %81 = vector.load %arg4[%c2, %c0_54, %c0_55] : memref<20x32x8xf32, #tpu.memory_space<vmem>>, vector<1x32x8xf32>
    %82 = vector.shape_cast %81 : vector<1x32x8xf32> to vector<32x8xf32>
    %cst_56 = arith.constant dense<0.000000e+00> : vector<22x8xf32>
    %83 = tpu.matmul %25, %82, %cst_56 {dimension_numbers = #tpu.dot_dimension_numbers<[1], [0], [0], [1], [0, 0, 1, 1], [], []>} : vector<22x32xf32>, vector<32x8xf32>, vector<22x8xf32> -> vector<22x8xf32>
    %c2_57 = arith.constant 2 : index
    %c0_58 = arith.constant 0 : index
    %c0_59 = arith.constant 0 : index
    %84 = vector.load %arg5[%c2_57, %c0_58, %c0_59] : memref<20x32x8xf32, #tpu.memory_space<vmem>>, vector<1x32x8xf32>
    %85 = vector.shape_cast %84 : vector<1x32x8xf32> to vector<32x8xf32>
    %cst_60 = arith.constant dense<0.000000e+00> : vector<22x8xf32>
    %86 = tpu.matmul %25, %85, %cst_60 {dimension_numbers = #tpu.dot_dimension_numbers<[1], [0], [0], [1], [0, 0, 1, 1], [], []>} : vector<22x32xf32>, vector<32x8xf32>, vector<22x8xf32> -> vector<22x8xf32>
    %c2_61 = arith.constant 2 : index
    %c0_62 = arith.constant 0 : index
    %c0_63 = arith.constant 0 : index
    %87 = vector.load %arg6[%c2_61, %c0_62, %c0_63] : memref<20x32x8xf32, #tpu.memory_space<vmem>>, vector<1x32x8xf32>
    %88 = vector.shape_cast %87 : vector<1x32x8xf32> to vector<32x8xf32>
    %cst_64 = arith.constant dense<0.000000e+00> : vector<22x8xf32>
    %89 = tpu.matmul %25, %88, %cst_64 {dimension_numbers = #tpu.dot_dimension_numbers<[1], [0], [0], [1], [0, 0, 1, 1], [], []>} : vector<22x32xf32>, vector<32x8xf32>, vector<22x8xf32> -> vector<22x8xf32>
    %cst_65 = arith.constant dense<0.000000e+00> : vector<22x22xf32>
    %90 = tpu.matmul %83, %86, %cst_65 {dimension_numbers = #tpu.dot_dimension_numbers<[1], [1], [0], [0], [0, 0, 1, 0], [], []>} : vector<22x8xf32>, vector<22x8xf32>, vector<22x22xf32> -> vector<22x22xf32>
    %cst_66 = arith.constant 0.353553385 : f32
    %91 = vector.broadcast %cst_66 : f32 to vector<22x22xf32>
    %92 = arith.mulf %90, %91 : vector<22x22xf32>
    %93 = arith.addf %92, %1 : vector<22x22xf32>
    %cst_67 = arith.constant dense<0xFF800000> : vector<22xf32>
    %94 = vector.multi_reduction <maximumf>, %93, %cst_67 [1] : vector<22x22xf32> to vector<22xf32>
    %95 = vector.shape_cast %94 : vector<22xf32> to vector<22x1xf32>
    %96 = vector.broadcast %95 : vector<22x1xf32> to vector<22x22xf32>
    %97 = arith.subf %93, %96 : vector<22x22xf32>
    %98 = math.exp %97 : vector<22x22xf32>
    %cst_68 = arith.constant dense<0.000000e+00> : vector<22xf32>
    %99 = vector.multi_reduction <add>, %98, %cst_68 [1] : vector<22x22xf32> to vector<22xf32>
    %100 = vector.shape_cast %99 : vector<22xf32> to vector<22x1xf32>
    %101 = tpu.reciprocal %100 {approx = true} : vector<22x1xf32> -> vector<22x1xf32>
    %102 = vector.broadcast %101 : vector<22x1xf32> to vector<22x22xf32>
    %103 = arith.mulf %98, %102 : vector<22x22xf32>
    %cst_69 = arith.constant dense<0.000000e+00> : vector<22x8xf32>
    %104 = tpu.matmul %103, %89, %cst_69 {dimension_numbers = #tpu.dot_dimension_numbers<[1], [0], [0], [1], [0, 0, 1, 1], [], []>} : vector<22x22xf32>, vector<22x8xf32>, vector<22x8xf32> -> vector<22x8xf32>
    %c2_70 = arith.constant 2 : index
    %c0_71 = arith.constant 0 : index
    %c0_72 = arith.constant 0 : index
    %105 = vector.load %arg7[%c2_70, %c0_71, %c0_72] : memref<20x8x32xf32, #tpu.memory_space<vmem>>, vector<1x8x32xf32>
    %106 = vector.shape_cast %105 : vector<1x8x32xf32> to vector<8x32xf32>
    %cst_73 = arith.constant dense<0.000000e+00> : vector<22x32xf32>
    %107 = tpu.matmul %104, %106, %cst_73 {dimension_numbers = #tpu.dot_dimension_numbers<[1], [0], [0], [1], [0, 0, 1, 1], [], []>} : vector<22x8xf32>, vector<8x32xf32>, vector<22x32xf32> -> vector<22x32xf32>
    %108 = arith.addf %80, %107 : vector<22x32xf32>
    %c3 = arith.constant 3 : index
    %c0_74 = arith.constant 0 : index
    %c0_75 = arith.constant 0 : index
    %109 = vector.load %arg4[%c3, %c0_74, %c0_75] : memref<20x32x8xf32, #tpu.memory_space<vmem>>, vector<1x32x8xf32>
    %110 = vector.shape_cast %109 : vector<1x32x8xf32> to vector<32x8xf32>
    %cst_76 = arith.constant dense<0.000000e+00> : vector<22x8xf32>
    %111 = tpu.matmul %25, %110, %cst_76 {dimension_numbers = #tpu.dot_dimension_numbers<[1], [0], [0], [1], [0, 0, 1, 1], [], []>} : vector<22x32xf32>, vector<32x8xf32>, vector<22x8xf32> -> vector<22x8xf32>
    %c3_77 = arith.constant 3 : index
    %c0_78 = arith.constant 0 : index
    %c0_79 = arith.constant 0 : index
    %112 = vector.load %arg5[%c3_77, %c0_78, %c0_79] : memref<20x32x8xf32, #tpu.memory_space<vmem>>, vector<1x32x8xf32>
    %113 = vector.shape_cast %112 : vector<1x32x8xf32> to vector<32x8xf32>
    %cst_80 = arith.constant dense<0.000000e+00> : vector<22x8xf32>
    %114 = tpu.matmul %25, %113, %cst_80 {dimension_numbers = #tpu.dot_dimension_numbers<[1], [0], [0], [1], [0, 0, 1, 1], [], []>} : vector<22x32xf32>, vector<32x8xf32>, vector<22x8xf32> -> vector<22x8xf32>
    %c3_81 = arith.constant 3 : index
    %c0_82 = arith.constant 0 : index
    %c0_83 = arith.constant 0 : index
    %115 = vector.load %arg6[%c3_81, %c0_82, %c0_83] : memref<20x32x8xf32, #tpu.memory_space<vmem>>, vector<1x32x8xf32>
    %116 = vector.shape_cast %115 : vector<1x32x8xf32> to vector<32x8xf32>
    %cst_84 = arith.constant dense<0.000000e+00> : vector<22x8xf32>
    %117 = tpu.matmul %25, %116, %cst_84 {dimension_numbers = #tpu.dot_dimension_numbers<[1], [0], [0], [1], [0, 0, 1, 1], [], []>} : vector<22x32xf32>, vector<32x8xf32>, vector<22x8xf32> -> vector<22x8xf32>
    %cst_85 = arith.constant dense<0.000000e+00> : vector<22x22xf32>
    %118 = tpu.matmul %111, %114, %cst_85 {dimension_numbers = #tpu.dot_dimension_numbers<[1], [1], [0], [0], [0, 0, 1, 0], [], []>} : vector<22x8xf32>, vector<22x8xf32>, vector<22x22xf32> -> vector<22x22xf32>
    %cst_86 = arith.constant 0.353553385 : f32
    %119 = vector.broadcast %cst_86 : f32 to vector<22x22xf32>
    %120 = arith.mulf %118, %119 : vector<22x22xf32>
    %121 = arith.addf %120, %1 : vector<22x22xf32>
    %cst_87 = arith.constant dense<0xFF800000> : vector<22xf32>
    %122 = vector.multi_reduction <maximumf>, %121, %cst_87 [1] : vector<22x22xf32> to vector<22xf32>
    %123 = vector.shape_cast %122 : vector<22xf32> to vector<22x1xf32>
    %124 = vector.broadcast %123 : vector<22x1xf32> to vector<22x22xf32>
    %125 = arith.subf %121, %124 : vector<22x22xf32>
    %126 = math.exp %125 : vector<22x22xf32>
    %cst_88 = arith.constant dense<0.000000e+00> : vector<22xf32>
    %127 = vector.multi_reduction <add>, %126, %cst_88 [1] : vector<22x22xf32> to vector<22xf32>
    %128 = vector.shape_cast %127 : vector<22xf32> to vector<22x1xf32>
    %129 = tpu.reciprocal %128 {approx = true} : vector<22x1xf32> -> vector<22x1xf32>
    %130 = vector.broadcast %129 : vector<22x1xf32> to vector<22x22xf32>
    %131 = arith.mulf %126, %130 : vector<22x22xf32>
    %cst_89 = arith.constant dense<0.000000e+00> : vector<22x8xf32>
    %132 = tpu.matmul %131, %117, %cst_89 {dimension_numbers = #tpu.dot_dimension_numbers<[1], [0], [0], [1], [0, 0, 1, 1], [], []>} : vector<22x22xf32>, vector<22x8xf32>, vector<22x8xf32> -> vector<22x8xf32>
    %c3_90 = arith.constant 3 : index
    %c0_91 = arith.constant 0 : index
    %c0_92 = arith.constant 0 : index
    %133 = vector.load %arg7[%c3_90, %c0_91, %c0_92] : memref<20x8x32xf32, #tpu.memory_space<vmem>>, vector<1x8x32xf32>
    %134 = vector.shape_cast %133 : vector<1x8x32xf32> to vector<8x32xf32>
    %cst_93 = arith.constant dense<0.000000e+00> : vector<22x32xf32>
    %135 = tpu.matmul %132, %134, %cst_93 {dimension_numbers = #tpu.dot_dimension_numbers<[1], [0], [0], [1], [0, 0, 1, 1], [], []>} : vector<22x8xf32>, vector<8x32xf32>, vector<22x32xf32> -> vector<22x32xf32>
    %136 = arith.addf %108, %135 : vector<22x32xf32>
    %137 = arith.addf %0, %136 : vector<22x32xf32>
    %c0_94 = arith.constant 0 : index
    %c0_95 = arith.constant 0 : index
    %c0_96 = arith.constant 0 : index
    %138 = vector.load %arg8[%c0_94, %c0_95, %c0_96] : memref<5x1x32xf32, #tpu.memory_space<vmem>>, vector<1x1x32xf32>
    %139 = vector.shape_cast %138 : vector<1x1x32xf32> to vector<1x32xf32>
    %140 = vector.broadcast %139 : vector<1x32xf32> to vector<22x32xf32>
    %141 = arith.addf %137, %140 : vector<22x32xf32>
    %c0_97 = arith.constant 0 : index
    %c0_98 = arith.constant 0 : index
    %c0_99 = arith.constant 0 : index
    %142 = vector.load %arg9[%c0_97, %c0_98, %c0_99] : memref<5x1x32xf32, #tpu.memory_space<vmem>>, vector<1x1x32xf32>
    %143 = vector.shape_cast %142 : vector<1x1x32xf32> to vector<1x32xf32>
    %c0_100 = arith.constant 0 : index
    %c0_101 = arith.constant 0 : index
    %c0_102 = arith.constant 0 : index
    %144 = vector.load %arg10[%c0_100, %c0_101, %c0_102] : memref<5x1x32xf32, #tpu.memory_space<vmem>>, vector<1x1x32xf32>
    %145 = vector.shape_cast %144 : vector<1x1x32xf32> to vector<1x32xf32>
    %cst_103 = arith.constant dense<0.000000e+00> : vector<22xf32>
    %146 = vector.multi_reduction <add>, %141, %cst_103 [1] : vector<22x32xf32> to vector<22xf32>
    %147 = vector.shape_cast %146 : vector<22xf32> to vector<22x1xf32>
    %cst_104 = arith.constant 3.200000e+01 : f32
    %148 = vector.broadcast %cst_104 : f32 to vector<22x1xf32>
    %149 = arith.divf %147, %148 : vector<22x1xf32>
    %150 = vector.broadcast %149 : vector<22x1xf32> to vector<22x32xf32>
    %151 = arith.subf %141, %150 : vector<22x32xf32>
    %152 = arith.mulf %151, %151 : vector<22x32xf32>
    %cst_105 = arith.constant dense<0.000000e+00> : vector<22xf32>
    %153 = vector.multi_reduction <add>, %152, %cst_105 [1] : vector<22x32xf32> to vector<22xf32>
    %154 = vector.shape_cast %153 : vector<22xf32> to vector<22x1xf32>
    %cst_106 = arith.constant 3.200000e+01 : f32
    %155 = vector.broadcast %cst_106 : f32 to vector<22x1xf32>
    %156 = arith.divf %154, %155 : vector<22x1xf32>
    %cst_107 = arith.constant 9.99999974E-6 : f32
    %157 = vector.broadcast %cst_107 : f32 to vector<22x1xf32>
    %158 = arith.addf %156, %157 : vector<22x1xf32>
    %159 = math.rsqrt %158 : vector<22x1xf32>
    %160 = vector.broadcast %159 : vector<22x1xf32> to vector<22x32xf32>
    %161 = arith.mulf %151, %160 : vector<22x32xf32>
    %162 = vector.broadcast %143 : vector<1x32xf32> to vector<22x32xf32>
    %163 = arith.mulf %161, %162 : vector<22x32xf32>
    %164 = vector.broadcast %145 : vector<1x32xf32> to vector<22x32xf32>
    %165 = arith.addf %163, %164 : vector<22x32xf32>
    %c0_108 = arith.constant 0 : index
    %c0_109 = arith.constant 0 : index
    %c0_110 = arith.constant 0 : index
    %166 = vector.load %arg11[%c0_108, %c0_109, %c0_110] : memref<5x32x128xf32, #tpu.memory_space<vmem>>, vector<1x32x128xf32>
    %167 = vector.shape_cast %166 : vector<1x32x128xf32> to vector<32x128xf32>
    %cst_111 = arith.constant dense<0.000000e+00> : vector<22x128xf32>
    %168 = tpu.matmul %165, %167, %cst_111 {dimension_numbers = #tpu.dot_dimension_numbers<[1], [0], [0], [1], [0, 0, 1, 1], [], []>} : vector<22x32xf32>, vector<32x128xf32>, vector<22x128xf32> -> vector<22x128xf32>
    %c0_112 = arith.constant 0 : index
    %c0_113 = arith.constant 0 : index
    %c0_114 = arith.constant 0 : index
    %169 = vector.load %arg12[%c0_112, %c0_113, %c0_114] : memref<5x1x128xf32, #tpu.memory_space<vmem>>, vector<1x1x128xf32>
    %170 = vector.shape_cast %169 : vector<1x1x128xf32> to vector<1x128xf32>
    %171 = vector.broadcast %170 : vector<1x128xf32> to vector<22x128xf32>
    %172 = arith.addf %168, %171 : vector<22x128xf32>
    %cst_115 = arith.constant 5.000000e-01 : f32
    %173 = vector.broadcast %cst_115 : f32 to vector<22x128xf32>
    %174 = arith.mulf %173, %172 : vector<22x128xf32>
    %cst_116 = arith.constant 0.707106769 : f32
    %175 = vector.broadcast %cst_116 : f32 to vector<22x128xf32>
    %176 = arith.mulf %172, %175 : vector<22x128xf32>
    %177 = math.absf %176 : vector<22x128xf32>
    %cst_117 = arith.constant 0.327591091 : f32
    %178 = vector.broadcast %cst_117 : f32 to vector<22x128xf32>
    %179 = arith.mulf %178, %177 : vector<22x128xf32>
    %cst_118 = arith.constant 1.000000e+00 : f32
    %180 = vector.broadcast %cst_118 : f32 to vector<22x128xf32>
    %181 = arith.addf %180, %179 : vector<22x128xf32>
    %cst_119 = arith.constant 1.000000e+00 : f32
    %182 = vector.broadcast %cst_119 : f32 to vector<22x128xf32>
    %183 = arith.divf %182, %181 : vector<22x128xf32>
    %cst_120 = arith.constant 1.06140542 : f32
    %184 = vector.broadcast %cst_120 : f32 to vector<22x128xf32>
    %185 = arith.mulf %184, %183 : vector<22x128xf32>
    %cst_121 = arith.constant -1.45315206 : f32
    %186 = vector.broadcast %cst_121 : f32 to vector<22x128xf32>
    %187 = arith.addf %185, %186 : vector<22x128xf32>
    %188 = arith.mulf %187, %183 : vector<22x128xf32>
    %cst_122 = arith.constant 1.42141378 : f32
    %189 = vector.broadcast %cst_122 : f32 to vector<22x128xf32>
    %190 = arith.addf %188, %189 : vector<22x128xf32>
    %191 = arith.mulf %190, %183 : vector<22x128xf32>
    %cst_123 = arith.constant -0.284496725 : f32
    %192 = vector.broadcast %cst_123 : f32 to vector<22x128xf32>
    %193 = arith.addf %191, %192 : vector<22x128xf32>
    %194 = arith.mulf %193, %183 : vector<22x128xf32>
    %cst_124 = arith.constant 0.254829586 : f32
    %195 = vector.broadcast %cst_124 : f32 to vector<22x128xf32>
    %196 = arith.addf %194, %195 : vector<22x128xf32>
    %197 = arith.mulf %196, %183 : vector<22x128xf32>
    %cst_125 = arith.constant 0.000000e+00 : f32
    %198 = vector.broadcast %cst_125 : f32 to vector<22x128xf32>
    %199 = arith.subf %198, %177 : vector<22x128xf32>
    %200 = arith.mulf %199, %177 : vector<22x128xf32>
    %201 = math.exp %200 : vector<22x128xf32>
    %202 = arith.mulf %197, %201 : vector<22x128xf32>
    %cst_126 = arith.constant 1.000000e+00 : f32
    %203 = vector.broadcast %cst_126 : f32 to vector<22x128xf32>
    %204 = arith.subf %203, %202 : vector<22x128xf32>
    %cst_127 = arith.constant 0.000000e+00 : f32
    %205 = vector.broadcast %cst_127 : f32 to vector<22x128xf32>
    %206 = arith.cmpf oge, %176, %205 : vector<22x128xf32>
    %cst_128 = arith.constant 0.000000e+00 : f32
    %207 = vector.broadcast %cst_128 : f32 to vector<22x128xf32>
    %208 = arith.subf %207, %204 : vector<22x128xf32>
    %209 = arith.select %206, %204, %208 : vector<22x128xi1>, vector<22x128xf32>
    %cst_129 = arith.constant 1.000000e+00 : f32
    %210 = vector.broadcast %cst_129 : f32 to vector<22x128xf32>
    %211 = arith.addf %210, %209 : vector<22x128xf32>
    %212 = arith.mulf %174, %211 : vector<22x128xf32>
    %c0_130 = arith.constant 0 : index
    %c0_131 = arith.constant 0 : index
    %c0_132 = arith.constant 0 : index
    %213 = vector.load %arg13[%c0_130, %c0_131, %c0_132] : memref<5x128x32xf32, #tpu.memory_space<vmem>>, vector<1x128x32xf32>
    %214 = vector.shape_cast %213 : vector<1x128x32xf32> to vector<128x32xf32>
    %cst_133 = arith.constant dense<0.000000e+00> : vector<22x32xf32>
    %215 = tpu.matmul %212, %214, %cst_133 {dimension_numbers = #tpu.dot_dimension_numbers<[1], [0], [0], [1], [0, 0, 1, 1], [], []>} : vector<22x128xf32>, vector<128x32xf32>, vector<22x32xf32> -> vector<22x32xf32>
    %216 = arith.addf %141, %215 : vector<22x32xf32>
    %c0_134 = arith.constant 0 : index
    %c0_135 = arith.constant 0 : index
    %c0_136 = arith.constant 0 : index
    %217 = vector.load %arg14[%c0_134, %c0_135, %c0_136] : memref<5x1x32xf32, #tpu.memory_space<vmem>>, vector<1x1x32xf32>
    %218 = vector.shape_cast %217 : vector<1x1x32xf32> to vector<1x32xf32>
    %219 = vector.broadcast %218 : vector<1x32xf32> to vector<22x32xf32>
    %220 = arith.addf %216, %219 : vector<22x32xf32>
    %c1_137 = arith.constant 1 : index
    %c0_138 = arith.constant 0 : index
    %c0_139 = arith.constant 0 : index
    %221 = vector.load %arg2[%c1_137, %c0_138, %c0_139] : memref<5x1x32xf32, #tpu.memory_space<vmem>>, vector<1x1x32xf32>
    %222 = vector.shape_cast %221 : vector<1x1x32xf32> to vector<1x32xf32>
    %c1_140 = arith.constant 1 : index
    %c0_141 = arith.constant 0 : index
    %c0_142 = arith.constant 0 : index
    %223 = vector.load %arg3[%c1_140, %c0_141, %c0_142] : memref<5x1x32xf32, #tpu.memory_space<vmem>>, vector<1x1x32xf32>
    %224 = vector.shape_cast %223 : vector<1x1x32xf32> to vector<1x32xf32>
    %cst_143 = arith.constant dense<0.000000e+00> : vector<22xf32>
    %225 = vector.multi_reduction <add>, %220, %cst_143 [1] : vector<22x32xf32> to vector<22xf32>
    %226 = vector.shape_cast %225 : vector<22xf32> to vector<22x1xf32>
    %cst_144 = arith.constant 3.200000e+01 : f32
    %227 = vector.broadcast %cst_144 : f32 to vector<22x1xf32>
    %228 = arith.divf %226, %227 : vector<22x1xf32>
    %229 = vector.broadcast %228 : vector<22x1xf32> to vector<22x32xf32>
    %230 = arith.subf %220, %229 : vector<22x32xf32>
    %231 = arith.mulf %230, %230 : vector<22x32xf32>
    %cst_145 = arith.constant dense<0.000000e+00> : vector<22xf32>
    %232 = vector.multi_reduction <add>, %231, %cst_145 [1] : vector<22x32xf32> to vector<22xf32>
    %233 = vector.shape_cast %232 : vector<22xf32> to vector<22x1xf32>
    %cst_146 = arith.constant 3.200000e+01 : f32
    %234 = vector.broadcast %cst_146 : f32 to vector<22x1xf32>
    %235 = arith.divf %233, %234 : vector<22x1xf32>
    %cst_147 = arith.constant 9.99999974E-6 : f32
    %236 = vector.broadcast %cst_147 : f32 to vector<22x1xf32>
    %237 = arith.addf %235, %236 : vector<22x1xf32>
    %238 = math.rsqrt %237 : vector<22x1xf32>
    %239 = vector.broadcast %238 : vector<22x1xf32> to vector<22x32xf32>
    %240 = arith.mulf %230, %239 : vector<22x32xf32>
    %241 = vector.broadcast %222 : vector<1x32xf32> to vector<22x32xf32>
    %242 = arith.mulf %240, %241 : vector<22x32xf32>
    %243 = vector.broadcast %224 : vector<1x32xf32> to vector<22x32xf32>
    %244 = arith.addf %242, %243 : vector<22x32xf32>
    %c4 = arith.constant 4 : index
    %c0_148 = arith.constant 0 : index
    %c0_149 = arith.constant 0 : index
    %245 = vector.load %arg4[%c4, %c0_148, %c0_149] : memref<20x32x8xf32, #tpu.memory_space<vmem>>, vector<1x32x8xf32>
    %246 = vector.shape_cast %245 : vector<1x32x8xf32> to vector<32x8xf32>
    %cst_150 = arith.constant dense<0.000000e+00> : vector<22x8xf32>
    %247 = tpu.matmul %244, %246, %cst_150 {dimension_numbers = #tpu.dot_dimension_numbers<[1], [0], [0], [1], [0, 0, 1, 1], [], []>} : vector<22x32xf32>, vector<32x8xf32>, vector<22x8xf32> -> vector<22x8xf32>
    %c4_151 = arith.constant 4 : index
    %c0_152 = arith.constant 0 : index
    %c0_153 = arith.constant 0 : index
    %248 = vector.load %arg5[%c4_151, %c0_152, %c0_153] : memref<20x32x8xf32, #tpu.memory_space<vmem>>, vector<1x32x8xf32>
    %249 = vector.shape_cast %248 : vector<1x32x8xf32> to vector<32x8xf32>
    %cst_154 = arith.constant dense<0.000000e+00> : vector<22x8xf32>
    %250 = tpu.matmul %244, %249, %cst_154 {dimension_numbers = #tpu.dot_dimension_numbers<[1], [0], [0], [1], [0, 0, 1, 1], [], []>} : vector<22x32xf32>, vector<32x8xf32>, vector<22x8xf32> -> vector<22x8xf32>
    %c4_155 = arith.constant 4 : index
    %c0_156 = arith.constant 0 : index
    %c0_157 = arith.constant 0 : index
    %251 = vector.load %arg6[%c4_155, %c0_156, %c0_157] : memref<20x32x8xf32, #tpu.memory_space<vmem>>, vector<1x32x8xf32>
    %252 = vector.shape_cast %251 : vector<1x32x8xf32> to vector<32x8xf32>
    %cst_158 = arith.constant dense<0.000000e+00> : vector<22x8xf32>
    %253 = tpu.matmul %244, %252, %cst_158 {dimension_numbers = #tpu.dot_dimension_numbers<[1], [0], [0], [1], [0, 0, 1, 1], [], []>} : vector<22x32xf32>, vector<32x8xf32>, vector<22x8xf32> -> vector<22x8xf32>
    %cst_159 = arith.constant dense<0.000000e+00> : vector<22x22xf32>
    %254 = tpu.matmul %247, %250, %cst_159 {dimension_numbers = #tpu.dot_dimension_numbers<[1], [1], [0], [0], [0, 0, 1, 0], [], []>} : vector<22x8xf32>, vector<22x8xf32>, vector<22x22xf32> -> vector<22x22xf32>
    %cst_160 = arith.constant 0.353553385 : f32
    %255 = vector.broadcast %cst_160 : f32 to vector<22x22xf32>
    %256 = arith.mulf %254, %255 : vector<22x22xf32>
    %257 = arith.addf %256, %1 : vector<22x22xf32>
    %cst_161 = arith.constant dense<0xFF800000> : vector<22xf32>
    %258 = vector.multi_reduction <maximumf>, %257, %cst_161 [1] : vector<22x22xf32> to vector<22xf32>
    %259 = vector.shape_cast %258 : vector<22xf32> to vector<22x1xf32>
    %260 = vector.broadcast %259 : vector<22x1xf32> to vector<22x22xf32>
    %261 = arith.subf %257, %260 : vector<22x22xf32>
    %262 = math.exp %261 : vector<22x22xf32>
    %cst_162 = arith.constant dense<0.000000e+00> : vector<22xf32>
    %263 = vector.multi_reduction <add>, %262, %cst_162 [1] : vector<22x22xf32> to vector<22xf32>
    %264 = vector.shape_cast %263 : vector<22xf32> to vector<22x1xf32>
    %265 = tpu.reciprocal %264 {approx = true} : vector<22x1xf32> -> vector<22x1xf32>
    %266 = vector.broadcast %265 : vector<22x1xf32> to vector<22x22xf32>
    %267 = arith.mulf %262, %266 : vector<22x22xf32>
    %cst_163 = arith.constant dense<0.000000e+00> : vector<22x8xf32>
    %268 = tpu.matmul %267, %253, %cst_163 {dimension_numbers = #tpu.dot_dimension_numbers<[1], [0], [0], [1], [0, 0, 1, 1], [], []>} : vector<22x22xf32>, vector<22x8xf32>, vector<22x8xf32> -> vector<22x8xf32>
    %c4_164 = arith.constant 4 : index
    %c0_165 = arith.constant 0 : index
    %c0_166 = arith.constant 0 : index
    %269 = vector.load %arg7[%c4_164, %c0_165, %c0_166] : memref<20x8x32xf32, #tpu.memory_space<vmem>>, vector<1x8x32xf32>
    %270 = vector.shape_cast %269 : vector<1x8x32xf32> to vector<8x32xf32>
    %cst_167 = arith.constant dense<0.000000e+00> : vector<22x32xf32>
    %271 = tpu.matmul %268, %270, %cst_167 {dimension_numbers = #tpu.dot_dimension_numbers<[1], [0], [0], [1], [0, 0, 1, 1], [], []>} : vector<22x8xf32>, vector<8x32xf32>, vector<22x32xf32> -> vector<22x32xf32>
    %c5 = arith.constant 5 : index
    %c0_168 = arith.constant 0 : index
    %c0_169 = arith.constant 0 : index
    %272 = vector.load %arg4[%c5, %c0_168, %c0_169] : memref<20x32x8xf32, #tpu.memory_space<vmem>>, vector<1x32x8xf32>
    %273 = vector.shape_cast %272 : vector<1x32x8xf32> to vector<32x8xf32>
    %cst_170 = arith.constant dense<0.000000e+00> : vector<22x8xf32>
    %274 = tpu.matmul %244, %273, %cst_170 {dimension_numbers = #tpu.dot_dimension_numbers<[1], [0], [0], [1], [0, 0, 1, 1], [], []>} : vector<22x32xf32>, vector<32x8xf32>, vector<22x8xf32> -> vector<22x8xf32>
    %c5_171 = arith.constant 5 : index
    %c0_172 = arith.constant 0 : index
    %c0_173 = arith.constant 0 : index
    %275 = vector.load %arg5[%c5_171, %c0_172, %c0_173] : memref<20x32x8xf32, #tpu.memory_space<vmem>>, vector<1x32x8xf32>
    %276 = vector.shape_cast %275 : vector<1x32x8xf32> to vector<32x8xf32>
    %cst_174 = arith.constant dense<0.000000e+00> : vector<22x8xf32>
    %277 = tpu.matmul %244, %276, %cst_174 {dimension_numbers = #tpu.dot_dimension_numbers<[1], [0], [0], [1], [0, 0, 1, 1], [], []>} : vector<22x32xf32>, vector<32x8xf32>, vector<22x8xf32> -> vector<22x8xf32>
    %c5_175 = arith.constant 5 : index
    %c0_176 = arith.constant 0 : index
    %c0_177 = arith.constant 0 : index
    %278 = vector.load %arg6[%c5_175, %c0_176, %c0_177] : memref<20x32x8xf32, #tpu.memory_space<vmem>>, vector<1x32x8xf32>
    %279 = vector.shape_cast %278 : vector<1x32x8xf32> to vector<32x8xf32>
    %cst_178 = arith.constant dense<0.000000e+00> : vector<22x8xf32>
    %280 = tpu.matmul %244, %279, %cst_178 {dimension_numbers = #tpu.dot_dimension_numbers<[1], [0], [0], [1], [0, 0, 1, 1], [], []>} : vector<22x32xf32>, vector<32x8xf32>, vector<22x8xf32> -> vector<22x8xf32>
    %cst_179 = arith.constant dense<0.000000e+00> : vector<22x22xf32>
    %281 = tpu.matmul %274, %277, %cst_179 {dimension_numbers = #tpu.dot_dimension_numbers<[1], [1], [0], [0], [0, 0, 1, 0], [], []>} : vector<22x8xf32>, vector<22x8xf32>, vector<22x22xf32> -> vector<22x22xf32>
    %cst_180 = arith.constant 0.353553385 : f32
    %282 = vector.broadcast %cst_180 : f32 to vector<22x22xf32>
    %283 = arith.mulf %281, %282 : vector<22x22xf32>
    %284 = arith.addf %283, %1 : vector<22x22xf32>
    %cst_181 = arith.constant dense<0xFF800000> : vector<22xf32>
    %285 = vector.multi_reduction <maximumf>, %284, %cst_181 [1] : vector<22x22xf32> to vector<22xf32>
    %286 = vector.shape_cast %285 : vector<22xf32> to vector<22x1xf32>
    %287 = vector.broadcast %286 : vector<22x1xf32> to vector<22x22xf32>
    %288 = arith.subf %284, %287 : vector<22x22xf32>
    %289 = math.exp %288 : vector<22x22xf32>
    %cst_182 = arith.constant dense<0.000000e+00> : vector<22xf32>
    %290 = vector.multi_reduction <add>, %289, %cst_182 [1] : vector<22x22xf32> to vector<22xf32>
    %291 = vector.shape_cast %290 : vector<22xf32> to vector<22x1xf32>
    %292 = tpu.reciprocal %291 {approx = true} : vector<22x1xf32> -> vector<22x1xf32>
    %293 = vector.broadcast %292 : vector<22x1xf32> to vector<22x22xf32>
    %294 = arith.mulf %289, %293 : vector<22x22xf32>
    %cst_183 = arith.constant dense<0.000000e+00> : vector<22x8xf32>
    %295 = tpu.matmul %294, %280, %cst_183 {dimension_numbers = #tpu.dot_dimension_numbers<[1], [0], [0], [1], [0, 0, 1, 1], [], []>} : vector<22x22xf32>, vector<22x8xf32>, vector<22x8xf32> -> vector<22x8xf32>
    %c5_184 = arith.constant 5 : index
    %c0_185 = arith.constant 0 : index
    %c0_186 = arith.constant 0 : index
    %296 = vector.load %arg7[%c5_184, %c0_185, %c0_186] : memref<20x8x32xf32, #tpu.memory_space<vmem>>, vector<1x8x32xf32>
    %297 = vector.shape_cast %296 : vector<1x8x32xf32> to vector<8x32xf32>
    %cst_187 = arith.constant dense<0.000000e+00> : vector<22x32xf32>
    %298 = tpu.matmul %295, %297, %cst_187 {dimension_numbers = #tpu.dot_dimension_numbers<[1], [0], [0], [1], [0, 0, 1, 1], [], []>} : vector<22x8xf32>, vector<8x32xf32>, vector<22x32xf32> -> vector<22x32xf32>
    %299 = arith.addf %271, %298 : vector<22x32xf32>
    %c6 = arith.constant 6 : index
    %c0_188 = arith.constant 0 : index
    %c0_189 = arith.constant 0 : index
    %300 = vector.load %arg4[%c6, %c0_188, %c0_189] : memref<20x32x8xf32, #tpu.memory_space<vmem>>, vector<1x32x8xf32>
    %301 = vector.shape_cast %300 : vector<1x32x8xf32> to vector<32x8xf32>
    %cst_190 = arith.constant dense<0.000000e+00> : vector<22x8xf32>
    %302 = tpu.matmul %244, %301, %cst_190 {dimension_numbers = #tpu.dot_dimension_numbers<[1], [0], [0], [1], [0, 0, 1, 1], [], []>} : vector<22x32xf32>, vector<32x8xf32>, vector<22x8xf32> -> vector<22x8xf32>
    %c6_191 = arith.constant 6 : index
    %c0_192 = arith.constant 0 : index
    %c0_193 = arith.constant 0 : index
    %303 = vector.load %arg5[%c6_191, %c0_192, %c0_193] : memref<20x32x8xf32, #tpu.memory_space<vmem>>, vector<1x32x8xf32>
    %304 = vector.shape_cast %303 : vector<1x32x8xf32> to vector<32x8xf32>
    %cst_194 = arith.constant dense<0.000000e+00> : vector<22x8xf32>
    %305 = tpu.matmul %244, %304, %cst_194 {dimension_numbers = #tpu.dot_dimension_numbers<[1], [0], [0], [1], [0, 0, 1, 1], [], []>} : vector<22x32xf32>, vector<32x8xf32>, vector<22x8xf32> -> vector<22x8xf32>
    %c6_195 = arith.constant 6 : index
    %c0_196 = arith.constant 0 : index
    %c0_197 = arith.constant 0 : index
    %306 = vector.load %arg6[%c6_195, %c0_196, %c0_197] : memref<20x32x8xf32, #tpu.memory_space<vmem>>, vector<1x32x8xf32>
    %307 = vector.shape_cast %306 : vector<1x32x8xf32> to vector<32x8xf32>
    %cst_198 = arith.constant dense<0.000000e+00> : vector<22x8xf32>
    %308 = tpu.matmul %244, %307, %cst_198 {dimension_numbers = #tpu.dot_dimension_numbers<[1], [0], [0], [1], [0, 0, 1, 1], [], []>} : vector<22x32xf32>, vector<32x8xf32>, vector<22x8xf32> -> vector<22x8xf32>
    %cst_199 = arith.constant dense<0.000000e+00> : vector<22x22xf32>
    %309 = tpu.matmul %302, %305, %cst_199 {dimension_numbers = #tpu.dot_dimension_numbers<[1], [1], [0], [0], [0, 0, 1, 0], [], []>} : vector<22x8xf32>, vector<22x8xf32>, vector<22x22xf32> -> vector<22x22xf32>
    %cst_200 = arith.constant 0.353553385 : f32
    %310 = vector.broadcast %cst_200 : f32 to vector<22x22xf32>
    %311 = arith.mulf %309, %310 : vector<22x22xf32>
    %312 = arith.addf %311, %1 : vector<22x22xf32>
    %cst_201 = arith.constant dense<0xFF800000> : vector<22xf32>
    %313 = vector.multi_reduction <maximumf>, %312, %cst_201 [1] : vector<22x22xf32> to vector<22xf32>
    %314 = vector.shape_cast %313 : vector<22xf32> to vector<22x1xf32>
    %315 = vector.broadcast %314 : vector<22x1xf32> to vector<22x22xf32>
    %316 = arith.subf %312, %315 : vector<22x22xf32>
    %317 = math.exp %316 : vector<22x22xf32>
    %cst_202 = arith.constant dense<0.000000e+00> : vector<22xf32>
    %318 = vector.multi_reduction <add>, %317, %cst_202 [1] : vector<22x22xf32> to vector<22xf32>
    %319 = vector.shape_cast %318 : vector<22xf32> to vector<22x1xf32>
    %320 = tpu.reciprocal %319 {approx = true} : vector<22x1xf32> -> vector<22x1xf32>
    %321 = vector.broadcast %320 : vector<22x1xf32> to vector<22x22xf32>
    %322 = arith.mulf %317, %321 : vector<22x22xf32>
    %cst_203 = arith.constant dense<0.000000e+00> : vector<22x8xf32>
    %323 = tpu.matmul %322, %308, %cst_203 {dimension_numbers = #tpu.dot_dimension_numbers<[1], [0], [0], [1], [0, 0, 1, 1], [], []>} : vector<22x22xf32>, vector<22x8xf32>, vector<22x8xf32> -> vector<22x8xf32>
    %c6_204 = arith.constant 6 : index
    %c0_205 = arith.constant 0 : index
    %c0_206 = arith.constant 0 : index
    %324 = vector.load %arg7[%c6_204, %c0_205, %c0_206] : memref<20x8x32xf32, #tpu.memory_space<vmem>>, vector<1x8x32xf32>
    %325 = vector.shape_cast %324 : vector<1x8x32xf32> to vector<8x32xf32>
    %cst_207 = arith.constant dense<0.000000e+00> : vector<22x32xf32>
    %326 = tpu.matmul %323, %325, %cst_207 {dimension_numbers = #tpu.dot_dimension_numbers<[1], [0], [0], [1], [0, 0, 1, 1], [], []>} : vector<22x8xf32>, vector<8x32xf32>, vector<22x32xf32> -> vector<22x32xf32>
    %327 = arith.addf %299, %326 : vector<22x32xf32>
    %c7 = arith.constant 7 : index
    %c0_208 = arith.constant 0 : index
    %c0_209 = arith.constant 0 : index
    %328 = vector.load %arg4[%c7, %c0_208, %c0_209] : memref<20x32x8xf32, #tpu.memory_space<vmem>>, vector<1x32x8xf32>
    %329 = vector.shape_cast %328 : vector<1x32x8xf32> to vector<32x8xf32>
    %cst_210 = arith.constant dense<0.000000e+00> : vector<22x8xf32>
    %330 = tpu.matmul %244, %329, %cst_210 {dimension_numbers = #tpu.dot_dimension_numbers<[1], [0], [0], [1], [0, 0, 1, 1], [], []>} : vector<22x32xf32>, vector<32x8xf32>, vector<22x8xf32> -> vector<22x8xf32>
    %c7_211 = arith.constant 7 : index
    %c0_212 = arith.constant 0 : index
    %c0_213 = arith.constant 0 : index
    %331 = vector.load %arg5[%c7_211, %c0_212, %c0_213] : memref<20x32x8xf32, #tpu.memory_space<vmem>>, vector<1x32x8xf32>
    %332 = vector.shape_cast %331 : vector<1x32x8xf32> to vector<32x8xf32>
    %cst_214 = arith.constant dense<0.000000e+00> : vector<22x8xf32>
    %333 = tpu.matmul %244, %332, %cst_214 {dimension_numbers = #tpu.dot_dimension_numbers<[1], [0], [0], [1], [0, 0, 1, 1], [], []>} : vector<22x32xf32>, vector<32x8xf32>, vector<22x8xf32> -> vector<22x8xf32>
    %c7_215 = arith.constant 7 : index
    %c0_216 = arith.constant 0 : index
    %c0_217 = arith.constant 0 : index
    %334 = vector.load %arg6[%c7_215, %c0_216, %c0_217] : memref<20x32x8xf32, #tpu.memory_space<vmem>>, vector<1x32x8xf32>
    %335 = vector.shape_cast %334 : vector<1x32x8xf32> to vector<32x8xf32>
    %cst_218 = arith.constant dense<0.000000e+00> : vector<22x8xf32>
    %336 = tpu.matmul %244, %335, %cst_218 {dimension_numbers = #tpu.dot_dimension_numbers<[1], [0], [0], [1], [0, 0, 1, 1], [], []>} : vector<22x32xf32>, vector<32x8xf32>, vector<22x8xf32> -> vector<22x8xf32>
    %cst_219 = arith.constant dense<0.000000e+00> : vector<22x22xf32>
    %337 = tpu.matmul %330, %333, %cst_219 {dimension_numbers = #tpu.dot_dimension_numbers<[1], [1], [0], [0], [0, 0, 1, 0], [], []>} : vector<22x8xf32>, vector<22x8xf32>, vector<22x22xf32> -> vector<22x22xf32>
    %cst_220 = arith.constant 0.353553385 : f32
    %338 = vector.broadcast %cst_220 : f32 to vector<22x22xf32>
    %339 = arith.mulf %337, %338 : vector<22x22xf32>
    %340 = arith.addf %339, %1 : vector<22x22xf32>
    %cst_221 = arith.constant dense<0xFF800000> : vector<22xf32>
    %341 = vector.multi_reduction <maximumf>, %340, %cst_221 [1] : vector<22x22xf32> to vector<22xf32>
    %342 = vector.shape_cast %341 : vector<22xf32> to vector<22x1xf32>
    %343 = vector.broadcast %342 : vector<22x1xf32> to vector<22x22xf32>
    %344 = arith.subf %340, %343 : vector<22x22xf32>
    %345 = math.exp %344 : vector<22x22xf32>
    %cst_222 = arith.constant dense<0.000000e+00> : vector<22xf32>
    %346 = vector.multi_reduction <add>, %345, %cst_222 [1] : vector<22x22xf32> to vector<22xf32>
    %347 = vector.shape_cast %346 : vector<22xf32> to vector<22x1xf32>
    %348 = tpu.reciprocal %347 {approx = true} : vector<22x1xf32> -> vector<22x1xf32>
    %349 = vector.broadcast %348 : vector<22x1xf32> to vector<22x22xf32>
    %350 = arith.mulf %345, %349 : vector<22x22xf32>
    %cst_223 = arith.constant dense<0.000000e+00> : vector<22x8xf32>
    %351 = tpu.matmul %350, %336, %cst_223 {dimension_numbers = #tpu.dot_dimension_numbers<[1], [0], [0], [1], [0, 0, 1, 1], [], []>} : vector<22x22xf32>, vector<22x8xf32>, vector<22x8xf32> -> vector<22x8xf32>
    %c7_224 = arith.constant 7 : index
    %c0_225 = arith.constant 0 : index
    %c0_226 = arith.constant 0 : index
    %352 = vector.load %arg7[%c7_224, %c0_225, %c0_226] : memref<20x8x32xf32, #tpu.memory_space<vmem>>, vector<1x8x32xf32>
    %353 = vector.shape_cast %352 : vector<1x8x32xf32> to vector<8x32xf32>
    %cst_227 = arith.constant dense<0.000000e+00> : vector<22x32xf32>
    %354 = tpu.matmul %351, %353, %cst_227 {dimension_numbers = #tpu.dot_dimension_numbers<[1], [0], [0], [1], [0, 0, 1, 1], [], []>} : vector<22x8xf32>, vector<8x32xf32>, vector<22x32xf32> -> vector<22x32xf32>
    %355 = arith.addf %327, %354 : vector<22x32xf32>
    %356 = arith.addf %220, %355 : vector<22x32xf32>
    %c1_228 = arith.constant 1 : index
    %c0_229 = arith.constant 0 : index
    %c0_230 = arith.constant 0 : index
    %357 = vector.load %arg8[%c1_228, %c0_229, %c0_230] : memref<5x1x32xf32, #tpu.memory_space<vmem>>, vector<1x1x32xf32>
    %358 = vector.shape_cast %357 : vector<1x1x32xf32> to vector<1x32xf32>
    %359 = vector.broadcast %358 : vector<1x32xf32> to vector<22x32xf32>
    %360 = arith.addf %356, %359 : vector<22x32xf32>
    %c1_231 = arith.constant 1 : index
    %c0_232 = arith.constant 0 : index
    %c0_233 = arith.constant 0 : index
    %361 = vector.load %arg9[%c1_231, %c0_232, %c0_233] : memref<5x1x32xf32, #tpu.memory_space<vmem>>, vector<1x1x32xf32>
    %362 = vector.shape_cast %361 : vector<1x1x32xf32> to vector<1x32xf32>
    %c1_234 = arith.constant 1 : index
    %c0_235 = arith.constant 0 : index
    %c0_236 = arith.constant 0 : index
    %363 = vector.load %arg10[%c1_234, %c0_235, %c0_236] : memref<5x1x32xf32, #tpu.memory_space<vmem>>, vector<1x1x32xf32>
    %364 = vector.shape_cast %363 : vector<1x1x32xf32> to vector<1x32xf32>
    %cst_237 = arith.constant dense<0.000000e+00> : vector<22xf32>
    %365 = vector.multi_reduction <add>, %360, %cst_237 [1] : vector<22x32xf32> to vector<22xf32>
    %366 = vector.shape_cast %365 : vector<22xf32> to vector<22x1xf32>
    %cst_238 = arith.constant 3.200000e+01 : f32
    %367 = vector.broadcast %cst_238 : f32 to vector<22x1xf32>
    %368 = arith.divf %366, %367 : vector<22x1xf32>
    %369 = vector.broadcast %368 : vector<22x1xf32> to vector<22x32xf32>
    %370 = arith.subf %360, %369 : vector<22x32xf32>
    %371 = arith.mulf %370, %370 : vector<22x32xf32>
    %cst_239 = arith.constant dense<0.000000e+00> : vector<22xf32>
    %372 = vector.multi_reduction <add>, %371, %cst_239 [1] : vector<22x32xf32> to vector<22xf32>
    %373 = vector.shape_cast %372 : vector<22xf32> to vector<22x1xf32>
    %cst_240 = arith.constant 3.200000e+01 : f32
    %374 = vector.broadcast %cst_240 : f32 to vector<22x1xf32>
    %375 = arith.divf %373, %374 : vector<22x1xf32>
    %cst_241 = arith.constant 9.99999974E-6 : f32
    %376 = vector.broadcast %cst_241 : f32 to vector<22x1xf32>
    %377 = arith.addf %375, %376 : vector<22x1xf32>
    %378 = math.rsqrt %377 : vector<22x1xf32>
    %379 = vector.broadcast %378 : vector<22x1xf32> to vector<22x32xf32>
    %380 = arith.mulf %370, %379 : vector<22x32xf32>
    %381 = vector.broadcast %362 : vector<1x32xf32> to vector<22x32xf32>
    %382 = arith.mulf %380, %381 : vector<22x32xf32>
    %383 = vector.broadcast %364 : vector<1x32xf32> to vector<22x32xf32>
    %384 = arith.addf %382, %383 : vector<22x32xf32>
    %c1_242 = arith.constant 1 : index
    %c0_243 = arith.constant 0 : index
    %c0_244 = arith.constant 0 : index
    %385 = vector.load %arg11[%c1_242, %c0_243, %c0_244] : memref<5x32x128xf32, #tpu.memory_space<vmem>>, vector<1x32x128xf32>
    %386 = vector.shape_cast %385 : vector<1x32x128xf32> to vector<32x128xf32>
    %cst_245 = arith.constant dense<0.000000e+00> : vector<22x128xf32>
    %387 = tpu.matmul %384, %386, %cst_245 {dimension_numbers = #tpu.dot_dimension_numbers<[1], [0], [0], [1], [0, 0, 1, 1], [], []>} : vector<22x32xf32>, vector<32x128xf32>, vector<22x128xf32> -> vector<22x128xf32>
    %c1_246 = arith.constant 1 : index
    %c0_247 = arith.constant 0 : index
    %c0_248 = arith.constant 0 : index
    %388 = vector.load %arg12[%c1_246, %c0_247, %c0_248] : memref<5x1x128xf32, #tpu.memory_space<vmem>>, vector<1x1x128xf32>
    %389 = vector.shape_cast %388 : vector<1x1x128xf32> to vector<1x128xf32>
    %390 = vector.broadcast %389 : vector<1x128xf32> to vector<22x128xf32>
    %391 = arith.addf %387, %390 : vector<22x128xf32>
    %cst_249 = arith.constant 5.000000e-01 : f32
    %392 = vector.broadcast %cst_249 : f32 to vector<22x128xf32>
    %393 = arith.mulf %392, %391 : vector<22x128xf32>
    %cst_250 = arith.constant 0.707106769 : f32
    %394 = vector.broadcast %cst_250 : f32 to vector<22x128xf32>
    %395 = arith.mulf %391, %394 : vector<22x128xf32>
    %396 = math.absf %395 : vector<22x128xf32>
    %cst_251 = arith.constant 0.327591091 : f32
    %397 = vector.broadcast %cst_251 : f32 to vector<22x128xf32>
    %398 = arith.mulf %397, %396 : vector<22x128xf32>
    %cst_252 = arith.constant 1.000000e+00 : f32
    %399 = vector.broadcast %cst_252 : f32 to vector<22x128xf32>
    %400 = arith.addf %399, %398 : vector<22x128xf32>
    %cst_253 = arith.constant 1.000000e+00 : f32
    %401 = vector.broadcast %cst_253 : f32 to vector<22x128xf32>
    %402 = arith.divf %401, %400 : vector<22x128xf32>
    %cst_254 = arith.constant 1.06140542 : f32
    %403 = vector.broadcast %cst_254 : f32 to vector<22x128xf32>
    %404 = arith.mulf %403, %402 : vector<22x128xf32>
    %cst_255 = arith.constant -1.45315206 : f32
    %405 = vector.broadcast %cst_255 : f32 to vector<22x128xf32>
    %406 = arith.addf %404, %405 : vector<22x128xf32>
    %407 = arith.mulf %406, %402 : vector<22x128xf32>
    %cst_256 = arith.constant 1.42141378 : f32
    %408 = vector.broadcast %cst_256 : f32 to vector<22x128xf32>
    %409 = arith.addf %407, %408 : vector<22x128xf32>
    %410 = arith.mulf %409, %402 : vector<22x128xf32>
    %cst_257 = arith.constant -0.284496725 : f32
    %411 = vector.broadcast %cst_257 : f32 to vector<22x128xf32>
    %412 = arith.addf %410, %411 : vector<22x128xf32>
    %413 = arith.mulf %412, %402 : vector<22x128xf32>
    %cst_258 = arith.constant 0.254829586 : f32
    %414 = vector.broadcast %cst_258 : f32 to vector<22x128xf32>
    %415 = arith.addf %413, %414 : vector<22x128xf32>
    %416 = arith.mulf %415, %402 : vector<22x128xf32>
    %cst_259 = arith.constant 0.000000e+00 : f32
    %417 = vector.broadcast %cst_259 : f32 to vector<22x128xf32>
    %418 = arith.subf %417, %396 : vector<22x128xf32>
    %419 = arith.mulf %418, %396 : vector<22x128xf32>
    %420 = math.exp %419 : vector<22x128xf32>
    %421 = arith.mulf %416, %420 : vector<22x128xf32>
    %cst_260 = arith.constant 1.000000e+00 : f32
    %422 = vector.broadcast %cst_260 : f32 to vector<22x128xf32>
    %423 = arith.subf %422, %421 : vector<22x128xf32>
    %cst_261 = arith.constant 0.000000e+00 : f32
    %424 = vector.broadcast %cst_261 : f32 to vector<22x128xf32>
    %425 = arith.cmpf oge, %395, %424 : vector<22x128xf32>
    %cst_262 = arith.constant 0.000000e+00 : f32
    %426 = vector.broadcast %cst_262 : f32 to vector<22x128xf32>
    %427 = arith.subf %426, %423 : vector<22x128xf32>
    %428 = arith.select %425, %423, %427 : vector<22x128xi1>, vector<22x128xf32>
    %cst_263 = arith.constant 1.000000e+00 : f32
    %429 = vector.broadcast %cst_263 : f32 to vector<22x128xf32>
    %430 = arith.addf %429, %428 : vector<22x128xf32>
    %431 = arith.mulf %393, %430 : vector<22x128xf32>
    %c1_264 = arith.constant 1 : index
    %c0_265 = arith.constant 0 : index
    %c0_266 = arith.constant 0 : index
    %432 = vector.load %arg13[%c1_264, %c0_265, %c0_266] : memref<5x128x32xf32, #tpu.memory_space<vmem>>, vector<1x128x32xf32>
    %433 = vector.shape_cast %432 : vector<1x128x32xf32> to vector<128x32xf32>
    %cst_267 = arith.constant dense<0.000000e+00> : vector<22x32xf32>
    %434 = tpu.matmul %431, %433, %cst_267 {dimension_numbers = #tpu.dot_dimension_numbers<[1], [0], [0], [1], [0, 0, 1, 1], [], []>} : vector<22x128xf32>, vector<128x32xf32>, vector<22x32xf32> -> vector<22x32xf32>
    %435 = arith.addf %360, %434 : vector<22x32xf32>
    %c1_268 = arith.constant 1 : index
    %c0_269 = arith.constant 0 : index
    %c0_270 = arith.constant 0 : index
    %436 = vector.load %arg14[%c1_268, %c0_269, %c0_270] : memref<5x1x32xf32, #tpu.memory_space<vmem>>, vector<1x1x32xf32>
    %437 = vector.shape_cast %436 : vector<1x1x32xf32> to vector<1x32xf32>
    %438 = vector.broadcast %437 : vector<1x32xf32> to vector<22x32xf32>
    %439 = arith.addf %435, %438 : vector<22x32xf32>
    %c2_271 = arith.constant 2 : index
    %c0_272 = arith.constant 0 : index
    %c0_273 = arith.constant 0 : index
    %440 = vector.load %arg2[%c2_271, %c0_272, %c0_273] : memref<5x1x32xf32, #tpu.memory_space<vmem>>, vector<1x1x32xf32>
    %441 = vector.shape_cast %440 : vector<1x1x32xf32> to vector<1x32xf32>
    %c2_274 = arith.constant 2 : index
    %c0_275 = arith.constant 0 : index
    %c0_276 = arith.constant 0 : index
    %442 = vector.load %arg3[%c2_274, %c0_275, %c0_276] : memref<5x1x32xf32, #tpu.memory_space<vmem>>, vector<1x1x32xf32>
    %443 = vector.shape_cast %442 : vector<1x1x32xf32> to vector<1x32xf32>
    %cst_277 = arith.constant dense<0.000000e+00> : vector<22xf32>
    %444 = vector.multi_reduction <add>, %439, %cst_277 [1] : vector<22x32xf32> to vector<22xf32>
    %445 = vector.shape_cast %444 : vector<22xf32> to vector<22x1xf32>
    %cst_278 = arith.constant 3.200000e+01 : f32
    %446 = vector.broadcast %cst_278 : f32 to vector<22x1xf32>
    %447 = arith.divf %445, %446 : vector<22x1xf32>
    %448 = vector.broadcast %447 : vector<22x1xf32> to vector<22x32xf32>
    %449 = arith.subf %439, %448 : vector<22x32xf32>
    %450 = arith.mulf %449, %449 : vector<22x32xf32>
    %cst_279 = arith.constant dense<0.000000e+00> : vector<22xf32>
    %451 = vector.multi_reduction <add>, %450, %cst_279 [1] : vector<22x32xf32> to vector<22xf32>
    %452 = vector.shape_cast %451 : vector<22xf32> to vector<22x1xf32>
    %cst_280 = arith.constant 3.200000e+01 : f32
    %453 = vector.broadcast %cst_280 : f32 to vector<22x1xf32>
    %454 = arith.divf %452, %453 : vector<22x1xf32>
    %cst_281 = arith.constant 9.99999974E-6 : f32
    %455 = vector.broadcast %cst_281 : f32 to vector<22x1xf32>
    %456 = arith.addf %454, %455 : vector<22x1xf32>
    %457 = math.rsqrt %456 : vector<22x1xf32>
    %458 = vector.broadcast %457 : vector<22x1xf32> to vector<22x32xf32>
    %459 = arith.mulf %449, %458 : vector<22x32xf32>
    %460 = vector.broadcast %441 : vector<1x32xf32> to vector<22x32xf32>
    %461 = arith.mulf %459, %460 : vector<22x32xf32>
    %462 = vector.broadcast %443 : vector<1x32xf32> to vector<22x32xf32>
    %463 = arith.addf %461, %462 : vector<22x32xf32>
    %c8 = arith.constant 8 : index
    %c0_282 = arith.constant 0 : index
    %c0_283 = arith.constant 0 : index
    %464 = vector.load %arg4[%c8, %c0_282, %c0_283] : memref<20x32x8xf32, #tpu.memory_space<vmem>>, vector<1x32x8xf32>
    %465 = vector.shape_cast %464 : vector<1x32x8xf32> to vector<32x8xf32>
    %cst_284 = arith.constant dense<0.000000e+00> : vector<22x8xf32>
    %466 = tpu.matmul %463, %465, %cst_284 {dimension_numbers = #tpu.dot_dimension_numbers<[1], [0], [0], [1], [0, 0, 1, 1], [], []>} : vector<22x32xf32>, vector<32x8xf32>, vector<22x8xf32> -> vector<22x8xf32>
    %c8_285 = arith.constant 8 : index
    %c0_286 = arith.constant 0 : index
    %c0_287 = arith.constant 0 : index
    %467 = vector.load %arg5[%c8_285, %c0_286, %c0_287] : memref<20x32x8xf32, #tpu.memory_space<vmem>>, vector<1x32x8xf32>
    %468 = vector.shape_cast %467 : vector<1x32x8xf32> to vector<32x8xf32>
    %cst_288 = arith.constant dense<0.000000e+00> : vector<22x8xf32>
    %469 = tpu.matmul %463, %468, %cst_288 {dimension_numbers = #tpu.dot_dimension_numbers<[1], [0], [0], [1], [0, 0, 1, 1], [], []>} : vector<22x32xf32>, vector<32x8xf32>, vector<22x8xf32> -> vector<22x8xf32>
    %c8_289 = arith.constant 8 : index
    %c0_290 = arith.constant 0 : index
    %c0_291 = arith.constant 0 : index
    %470 = vector.load %arg6[%c8_289, %c0_290, %c0_291] : memref<20x32x8xf32, #tpu.memory_space<vmem>>, vector<1x32x8xf32>
    %471 = vector.shape_cast %470 : vector<1x32x8xf32> to vector<32x8xf32>
    %cst_292 = arith.constant dense<0.000000e+00> : vector<22x8xf32>
    %472 = tpu.matmul %463, %471, %cst_292 {dimension_numbers = #tpu.dot_dimension_numbers<[1], [0], [0], [1], [0, 0, 1, 1], [], []>} : vector<22x32xf32>, vector<32x8xf32>, vector<22x8xf32> -> vector<22x8xf32>
    %cst_293 = arith.constant dense<0.000000e+00> : vector<22x22xf32>
    %473 = tpu.matmul %466, %469, %cst_293 {dimension_numbers = #tpu.dot_dimension_numbers<[1], [1], [0], [0], [0, 0, 1, 0], [], []>} : vector<22x8xf32>, vector<22x8xf32>, vector<22x22xf32> -> vector<22x22xf32>
    %cst_294 = arith.constant 0.353553385 : f32
    %474 = vector.broadcast %cst_294 : f32 to vector<22x22xf32>
    %475 = arith.mulf %473, %474 : vector<22x22xf32>
    %476 = arith.addf %475, %1 : vector<22x22xf32>
    %cst_295 = arith.constant dense<0xFF800000> : vector<22xf32>
    %477 = vector.multi_reduction <maximumf>, %476, %cst_295 [1] : vector<22x22xf32> to vector<22xf32>
    %478 = vector.shape_cast %477 : vector<22xf32> to vector<22x1xf32>
    %479 = vector.broadcast %478 : vector<22x1xf32> to vector<22x22xf32>
    %480 = arith.subf %476, %479 : vector<22x22xf32>
    %481 = math.exp %480 : vector<22x22xf32>
    %cst_296 = arith.constant dense<0.000000e+00> : vector<22xf32>
    %482 = vector.multi_reduction <add>, %481, %cst_296 [1] : vector<22x22xf32> to vector<22xf32>
    %483 = vector.shape_cast %482 : vector<22xf32> to vector<22x1xf32>
    %484 = tpu.reciprocal %483 {approx = true} : vector<22x1xf32> -> vector<22x1xf32>
    %485 = vector.broadcast %484 : vector<22x1xf32> to vector<22x22xf32>
    %486 = arith.mulf %481, %485 : vector<22x22xf32>
    %cst_297 = arith.constant dense<0.000000e+00> : vector<22x8xf32>
    %487 = tpu.matmul %486, %472, %cst_297 {dimension_numbers = #tpu.dot_dimension_numbers<[1], [0], [0], [1], [0, 0, 1, 1], [], []>} : vector<22x22xf32>, vector<22x8xf32>, vector<22x8xf32> -> vector<22x8xf32>
    %c8_298 = arith.constant 8 : index
    %c0_299 = arith.constant 0 : index
    %c0_300 = arith.constant 0 : index
    %488 = vector.load %arg7[%c8_298, %c0_299, %c0_300] : memref<20x8x32xf32, #tpu.memory_space<vmem>>, vector<1x8x32xf32>
    %489 = vector.shape_cast %488 : vector<1x8x32xf32> to vector<8x32xf32>
    %cst_301 = arith.constant dense<0.000000e+00> : vector<22x32xf32>
    %490 = tpu.matmul %487, %489, %cst_301 {dimension_numbers = #tpu.dot_dimension_numbers<[1], [0], [0], [1], [0, 0, 1, 1], [], []>} : vector<22x8xf32>, vector<8x32xf32>, vector<22x32xf32> -> vector<22x32xf32>
    %c9 = arith.constant 9 : index
    %c0_302 = arith.constant 0 : index
    %c0_303 = arith.constant 0 : index
    %491 = vector.load %arg4[%c9, %c0_302, %c0_303] : memref<20x32x8xf32, #tpu.memory_space<vmem>>, vector<1x32x8xf32>
    %492 = vector.shape_cast %491 : vector<1x32x8xf32> to vector<32x8xf32>
    %cst_304 = arith.constant dense<0.000000e+00> : vector<22x8xf32>
    %493 = tpu.matmul %463, %492, %cst_304 {dimension_numbers = #tpu.dot_dimension_numbers<[1], [0], [0], [1], [0, 0, 1, 1], [], []>} : vector<22x32xf32>, vector<32x8xf32>, vector<22x8xf32> -> vector<22x8xf32>
    %c9_305 = arith.constant 9 : index
    %c0_306 = arith.constant 0 : index
    %c0_307 = arith.constant 0 : index
    %494 = vector.load %arg5[%c9_305, %c0_306, %c0_307] : memref<20x32x8xf32, #tpu.memory_space<vmem>>, vector<1x32x8xf32>
    %495 = vector.shape_cast %494 : vector<1x32x8xf32> to vector<32x8xf32>
    %cst_308 = arith.constant dense<0.000000e+00> : vector<22x8xf32>
    %496 = tpu.matmul %463, %495, %cst_308 {dimension_numbers = #tpu.dot_dimension_numbers<[1], [0], [0], [1], [0, 0, 1, 1], [], []>} : vector<22x32xf32>, vector<32x8xf32>, vector<22x8xf32> -> vector<22x8xf32>
    %c9_309 = arith.constant 9 : index
    %c0_310 = arith.constant 0 : index
    %c0_311 = arith.constant 0 : index
    %497 = vector.load %arg6[%c9_309, %c0_310, %c0_311] : memref<20x32x8xf32, #tpu.memory_space<vmem>>, vector<1x32x8xf32>
    %498 = vector.shape_cast %497 : vector<1x32x8xf32> to vector<32x8xf32>
    %cst_312 = arith.constant dense<0.000000e+00> : vector<22x8xf32>
    %499 = tpu.matmul %463, %498, %cst_312 {dimension_numbers = #tpu.dot_dimension_numbers<[1], [0], [0], [1], [0, 0, 1, 1], [], []>} : vector<22x32xf32>, vector<32x8xf32>, vector<22x8xf32> -> vector<22x8xf32>
    %cst_313 = arith.constant dense<0.000000e+00> : vector<22x22xf32>
    %500 = tpu.matmul %493, %496, %cst_313 {dimension_numbers = #tpu.dot_dimension_numbers<[1], [1], [0], [0], [0, 0, 1, 0], [], []>} : vector<22x8xf32>, vector<22x8xf32>, vector<22x22xf32> -> vector<22x22xf32>
    %cst_314 = arith.constant 0.353553385 : f32
    %501 = vector.broadcast %cst_314 : f32 to vector<22x22xf32>
    %502 = arith.mulf %500, %501 : vector<22x22xf32>
    %503 = arith.addf %502, %1 : vector<22x22xf32>
    %cst_315 = arith.constant dense<0xFF800000> : vector<22xf32>
    %504 = vector.multi_reduction <maximumf>, %503, %cst_315 [1] : vector<22x22xf32> to vector<22xf32>
    %505 = vector.shape_cast %504 : vector<22xf32> to vector<22x1xf32>
    %506 = vector.broadcast %505 : vector<22x1xf32> to vector<22x22xf32>
    %507 = arith.subf %503, %506 : vector<22x22xf32>
    %508 = math.exp %507 : vector<22x22xf32>
    %cst_316 = arith.constant dense<0.000000e+00> : vector<22xf32>
    %509 = vector.multi_reduction <add>, %508, %cst_316 [1] : vector<22x22xf32> to vector<22xf32>
    %510 = vector.shape_cast %509 : vector<22xf32> to vector<22x1xf32>
    %511 = tpu.reciprocal %510 {approx = true} : vector<22x1xf32> -> vector<22x1xf32>
    %512 = vector.broadcast %511 : vector<22x1xf32> to vector<22x22xf32>
    %513 = arith.mulf %508, %512 : vector<22x22xf32>
    %cst_317 = arith.constant dense<0.000000e+00> : vector<22x8xf32>
    %514 = tpu.matmul %513, %499, %cst_317 {dimension_numbers = #tpu.dot_dimension_numbers<[1], [0], [0], [1], [0, 0, 1, 1], [], []>} : vector<22x22xf32>, vector<22x8xf32>, vector<22x8xf32> -> vector<22x8xf32>
    %c9_318 = arith.constant 9 : index
    %c0_319 = arith.constant 0 : index
    %c0_320 = arith.constant 0 : index
    %515 = vector.load %arg7[%c9_318, %c0_319, %c0_320] : memref<20x8x32xf32, #tpu.memory_space<vmem>>, vector<1x8x32xf32>
    %516 = vector.shape_cast %515 : vector<1x8x32xf32> to vector<8x32xf32>
    %cst_321 = arith.constant dense<0.000000e+00> : vector<22x32xf32>
    %517 = tpu.matmul %514, %516, %cst_321 {dimension_numbers = #tpu.dot_dimension_numbers<[1], [0], [0], [1], [0, 0, 1, 1], [], []>} : vector<22x8xf32>, vector<8x32xf32>, vector<22x32xf32> -> vector<22x32xf32>
    %518 = arith.addf %490, %517 : vector<22x32xf32>
    %c10 = arith.constant 10 : index
    %c0_322 = arith.constant 0 : index
    %c0_323 = arith.constant 0 : index
    %519 = vector.load %arg4[%c10, %c0_322, %c0_323] : memref<20x32x8xf32, #tpu.memory_space<vmem>>, vector<1x32x8xf32>
    %520 = vector.shape_cast %519 : vector<1x32x8xf32> to vector<32x8xf32>
    %cst_324 = arith.constant dense<0.000000e+00> : vector<22x8xf32>
    %521 = tpu.matmul %463, %520, %cst_324 {dimension_numbers = #tpu.dot_dimension_numbers<[1], [0], [0], [1], [0, 0, 1, 1], [], []>} : vector<22x32xf32>, vector<32x8xf32>, vector<22x8xf32> -> vector<22x8xf32>
    %c10_325 = arith.constant 10 : index
    %c0_326 = arith.constant 0 : index
    %c0_327 = arith.constant 0 : index
    %522 = vector.load %arg5[%c10_325, %c0_326, %c0_327] : memref<20x32x8xf32, #tpu.memory_space<vmem>>, vector<1x32x8xf32>
    %523 = vector.shape_cast %522 : vector<1x32x8xf32> to vector<32x8xf32>
    %cst_328 = arith.constant dense<0.000000e+00> : vector<22x8xf32>
    %524 = tpu.matmul %463, %523, %cst_328 {dimension_numbers = #tpu.dot_dimension_numbers<[1], [0], [0], [1], [0, 0, 1, 1], [], []>} : vector<22x32xf32>, vector<32x8xf32>, vector<22x8xf32> -> vector<22x8xf32>
    %c10_329 = arith.constant 10 : index
    %c0_330 = arith.constant 0 : index
    %c0_331 = arith.constant 0 : index
    %525 = vector.load %arg6[%c10_329, %c0_330, %c0_331] : memref<20x32x8xf32, #tpu.memory_space<vmem>>, vector<1x32x8xf32>
    %526 = vector.shape_cast %525 : vector<1x32x8xf32> to vector<32x8xf32>
    %cst_332 = arith.constant dense<0.000000e+00> : vector<22x8xf32>
    %527 = tpu.matmul %463, %526, %cst_332 {dimension_numbers = #tpu.dot_dimension_numbers<[1], [0], [0], [1], [0, 0, 1, 1], [], []>} : vector<22x32xf32>, vector<32x8xf32>, vector<22x8xf32> -> vector<22x8xf32>
    %cst_333 = arith.constant dense<0.000000e+00> : vector<22x22xf32>
    %528 = tpu.matmul %521, %524, %cst_333 {dimension_numbers = #tpu.dot_dimension_numbers<[1], [1], [0], [0], [0, 0, 1, 0], [], []>} : vector<22x8xf32>, vector<22x8xf32>, vector<22x22xf32> -> vector<22x22xf32>
    %cst_334 = arith.constant 0.353553385 : f32
    %529 = vector.broadcast %cst_334 : f32 to vector<22x22xf32>
    %530 = arith.mulf %528, %529 : vector<22x22xf32>
    %531 = arith.addf %530, %1 : vector<22x22xf32>
    %cst_335 = arith.constant dense<0xFF800000> : vector<22xf32>
    %532 = vector.multi_reduction <maximumf>, %531, %cst_335 [1] : vector<22x22xf32> to vector<22xf32>
    %533 = vector.shape_cast %532 : vector<22xf32> to vector<22x1xf32>
    %534 = vector.broadcast %533 : vector<22x1xf32> to vector<22x22xf32>
    %535 = arith.subf %531, %534 : vector<22x22xf32>
    %536 = math.exp %535 : vector<22x22xf32>
    %cst_336 = arith.constant dense<0.000000e+00> : vector<22xf32>
    %537 = vector.multi_reduction <add>, %536, %cst_336 [1] : vector<22x22xf32> to vector<22xf32>
    %538 = vector.shape_cast %537 : vector<22xf32> to vector<22x1xf32>
    %539 = tpu.reciprocal %538 {approx = true} : vector<22x1xf32> -> vector<22x1xf32>
    %540 = vector.broadcast %539 : vector<22x1xf32> to vector<22x22xf32>
    %541 = arith.mulf %536, %540 : vector<22x22xf32>
    %cst_337 = arith.constant dense<0.000000e+00> : vector<22x8xf32>
    %542 = tpu.matmul %541, %527, %cst_337 {dimension_numbers = #tpu.dot_dimension_numbers<[1], [0], [0], [1], [0, 0, 1, 1], [], []>} : vector<22x22xf32>, vector<22x8xf32>, vector<22x8xf32> -> vector<22x8xf32>
    %c10_338 = arith.constant 10 : index
    %c0_339 = arith.constant 0 : index
    %c0_340 = arith.constant 0 : index
    %543 = vector.load %arg7[%c10_338, %c0_339, %c0_340] : memref<20x8x32xf32, #tpu.memory_space<vmem>>, vector<1x8x32xf32>
    %544 = vector.shape_cast %543 : vector<1x8x32xf32> to vector<8x32xf32>
    %cst_341 = arith.constant dense<0.000000e+00> : vector<22x32xf32>
    %545 = tpu.matmul %542, %544, %cst_341 {dimension_numbers = #tpu.dot_dimension_numbers<[1], [0], [0], [1], [0, 0, 1, 1], [], []>} : vector<22x8xf32>, vector<8x32xf32>, vector<22x32xf32> -> vector<22x32xf32>
    %546 = arith.addf %518, %545 : vector<22x32xf32>
    %c11 = arith.constant 11 : index
    %c0_342 = arith.constant 0 : index
    %c0_343 = arith.constant 0 : index
    %547 = vector.load %arg4[%c11, %c0_342, %c0_343] : memref<20x32x8xf32, #tpu.memory_space<vmem>>, vector<1x32x8xf32>
    %548 = vector.shape_cast %547 : vector<1x32x8xf32> to vector<32x8xf32>
    %cst_344 = arith.constant dense<0.000000e+00> : vector<22x8xf32>
    %549 = tpu.matmul %463, %548, %cst_344 {dimension_numbers = #tpu.dot_dimension_numbers<[1], [0], [0], [1], [0, 0, 1, 1], [], []>} : vector<22x32xf32>, vector<32x8xf32>, vector<22x8xf32> -> vector<22x8xf32>
    %c11_345 = arith.constant 11 : index
    %c0_346 = arith.constant 0 : index
    %c0_347 = arith.constant 0 : index
    %550 = vector.load %arg5[%c11_345, %c0_346, %c0_347] : memref<20x32x8xf32, #tpu.memory_space<vmem>>, vector<1x32x8xf32>
    %551 = vector.shape_cast %550 : vector<1x32x8xf32> to vector<32x8xf32>
    %cst_348 = arith.constant dense<0.000000e+00> : vector<22x8xf32>
    %552 = tpu.matmul %463, %551, %cst_348 {dimension_numbers = #tpu.dot_dimension_numbers<[1], [0], [0], [1], [0, 0, 1, 1], [], []>} : vector<22x32xf32>, vector<32x8xf32>, vector<22x8xf32> -> vector<22x8xf32>
    %c11_349 = arith.constant 11 : index
    %c0_350 = arith.constant 0 : index
    %c0_351 = arith.constant 0 : index
    %553 = vector.load %arg6[%c11_349, %c0_350, %c0_351] : memref<20x32x8xf32, #tpu.memory_space<vmem>>, vector<1x32x8xf32>
    %554 = vector.shape_cast %553 : vector<1x32x8xf32> to vector<32x8xf32>
    %cst_352 = arith.constant dense<0.000000e+00> : vector<22x8xf32>
    %555 = tpu.matmul %463, %554, %cst_352 {dimension_numbers = #tpu.dot_dimension_numbers<[1], [0], [0], [1], [0, 0, 1, 1], [], []>} : vector<22x32xf32>, vector<32x8xf32>, vector<22x8xf32> -> vector<22x8xf32>
    %cst_353 = arith.constant dense<0.000000e+00> : vector<22x22xf32>
    %556 = tpu.matmul %549, %552, %cst_353 {dimension_numbers = #tpu.dot_dimension_numbers<[1], [1], [0], [0], [0, 0, 1, 0], [], []>} : vector<22x8xf32>, vector<22x8xf32>, vector<22x22xf32> -> vector<22x22xf32>
    %cst_354 = arith.constant 0.353553385 : f32
    %557 = vector.broadcast %cst_354 : f32 to vector<22x22xf32>
    %558 = arith.mulf %556, %557 : vector<22x22xf32>
    %559 = arith.addf %558, %1 : vector<22x22xf32>
    %cst_355 = arith.constant dense<0xFF800000> : vector<22xf32>
    %560 = vector.multi_reduction <maximumf>, %559, %cst_355 [1] : vector<22x22xf32> to vector<22xf32>
    %561 = vector.shape_cast %560 : vector<22xf32> to vector<22x1xf32>
    %562 = vector.broadcast %561 : vector<22x1xf32> to vector<22x22xf32>
    %563 = arith.subf %559, %562 : vector<22x22xf32>
    %564 = math.exp %563 : vector<22x22xf32>
    %cst_356 = arith.constant dense<0.000000e+00> : vector<22xf32>
    %565 = vector.multi_reduction <add>, %564, %cst_356 [1] : vector<22x22xf32> to vector<22xf32>
    %566 = vector.shape_cast %565 : vector<22xf32> to vector<22x1xf32>
    %567 = tpu.reciprocal %566 {approx = true} : vector<22x1xf32> -> vector<22x1xf32>
    %568 = vector.broadcast %567 : vector<22x1xf32> to vector<22x22xf32>
    %569 = arith.mulf %564, %568 : vector<22x22xf32>
    %cst_357 = arith.constant dense<0.000000e+00> : vector<22x8xf32>
    %570 = tpu.matmul %569, %555, %cst_357 {dimension_numbers = #tpu.dot_dimension_numbers<[1], [0], [0], [1], [0, 0, 1, 1], [], []>} : vector<22x22xf32>, vector<22x8xf32>, vector<22x8xf32> -> vector<22x8xf32>
    %c11_358 = arith.constant 11 : index
    %c0_359 = arith.constant 0 : index
    %c0_360 = arith.constant 0 : index
    %571 = vector.load %arg7[%c11_358, %c0_359, %c0_360] : memref<20x8x32xf32, #tpu.memory_space<vmem>>, vector<1x8x32xf32>
    %572 = vector.shape_cast %571 : vector<1x8x32xf32> to vector<8x32xf32>
    %cst_361 = arith.constant dense<0.000000e+00> : vector<22x32xf32>
    %573 = tpu.matmul %570, %572, %cst_361 {dimension_numbers = #tpu.dot_dimension_numbers<[1], [0], [0], [1], [0, 0, 1, 1], [], []>} : vector<22x8xf32>, vector<8x32xf32>, vector<22x32xf32> -> vector<22x32xf32>
    %574 = arith.addf %546, %573 : vector<22x32xf32>
    %575 = arith.addf %439, %574 : vector<22x32xf32>
    %c2_362 = arith.constant 2 : index
    %c0_363 = arith.constant 0 : index
    %c0_364 = arith.constant 0 : index
    %576 = vector.load %arg8[%c2_362, %c0_363, %c0_364] : memref<5x1x32xf32, #tpu.memory_space<vmem>>, vector<1x1x32xf32>
    %577 = vector.shape_cast %576 : vector<1x1x32xf32> to vector<1x32xf32>
    %578 = vector.broadcast %577 : vector<1x32xf32> to vector<22x32xf32>
    %579 = arith.addf %575, %578 : vector<22x32xf32>
    %c2_365 = arith.constant 2 : index
    %c0_366 = arith.constant 0 : index
    %c0_367 = arith.constant 0 : index
    %580 = vector.load %arg9[%c2_365, %c0_366, %c0_367] : memref<5x1x32xf32, #tpu.memory_space<vmem>>, vector<1x1x32xf32>
    %581 = vector.shape_cast %580 : vector<1x1x32xf32> to vector<1x32xf32>
    %c2_368 = arith.constant 2 : index
    %c0_369 = arith.constant 0 : index
    %c0_370 = arith.constant 0 : index
    %582 = vector.load %arg10[%c2_368, %c0_369, %c0_370] : memref<5x1x32xf32, #tpu.memory_space<vmem>>, vector<1x1x32xf32>
    %583 = vector.shape_cast %582 : vector<1x1x32xf32> to vector<1x32xf32>
    %cst_371 = arith.constant dense<0.000000e+00> : vector<22xf32>
    %584 = vector.multi_reduction <add>, %579, %cst_371 [1] : vector<22x32xf32> to vector<22xf32>
    %585 = vector.shape_cast %584 : vector<22xf32> to vector<22x1xf32>
    %cst_372 = arith.constant 3.200000e+01 : f32
    %586 = vector.broadcast %cst_372 : f32 to vector<22x1xf32>
    %587 = arith.divf %585, %586 : vector<22x1xf32>
    %588 = vector.broadcast %587 : vector<22x1xf32> to vector<22x32xf32>
    %589 = arith.subf %579, %588 : vector<22x32xf32>
    %590 = arith.mulf %589, %589 : vector<22x32xf32>
    %cst_373 = arith.constant dense<0.000000e+00> : vector<22xf32>
    %591 = vector.multi_reduction <add>, %590, %cst_373 [1] : vector<22x32xf32> to vector<22xf32>
    %592 = vector.shape_cast %591 : vector<22xf32> to vector<22x1xf32>
    %cst_374 = arith.constant 3.200000e+01 : f32
    %593 = vector.broadcast %cst_374 : f32 to vector<22x1xf32>
    %594 = arith.divf %592, %593 : vector<22x1xf32>
    %cst_375 = arith.constant 9.99999974E-6 : f32
    %595 = vector.broadcast %cst_375 : f32 to vector<22x1xf32>
    %596 = arith.addf %594, %595 : vector<22x1xf32>
    %597 = math.rsqrt %596 : vector<22x1xf32>
    %598 = vector.broadcast %597 : vector<22x1xf32> to vector<22x32xf32>
    %599 = arith.mulf %589, %598 : vector<22x32xf32>
    %600 = vector.broadcast %581 : vector<1x32xf32> to vector<22x32xf32>
    %601 = arith.mulf %599, %600 : vector<22x32xf32>
    %602 = vector.broadcast %583 : vector<1x32xf32> to vector<22x32xf32>
    %603 = arith.addf %601, %602 : vector<22x32xf32>
    %c2_376 = arith.constant 2 : index
    %c0_377 = arith.constant 0 : index
    %c0_378 = arith.constant 0 : index
    %604 = vector.load %arg11[%c2_376, %c0_377, %c0_378] : memref<5x32x128xf32, #tpu.memory_space<vmem>>, vector<1x32x128xf32>
    %605 = vector.shape_cast %604 : vector<1x32x128xf32> to vector<32x128xf32>
    %cst_379 = arith.constant dense<0.000000e+00> : vector<22x128xf32>
    %606 = tpu.matmul %603, %605, %cst_379 {dimension_numbers = #tpu.dot_dimension_numbers<[1], [0], [0], [1], [0, 0, 1, 1], [], []>} : vector<22x32xf32>, vector<32x128xf32>, vector<22x128xf32> -> vector<22x128xf32>
    %c2_380 = arith.constant 2 : index
    %c0_381 = arith.constant 0 : index
    %c0_382 = arith.constant 0 : index
    %607 = vector.load %arg12[%c2_380, %c0_381, %c0_382] : memref<5x1x128xf32, #tpu.memory_space<vmem>>, vector<1x1x128xf32>
    %608 = vector.shape_cast %607 : vector<1x1x128xf32> to vector<1x128xf32>
    %609 = vector.broadcast %608 : vector<1x128xf32> to vector<22x128xf32>
    %610 = arith.addf %606, %609 : vector<22x128xf32>
    %cst_383 = arith.constant 5.000000e-01 : f32
    %611 = vector.broadcast %cst_383 : f32 to vector<22x128xf32>
    %612 = arith.mulf %611, %610 : vector<22x128xf32>
    %cst_384 = arith.constant 0.707106769 : f32
    %613 = vector.broadcast %cst_384 : f32 to vector<22x128xf32>
    %614 = arith.mulf %610, %613 : vector<22x128xf32>
    %615 = math.absf %614 : vector<22x128xf32>
    %cst_385 = arith.constant 0.327591091 : f32
    %616 = vector.broadcast %cst_385 : f32 to vector<22x128xf32>
    %617 = arith.mulf %616, %615 : vector<22x128xf32>
    %cst_386 = arith.constant 1.000000e+00 : f32
    %618 = vector.broadcast %cst_386 : f32 to vector<22x128xf32>
    %619 = arith.addf %618, %617 : vector<22x128xf32>
    %cst_387 = arith.constant 1.000000e+00 : f32
    %620 = vector.broadcast %cst_387 : f32 to vector<22x128xf32>
    %621 = arith.divf %620, %619 : vector<22x128xf32>
    %cst_388 = arith.constant 1.06140542 : f32
    %622 = vector.broadcast %cst_388 : f32 to vector<22x128xf32>
    %623 = arith.mulf %622, %621 : vector<22x128xf32>
    %cst_389 = arith.constant -1.45315206 : f32
    %624 = vector.broadcast %cst_389 : f32 to vector<22x128xf32>
    %625 = arith.addf %623, %624 : vector<22x128xf32>
    %626 = arith.mulf %625, %621 : vector<22x128xf32>
    %cst_390 = arith.constant 1.42141378 : f32
    %627 = vector.broadcast %cst_390 : f32 to vector<22x128xf32>
    %628 = arith.addf %626, %627 : vector<22x128xf32>
    %629 = arith.mulf %628, %621 : vector<22x128xf32>
    %cst_391 = arith.constant -0.284496725 : f32
    %630 = vector.broadcast %cst_391 : f32 to vector<22x128xf32>
    %631 = arith.addf %629, %630 : vector<22x128xf32>
    %632 = arith.mulf %631, %621 : vector<22x128xf32>
    %cst_392 = arith.constant 0.254829586 : f32
    %633 = vector.broadcast %cst_392 : f32 to vector<22x128xf32>
    %634 = arith.addf %632, %633 : vector<22x128xf32>
    %635 = arith.mulf %634, %621 : vector<22x128xf32>
    %cst_393 = arith.constant 0.000000e+00 : f32
    %636 = vector.broadcast %cst_393 : f32 to vector<22x128xf32>
    %637 = arith.subf %636, %615 : vector<22x128xf32>
    %638 = arith.mulf %637, %615 : vector<22x128xf32>
    %639 = math.exp %638 : vector<22x128xf32>
    %640 = arith.mulf %635, %639 : vector<22x128xf32>
    %cst_394 = arith.constant 1.000000e+00 : f32
    %641 = vector.broadcast %cst_394 : f32 to vector<22x128xf32>
    %642 = arith.subf %641, %640 : vector<22x128xf32>
    %cst_395 = arith.constant 0.000000e+00 : f32
    %643 = vector.broadcast %cst_395 : f32 to vector<22x128xf32>
    %644 = arith.cmpf oge, %614, %643 : vector<22x128xf32>
    %cst_396 = arith.constant 0.000000e+00 : f32
    %645 = vector.broadcast %cst_396 : f32 to vector<22x128xf32>
    %646 = arith.subf %645, %642 : vector<22x128xf32>
    %647 = arith.select %644, %642, %646 : vector<22x128xi1>, vector<22x128xf32>
    %cst_397 = arith.constant 1.000000e+00 : f32
    %648 = vector.broadcast %cst_397 : f32 to vector<22x128xf32>
    %649 = arith.addf %648, %647 : vector<22x128xf32>
    %650 = arith.mulf %612, %649 : vector<22x128xf32>
    %c2_398 = arith.constant 2 : index
    %c0_399 = arith.constant 0 : index
    %c0_400 = arith.constant 0 : index
    %651 = vector.load %arg13[%c2_398, %c0_399, %c0_400] : memref<5x128x32xf32, #tpu.memory_space<vmem>>, vector<1x128x32xf32>
    %652 = vector.shape_cast %651 : vector<1x128x32xf32> to vector<128x32xf32>
    %cst_401 = arith.constant dense<0.000000e+00> : vector<22x32xf32>
    %653 = tpu.matmul %650, %652, %cst_401 {dimension_numbers = #tpu.dot_dimension_numbers<[1], [0], [0], [1], [0, 0, 1, 1], [], []>} : vector<22x128xf32>, vector<128x32xf32>, vector<22x32xf32> -> vector<22x32xf32>
    %654 = arith.addf %579, %653 : vector<22x32xf32>
    %c2_402 = arith.constant 2 : index
    %c0_403 = arith.constant 0 : index
    %c0_404 = arith.constant 0 : index
    %655 = vector.load %arg14[%c2_402, %c0_403, %c0_404] : memref<5x1x32xf32, #tpu.memory_space<vmem>>, vector<1x1x32xf32>
    %656 = vector.shape_cast %655 : vector<1x1x32xf32> to vector<1x32xf32>
    %657 = vector.broadcast %656 : vector<1x32xf32> to vector<22x32xf32>
    %658 = arith.addf %654, %657 : vector<22x32xf32>
    %c0_405 = arith.constant 0 : index
    %c0_406 = arith.constant 0 : index
    %c0_407 = arith.constant 0 : index
    %659 = vector.load %arg15[%c0_405, %c0_406, %c0_407] : memref<2x32x32xf32, #tpu.memory_space<vmem>>, vector<1x32x32xf32>
    %660 = vector.shape_cast %659 : vector<1x32x32xf32> to vector<32x32xf32>
    %cst_408 = arith.constant dense<0.000000e+00> : vector<22x32xf32>
    %661 = tpu.matmul %658, %660, %cst_408 {dimension_numbers = #tpu.dot_dimension_numbers<[1], [0], [0], [1], [0, 0, 1, 1], [], []>} : vector<22x32xf32>, vector<32x32xf32>, vector<22x32xf32> -> vector<22x32xf32>
    %c0_409 = arith.constant 0 : index
    %c0_410 = arith.constant 0 : index
    %c0_411 = arith.constant 0 : index
    %662 = vector.load %arg16[%c0_409, %c0_410, %c0_411] : memref<2x32x32xf32, #tpu.memory_space<vmem>>, vector<1x32x32xf32>
    %663 = vector.shape_cast %662 : vector<1x32x32xf32> to vector<32x32xf32>
    %cst_412 = arith.constant dense<0.000000e+00> : vector<22x32xf32>
    %664 = tpu.matmul %439, %663, %cst_412 {dimension_numbers = #tpu.dot_dimension_numbers<[1], [0], [0], [1], [0, 0, 1, 1], [], []>} : vector<22x32xf32>, vector<32x32xf32>, vector<22x32xf32> -> vector<22x32xf32>
    %665 = arith.addf %661, %664 : vector<22x32xf32>
    %c0_413 = arith.constant 0 : index
    %c0_414 = arith.constant 0 : index
    %c0_415 = arith.constant 0 : index
    %666 = vector.load %arg17[%c0_413, %c0_414, %c0_415] : memref<2x1x32xf32, #tpu.memory_space<vmem>>, vector<1x1x32xf32>
    %667 = vector.shape_cast %666 : vector<1x1x32xf32> to vector<1x32xf32>
    %668 = vector.broadcast %667 : vector<1x32xf32> to vector<22x32xf32>
    %669 = arith.addf %665, %668 : vector<22x32xf32>
    %c3_416 = arith.constant 3 : index
    %c0_417 = arith.constant 0 : index
    %c0_418 = arith.constant 0 : index
    %670 = vector.load %arg2[%c3_416, %c0_417, %c0_418] : memref<5x1x32xf32, #tpu.memory_space<vmem>>, vector<1x1x32xf32>
    %671 = vector.shape_cast %670 : vector<1x1x32xf32> to vector<1x32xf32>
    %c3_419 = arith.constant 3 : index
    %c0_420 = arith.constant 0 : index
    %c0_421 = arith.constant 0 : index
    %672 = vector.load %arg3[%c3_419, %c0_420, %c0_421] : memref<5x1x32xf32, #tpu.memory_space<vmem>>, vector<1x1x32xf32>
    %673 = vector.shape_cast %672 : vector<1x1x32xf32> to vector<1x32xf32>
    %cst_422 = arith.constant dense<0.000000e+00> : vector<22xf32>
    %674 = vector.multi_reduction <add>, %669, %cst_422 [1] : vector<22x32xf32> to vector<22xf32>
    %675 = vector.shape_cast %674 : vector<22xf32> to vector<22x1xf32>
    %cst_423 = arith.constant 3.200000e+01 : f32
    %676 = vector.broadcast %cst_423 : f32 to vector<22x1xf32>
    %677 = arith.divf %675, %676 : vector<22x1xf32>
    %678 = vector.broadcast %677 : vector<22x1xf32> to vector<22x32xf32>
    %679 = arith.subf %669, %678 : vector<22x32xf32>
    %680 = arith.mulf %679, %679 : vector<22x32xf32>
    %cst_424 = arith.constant dense<0.000000e+00> : vector<22xf32>
    %681 = vector.multi_reduction <add>, %680, %cst_424 [1] : vector<22x32xf32> to vector<22xf32>
    %682 = vector.shape_cast %681 : vector<22xf32> to vector<22x1xf32>
    %cst_425 = arith.constant 3.200000e+01 : f32
    %683 = vector.broadcast %cst_425 : f32 to vector<22x1xf32>
    %684 = arith.divf %682, %683 : vector<22x1xf32>
    %cst_426 = arith.constant 9.99999974E-6 : f32
    %685 = vector.broadcast %cst_426 : f32 to vector<22x1xf32>
    %686 = arith.addf %684, %685 : vector<22x1xf32>
    %687 = math.rsqrt %686 : vector<22x1xf32>
    %688 = vector.broadcast %687 : vector<22x1xf32> to vector<22x32xf32>
    %689 = arith.mulf %679, %688 : vector<22x32xf32>
    %690 = vector.broadcast %671 : vector<1x32xf32> to vector<22x32xf32>
    %691 = arith.mulf %689, %690 : vector<22x32xf32>
    %692 = vector.broadcast %673 : vector<1x32xf32> to vector<22x32xf32>
    %693 = arith.addf %691, %692 : vector<22x32xf32>
    %c12 = arith.constant 12 : index
    %c0_427 = arith.constant 0 : index
    %c0_428 = arith.constant 0 : index
    %694 = vector.load %arg4[%c12, %c0_427, %c0_428] : memref<20x32x8xf32, #tpu.memory_space<vmem>>, vector<1x32x8xf32>
    %695 = vector.shape_cast %694 : vector<1x32x8xf32> to vector<32x8xf32>
    %cst_429 = arith.constant dense<0.000000e+00> : vector<22x8xf32>
    %696 = tpu.matmul %693, %695, %cst_429 {dimension_numbers = #tpu.dot_dimension_numbers<[1], [0], [0], [1], [0, 0, 1, 1], [], []>} : vector<22x32xf32>, vector<32x8xf32>, vector<22x8xf32> -> vector<22x8xf32>
    %c12_430 = arith.constant 12 : index
    %c0_431 = arith.constant 0 : index
    %c0_432 = arith.constant 0 : index
    %697 = vector.load %arg5[%c12_430, %c0_431, %c0_432] : memref<20x32x8xf32, #tpu.memory_space<vmem>>, vector<1x32x8xf32>
    %698 = vector.shape_cast %697 : vector<1x32x8xf32> to vector<32x8xf32>
    %cst_433 = arith.constant dense<0.000000e+00> : vector<22x8xf32>
    %699 = tpu.matmul %693, %698, %cst_433 {dimension_numbers = #tpu.dot_dimension_numbers<[1], [0], [0], [1], [0, 0, 1, 1], [], []>} : vector<22x32xf32>, vector<32x8xf32>, vector<22x8xf32> -> vector<22x8xf32>
    %c12_434 = arith.constant 12 : index
    %c0_435 = arith.constant 0 : index
    %c0_436 = arith.constant 0 : index
    %700 = vector.load %arg6[%c12_434, %c0_435, %c0_436] : memref<20x32x8xf32, #tpu.memory_space<vmem>>, vector<1x32x8xf32>
    %701 = vector.shape_cast %700 : vector<1x32x8xf32> to vector<32x8xf32>
    %cst_437 = arith.constant dense<0.000000e+00> : vector<22x8xf32>
    %702 = tpu.matmul %693, %701, %cst_437 {dimension_numbers = #tpu.dot_dimension_numbers<[1], [0], [0], [1], [0, 0, 1, 1], [], []>} : vector<22x32xf32>, vector<32x8xf32>, vector<22x8xf32> -> vector<22x8xf32>
    %cst_438 = arith.constant dense<0.000000e+00> : vector<22x22xf32>
    %703 = tpu.matmul %696, %699, %cst_438 {dimension_numbers = #tpu.dot_dimension_numbers<[1], [1], [0], [0], [0, 0, 1, 0], [], []>} : vector<22x8xf32>, vector<22x8xf32>, vector<22x22xf32> -> vector<22x22xf32>
    %cst_439 = arith.constant 0.353553385 : f32
    %704 = vector.broadcast %cst_439 : f32 to vector<22x22xf32>
    %705 = arith.mulf %703, %704 : vector<22x22xf32>
    %706 = arith.addf %705, %1 : vector<22x22xf32>
    %cst_440 = arith.constant dense<0xFF800000> : vector<22xf32>
    %707 = vector.multi_reduction <maximumf>, %706, %cst_440 [1] : vector<22x22xf32> to vector<22xf32>
    %708 = vector.shape_cast %707 : vector<22xf32> to vector<22x1xf32>
    %709 = vector.broadcast %708 : vector<22x1xf32> to vector<22x22xf32>
    %710 = arith.subf %706, %709 : vector<22x22xf32>
    %711 = math.exp %710 : vector<22x22xf32>
    %cst_441 = arith.constant dense<0.000000e+00> : vector<22xf32>
    %712 = vector.multi_reduction <add>, %711, %cst_441 [1] : vector<22x22xf32> to vector<22xf32>
    %713 = vector.shape_cast %712 : vector<22xf32> to vector<22x1xf32>
    %714 = tpu.reciprocal %713 {approx = true} : vector<22x1xf32> -> vector<22x1xf32>
    %715 = vector.broadcast %714 : vector<22x1xf32> to vector<22x22xf32>
    %716 = arith.mulf %711, %715 : vector<22x22xf32>
    %cst_442 = arith.constant dense<0.000000e+00> : vector<22x8xf32>
    %717 = tpu.matmul %716, %702, %cst_442 {dimension_numbers = #tpu.dot_dimension_numbers<[1], [0], [0], [1], [0, 0, 1, 1], [], []>} : vector<22x22xf32>, vector<22x8xf32>, vector<22x8xf32> -> vector<22x8xf32>
    %c12_443 = arith.constant 12 : index
    %c0_444 = arith.constant 0 : index
    %c0_445 = arith.constant 0 : index
    %718 = vector.load %arg7[%c12_443, %c0_444, %c0_445] : memref<20x8x32xf32, #tpu.memory_space<vmem>>, vector<1x8x32xf32>
    %719 = vector.shape_cast %718 : vector<1x8x32xf32> to vector<8x32xf32>
    %cst_446 = arith.constant dense<0.000000e+00> : vector<22x32xf32>
    %720 = tpu.matmul %717, %719, %cst_446 {dimension_numbers = #tpu.dot_dimension_numbers<[1], [0], [0], [1], [0, 0, 1, 1], [], []>} : vector<22x8xf32>, vector<8x32xf32>, vector<22x32xf32> -> vector<22x32xf32>
    %c13 = arith.constant 13 : index
    %c0_447 = arith.constant 0 : index
    %c0_448 = arith.constant 0 : index
    %721 = vector.load %arg4[%c13, %c0_447, %c0_448] : memref<20x32x8xf32, #tpu.memory_space<vmem>>, vector<1x32x8xf32>
    %722 = vector.shape_cast %721 : vector<1x32x8xf32> to vector<32x8xf32>
    %cst_449 = arith.constant dense<0.000000e+00> : vector<22x8xf32>
    %723 = tpu.matmul %693, %722, %cst_449 {dimension_numbers = #tpu.dot_dimension_numbers<[1], [0], [0], [1], [0, 0, 1, 1], [], []>} : vector<22x32xf32>, vector<32x8xf32>, vector<22x8xf32> -> vector<22x8xf32>
    %c13_450 = arith.constant 13 : index
    %c0_451 = arith.constant 0 : index
    %c0_452 = arith.constant 0 : index
    %724 = vector.load %arg5[%c13_450, %c0_451, %c0_452] : memref<20x32x8xf32, #tpu.memory_space<vmem>>, vector<1x32x8xf32>
    %725 = vector.shape_cast %724 : vector<1x32x8xf32> to vector<32x8xf32>
    %cst_453 = arith.constant dense<0.000000e+00> : vector<22x8xf32>
    %726 = tpu.matmul %693, %725, %cst_453 {dimension_numbers = #tpu.dot_dimension_numbers<[1], [0], [0], [1], [0, 0, 1, 1], [], []>} : vector<22x32xf32>, vector<32x8xf32>, vector<22x8xf32> -> vector<22x8xf32>
    %c13_454 = arith.constant 13 : index
    %c0_455 = arith.constant 0 : index
    %c0_456 = arith.constant 0 : index
    %727 = vector.load %arg6[%c13_454, %c0_455, %c0_456] : memref<20x32x8xf32, #tpu.memory_space<vmem>>, vector<1x32x8xf32>
    %728 = vector.shape_cast %727 : vector<1x32x8xf32> to vector<32x8xf32>
    %cst_457 = arith.constant dense<0.000000e+00> : vector<22x8xf32>
    %729 = tpu.matmul %693, %728, %cst_457 {dimension_numbers = #tpu.dot_dimension_numbers<[1], [0], [0], [1], [0, 0, 1, 1], [], []>} : vector<22x32xf32>, vector<32x8xf32>, vector<22x8xf32> -> vector<22x8xf32>
    %cst_458 = arith.constant dense<0.000000e+00> : vector<22x22xf32>
    %730 = tpu.matmul %723, %726, %cst_458 {dimension_numbers = #tpu.dot_dimension_numbers<[1], [1], [0], [0], [0, 0, 1, 0], [], []>} : vector<22x8xf32>, vector<22x8xf32>, vector<22x22xf32> -> vector<22x22xf32>
    %cst_459 = arith.constant 0.353553385 : f32
    %731 = vector.broadcast %cst_459 : f32 to vector<22x22xf32>
    %732 = arith.mulf %730, %731 : vector<22x22xf32>
    %733 = arith.addf %732, %1 : vector<22x22xf32>
    %cst_460 = arith.constant dense<0xFF800000> : vector<22xf32>
    %734 = vector.multi_reduction <maximumf>, %733, %cst_460 [1] : vector<22x22xf32> to vector<22xf32>
    %735 = vector.shape_cast %734 : vector<22xf32> to vector<22x1xf32>
    %736 = vector.broadcast %735 : vector<22x1xf32> to vector<22x22xf32>
    %737 = arith.subf %733, %736 : vector<22x22xf32>
    %738 = math.exp %737 : vector<22x22xf32>
    %cst_461 = arith.constant dense<0.000000e+00> : vector<22xf32>
    %739 = vector.multi_reduction <add>, %738, %cst_461 [1] : vector<22x22xf32> to vector<22xf32>
    %740 = vector.shape_cast %739 : vector<22xf32> to vector<22x1xf32>
    %741 = tpu.reciprocal %740 {approx = true} : vector<22x1xf32> -> vector<22x1xf32>
    %742 = vector.broadcast %741 : vector<22x1xf32> to vector<22x22xf32>
    %743 = arith.mulf %738, %742 : vector<22x22xf32>
    %cst_462 = arith.constant dense<0.000000e+00> : vector<22x8xf32>
    %744 = tpu.matmul %743, %729, %cst_462 {dimension_numbers = #tpu.dot_dimension_numbers<[1], [0], [0], [1], [0, 0, 1, 1], [], []>} : vector<22x22xf32>, vector<22x8xf32>, vector<22x8xf32> -> vector<22x8xf32>
    %c13_463 = arith.constant 13 : index
    %c0_464 = arith.constant 0 : index
    %c0_465 = arith.constant 0 : index
    %745 = vector.load %arg7[%c13_463, %c0_464, %c0_465] : memref<20x8x32xf32, #tpu.memory_space<vmem>>, vector<1x8x32xf32>
    %746 = vector.shape_cast %745 : vector<1x8x32xf32> to vector<8x32xf32>
    %cst_466 = arith.constant dense<0.000000e+00> : vector<22x32xf32>
    %747 = tpu.matmul %744, %746, %cst_466 {dimension_numbers = #tpu.dot_dimension_numbers<[1], [0], [0], [1], [0, 0, 1, 1], [], []>} : vector<22x8xf32>, vector<8x32xf32>, vector<22x32xf32> -> vector<22x32xf32>
    %748 = arith.addf %720, %747 : vector<22x32xf32>
    %c14 = arith.constant 14 : index
    %c0_467 = arith.constant 0 : index
    %c0_468 = arith.constant 0 : index
    %749 = vector.load %arg4[%c14, %c0_467, %c0_468] : memref<20x32x8xf32, #tpu.memory_space<vmem>>, vector<1x32x8xf32>
    %750 = vector.shape_cast %749 : vector<1x32x8xf32> to vector<32x8xf32>
    %cst_469 = arith.constant dense<0.000000e+00> : vector<22x8xf32>
    %751 = tpu.matmul %693, %750, %cst_469 {dimension_numbers = #tpu.dot_dimension_numbers<[1], [0], [0], [1], [0, 0, 1, 1], [], []>} : vector<22x32xf32>, vector<32x8xf32>, vector<22x8xf32> -> vector<22x8xf32>
    %c14_470 = arith.constant 14 : index
    %c0_471 = arith.constant 0 : index
    %c0_472 = arith.constant 0 : index
    %752 = vector.load %arg5[%c14_470, %c0_471, %c0_472] : memref<20x32x8xf32, #tpu.memory_space<vmem>>, vector<1x32x8xf32>
    %753 = vector.shape_cast %752 : vector<1x32x8xf32> to vector<32x8xf32>
    %cst_473 = arith.constant dense<0.000000e+00> : vector<22x8xf32>
    %754 = tpu.matmul %693, %753, %cst_473 {dimension_numbers = #tpu.dot_dimension_numbers<[1], [0], [0], [1], [0, 0, 1, 1], [], []>} : vector<22x32xf32>, vector<32x8xf32>, vector<22x8xf32> -> vector<22x8xf32>
    %c14_474 = arith.constant 14 : index
    %c0_475 = arith.constant 0 : index
    %c0_476 = arith.constant 0 : index
    %755 = vector.load %arg6[%c14_474, %c0_475, %c0_476] : memref<20x32x8xf32, #tpu.memory_space<vmem>>, vector<1x32x8xf32>
    %756 = vector.shape_cast %755 : vector<1x32x8xf32> to vector<32x8xf32>
    %cst_477 = arith.constant dense<0.000000e+00> : vector<22x8xf32>
    %757 = tpu.matmul %693, %756, %cst_477 {dimension_numbers = #tpu.dot_dimension_numbers<[1], [0], [0], [1], [0, 0, 1, 1], [], []>} : vector<22x32xf32>, vector<32x8xf32>, vector<22x8xf32> -> vector<22x8xf32>
    %cst_478 = arith.constant dense<0.000000e+00> : vector<22x22xf32>
    %758 = tpu.matmul %751, %754, %cst_478 {dimension_numbers = #tpu.dot_dimension_numbers<[1], [1], [0], [0], [0, 0, 1, 0], [], []>} : vector<22x8xf32>, vector<22x8xf32>, vector<22x22xf32> -> vector<22x22xf32>
    %cst_479 = arith.constant 0.353553385 : f32
    %759 = vector.broadcast %cst_479 : f32 to vector<22x22xf32>
    %760 = arith.mulf %758, %759 : vector<22x22xf32>
    %761 = arith.addf %760, %1 : vector<22x22xf32>
    %cst_480 = arith.constant dense<0xFF800000> : vector<22xf32>
    %762 = vector.multi_reduction <maximumf>, %761, %cst_480 [1] : vector<22x22xf32> to vector<22xf32>
    %763 = vector.shape_cast %762 : vector<22xf32> to vector<22x1xf32>
    %764 = vector.broadcast %763 : vector<22x1xf32> to vector<22x22xf32>
    %765 = arith.subf %761, %764 : vector<22x22xf32>
    %766 = math.exp %765 : vector<22x22xf32>
    %cst_481 = arith.constant dense<0.000000e+00> : vector<22xf32>
    %767 = vector.multi_reduction <add>, %766, %cst_481 [1] : vector<22x22xf32> to vector<22xf32>
    %768 = vector.shape_cast %767 : vector<22xf32> to vector<22x1xf32>
    %769 = tpu.reciprocal %768 {approx = true} : vector<22x1xf32> -> vector<22x1xf32>
    %770 = vector.broadcast %769 : vector<22x1xf32> to vector<22x22xf32>
    %771 = arith.mulf %766, %770 : vector<22x22xf32>
    %cst_482 = arith.constant dense<0.000000e+00> : vector<22x8xf32>
    %772 = tpu.matmul %771, %757, %cst_482 {dimension_numbers = #tpu.dot_dimension_numbers<[1], [0], [0], [1], [0, 0, 1, 1], [], []>} : vector<22x22xf32>, vector<22x8xf32>, vector<22x8xf32> -> vector<22x8xf32>
    %c14_483 = arith.constant 14 : index
    %c0_484 = arith.constant 0 : index
    %c0_485 = arith.constant 0 : index
    %773 = vector.load %arg7[%c14_483, %c0_484, %c0_485] : memref<20x8x32xf32, #tpu.memory_space<vmem>>, vector<1x8x32xf32>
    %774 = vector.shape_cast %773 : vector<1x8x32xf32> to vector<8x32xf32>
    %cst_486 = arith.constant dense<0.000000e+00> : vector<22x32xf32>
    %775 = tpu.matmul %772, %774, %cst_486 {dimension_numbers = #tpu.dot_dimension_numbers<[1], [0], [0], [1], [0, 0, 1, 1], [], []>} : vector<22x8xf32>, vector<8x32xf32>, vector<22x32xf32> -> vector<22x32xf32>
    %776 = arith.addf %748, %775 : vector<22x32xf32>
    %c15 = arith.constant 15 : index
    %c0_487 = arith.constant 0 : index
    %c0_488 = arith.constant 0 : index
    %777 = vector.load %arg4[%c15, %c0_487, %c0_488] : memref<20x32x8xf32, #tpu.memory_space<vmem>>, vector<1x32x8xf32>
    %778 = vector.shape_cast %777 : vector<1x32x8xf32> to vector<32x8xf32>
    %cst_489 = arith.constant dense<0.000000e+00> : vector<22x8xf32>
    %779 = tpu.matmul %693, %778, %cst_489 {dimension_numbers = #tpu.dot_dimension_numbers<[1], [0], [0], [1], [0, 0, 1, 1], [], []>} : vector<22x32xf32>, vector<32x8xf32>, vector<22x8xf32> -> vector<22x8xf32>
    %c15_490 = arith.constant 15 : index
    %c0_491 = arith.constant 0 : index
    %c0_492 = arith.constant 0 : index
    %780 = vector.load %arg5[%c15_490, %c0_491, %c0_492] : memref<20x32x8xf32, #tpu.memory_space<vmem>>, vector<1x32x8xf32>
    %781 = vector.shape_cast %780 : vector<1x32x8xf32> to vector<32x8xf32>
    %cst_493 = arith.constant dense<0.000000e+00> : vector<22x8xf32>
    %782 = tpu.matmul %693, %781, %cst_493 {dimension_numbers = #tpu.dot_dimension_numbers<[1], [0], [0], [1], [0, 0, 1, 1], [], []>} : vector<22x32xf32>, vector<32x8xf32>, vector<22x8xf32> -> vector<22x8xf32>
    %c15_494 = arith.constant 15 : index
    %c0_495 = arith.constant 0 : index
    %c0_496 = arith.constant 0 : index
    %783 = vector.load %arg6[%c15_494, %c0_495, %c0_496] : memref<20x32x8xf32, #tpu.memory_space<vmem>>, vector<1x32x8xf32>
    %784 = vector.shape_cast %783 : vector<1x32x8xf32> to vector<32x8xf32>
    %cst_497 = arith.constant dense<0.000000e+00> : vector<22x8xf32>
    %785 = tpu.matmul %693, %784, %cst_497 {dimension_numbers = #tpu.dot_dimension_numbers<[1], [0], [0], [1], [0, 0, 1, 1], [], []>} : vector<22x32xf32>, vector<32x8xf32>, vector<22x8xf32> -> vector<22x8xf32>
    %cst_498 = arith.constant dense<0.000000e+00> : vector<22x22xf32>
    %786 = tpu.matmul %779, %782, %cst_498 {dimension_numbers = #tpu.dot_dimension_numbers<[1], [1], [0], [0], [0, 0, 1, 0], [], []>} : vector<22x8xf32>, vector<22x8xf32>, vector<22x22xf32> -> vector<22x22xf32>
    %cst_499 = arith.constant 0.353553385 : f32
    %787 = vector.broadcast %cst_499 : f32 to vector<22x22xf32>
    %788 = arith.mulf %786, %787 : vector<22x22xf32>
    %789 = arith.addf %788, %1 : vector<22x22xf32>
    %cst_500 = arith.constant dense<0xFF800000> : vector<22xf32>
    %790 = vector.multi_reduction <maximumf>, %789, %cst_500 [1] : vector<22x22xf32> to vector<22xf32>
    %791 = vector.shape_cast %790 : vector<22xf32> to vector<22x1xf32>
    %792 = vector.broadcast %791 : vector<22x1xf32> to vector<22x22xf32>
    %793 = arith.subf %789, %792 : vector<22x22xf32>
    %794 = math.exp %793 : vector<22x22xf32>
    %cst_501 = arith.constant dense<0.000000e+00> : vector<22xf32>
    %795 = vector.multi_reduction <add>, %794, %cst_501 [1] : vector<22x22xf32> to vector<22xf32>
    %796 = vector.shape_cast %795 : vector<22xf32> to vector<22x1xf32>
    %797 = tpu.reciprocal %796 {approx = true} : vector<22x1xf32> -> vector<22x1xf32>
    %798 = vector.broadcast %797 : vector<22x1xf32> to vector<22x22xf32>
    %799 = arith.mulf %794, %798 : vector<22x22xf32>
    %cst_502 = arith.constant dense<0.000000e+00> : vector<22x8xf32>
    %800 = tpu.matmul %799, %785, %cst_502 {dimension_numbers = #tpu.dot_dimension_numbers<[1], [0], [0], [1], [0, 0, 1, 1], [], []>} : vector<22x22xf32>, vector<22x8xf32>, vector<22x8xf32> -> vector<22x8xf32>
    %c15_503 = arith.constant 15 : index
    %c0_504 = arith.constant 0 : index
    %c0_505 = arith.constant 0 : index
    %801 = vector.load %arg7[%c15_503, %c0_504, %c0_505] : memref<20x8x32xf32, #tpu.memory_space<vmem>>, vector<1x8x32xf32>
    %802 = vector.shape_cast %801 : vector<1x8x32xf32> to vector<8x32xf32>
    %cst_506 = arith.constant dense<0.000000e+00> : vector<22x32xf32>
    %803 = tpu.matmul %800, %802, %cst_506 {dimension_numbers = #tpu.dot_dimension_numbers<[1], [0], [0], [1], [0, 0, 1, 1], [], []>} : vector<22x8xf32>, vector<8x32xf32>, vector<22x32xf32> -> vector<22x32xf32>
    %804 = arith.addf %776, %803 : vector<22x32xf32>
    %805 = arith.addf %669, %804 : vector<22x32xf32>
    %c3_507 = arith.constant 3 : index
    %c0_508 = arith.constant 0 : index
    %c0_509 = arith.constant 0 : index
    %806 = vector.load %arg8[%c3_507, %c0_508, %c0_509] : memref<5x1x32xf32, #tpu.memory_space<vmem>>, vector<1x1x32xf32>
    %807 = vector.shape_cast %806 : vector<1x1x32xf32> to vector<1x32xf32>
    %808 = vector.broadcast %807 : vector<1x32xf32> to vector<22x32xf32>
    %809 = arith.addf %805, %808 : vector<22x32xf32>
    %c3_510 = arith.constant 3 : index
    %c0_511 = arith.constant 0 : index
    %c0_512 = arith.constant 0 : index
    %810 = vector.load %arg9[%c3_510, %c0_511, %c0_512] : memref<5x1x32xf32, #tpu.memory_space<vmem>>, vector<1x1x32xf32>
    %811 = vector.shape_cast %810 : vector<1x1x32xf32> to vector<1x32xf32>
    %c3_513 = arith.constant 3 : index
    %c0_514 = arith.constant 0 : index
    %c0_515 = arith.constant 0 : index
    %812 = vector.load %arg10[%c3_513, %c0_514, %c0_515] : memref<5x1x32xf32, #tpu.memory_space<vmem>>, vector<1x1x32xf32>
    %813 = vector.shape_cast %812 : vector<1x1x32xf32> to vector<1x32xf32>
    %cst_516 = arith.constant dense<0.000000e+00> : vector<22xf32>
    %814 = vector.multi_reduction <add>, %809, %cst_516 [1] : vector<22x32xf32> to vector<22xf32>
    %815 = vector.shape_cast %814 : vector<22xf32> to vector<22x1xf32>
    %cst_517 = arith.constant 3.200000e+01 : f32
    %816 = vector.broadcast %cst_517 : f32 to vector<22x1xf32>
    %817 = arith.divf %815, %816 : vector<22x1xf32>
    %818 = vector.broadcast %817 : vector<22x1xf32> to vector<22x32xf32>
    %819 = arith.subf %809, %818 : vector<22x32xf32>
    %820 = arith.mulf %819, %819 : vector<22x32xf32>
    %cst_518 = arith.constant dense<0.000000e+00> : vector<22xf32>
    %821 = vector.multi_reduction <add>, %820, %cst_518 [1] : vector<22x32xf32> to vector<22xf32>
    %822 = vector.shape_cast %821 : vector<22xf32> to vector<22x1xf32>
    %cst_519 = arith.constant 3.200000e+01 : f32
    %823 = vector.broadcast %cst_519 : f32 to vector<22x1xf32>
    %824 = arith.divf %822, %823 : vector<22x1xf32>
    %cst_520 = arith.constant 9.99999974E-6 : f32
    %825 = vector.broadcast %cst_520 : f32 to vector<22x1xf32>
    %826 = arith.addf %824, %825 : vector<22x1xf32>
    %827 = math.rsqrt %826 : vector<22x1xf32>
    %828 = vector.broadcast %827 : vector<22x1xf32> to vector<22x32xf32>
    %829 = arith.mulf %819, %828 : vector<22x32xf32>
    %830 = vector.broadcast %811 : vector<1x32xf32> to vector<22x32xf32>
    %831 = arith.mulf %829, %830 : vector<22x32xf32>
    %832 = vector.broadcast %813 : vector<1x32xf32> to vector<22x32xf32>
    %833 = arith.addf %831, %832 : vector<22x32xf32>
    %c3_521 = arith.constant 3 : index
    %c0_522 = arith.constant 0 : index
    %c0_523 = arith.constant 0 : index
    %834 = vector.load %arg11[%c3_521, %c0_522, %c0_523] : memref<5x32x128xf32, #tpu.memory_space<vmem>>, vector<1x32x128xf32>
    %835 = vector.shape_cast %834 : vector<1x32x128xf32> to vector<32x128xf32>
    %cst_524 = arith.constant dense<0.000000e+00> : vector<22x128xf32>
    %836 = tpu.matmul %833, %835, %cst_524 {dimension_numbers = #tpu.dot_dimension_numbers<[1], [0], [0], [1], [0, 0, 1, 1], [], []>} : vector<22x32xf32>, vector<32x128xf32>, vector<22x128xf32> -> vector<22x128xf32>
    %c3_525 = arith.constant 3 : index
    %c0_526 = arith.constant 0 : index
    %c0_527 = arith.constant 0 : index
    %837 = vector.load %arg12[%c3_525, %c0_526, %c0_527] : memref<5x1x128xf32, #tpu.memory_space<vmem>>, vector<1x1x128xf32>
    %838 = vector.shape_cast %837 : vector<1x1x128xf32> to vector<1x128xf32>
    %839 = vector.broadcast %838 : vector<1x128xf32> to vector<22x128xf32>
    %840 = arith.addf %836, %839 : vector<22x128xf32>
    %cst_528 = arith.constant 5.000000e-01 : f32
    %841 = vector.broadcast %cst_528 : f32 to vector<22x128xf32>
    %842 = arith.mulf %841, %840 : vector<22x128xf32>
    %cst_529 = arith.constant 0.707106769 : f32
    %843 = vector.broadcast %cst_529 : f32 to vector<22x128xf32>
    %844 = arith.mulf %840, %843 : vector<22x128xf32>
    %845 = math.absf %844 : vector<22x128xf32>
    %cst_530 = arith.constant 0.327591091 : f32
    %846 = vector.broadcast %cst_530 : f32 to vector<22x128xf32>
    %847 = arith.mulf %846, %845 : vector<22x128xf32>
    %cst_531 = arith.constant 1.000000e+00 : f32
    %848 = vector.broadcast %cst_531 : f32 to vector<22x128xf32>
    %849 = arith.addf %848, %847 : vector<22x128xf32>
    %cst_532 = arith.constant 1.000000e+00 : f32
    %850 = vector.broadcast %cst_532 : f32 to vector<22x128xf32>
    %851 = arith.divf %850, %849 : vector<22x128xf32>
    %cst_533 = arith.constant 1.06140542 : f32
    %852 = vector.broadcast %cst_533 : f32 to vector<22x128xf32>
    %853 = arith.mulf %852, %851 : vector<22x128xf32>
    %cst_534 = arith.constant -1.45315206 : f32
    %854 = vector.broadcast %cst_534 : f32 to vector<22x128xf32>
    %855 = arith.addf %853, %854 : vector<22x128xf32>
    %856 = arith.mulf %855, %851 : vector<22x128xf32>
    %cst_535 = arith.constant 1.42141378 : f32
    %857 = vector.broadcast %cst_535 : f32 to vector<22x128xf32>
    %858 = arith.addf %856, %857 : vector<22x128xf32>
    %859 = arith.mulf %858, %851 : vector<22x128xf32>
    %cst_536 = arith.constant -0.284496725 : f32
    %860 = vector.broadcast %cst_536 : f32 to vector<22x128xf32>
    %861 = arith.addf %859, %860 : vector<22x128xf32>
    %862 = arith.mulf %861, %851 : vector<22x128xf32>
    %cst_537 = arith.constant 0.254829586 : f32
    %863 = vector.broadcast %cst_537 : f32 to vector<22x128xf32>
    %864 = arith.addf %862, %863 : vector<22x128xf32>
    %865 = arith.mulf %864, %851 : vector<22x128xf32>
    %cst_538 = arith.constant 0.000000e+00 : f32
    %866 = vector.broadcast %cst_538 : f32 to vector<22x128xf32>
    %867 = arith.subf %866, %845 : vector<22x128xf32>
    %868 = arith.mulf %867, %845 : vector<22x128xf32>
    %869 = math.exp %868 : vector<22x128xf32>
    %870 = arith.mulf %865, %869 : vector<22x128xf32>
    %cst_539 = arith.constant 1.000000e+00 : f32
    %871 = vector.broadcast %cst_539 : f32 to vector<22x128xf32>
    %872 = arith.subf %871, %870 : vector<22x128xf32>
    %cst_540 = arith.constant 0.000000e+00 : f32
    %873 = vector.broadcast %cst_540 : f32 to vector<22x128xf32>
    %874 = arith.cmpf oge, %844, %873 : vector<22x128xf32>
    %cst_541 = arith.constant 0.000000e+00 : f32
    %875 = vector.broadcast %cst_541 : f32 to vector<22x128xf32>
    %876 = arith.subf %875, %872 : vector<22x128xf32>
    %877 = arith.select %874, %872, %876 : vector<22x128xi1>, vector<22x128xf32>
    %cst_542 = arith.constant 1.000000e+00 : f32
    %878 = vector.broadcast %cst_542 : f32 to vector<22x128xf32>
    %879 = arith.addf %878, %877 : vector<22x128xf32>
    %880 = arith.mulf %842, %879 : vector<22x128xf32>
    %c3_543 = arith.constant 3 : index
    %c0_544 = arith.constant 0 : index
    %c0_545 = arith.constant 0 : index
    %881 = vector.load %arg13[%c3_543, %c0_544, %c0_545] : memref<5x128x32xf32, #tpu.memory_space<vmem>>, vector<1x128x32xf32>
    %882 = vector.shape_cast %881 : vector<1x128x32xf32> to vector<128x32xf32>
    %cst_546 = arith.constant dense<0.000000e+00> : vector<22x32xf32>
    %883 = tpu.matmul %880, %882, %cst_546 {dimension_numbers = #tpu.dot_dimension_numbers<[1], [0], [0], [1], [0, 0, 1, 1], [], []>} : vector<22x128xf32>, vector<128x32xf32>, vector<22x32xf32> -> vector<22x32xf32>
    %884 = arith.addf %809, %883 : vector<22x32xf32>
    %c3_547 = arith.constant 3 : index
    %c0_548 = arith.constant 0 : index
    %c0_549 = arith.constant 0 : index
    %885 = vector.load %arg14[%c3_547, %c0_548, %c0_549] : memref<5x1x32xf32, #tpu.memory_space<vmem>>, vector<1x1x32xf32>
    %886 = vector.shape_cast %885 : vector<1x1x32xf32> to vector<1x32xf32>
    %887 = vector.broadcast %886 : vector<1x32xf32> to vector<22x32xf32>
    %888 = arith.addf %884, %887 : vector<22x32xf32>
    %c1_550 = arith.constant 1 : index
    %c0_551 = arith.constant 0 : index
    %c0_552 = arith.constant 0 : index
    %889 = vector.load %arg15[%c1_550, %c0_551, %c0_552] : memref<2x32x32xf32, #tpu.memory_space<vmem>>, vector<1x32x32xf32>
    %890 = vector.shape_cast %889 : vector<1x32x32xf32> to vector<32x32xf32>
    %cst_553 = arith.constant dense<0.000000e+00> : vector<22x32xf32>
    %891 = tpu.matmul %888, %890, %cst_553 {dimension_numbers = #tpu.dot_dimension_numbers<[1], [0], [0], [1], [0, 0, 1, 1], [], []>} : vector<22x32xf32>, vector<32x32xf32>, vector<22x32xf32> -> vector<22x32xf32>
    %c1_554 = arith.constant 1 : index
    %c0_555 = arith.constant 0 : index
    %c0_556 = arith.constant 0 : index
    %892 = vector.load %arg16[%c1_554, %c0_555, %c0_556] : memref<2x32x32xf32, #tpu.memory_space<vmem>>, vector<1x32x32xf32>
    %893 = vector.shape_cast %892 : vector<1x32x32xf32> to vector<32x32xf32>
    %cst_557 = arith.constant dense<0.000000e+00> : vector<22x32xf32>
    %894 = tpu.matmul %220, %893, %cst_557 {dimension_numbers = #tpu.dot_dimension_numbers<[1], [0], [0], [1], [0, 0, 1, 1], [], []>} : vector<22x32xf32>, vector<32x32xf32>, vector<22x32xf32> -> vector<22x32xf32>
    %895 = arith.addf %891, %894 : vector<22x32xf32>
    %c1_558 = arith.constant 1 : index
    %c0_559 = arith.constant 0 : index
    %c0_560 = arith.constant 0 : index
    %896 = vector.load %arg17[%c1_558, %c0_559, %c0_560] : memref<2x1x32xf32, #tpu.memory_space<vmem>>, vector<1x1x32xf32>
    %897 = vector.shape_cast %896 : vector<1x1x32xf32> to vector<1x32xf32>
    %898 = vector.broadcast %897 : vector<1x32xf32> to vector<22x32xf32>
    %899 = arith.addf %895, %898 : vector<22x32xf32>
    %c4_561 = arith.constant 4 : index
    %c0_562 = arith.constant 0 : index
    %c0_563 = arith.constant 0 : index
    %900 = vector.load %arg2[%c4_561, %c0_562, %c0_563] : memref<5x1x32xf32, #tpu.memory_space<vmem>>, vector<1x1x32xf32>
    %901 = vector.shape_cast %900 : vector<1x1x32xf32> to vector<1x32xf32>
    %c4_564 = arith.constant 4 : index
    %c0_565 = arith.constant 0 : index
    %c0_566 = arith.constant 0 : index
    %902 = vector.load %arg3[%c4_564, %c0_565, %c0_566] : memref<5x1x32xf32, #tpu.memory_space<vmem>>, vector<1x1x32xf32>
    %903 = vector.shape_cast %902 : vector<1x1x32xf32> to vector<1x32xf32>
    %cst_567 = arith.constant dense<0.000000e+00> : vector<22xf32>
    %904 = vector.multi_reduction <add>, %899, %cst_567 [1] : vector<22x32xf32> to vector<22xf32>
    %905 = vector.shape_cast %904 : vector<22xf32> to vector<22x1xf32>
    %cst_568 = arith.constant 3.200000e+01 : f32
    %906 = vector.broadcast %cst_568 : f32 to vector<22x1xf32>
    %907 = arith.divf %905, %906 : vector<22x1xf32>
    %908 = vector.broadcast %907 : vector<22x1xf32> to vector<22x32xf32>
    %909 = arith.subf %899, %908 : vector<22x32xf32>
    %910 = arith.mulf %909, %909 : vector<22x32xf32>
    %cst_569 = arith.constant dense<0.000000e+00> : vector<22xf32>
    %911 = vector.multi_reduction <add>, %910, %cst_569 [1] : vector<22x32xf32> to vector<22xf32>
    %912 = vector.shape_cast %911 : vector<22xf32> to vector<22x1xf32>
    %cst_570 = arith.constant 3.200000e+01 : f32
    %913 = vector.broadcast %cst_570 : f32 to vector<22x1xf32>
    %914 = arith.divf %912, %913 : vector<22x1xf32>
    %cst_571 = arith.constant 9.99999974E-6 : f32
    %915 = vector.broadcast %cst_571 : f32 to vector<22x1xf32>
    %916 = arith.addf %914, %915 : vector<22x1xf32>
    %917 = math.rsqrt %916 : vector<22x1xf32>
    %918 = vector.broadcast %917 : vector<22x1xf32> to vector<22x32xf32>
    %919 = arith.mulf %909, %918 : vector<22x32xf32>
    %920 = vector.broadcast %901 : vector<1x32xf32> to vector<22x32xf32>
    %921 = arith.mulf %919, %920 : vector<22x32xf32>
    %922 = vector.broadcast %903 : vector<1x32xf32> to vector<22x32xf32>
    %923 = arith.addf %921, %922 : vector<22x32xf32>
    %c16 = arith.constant 16 : index
    %c0_572 = arith.constant 0 : index
    %c0_573 = arith.constant 0 : index
    %924 = vector.load %arg4[%c16, %c0_572, %c0_573] : memref<20x32x8xf32, #tpu.memory_space<vmem>>, vector<1x32x8xf32>
    %925 = vector.shape_cast %924 : vector<1x32x8xf32> to vector<32x8xf32>
    %cst_574 = arith.constant dense<0.000000e+00> : vector<22x8xf32>
    %926 = tpu.matmul %923, %925, %cst_574 {dimension_numbers = #tpu.dot_dimension_numbers<[1], [0], [0], [1], [0, 0, 1, 1], [], []>} : vector<22x32xf32>, vector<32x8xf32>, vector<22x8xf32> -> vector<22x8xf32>
    %c16_575 = arith.constant 16 : index
    %c0_576 = arith.constant 0 : index
    %c0_577 = arith.constant 0 : index
    %927 = vector.load %arg5[%c16_575, %c0_576, %c0_577] : memref<20x32x8xf32, #tpu.memory_space<vmem>>, vector<1x32x8xf32>
    %928 = vector.shape_cast %927 : vector<1x32x8xf32> to vector<32x8xf32>
    %cst_578 = arith.constant dense<0.000000e+00> : vector<22x8xf32>
    %929 = tpu.matmul %923, %928, %cst_578 {dimension_numbers = #tpu.dot_dimension_numbers<[1], [0], [0], [1], [0, 0, 1, 1], [], []>} : vector<22x32xf32>, vector<32x8xf32>, vector<22x8xf32> -> vector<22x8xf32>
    %c16_579 = arith.constant 16 : index
    %c0_580 = arith.constant 0 : index
    %c0_581 = arith.constant 0 : index
    %930 = vector.load %arg6[%c16_579, %c0_580, %c0_581] : memref<20x32x8xf32, #tpu.memory_space<vmem>>, vector<1x32x8xf32>
    %931 = vector.shape_cast %930 : vector<1x32x8xf32> to vector<32x8xf32>
    %cst_582 = arith.constant dense<0.000000e+00> : vector<22x8xf32>
    %932 = tpu.matmul %923, %931, %cst_582 {dimension_numbers = #tpu.dot_dimension_numbers<[1], [0], [0], [1], [0, 0, 1, 1], [], []>} : vector<22x32xf32>, vector<32x8xf32>, vector<22x8xf32> -> vector<22x8xf32>
    %cst_583 = arith.constant dense<0.000000e+00> : vector<22x22xf32>
    %933 = tpu.matmul %926, %929, %cst_583 {dimension_numbers = #tpu.dot_dimension_numbers<[1], [1], [0], [0], [0, 0, 1, 0], [], []>} : vector<22x8xf32>, vector<22x8xf32>, vector<22x22xf32> -> vector<22x22xf32>
    %cst_584 = arith.constant 0.353553385 : f32
    %934 = vector.broadcast %cst_584 : f32 to vector<22x22xf32>
    %935 = arith.mulf %933, %934 : vector<22x22xf32>
    %936 = arith.addf %935, %1 : vector<22x22xf32>
    %cst_585 = arith.constant dense<0xFF800000> : vector<22xf32>
    %937 = vector.multi_reduction <maximumf>, %936, %cst_585 [1] : vector<22x22xf32> to vector<22xf32>
    %938 = vector.shape_cast %937 : vector<22xf32> to vector<22x1xf32>
    %939 = vector.broadcast %938 : vector<22x1xf32> to vector<22x22xf32>
    %940 = arith.subf %936, %939 : vector<22x22xf32>
    %941 = math.exp %940 : vector<22x22xf32>
    %cst_586 = arith.constant dense<0.000000e+00> : vector<22xf32>
    %942 = vector.multi_reduction <add>, %941, %cst_586 [1] : vector<22x22xf32> to vector<22xf32>
    %943 = vector.shape_cast %942 : vector<22xf32> to vector<22x1xf32>
    %944 = tpu.reciprocal %943 {approx = true} : vector<22x1xf32> -> vector<22x1xf32>
    %945 = vector.broadcast %944 : vector<22x1xf32> to vector<22x22xf32>
    %946 = arith.mulf %941, %945 : vector<22x22xf32>
    %cst_587 = arith.constant dense<0.000000e+00> : vector<22x8xf32>
    %947 = tpu.matmul %946, %932, %cst_587 {dimension_numbers = #tpu.dot_dimension_numbers<[1], [0], [0], [1], [0, 0, 1, 1], [], []>} : vector<22x22xf32>, vector<22x8xf32>, vector<22x8xf32> -> vector<22x8xf32>
    %c16_588 = arith.constant 16 : index
    %c0_589 = arith.constant 0 : index
    %c0_590 = arith.constant 0 : index
    %948 = vector.load %arg7[%c16_588, %c0_589, %c0_590] : memref<20x8x32xf32, #tpu.memory_space<vmem>>, vector<1x8x32xf32>
    %949 = vector.shape_cast %948 : vector<1x8x32xf32> to vector<8x32xf32>
    %cst_591 = arith.constant dense<0.000000e+00> : vector<22x32xf32>
    %950 = tpu.matmul %947, %949, %cst_591 {dimension_numbers = #tpu.dot_dimension_numbers<[1], [0], [0], [1], [0, 0, 1, 1], [], []>} : vector<22x8xf32>, vector<8x32xf32>, vector<22x32xf32> -> vector<22x32xf32>
    %c17 = arith.constant 17 : index
    %c0_592 = arith.constant 0 : index
    %c0_593 = arith.constant 0 : index
    %951 = vector.load %arg4[%c17, %c0_592, %c0_593] : memref<20x32x8xf32, #tpu.memory_space<vmem>>, vector<1x32x8xf32>
    %952 = vector.shape_cast %951 : vector<1x32x8xf32> to vector<32x8xf32>
    %cst_594 = arith.constant dense<0.000000e+00> : vector<22x8xf32>
    %953 = tpu.matmul %923, %952, %cst_594 {dimension_numbers = #tpu.dot_dimension_numbers<[1], [0], [0], [1], [0, 0, 1, 1], [], []>} : vector<22x32xf32>, vector<32x8xf32>, vector<22x8xf32> -> vector<22x8xf32>
    %c17_595 = arith.constant 17 : index
    %c0_596 = arith.constant 0 : index
    %c0_597 = arith.constant 0 : index
    %954 = vector.load %arg5[%c17_595, %c0_596, %c0_597] : memref<20x32x8xf32, #tpu.memory_space<vmem>>, vector<1x32x8xf32>
    %955 = vector.shape_cast %954 : vector<1x32x8xf32> to vector<32x8xf32>
    %cst_598 = arith.constant dense<0.000000e+00> : vector<22x8xf32>
    %956 = tpu.matmul %923, %955, %cst_598 {dimension_numbers = #tpu.dot_dimension_numbers<[1], [0], [0], [1], [0, 0, 1, 1], [], []>} : vector<22x32xf32>, vector<32x8xf32>, vector<22x8xf32> -> vector<22x8xf32>
    %c17_599 = arith.constant 17 : index
    %c0_600 = arith.constant 0 : index
    %c0_601 = arith.constant 0 : index
    %957 = vector.load %arg6[%c17_599, %c0_600, %c0_601] : memref<20x32x8xf32, #tpu.memory_space<vmem>>, vector<1x32x8xf32>
    %958 = vector.shape_cast %957 : vector<1x32x8xf32> to vector<32x8xf32>
    %cst_602 = arith.constant dense<0.000000e+00> : vector<22x8xf32>
    %959 = tpu.matmul %923, %958, %cst_602 {dimension_numbers = #tpu.dot_dimension_numbers<[1], [0], [0], [1], [0, 0, 1, 1], [], []>} : vector<22x32xf32>, vector<32x8xf32>, vector<22x8xf32> -> vector<22x8xf32>
    %cst_603 = arith.constant dense<0.000000e+00> : vector<22x22xf32>
    %960 = tpu.matmul %953, %956, %cst_603 {dimension_numbers = #tpu.dot_dimension_numbers<[1], [1], [0], [0], [0, 0, 1, 0], [], []>} : vector<22x8xf32>, vector<22x8xf32>, vector<22x22xf32> -> vector<22x22xf32>
    %cst_604 = arith.constant 0.353553385 : f32
    %961 = vector.broadcast %cst_604 : f32 to vector<22x22xf32>
    %962 = arith.mulf %960, %961 : vector<22x22xf32>
    %963 = arith.addf %962, %1 : vector<22x22xf32>
    %cst_605 = arith.constant dense<0xFF800000> : vector<22xf32>
    %964 = vector.multi_reduction <maximumf>, %963, %cst_605 [1] : vector<22x22xf32> to vector<22xf32>
    %965 = vector.shape_cast %964 : vector<22xf32> to vector<22x1xf32>
    %966 = vector.broadcast %965 : vector<22x1xf32> to vector<22x22xf32>
    %967 = arith.subf %963, %966 : vector<22x22xf32>
    %968 = math.exp %967 : vector<22x22xf32>
    %cst_606 = arith.constant dense<0.000000e+00> : vector<22xf32>
    %969 = vector.multi_reduction <add>, %968, %cst_606 [1] : vector<22x22xf32> to vector<22xf32>
    %970 = vector.shape_cast %969 : vector<22xf32> to vector<22x1xf32>
    %971 = tpu.reciprocal %970 {approx = true} : vector<22x1xf32> -> vector<22x1xf32>
    %972 = vector.broadcast %971 : vector<22x1xf32> to vector<22x22xf32>
    %973 = arith.mulf %968, %972 : vector<22x22xf32>
    %cst_607 = arith.constant dense<0.000000e+00> : vector<22x8xf32>
    %974 = tpu.matmul %973, %959, %cst_607 {dimension_numbers = #tpu.dot_dimension_numbers<[1], [0], [0], [1], [0, 0, 1, 1], [], []>} : vector<22x22xf32>, vector<22x8xf32>, vector<22x8xf32> -> vector<22x8xf32>
    %c17_608 = arith.constant 17 : index
    %c0_609 = arith.constant 0 : index
    %c0_610 = arith.constant 0 : index
    %975 = vector.load %arg7[%c17_608, %c0_609, %c0_610] : memref<20x8x32xf32, #tpu.memory_space<vmem>>, vector<1x8x32xf32>
    %976 = vector.shape_cast %975 : vector<1x8x32xf32> to vector<8x32xf32>
    %cst_611 = arith.constant dense<0.000000e+00> : vector<22x32xf32>
    %977 = tpu.matmul %974, %976, %cst_611 {dimension_numbers = #tpu.dot_dimension_numbers<[1], [0], [0], [1], [0, 0, 1, 1], [], []>} : vector<22x8xf32>, vector<8x32xf32>, vector<22x32xf32> -> vector<22x32xf32>
    %978 = arith.addf %950, %977 : vector<22x32xf32>
    %c18 = arith.constant 18 : index
    %c0_612 = arith.constant 0 : index
    %c0_613 = arith.constant 0 : index
    %979 = vector.load %arg4[%c18, %c0_612, %c0_613] : memref<20x32x8xf32, #tpu.memory_space<vmem>>, vector<1x32x8xf32>
    %980 = vector.shape_cast %979 : vector<1x32x8xf32> to vector<32x8xf32>
    %cst_614 = arith.constant dense<0.000000e+00> : vector<22x8xf32>
    %981 = tpu.matmul %923, %980, %cst_614 {dimension_numbers = #tpu.dot_dimension_numbers<[1], [0], [0], [1], [0, 0, 1, 1], [], []>} : vector<22x32xf32>, vector<32x8xf32>, vector<22x8xf32> -> vector<22x8xf32>
    %c18_615 = arith.constant 18 : index
    %c0_616 = arith.constant 0 : index
    %c0_617 = arith.constant 0 : index
    %982 = vector.load %arg5[%c18_615, %c0_616, %c0_617] : memref<20x32x8xf32, #tpu.memory_space<vmem>>, vector<1x32x8xf32>
    %983 = vector.shape_cast %982 : vector<1x32x8xf32> to vector<32x8xf32>
    %cst_618 = arith.constant dense<0.000000e+00> : vector<22x8xf32>
    %984 = tpu.matmul %923, %983, %cst_618 {dimension_numbers = #tpu.dot_dimension_numbers<[1], [0], [0], [1], [0, 0, 1, 1], [], []>} : vector<22x32xf32>, vector<32x8xf32>, vector<22x8xf32> -> vector<22x8xf32>
    %c18_619 = arith.constant 18 : index
    %c0_620 = arith.constant 0 : index
    %c0_621 = arith.constant 0 : index
    %985 = vector.load %arg6[%c18_619, %c0_620, %c0_621] : memref<20x32x8xf32, #tpu.memory_space<vmem>>, vector<1x32x8xf32>
    %986 = vector.shape_cast %985 : vector<1x32x8xf32> to vector<32x8xf32>
    %cst_622 = arith.constant dense<0.000000e+00> : vector<22x8xf32>
    %987 = tpu.matmul %923, %986, %cst_622 {dimension_numbers = #tpu.dot_dimension_numbers<[1], [0], [0], [1], [0, 0, 1, 1], [], []>} : vector<22x32xf32>, vector<32x8xf32>, vector<22x8xf32> -> vector<22x8xf32>
    %cst_623 = arith.constant dense<0.000000e+00> : vector<22x22xf32>
    %988 = tpu.matmul %981, %984, %cst_623 {dimension_numbers = #tpu.dot_dimension_numbers<[1], [1], [0], [0], [0, 0, 1, 0], [], []>} : vector<22x8xf32>, vector<22x8xf32>, vector<22x22xf32> -> vector<22x22xf32>
    %cst_624 = arith.constant 0.353553385 : f32
    %989 = vector.broadcast %cst_624 : f32 to vector<22x22xf32>
    %990 = arith.mulf %988, %989 : vector<22x22xf32>
    %991 = arith.addf %990, %1 : vector<22x22xf32>
    %cst_625 = arith.constant dense<0xFF800000> : vector<22xf32>
    %992 = vector.multi_reduction <maximumf>, %991, %cst_625 [1] : vector<22x22xf32> to vector<22xf32>
    %993 = vector.shape_cast %992 : vector<22xf32> to vector<22x1xf32>
    %994 = vector.broadcast %993 : vector<22x1xf32> to vector<22x22xf32>
    %995 = arith.subf %991, %994 : vector<22x22xf32>
    %996 = math.exp %995 : vector<22x22xf32>
    %cst_626 = arith.constant dense<0.000000e+00> : vector<22xf32>
    %997 = vector.multi_reduction <add>, %996, %cst_626 [1] : vector<22x22xf32> to vector<22xf32>
    %998 = vector.shape_cast %997 : vector<22xf32> to vector<22x1xf32>
    %999 = tpu.reciprocal %998 {approx = true} : vector<22x1xf32> -> vector<22x1xf32>
    %1000 = vector.broadcast %999 : vector<22x1xf32> to vector<22x22xf32>
    %1001 = arith.mulf %996, %1000 : vector<22x22xf32>
    %cst_627 = arith.constant dense<0.000000e+00> : vector<22x8xf32>
    %1002 = tpu.matmul %1001, %987, %cst_627 {dimension_numbers = #tpu.dot_dimension_numbers<[1], [0], [0], [1], [0, 0, 1, 1], [], []>} : vector<22x22xf32>, vector<22x8xf32>, vector<22x8xf32> -> vector<22x8xf32>
    %c18_628 = arith.constant 18 : index
    %c0_629 = arith.constant 0 : index
    %c0_630 = arith.constant 0 : index
    %1003 = vector.load %arg7[%c18_628, %c0_629, %c0_630] : memref<20x8x32xf32, #tpu.memory_space<vmem>>, vector<1x8x32xf32>
    %1004 = vector.shape_cast %1003 : vector<1x8x32xf32> to vector<8x32xf32>
    %cst_631 = arith.constant dense<0.000000e+00> : vector<22x32xf32>
    %1005 = tpu.matmul %1002, %1004, %cst_631 {dimension_numbers = #tpu.dot_dimension_numbers<[1], [0], [0], [1], [0, 0, 1, 1], [], []>} : vector<22x8xf32>, vector<8x32xf32>, vector<22x32xf32> -> vector<22x32xf32>
    %1006 = arith.addf %978, %1005 : vector<22x32xf32>
    %c19 = arith.constant 19 : index
    %c0_632 = arith.constant 0 : index
    %c0_633 = arith.constant 0 : index
    %1007 = vector.load %arg4[%c19, %c0_632, %c0_633] : memref<20x32x8xf32, #tpu.memory_space<vmem>>, vector<1x32x8xf32>
    %1008 = vector.shape_cast %1007 : vector<1x32x8xf32> to vector<32x8xf32>
    %cst_634 = arith.constant dense<0.000000e+00> : vector<22x8xf32>
    %1009 = tpu.matmul %923, %1008, %cst_634 {dimension_numbers = #tpu.dot_dimension_numbers<[1], [0], [0], [1], [0, 0, 1, 1], [], []>} : vector<22x32xf32>, vector<32x8xf32>, vector<22x8xf32> -> vector<22x8xf32>
    %c19_635 = arith.constant 19 : index
    %c0_636 = arith.constant 0 : index
    %c0_637 = arith.constant 0 : index
    %1010 = vector.load %arg5[%c19_635, %c0_636, %c0_637] : memref<20x32x8xf32, #tpu.memory_space<vmem>>, vector<1x32x8xf32>
    %1011 = vector.shape_cast %1010 : vector<1x32x8xf32> to vector<32x8xf32>
    %cst_638 = arith.constant dense<0.000000e+00> : vector<22x8xf32>
    %1012 = tpu.matmul %923, %1011, %cst_638 {dimension_numbers = #tpu.dot_dimension_numbers<[1], [0], [0], [1], [0, 0, 1, 1], [], []>} : vector<22x32xf32>, vector<32x8xf32>, vector<22x8xf32> -> vector<22x8xf32>
    %c19_639 = arith.constant 19 : index
    %c0_640 = arith.constant 0 : index
    %c0_641 = arith.constant 0 : index
    %1013 = vector.load %arg6[%c19_639, %c0_640, %c0_641] : memref<20x32x8xf32, #tpu.memory_space<vmem>>, vector<1x32x8xf32>
    %1014 = vector.shape_cast %1013 : vector<1x32x8xf32> to vector<32x8xf32>
    %cst_642 = arith.constant dense<0.000000e+00> : vector<22x8xf32>
    %1015 = tpu.matmul %923, %1014, %cst_642 {dimension_numbers = #tpu.dot_dimension_numbers<[1], [0], [0], [1], [0, 0, 1, 1], [], []>} : vector<22x32xf32>, vector<32x8xf32>, vector<22x8xf32> -> vector<22x8xf32>
    %cst_643 = arith.constant dense<0.000000e+00> : vector<22x22xf32>
    %1016 = tpu.matmul %1009, %1012, %cst_643 {dimension_numbers = #tpu.dot_dimension_numbers<[1], [1], [0], [0], [0, 0, 1, 0], [], []>} : vector<22x8xf32>, vector<22x8xf32>, vector<22x22xf32> -> vector<22x22xf32>
    %cst_644 = arith.constant 0.353553385 : f32
    %1017 = vector.broadcast %cst_644 : f32 to vector<22x22xf32>
    %1018 = arith.mulf %1016, %1017 : vector<22x22xf32>
    %1019 = arith.addf %1018, %1 : vector<22x22xf32>
    %cst_645 = arith.constant dense<0xFF800000> : vector<22xf32>
    %1020 = vector.multi_reduction <maximumf>, %1019, %cst_645 [1] : vector<22x22xf32> to vector<22xf32>
    %1021 = vector.shape_cast %1020 : vector<22xf32> to vector<22x1xf32>
    %1022 = vector.broadcast %1021 : vector<22x1xf32> to vector<22x22xf32>
    %1023 = arith.subf %1019, %1022 : vector<22x22xf32>
    %1024 = math.exp %1023 : vector<22x22xf32>
    %cst_646 = arith.constant dense<0.000000e+00> : vector<22xf32>
    %1025 = vector.multi_reduction <add>, %1024, %cst_646 [1] : vector<22x22xf32> to vector<22xf32>
    %1026 = vector.shape_cast %1025 : vector<22xf32> to vector<22x1xf32>
    %1027 = tpu.reciprocal %1026 {approx = true} : vector<22x1xf32> -> vector<22x1xf32>
    %1028 = vector.broadcast %1027 : vector<22x1xf32> to vector<22x22xf32>
    %1029 = arith.mulf %1024, %1028 : vector<22x22xf32>
    %cst_647 = arith.constant dense<0.000000e+00> : vector<22x8xf32>
    %1030 = tpu.matmul %1029, %1015, %cst_647 {dimension_numbers = #tpu.dot_dimension_numbers<[1], [0], [0], [1], [0, 0, 1, 1], [], []>} : vector<22x22xf32>, vector<22x8xf32>, vector<22x8xf32> -> vector<22x8xf32>
    %c19_648 = arith.constant 19 : index
    %c0_649 = arith.constant 0 : index
    %c0_650 = arith.constant 0 : index
    %1031 = vector.load %arg7[%c19_648, %c0_649, %c0_650] : memref<20x8x32xf32, #tpu.memory_space<vmem>>, vector<1x8x32xf32>
    %1032 = vector.shape_cast %1031 : vector<1x8x32xf32> to vector<8x32xf32>
    %cst_651 = arith.constant dense<0.000000e+00> : vector<22x32xf32>
    %1033 = tpu.matmul %1030, %1032, %cst_651 {dimension_numbers = #tpu.dot_dimension_numbers<[1], [0], [0], [1], [0, 0, 1, 1], [], []>} : vector<22x8xf32>, vector<8x32xf32>, vector<22x32xf32> -> vector<22x32xf32>
    %1034 = arith.addf %1006, %1033 : vector<22x32xf32>
    %1035 = arith.addf %899, %1034 : vector<22x32xf32>
    %c4_652 = arith.constant 4 : index
    %c0_653 = arith.constant 0 : index
    %c0_654 = arith.constant 0 : index
    %1036 = vector.load %arg8[%c4_652, %c0_653, %c0_654] : memref<5x1x32xf32, #tpu.memory_space<vmem>>, vector<1x1x32xf32>
    %1037 = vector.shape_cast %1036 : vector<1x1x32xf32> to vector<1x32xf32>
    %1038 = vector.broadcast %1037 : vector<1x32xf32> to vector<22x32xf32>
    %1039 = arith.addf %1035, %1038 : vector<22x32xf32>
    %c4_655 = arith.constant 4 : index
    %c0_656 = arith.constant 0 : index
    %c0_657 = arith.constant 0 : index
    %1040 = vector.load %arg9[%c4_655, %c0_656, %c0_657] : memref<5x1x32xf32, #tpu.memory_space<vmem>>, vector<1x1x32xf32>
    %1041 = vector.shape_cast %1040 : vector<1x1x32xf32> to vector<1x32xf32>
    %c4_658 = arith.constant 4 : index
    %c0_659 = arith.constant 0 : index
    %c0_660 = arith.constant 0 : index
    %1042 = vector.load %arg10[%c4_658, %c0_659, %c0_660] : memref<5x1x32xf32, #tpu.memory_space<vmem>>, vector<1x1x32xf32>
    %1043 = vector.shape_cast %1042 : vector<1x1x32xf32> to vector<1x32xf32>
    %cst_661 = arith.constant dense<0.000000e+00> : vector<22xf32>
    %1044 = vector.multi_reduction <add>, %1039, %cst_661 [1] : vector<22x32xf32> to vector<22xf32>
    %1045 = vector.shape_cast %1044 : vector<22xf32> to vector<22x1xf32>
    %cst_662 = arith.constant 3.200000e+01 : f32
    %1046 = vector.broadcast %cst_662 : f32 to vector<22x1xf32>
    %1047 = arith.divf %1045, %1046 : vector<22x1xf32>
    %1048 = vector.broadcast %1047 : vector<22x1xf32> to vector<22x32xf32>
    %1049 = arith.subf %1039, %1048 : vector<22x32xf32>
    %1050 = arith.mulf %1049, %1049 : vector<22x32xf32>
    %cst_663 = arith.constant dense<0.000000e+00> : vector<22xf32>
    %1051 = vector.multi_reduction <add>, %1050, %cst_663 [1] : vector<22x32xf32> to vector<22xf32>
    %1052 = vector.shape_cast %1051 : vector<22xf32> to vector<22x1xf32>
    %cst_664 = arith.constant 3.200000e+01 : f32
    %1053 = vector.broadcast %cst_664 : f32 to vector<22x1xf32>
    %1054 = arith.divf %1052, %1053 : vector<22x1xf32>
    %cst_665 = arith.constant 9.99999974E-6 : f32
    %1055 = vector.broadcast %cst_665 : f32 to vector<22x1xf32>
    %1056 = arith.addf %1054, %1055 : vector<22x1xf32>
    %1057 = math.rsqrt %1056 : vector<22x1xf32>
    %1058 = vector.broadcast %1057 : vector<22x1xf32> to vector<22x32xf32>
    %1059 = arith.mulf %1049, %1058 : vector<22x32xf32>
    %1060 = vector.broadcast %1041 : vector<1x32xf32> to vector<22x32xf32>
    %1061 = arith.mulf %1059, %1060 : vector<22x32xf32>
    %1062 = vector.broadcast %1043 : vector<1x32xf32> to vector<22x32xf32>
    %1063 = arith.addf %1061, %1062 : vector<22x32xf32>
    %c4_666 = arith.constant 4 : index
    %c0_667 = arith.constant 0 : index
    %c0_668 = arith.constant 0 : index
    %1064 = vector.load %arg11[%c4_666, %c0_667, %c0_668] : memref<5x32x128xf32, #tpu.memory_space<vmem>>, vector<1x32x128xf32>
    %1065 = vector.shape_cast %1064 : vector<1x32x128xf32> to vector<32x128xf32>
    %cst_669 = arith.constant dense<0.000000e+00> : vector<22x128xf32>
    %1066 = tpu.matmul %1063, %1065, %cst_669 {dimension_numbers = #tpu.dot_dimension_numbers<[1], [0], [0], [1], [0, 0, 1, 1], [], []>} : vector<22x32xf32>, vector<32x128xf32>, vector<22x128xf32> -> vector<22x128xf32>
    %c4_670 = arith.constant 4 : index
    %c0_671 = arith.constant 0 : index
    %c0_672 = arith.constant 0 : index
    %1067 = vector.load %arg12[%c4_670, %c0_671, %c0_672] : memref<5x1x128xf32, #tpu.memory_space<vmem>>, vector<1x1x128xf32>
    %1068 = vector.shape_cast %1067 : vector<1x1x128xf32> to vector<1x128xf32>
    %1069 = vector.broadcast %1068 : vector<1x128xf32> to vector<22x128xf32>
    %1070 = arith.addf %1066, %1069 : vector<22x128xf32>
    %cst_673 = arith.constant 5.000000e-01 : f32
    %1071 = vector.broadcast %cst_673 : f32 to vector<22x128xf32>
    %1072 = arith.mulf %1071, %1070 : vector<22x128xf32>
    %cst_674 = arith.constant 0.707106769 : f32
    %1073 = vector.broadcast %cst_674 : f32 to vector<22x128xf32>
    %1074 = arith.mulf %1070, %1073 : vector<22x128xf32>
    %1075 = math.absf %1074 : vector<22x128xf32>
    %cst_675 = arith.constant 0.327591091 : f32
    %1076 = vector.broadcast %cst_675 : f32 to vector<22x128xf32>
    %1077 = arith.mulf %1076, %1075 : vector<22x128xf32>
    %cst_676 = arith.constant 1.000000e+00 : f32
    %1078 = vector.broadcast %cst_676 : f32 to vector<22x128xf32>
    %1079 = arith.addf %1078, %1077 : vector<22x128xf32>
    %cst_677 = arith.constant 1.000000e+00 : f32
    %1080 = vector.broadcast %cst_677 : f32 to vector<22x128xf32>
    %1081 = arith.divf %1080, %1079 : vector<22x128xf32>
    %cst_678 = arith.constant 1.06140542 : f32
    %1082 = vector.broadcast %cst_678 : f32 to vector<22x128xf32>
    %1083 = arith.mulf %1082, %1081 : vector<22x128xf32>
    %cst_679 = arith.constant -1.45315206 : f32
    %1084 = vector.broadcast %cst_679 : f32 to vector<22x128xf32>
    %1085 = arith.addf %1083, %1084 : vector<22x128xf32>
    %1086 = arith.mulf %1085, %1081 : vector<22x128xf32>
    %cst_680 = arith.constant 1.42141378 : f32
    %1087 = vector.broadcast %cst_680 : f32 to vector<22x128xf32>
    %1088 = arith.addf %1086, %1087 : vector<22x128xf32>
    %1089 = arith.mulf %1088, %1081 : vector<22x128xf32>
    %cst_681 = arith.constant -0.284496725 : f32
    %1090 = vector.broadcast %cst_681 : f32 to vector<22x128xf32>
    %1091 = arith.addf %1089, %1090 : vector<22x128xf32>
    %1092 = arith.mulf %1091, %1081 : vector<22x128xf32>
    %cst_682 = arith.constant 0.254829586 : f32
    %1093 = vector.broadcast %cst_682 : f32 to vector<22x128xf32>
    %1094 = arith.addf %1092, %1093 : vector<22x128xf32>
    %1095 = arith.mulf %1094, %1081 : vector<22x128xf32>
    %cst_683 = arith.constant 0.000000e+00 : f32
    %1096 = vector.broadcast %cst_683 : f32 to vector<22x128xf32>
    %1097 = arith.subf %1096, %1075 : vector<22x128xf32>
    %1098 = arith.mulf %1097, %1075 : vector<22x128xf32>
    %1099 = math.exp %1098 : vector<22x128xf32>
    %1100 = arith.mulf %1095, %1099 : vector<22x128xf32>
    %cst_684 = arith.constant 1.000000e+00 : f32
    %1101 = vector.broadcast %cst_684 : f32 to vector<22x128xf32>
    %1102 = arith.subf %1101, %1100 : vector<22x128xf32>
    %cst_685 = arith.constant 0.000000e+00 : f32
    %1103 = vector.broadcast %cst_685 : f32 to vector<22x128xf32>
    %1104 = arith.cmpf oge, %1074, %1103 : vector<22x128xf32>
    %cst_686 = arith.constant 0.000000e+00 : f32
    %1105 = vector.broadcast %cst_686 : f32 to vector<22x128xf32>
    %1106 = arith.subf %1105, %1102 : vector<22x128xf32>
    %1107 = arith.select %1104, %1102, %1106 : vector<22x128xi1>, vector<22x128xf32>
    %cst_687 = arith.constant 1.000000e+00 : f32
    %1108 = vector.broadcast %cst_687 : f32 to vector<22x128xf32>
    %1109 = arith.addf %1108, %1107 : vector<22x128xf32>
    %1110 = arith.mulf %1072, %1109 : vector<22x128xf32>
    %c4_688 = arith.constant 4 : index
    %c0_689 = arith.constant 0 : index
    %c0_690 = arith.constant 0 : index
    %1111 = vector.load %arg13[%c4_688, %c0_689, %c0_690] : memref<5x128x32xf32, #tpu.memory_space<vmem>>, vector<1x128x32xf32>
    %1112 = vector.shape_cast %1111 : vector<1x128x32xf32> to vector<128x32xf32>
    %cst_691 = arith.constant dense<0.000000e+00> : vector<22x32xf32>
    %1113 = tpu.matmul %1110, %1112, %cst_691 {dimension_numbers = #tpu.dot_dimension_numbers<[1], [0], [0], [1], [0, 0, 1, 1], [], []>} : vector<22x128xf32>, vector<128x32xf32>, vector<22x32xf32> -> vector<22x32xf32>
    %1114 = arith.addf %1039, %1113 : vector<22x32xf32>
    %c4_692 = arith.constant 4 : index
    %c0_693 = arith.constant 0 : index
    %c0_694 = arith.constant 0 : index
    %1115 = vector.load %arg14[%c4_692, %c0_693, %c0_694] : memref<5x1x32xf32, #tpu.memory_space<vmem>>, vector<1x1x32xf32>
    %1116 = vector.shape_cast %1115 : vector<1x1x32xf32> to vector<1x32xf32>
    %1117 = vector.broadcast %1116 : vector<1x32xf32> to vector<22x32xf32>
    %1118 = arith.addf %1114, %1117 : vector<22x32xf32>
    %c0_695 = arith.constant 0 : index
    %c0_696 = arith.constant 0 : index
    %1119 = vector.load %arg18[%c0_695, %c0_696] : memref<1x32xf32, #tpu.memory_space<vmem>>, vector<1x32xf32>
    %c0_697 = arith.constant 0 : index
    %c0_698 = arith.constant 0 : index
    %1120 = vector.load %arg19[%c0_697, %c0_698] : memref<1x32xf32, #tpu.memory_space<vmem>>, vector<1x32xf32>
    %cst_699 = arith.constant dense<0.000000e+00> : vector<22xf32>
    %1121 = vector.multi_reduction <add>, %1118, %cst_699 [1] : vector<22x32xf32> to vector<22xf32>
    %1122 = vector.shape_cast %1121 : vector<22xf32> to vector<22x1xf32>
    %cst_700 = arith.constant 3.200000e+01 : f32
    %1123 = vector.broadcast %cst_700 : f32 to vector<22x1xf32>
    %1124 = arith.divf %1122, %1123 : vector<22x1xf32>
    %1125 = vector.broadcast %1124 : vector<22x1xf32> to vector<22x32xf32>
    %1126 = arith.subf %1118, %1125 : vector<22x32xf32>
    %1127 = arith.mulf %1126, %1126 : vector<22x32xf32>
    %cst_701 = arith.constant dense<0.000000e+00> : vector<22xf32>
    %1128 = vector.multi_reduction <add>, %1127, %cst_701 [1] : vector<22x32xf32> to vector<22xf32>
    %1129 = vector.shape_cast %1128 : vector<22xf32> to vector<22x1xf32>
    %cst_702 = arith.constant 3.200000e+01 : f32
    %1130 = vector.broadcast %cst_702 : f32 to vector<22x1xf32>
    %1131 = arith.divf %1129, %1130 : vector<22x1xf32>
    %cst_703 = arith.constant 9.99999974E-6 : f32
    %1132 = vector.broadcast %cst_703 : f32 to vector<22x1xf32>
    %1133 = arith.addf %1131, %1132 : vector<22x1xf32>
    %1134 = math.rsqrt %1133 : vector<22x1xf32>
    %1135 = vector.broadcast %1134 : vector<22x1xf32> to vector<22x32xf32>
    %1136 = arith.mulf %1126, %1135 : vector<22x32xf32>
    %1137 = vector.broadcast %1119 : vector<1x32xf32> to vector<22x32xf32>
    %1138 = arith.mulf %1136, %1137 : vector<22x32xf32>
    %1139 = vector.broadcast %1120 : vector<1x32xf32> to vector<22x32xf32>
    %1140 = arith.addf %1138, %1139 : vector<22x32xf32>
    %c0_704 = arith.constant 0 : index
    %c0_705 = arith.constant 0 : index
    %1141 = vector.load %arg20[%c0_704, %c0_705] : memref<32x4xf32, #tpu.memory_space<vmem>>, vector<32x4xf32>
    %cst_706 = arith.constant dense<0.000000e+00> : vector<22x4xf32>
    %1142 = tpu.matmul %1140, %1141, %cst_706 {dimension_numbers = #tpu.dot_dimension_numbers<[1], [0], [0], [1], [0, 0, 1, 1], [], []>} : vector<22x32xf32>, vector<32x4xf32>, vector<22x4xf32> -> vector<22x4xf32>
    %c0_707 = arith.constant 0 : index
    %c0_708 = arith.constant 0 : index
    %1143 = vector.load %arg21[%c0_707, %c0_708] : memref<1x4xf32, #tpu.memory_space<vmem>>, vector<1x4xf32>
    %1144 = vector.broadcast %1143 : vector<1x4xf32> to vector<22x4xf32>
    %1145 = arith.addf %1142, %1144 : vector<22x4xf32>
    %c0_709 = arith.constant 0 : index
    %c0_710 = arith.constant 0 : index
    %1146 = vector.load %arg22[%c0_709, %c0_710] : memref<22x4xf32, #tpu.memory_space<vmem>>, vector<22x4xf32>
    tpu.vector_store %arg22[%c0_709, %c0_710], %1145 {strides = array<i32>} : memref<22x4xf32, #tpu.memory_space<vmem>>, vector<22x4xf32>,
    return
  }
}

</mosaic_0001>

<bundles_post_ra>
// kernel: uvit_forward.1
= control target key start
LH: loop header
LB: loop body
LE: loop exit
PB: predicated region body
PF: predicated region fallthrough
CT: control target
= control target key end

     0   :  { %vm79_vm0 = vcmask 261120   ;;  %vm86_vm1 = vcmask 259072   ;;  %v18742_v21 = vmov 0.0   ;;  %vm18743_vm2 = vmmov 0   ;;  %s22987_s0 = inlined_call_operand.vmem [shape: f32[22,32], index: 0, kind: input, shape index: {}]   ;;  %s22988_s4 = inlined_call_operand.vmem [shape: f32[20,32,8], index: 4, kind: input, shape index: {}]   ;;  %s22989_s5 = inlined_call_operand.vmem [shape: f32[20,32,8], index: 5, kind: input, shape index: {}]   ;;  %s22990_s2 = inlined_call_operand.vmem [shape: f32[5,1,32], index: 2, kind: input, shape index: {}]   ;;  %s22991_s3 = inlined_call_operand.vmem [shape: f32[5,1,32], index: 3, kind: input, shape index: {}]   ;;  %s22992_s6 = inlined_call_operand.vmem [shape: f32[20,32,8], index: 6, kind: input, shape index: {}]   ;;  %s22993_s1 = inlined_call_operand.vmem [shape: f32[22,22], index: 1, kind: input, shape index: {}]   ;;  %s22994_s7 = inlined_call_operand.vmem [shape: f32[20,8,32], index: 7, kind: input, shape index: {}]   ;;  %s22995_s8 = inlined_call_operand.vmem [shape: f32[5,1,32], index: 8, kind: input, shape index: {}]   ;;  %s22996_s11 = inlined_call_operand.vmem [shape: f32[5,32,128], index: 11, kind: input, shape index: {}]   ;;  %s22997_s9 = inlined_call_operand.vmem [shape: f32[5,1,32], index: 9, kind: input, shape index: {}]   ;;  %s22998_s10 = inlined_call_operand.vmem [shape: f32[5,1,32], index: 10, kind: input, shape index: {}]   ;;  %s22999_s13 = inlined_call_operand.vmem [shape: f32[5,128,32], index: 13, kind: input, shape index: {}]   ;;  %s23000_s12 = inlined_call_operand.vmem [shape: f32[5,1,128], index: 12, kind: input, shape index: {}]   ;;  %s23001_s14 = inlined_call_operand.vmem [shape: f32[5,1,32], index: 14, kind: input, shape index: {}]   ;;  %s23002_s16 = inlined_call_operand.vmem [shape: f32[2,32,32], index: 16, kind: input, shape index: {}]   ;;  %s23003_s15 = inlined_call_operand.vmem [shape: f32[2,32,32], index: 15, kind: input, shape index: {}]   ;;  %s23004_s17 = inlined_call_operand.vmem [shape: f32[2,1,32], index: 17, kind: input, shape index: {}]   ;;  %s23005_s20 = inlined_call_operand.vmem [shape: f32[32,4], index: 20, kind: input, shape index: {}]   ;;  %s23006_s18 = inlined_call_operand.vmem [shape: f32[1,32], index: 18, kind: input, shape index: {}]   ;;  %s23007_s19 = inlined_call_operand.vmem [shape: f32[1,32], index: 19, kind: input, shape index: {}]   ;;  %s23008_s21 = inlined_call_operand.vmem [shape: f32[1,4], index: 21, kind: input, shape index: {}]   ;;  %s23009_s22 = inlined_call_operand.vmem [shape: f32[22,4], index: 22, kind: output, shape index: {}]  }
   0x1   :  { %23017 = sst [smem:[#allocation2_spill]] %s22987_s0  ;;  %16138 = vmatprep.subr.mxu0 %v18742_v21  ;;  %16155 = vmatprep.subr.mxu1 %v18742_v21  ;;  %vm400_vm3 = vcmask 64512   ;;  %vm549_vm4 = vcmask 1045504   ;;  %vm505_vm5 = vcmask 179200   ;;  %vm512_vm6 = vcmask 177152  }
   0x2   :  { %23018 = sst [smem:[#allocation3_spill]] %s22988_s4  ;;  %16146 = vmatprep.mubr.msk.f32.mxu0 %vm18743_vm2, %v18742_v21  ;;  %16163 = vmatprep.mubr.msk.f32.mxu1 %vm18743_vm2, %v18742_v21 }
   0x3   :  { %23019 = sst [smem:[#allocation4_spill]] %s22989_s5 }
   0x4   :  { %23020 = sst [smem:[#allocation5_spill]] %s22990_s2 }
   0x5   :  { %23021 = sst [smem:[#allocation6_spill]] %s22991_s3 }
   0x6   :  { %23022 = sst [smem:[#allocation7_spill]] %s22992_s6 }
   0x7   :  { %23023 = sst [smem:[#allocation8_spill]] %s22993_s1 }
   0x8   :  { %s23024_s29 = sld [smem:[#allocation2_spill]] }
   0x9   :  { %s23025_s24 = sld [smem:[#allocation3_spill]] }
   0xa   :  { %s23026_s26 = sld [smem:[#allocation4_spill]] }
   0xb   :  { %s23027_s2 = sld [smem:[#allocation5_spill]] }
   0xc   :  { %s23028_s3 = sld [smem:[#allocation6_spill]] }
   0xd   :  { %s23029_s4 = sld [smem:[#allocation7_spill]] }
   0xe   :  { %v71_v0 = vld [vmem:[%s23024_s29] sm:$0xff]  ;;  %v73_v1 = vld [vmem:[%s23024_s29 + $0x10] sm:$0x3f]  ;;  %v72_v2 = vld [vmem:[%s23024_s29 + $0x8] sm:$0xff]  ;;  %s23030_s30 = sld [smem:[#allocation8_spill]] }
   0xf   :  { %v80_v3 = vsel %vm79_vm0, %v71_v0, 0.0  ;;  %v87_v4 = vsel %vm86_vm1, %v73_v1, 0.0  ;;  %v83_v5 = vsel %vm79_vm0, %v72_v2, 0.0  ;;  %v142_v22 = vld [vmem:[%s23025_s24 + $0x18] sm:$0xff]  ;;  %v141_v24 = vld [vmem:[%s23025_s24 + $0x10] sm:$0xff]  ;;  %v140_v26 = vld [vmem:[%s23025_s24 + $0x8] sm:$0xff] }
  0x10   :  { %81 = vadd.xlane.f32.xlu0 %v80_v3  ;;  %88 = vadd.xlane.f32.xlu1 %v87_v4  ;;  %v235_v23 = vld [vmem:[%s23026_s26 + $0x18] sm:$0xff]  ;;  %v234_v25 = vld [vmem:[%s23026_s26 + $0x10] sm:$0xff]  ;;  %v233_v27 = vld [vmem:[%s23026_s26 + $0x8] sm:$0xff] }
  0x11   :  { %16139 = vmatpush3.msra.mxu0 %v142_v22  ;;  %16156 = vmatpush3.msra.mxu1 %v235_v23  ;;  %v139_v28 = vld [vmem:[%s23025_s24] sm:$0xff] }
  0x12   :  { %16140 = vmatprep.subr.mxu0 %v18742_v21  ;;  %16157 = vmatprep.subr.mxu1 %v18742_v21  ;;  %v232_v29 = vld [vmem:[%s23026_s26] sm:$0xff] }
  0x13   :  { %16141 = vmatpush3.msra.mxu0 %v141_v24  ;;  %16158 = vmatpush3.msra.mxu1 %v234_v25  ;;  %v14359_v40 = vld [vmem:[%s23027_s2] ss:$0 sm:$0xff]  ;;  %v319_v49 = vld [vmem:[%s23029_s4 + $0x18] sm:$0xff]  ;;  %v318_v51 = vld [vmem:[%s23029_s4 + $0x10] sm:$0xff] }
  0x14   :  { %84 = vadd.xlane.f32.xlu0 %v83_v5  ;;  %16142 = vmatprep.subr.mxu0 %v18742_v21  ;;  %v14360_v42 = vld [vmem:[%s23028_s3] ss:$0 sm:$0xff]  ;;  %v317_v54 = vld [vmem:[%s23029_s4 + $0x8] sm:$0xff] }
  0x15   :  { %16159 = vmatprep.subr.mxu1 %v18742_v21  ;;  %16143 = vmatpush3.msra.mxu0 %v140_v26  ;;  %v316_v56 = vld [vmem:[%s23029_s4] sm:$0xff]  ;;  %v19070_v26 = vld [vmem:[%s23030_s30 + $0x8] sm:$0xff] }
  0x16   :  { %16160 = vmatpush3.msra.mxu1 %v233_v27  ;;  %16144 = vmatprep.subr.mxu0 %v18742_v21 }
  0x17   :  { %16161 = vmatprep.subr.mxu1 %v18742_v21  ;;  %16145 = vmatpush3.msra.mxu0 %v139_v28 }
  0x18   :  { %16162 = vmatpush3.msra.mxu1 %v232_v29  ;;  %16172 = vmatprep.subr.mxu0 %v18742_v21 }
  0x19   :  { %16189 = vmatprep.subr.mxu1 %v18742_v21 }
  0x99   :  { %v82_v6 = vpop.xlane.xlu0 %81  ;;  %v89_v7 = vpop.xlane.xlu1 %88 }
  0x9a   :  { %v91_v8 = vmul.f32 0.03125, %v82_v6  ;;  %v93_v9 = vmul.f32 0.03125, %v89_v7 }
  0x9c   :  { %v94_v10 = vsub.f32 %v71_v0, %v91_v8  ;;  %v18871_v11 = vsub.f32 %v73_v1, %v93_v9  ;;  %v14383_v9 = vld [vmem:[%s23025_s24 + $0x38] sm:$0xff] }
  0x9d   :  { %v85_v12 = vpop.xlane.xlu0 %84 }
  0x9e   :  { %v92_v13 = vmul.f32 0.03125, %v85_v12  ;;  %v97_v14 = vmul.f32 %v94_v10, %v94_v10  ;;  %v99_v15 = vmul.f32 %v18871_v11, %v18871_v11  ;;  %v14382_v12 = vld [vmem:[%s23025_s24 + $0x30] sm:$0xff] }
  0xa0   :  { %v18875_v16 = vsub.f32 %v72_v2, %v92_v13  ;;  %v100_v17 = vsel %vm79_vm0, %v97_v14, 0.0  ;;  %v106_v18 = vsel %vm86_vm1, %v99_v15, 0.0  ;;  %v14381_v13 = vld [vmem:[%s23025_s24 + $0x28] sm:$0xff]  ;;  %v14380_v14 = vld [vmem:[%s23025_s24 + $0x20] sm:$0xff]  ;;  %v14397_v15 = vld [vmem:[%s23029_s4 + $0x38] sm:$0xff] }
  0xa1   :  { %101 = vadd.xlane.f32.xlu1 %v100_v17  ;;  %v14395_v17 = vld [vmem:[%s23029_s4 + $0x28] sm:$0xff] }
  0xa2   :  { %v98_v19 = vmul.f32 %v18875_v16, %v18875_v16 }
  0xa4   :  { %v103_v20 = vsel %vm79_vm0, %v98_v19, 0.0 }
  0xa5   :  { %107 = vadd.xlane.f32.xlu1 %v106_v18  ;;  %104 = vadd.xlane.f32.xlu0 %v103_v20  ;;  %v14394_v18 = vld [vmem:[%s23029_s4 + $0x20] sm:$0xff] }
  0xa6   :  { %v19064_v20 = vld [vmem:[%s23030_s30] sm:$0xff] }
 0x12a   :  { %v102_v30 = vpop.xlane.xlu1 %101 }
 0x12b   :  { %v109_v31 = vmul.f32 0.03125, %v102_v30 }
 0x12d   :  { %v112_v32 = vadd.f32 1e-05, %v109_v31 }
 0x12e   :  { %v108_v33 = vpop.xlane.xlu1 %107  ;;  %v105_v34 = vpop.xlane.xlu0 %104 }
 0x12f   :  { %18361 = vrsqrt.f32 %v112_v32  ;;  %v111_v35 = vmul.f32 0.03125, %v108_v33  ;;  %v110_v36 = vmul.f32 0.03125, %v105_v34  ;;  %v19077_v32 = vld [vmem:[%s23030_s30 + $0x10] sm:$0x3f] }
 0x131   :  { %v114_v37 = vadd.f32 1e-05, %v111_v35  ;;  %v113_v38 = vadd.f32 1e-05, %v110_v36 }
 0x133   :  { %18363 = vrsqrt.f32 %v114_v37 }
 0x134   :  { %18365 = vrsqrt.f32 %v113_v38 }
 0x13c   :  { %v18362_v39 = vpop.eup %18361 }
 0x13d   :  { %v118_v41 = vmul.f32 %v18362_v39, %v94_v10 }
 0x13f   :  { %v127_v43 = vmul.f32 %v14359_v40, %v118_v41 }
 0x140   :  { %v18364_v44 = vpop.eup %18363 }
 0x141   :  { %v18366_v45 = vpop.eup %18365  ;;  %v18926_v46 = vadd.f32 %v14360_v42, %v127_v43  ;;  %v120_v47 = vmul.f32 %v18364_v44, %v18871_v11 }
 0x142   :  { %v119_v48 = vmul.f32 %v18366_v45, %v18875_v16  ;;  %v14396_v16 = vld [vmem:[%s23029_s4 + $0x30] sm:$0xff] }
 0x143   :  { %16147 = vmatmul.mubr.msk.f32.vlgmr.msra.gmra.mxu0 %vm79_vm0, %v18926_v46  ;;  %16164 = vmatmul.mubr.msk.f32.vlgmr.msra.gmra.mxu1 %vm79_vm0, %v18926_v46  ;;  %v129_v52 = vmul.f32 %v14359_v40, %v120_v47 }
 0x144   :  { %v128_v50 = vmul.f32 %v14359_v40, %v119_v48  ;;  %16149 = vmatprep.mubr.msk.f32.mxu0 %vm18743_vm2, %v18742_v21  ;;  %16166 = vmatprep.mubr.msk.f32.mxu1 %vm18743_vm2, %v18742_v21 }
 0x145   :  { %16173 = vmatpush3.msra.mxu0 %v319_v49  ;;  %v18958_v55 = vadd.f32 %v14360_v42, %v129_v52 }
 0x146   :  { %v18944_v53 = vadd.f32 %v14360_v42, %v128_v50  ;;  %16174 = vmatprep.subr.mxu0 %v18742_v21 }
 0x147   :  { %16175 = vmatpush3.msra.mxu0 %v318_v51 }
 0x148   :  { %16150 = vmatmul.mubr.msk.f32.gmra.mxu0 %vm79_vm0, %v18944_v53  ;;  %16167 = vmatmul.mubr.msk.f32.gmra.mxu1 %vm79_vm0, %v18944_v53 }
 0x149   :  { %16152 = vmatprep.mubr.msk.f32.mxu0 %vm18743_vm2, %v18742_v21  ;;  %16169 = vmatprep.mubr.msk.f32.mxu1 %vm18743_vm2, %v18742_v21 }
 0x14a   :  { %16176 = vmatprep.subr.mxu0 %v18742_v21 }
 0x14b   :  { %16177 = vmatpush3.msra.mxu0 %v317_v54 }
 0x14c   :  { %16153 = vmatmul.mubr.msk.f32.gmra.mxu0 %vm79_vm0, %v18958_v55  ;;  %16170 = vmatmul.mubr.msk.f32.gmra.mxu1 %vm79_vm0, %v18958_v55 }
 0x14d   :  { %16178 = vmatprep.subr.mxu0 %v18742_v21  ;;  %16180 = vmatprep.mubr.msk.f32.mxu0 %vm18743_vm2, %v18742_v21 }
 0x14e   :  { %16179 = vmatpush3.msra.mxu0 %v316_v56  ;;  %16195 = vmatprep.mubr.msk.f32.mxu1 %vm18743_vm2, %v18742_v21 }
 0x14f   :  { %16204 = vmatprep.subr.mxu0 %v18742_v21 }
 0x150   :  { %16181 = vmatmul.mubr.msk.f32.vlgmr.msra.gmra.mxu0 %vm79_vm0, %v18926_v46 }
 0x151   :  { %16183 = vmatprep.mubr.msk.f32.mxu0 %vm18743_vm2, %v18742_v21 }
 0x154   :  { %16184 = vmatmul.mubr.msk.f32.gmra.mxu0 %vm79_vm0, %v18944_v53 }
 0x155   :  { %16186 = vmatprep.mubr.msk.f32.mxu0 %vm18743_vm2, %v18742_v21 }
 0x158   :  { %16187 = vmatmul.mubr.msk.f32.gmra.mxu0 %vm79_vm0, %v18958_v55 }
 0x159   :  { %16210 = vmatprep.mubr.msk.f32.mxu0 %vm18743_vm2, %v18742_v21 }
 0x203   :  { %v218_v57 = vpop.f32.mrf.mxu0  ;;  %v302_v58 = vpop.f32.mrf.mxu1 }
 0x205   :  { %v16148_v59 = vpop.f32.mrf.mxu0  ;;  %v16165_v60 = vpop.f32.mrf.mxu1 }
 0x208   :  { %v223_v61 = vpop.f32.mrf.mxu0  ;;  %v307_v62 = vpop.f32.mrf.mxu1 }
 0x20a   :  { %v16151_v63 = vpop.f32.mrf.mxu0  ;;  %v16168_v0 = vpop.f32.mrf.mxu1 }
 0x20c   :  { %v228_v1 = vpop.f32.mrf.mxu0  ;;  %v312_v2 = vpop.f32.mrf.mxu1 }
 0x20d   :  { %16190 = vmatpush3.xpose.msk.msra.mxu1 %vm400_vm3, %v312_v2 }
 0x20e   :  { %v16154_v3 = vpop.f32.mrf.mxu0  ;;  %v16171_v4 = vpop.f32.mrf.mxu1  ;;  %16191 = vmatprep.subr.mxu1 %v18742_v21 }
 0x210   :  { %v386_v5 = vpop.f32.mrf.mxu0 }
 0x211   :  { %16192 = vmatpush3.xpose.msk.msra.mxu1 %vm400_vm3, %v307_v62 }
 0x212   :  { %v16182_v6 = vpop.f32.mrf.mxu0  ;;  %16193 = vmatprep.subr.mxu1 %v18742_v21 }
 0x214   :  { %v391_v7 = vpop.f32.mrf.mxu0 }
 0x215   :  { %16194 = vmatpush3.xpose.msk.msra.mxu1 %vm400_vm3, %v302_v58 }
 0x216   :  { %v16185_v8 = vpop.f32.mrf.mxu0  ;;  %16219 = vmatprep.subr.mxu1 %v18742_v21 }
 0x218   :  { %v396_v10 = vpop.f32.mrf.mxu0  ;;  %16196 = vmatmul.mubr.msk.f32.vlgmr.msra.gmra.mxu1 %vm400_vm3, %v218_v57 }
 0x219   :  { %16205 = vmatpush3.msk.msra.mxu0 %vm549_vm4, %v396_v10  ;;  %16198 = vmatprep.mubr.msk.f32.mxu1 %vm18743_vm2, %v18742_v21  ;;  %v14389_v10 = vld [vmem:[%s23026_s26 + $0x30] sm:$0xff] }
 0x21a   :  { %v16188_v11 = vpop.f32.mrf.mxu0  ;;  %16206 = vmatprep.subr.mxu0 %v18742_v21  ;;  %16220 = vmatpush3.msra.mxu1 %v14383_v9  ;;  %v14390_v9 = vld [vmem:[%s23026_s26 + $0x38] sm:$0xff] }
 0x21b   :  { %16207 = vmatpush3.msra.mxu0 %v391_v7  ;;  %16221 = vmatprep.subr.mxu1 %v18742_v21 }
 0x21c   :  { %16199 = vmatmul.mubr.msk.f32.gmra.mxu1 %vm400_vm3, %v223_v61  ;;  %16208 = vmatprep.subr.mxu0 %v18742_v21 }
 0x21d   :  { %16209 = vmatpush3.msra.mxu0 %v386_v5  ;;  %16201 = vmatprep.mubr.msk.f32.mxu1 %vm18743_vm2, %v18742_v21 }
 0x21e   :  { %16222 = vmatpush3.msra.mxu1 %v14382_v12  ;;  %16236 = vmatprep.subr.mxu0 %v18742_v21 }
 0x21f   :  { %16223 = vmatprep.subr.mxu1 %v18742_v21 }
 0x220   :  { %16202 = vmatmul.mubr.msk.f32.gmra.mxu1 %vm400_vm3, %v228_v1 }
 0x221   :  { %16224 = vmatpush3.msra.mxu1 %v14381_v13  ;;  %16227 = vmatprep.mubr.msk.f32.mxu1 %vm18743_vm2, %v18742_v21  ;;  %v14388_v13 = vld [vmem:[%s23026_s26 + $0x28] sm:$0xff] }
 0x222   :  { %16225 = vmatprep.subr.mxu1 %v18742_v21 }
 0x223   :  { %16226 = vmatpush3.msra.mxu1 %v14380_v14  ;;  %v14387_v14 = vld [vmem:[%s23026_s26 + $0x20] sm:$0xff] }
 0x224   :  { %16228 = vmatmul.mubr.msk.f32.vlgmr.msra.gmra.mxu1 %vm79_vm0, %v18926_v46  ;;  %16253 = vmatprep.subr.mxu1 %v18742_v21 }
 0x225   :  { %16230 = vmatprep.mubr.msk.f32.mxu1 %vm18743_vm2, %v18742_v21  ;;  %16254 = vmatpush3.msra.mxu1 %v14397_v15 }
 0x226   :  { %16255 = vmatprep.subr.mxu1 %v18742_v21 }
 0x227   :  { %16256 = vmatpush3.msra.mxu1 %v14396_v16 }
 0x228   :  { %16231 = vmatmul.mubr.msk.f32.gmra.mxu1 %vm79_vm0, %v18944_v53  ;;  %16257 = vmatprep.subr.mxu1 %v18742_v21 }
 0x229   :  { %16233 = vmatprep.mubr.msk.f32.mxu1 %vm18743_vm2, %v18742_v21  ;;  %16258 = vmatpush3.msra.mxu1 %v14395_v17 }
 0x22a   :  { %16259 = vmatprep.subr.mxu1 %v18742_v21 }
 0x22b   :  { %16260 = vmatpush3.msra.mxu1 %v14394_v18 }
 0x22c   :  { %16234 = vmatmul.mubr.msk.f32.gmra.mxu1 %vm79_vm0, %v18958_v55  ;;  %18353 = vmatprep.subr.mxu1 %v18742_v21 }
 0x22d   :  { %16261 = vmatprep.mubr.msk.f32.mxu1 %vm18743_vm2, %v18742_v21 }
 0x230   :  { %16262 = vmatmul.mubr.msk.f32.vlgmr.msra.gmra.mxu1 %vm79_vm0, %v18926_v46 }
 0x231   :  { %16264 = vmatprep.mubr.msk.f32.mxu1 %vm18743_vm2, %v18742_v21 }
 0x234   :  { %16265 = vmatmul.mubr.msk.f32.gmra.mxu1 %vm79_vm0, %v18944_v53 }
 0x235   :  { %16267 = vmatprep.mubr.msk.f32.mxu1 %vm18743_vm2, %v18742_v21 }
 0x238   :  { %16268 = vmatmul.mubr.msk.f32.gmra.mxu1 %vm79_vm0, %v18958_v55 }
 0x239   :  { %16294 = vmatprep.mubr.msk.f32.mxu1 %vm18743_vm2, %v18742_v21 }
 0x2d8   :  { %v485_v19 = vpop.f32.mrf.mxu1 }
 0x2d9   :  { %v499_v22 = vmul.f32 0.35355338, %v485_v19 }
 0x2da   :  { %v16197_v23 = vpop.f32.mrf.mxu1 }
 0x2db   :  { %v502_v24 = vadd.f32 %v499_v22, %v19064_v20 }
 0x2dc   :  { %v490_v25 = vpop.f32.mrf.mxu1 }
 0x2dd   :  { %v500_v27 = vmul.f32 0.35355338, %v490_v25  ;;  %v506_v28 = vsel %vm505_vm5, %v502_v24, -inf }
 0x2de   :  { %507 = vmax.xlane.f32.xlu0 %v506_v28  ;;  %v16200_v29 = vpop.f32.mrf.mxu1 }
 0x2df   :  { %v503_v30 = vadd.f32 %v500_v27, %v19070_v26 }
 0x2e0   :  { %v495_v31 = vpop.f32.mrf.mxu1 }
 0x2e1   :  { %v501_v33 = vmul.f32 0.35355338, %v495_v31  ;;  %v509_v34 = vsel %vm505_vm5, %v503_v30, -inf }
 0x2e2   :  { %510 = vmax.xlane.f32.xlu1 %v509_v34  ;;  %v16203_v35 = vpop.f32.mrf.mxu1 }
 0x2e3   :  { %v504_v36 = vadd.f32 %v501_v33, %v19077_v32 }
 0x2e4   :  { %v19081_v37 = vpop.f32.mrf.mxu1 }
 0x2e5   :  { %v513_v38 = vsel %vm512_vm6, %v504_v36, -inf }
 0x2e6   :  { %514 = vmax.xlane.f32.xlu0 %v513_v38  ;;  %v16229_v39 = vpop.f32.mrf.mxu1 }
 0x2e8   :  { %v19084_v40 = vpop.f32.mrf.mxu1 }
 0x2ea   :  { %v16232_v41 = vpop.f32.mrf.mxu1 }
 0x2ec   :  { %v19086_v42 = vpop.f32.mrf.mxu1 }
 0x2ee   :  { %v16235_v43 = vpop.f32.mrf.mxu1 }
 0x2f0   :  { %v19088_v44 = vpop.f32.mrf.mxu1 }
 0x2f2   :  { %v16263_v45 = vpop.f32.mrf.mxu1 }
 0x2f4   :  { %v19090_v47 = vpop.f32.mrf.mxu1 }
 0x2f6   :  { %v16266_v48 = vpop.f32.mrf.mxu1 }
 0x2f8   :  { %v19092_v49 = vpop.f32.mrf.mxu1 }
 0x2f9   :  { %18356 = vmatpush3.msk.msra.mxu1 %vm549_vm4, %v19092_v49 }
 0x2fa   :  { %v16269_v50 = vpop.f32.mrf.mxu1  ;;  %18354 = vmatprep.subr.mxu1 %v18742_v21 }
 0x2fb   :  { %18357 = vmatpush3.msra.mxu1 %v19090_v47 }
 0x2fc   :  { %18355 = vmatprep.subr.mxu1 %v18742_v21 }
 0x2fd   :  { %18358 = vmatpush3.msra.mxu1 %v19088_v44 }
 0x2fe   :  { %16311 = vmatprep.subr.mxu1 %v18742_v21 }
 0x367   :  { %v508_v51 = vpop.xlane.xlu0 %507 }
 0x368   :  { %v516_v52 = vsub.f32 %v502_v24, %v508_v51 }
 0x36a   :  { %v519_v54 = vmul.f32 1.442695, %v516_v52 }
 0x36b   :  { %v511_v56 = vpop.xlane.xlu1 %510 }
 0x36c   :  { %18367 = vpow2.f32 %v519_v54  ;;  %v517_v57 = vsub.f32 %v503_v30, %v511_v56 }
 0x36e   :  { %v521_v58 = vmul.f32 1.442695, %v517_v57 }
 0x36f   :  { %v515_v59 = vpop.xlane.xlu0 %514 }
 0x370   :  { %18369 = vpow2.f32 %v521_v58  ;;  %v518_v60 = vsub.f32 %v504_v36, %v515_v59 }
 0x372   :  { %v523_v61 = vmul.f32 1.442695, %v518_v60 }
 0x374   :  { %18371 = vpow2.f32 %v523_v61 }
 0x379   :  { %v18368_v62 = vpop.eup %18367 }
 0x37a   :  { %v525_v63 = vsel %vm505_vm5, %v18368_v62, 0.0 }
 0x37b   :  { %526 = vadd.xlane.f32.xlu1 %v525_v63 }
 0x37d   :  { %v18370_v0 = vpop.eup %18369 }
 0x37e   :  { %v528_v1 = vsel %vm505_vm5, %v18370_v0, 0.0 }
 0x37f   :  { %529 = vadd.xlane.f32.xlu0 %v528_v1 }
 0x381   :  { %v18372_v2 = vpop.eup %18371 }
 0x382   :  { %v531_v3 = vsel %vm512_vm6, %v18372_v2, 0.0 }
 0x383   :  { %532 = vadd.xlane.f32.xlu1 %v531_v3 }
 0x404   :  { %v527_v4 = vpop.xlane.xlu1 %526 }
 0x405   :  { %18373 = vrcp.f32 %v527_v4 }
 0x408   :  { %v530_v5 = vpop.xlane.xlu0 %529 }
 0x409   :  { %18375 = vrcp.f32 %v530_v5 }
 0x40c   :  { %v533_v6 = vpop.xlane.xlu1 %532 }
 0x40d   :  { %18377 = vrcp.f32 %v533_v6 }
 0x412   :  { %v18374_v7 = vpop.eup %18373 }
 0x413   :  { %v537_v8 = vmul.f32 %v18374_v7, %v18368_v62  ;;  %v14411_v7 = vld [vmem:[%s22994_s7 + $0x8] sm:$0xff] }
 0x415   :  { %16211 = vmatmul.mubr.msk.f32.vlgmr.msra.gmra.mxu0 %vm505_vm5, %v537_v8 }
 0x416   :  { %v18376_v11 = vpop.eup %18375  ;;  %16237 = vmatpush3.msra.mxu0 %v14390_v9  ;;  %16213 = vmatprep.mubr.msk.f32.mxu0 %vm18743_vm2, %v18742_v21 }
 0x417   :  { %16238 = vmatprep.subr.mxu0 %v18742_v21  ;;  %v538_v12 = vmul.f32 %v18376_v11, %v18370_v0 }
 0x418   :  { %16239 = vmatpush3.msra.mxu0 %v14389_v10  ;;  %v633_v10 = vld [vmem:[%s22994_s7] sm:$0xff] }
 0x419   :  { %16214 = vmatmul.mubr.msk.f32.gmra.mxu0 %vm505_vm5, %v538_v12  ;;  %16240 = vmatprep.subr.mxu0 %v18742_v21 }
 0x41a   :  { %v18378_v15 = vpop.eup %18377  ;;  %16216 = vmatprep.mubr.msk.f32.mxu0 %vm18743_vm2, %v18742_v21  ;;  %16241 = vmatpush3.msra.mxu0 %v14388_v13  ;;  %v14428_v13 = vld [vmem:[%s23026_s26 + $0x58] sm:$0xff] }
 0x41b   :  { %v539_v16 = vmul.f32 %v18378_v15, %v18372_v2  ;;  %16242 = vmatprep.subr.mxu0 %v18742_v21  ;;  %v14426_v15 = vld [vmem:[%s23026_s26 + $0x48] sm:$0xff] }
 0x41c   :  { %16243 = vmatpush3.msra.mxu0 %v14387_v14  ;;  %v14427_v14 = vld [vmem:[%s23026_s26 + $0x50] sm:$0xff] }
 0x41d   :  { %16217 = vmatmul.mubr.msk.f32.gmra.mxu0 %vm505_vm5, %v539_v16  ;;  %16270 = vmatprep.subr.mxu0 %v18742_v21  ;;  %v14425_v16 = vld [vmem:[%s23026_s26 + $0x40] sm:$0xff] }
 0x41e   :  { %16244 = vmatprep.mubr.msk.f32.mxu0 %vm18743_vm2, %v18742_v21 }
 0x421   :  { %16245 = vmatmul.mubr.msk.f32.vlgmr.msra.gmra.mxu0 %vm79_vm0, %v18926_v46 }
 0x422   :  { %16247 = vmatprep.mubr.msk.f32.mxu0 %vm18743_vm2, %v18742_v21 }
 0x425   :  { %16248 = vmatmul.mubr.msk.f32.gmra.mxu0 %vm79_vm0, %v18944_v53 }
 0x426   :  { %16250 = vmatprep.mubr.msk.f32.mxu0 %vm18743_vm2, %v18742_v21 }
 0x429   :  { %16251 = vmatmul.mubr.msk.f32.gmra.mxu0 %vm79_vm0, %v18958_v55 }
 0x42a   :  { %16276 = vmatprep.mubr.msk.f32.mxu0 %vm18743_vm2, %v18742_v21 }
 0x4d5   :  { %v19141_v17 = vpop.f32.mrf.mxu0 }
 0x4d7   :  { %v16212_v18 = vpop.f32.mrf.mxu0 }
 0x4d9   :  { %v19143_v19 = vpop.f32.mrf.mxu0 }
 0x4db   :  { %v16215_v22 = vpop.f32.mrf.mxu0 }
 0x4dd   :  { %v19145_v23 = vpop.f32.mrf.mxu0 }
 0x4df   :  { %v16218_v24 = vpop.f32.mrf.mxu0 }
 0x4e1   :  { %v790_v25 = vpop.f32.mrf.mxu0 }
 0x4e3   :  { %v16246_v27 = vpop.f32.mrf.mxu0 }
 0x4e5   :  { %v795_v28 = vpop.f32.mrf.mxu0 }
 0x4e7   :  { %v16249_v29 = vpop.f32.mrf.mxu0 }
 0x4e9   :  { %v800_v30 = vpop.f32.mrf.mxu0 }
 0x4ea   :  { %16271 = vmatpush3.xpose.msk.msra.mxu0 %vm400_vm3, %v800_v30  ;;  %v14435_v30 = vld [vmem:[%s23029_s4 + $0x58] sm:$0xff] }
 0x4eb   :  { %v16252_v31 = vpop.f32.mrf.mxu0  ;;  %16272 = vmatprep.subr.mxu0 %v18742_v21 }
 0x4ee   :  { %16273 = vmatpush3.xpose.msk.msra.mxu0 %vm400_vm3, %v795_v28 }
 0x4ef   :  { %16274 = vmatprep.subr.mxu0 %v18742_v21 }
 0x4f2   :  { %16275 = vmatpush3.xpose.msk.msra.mxu0 %vm400_vm3, %v790_v25  ;;  %v14418_v25 = vld [vmem:[%s23025_s24 + $0x40] sm:$0xff] }
 0x4f3   :  { %16285 = vmatprep.subr.mxu0 %v18742_v21 }
 0x4f5   :  { %16277 = vmatmul.mubr.msk.f32.vlgmr.msra.gmra.mxu0 %vm400_vm3, %v19081_v37 }
 0x4f6   :  { %16286 = vmatpush3.msk.msra.mxu0 %vm549_vm4, %v19092_v49  ;;  %16279 = vmatprep.mubr.msk.f32.mxu0 %vm18743_vm2, %v18742_v21 }
 0x4f7   :  { %16287 = vmatprep.subr.mxu0 %v18742_v21 }
 0x4f8   :  { %16288 = vmatpush3.msra.mxu0 %v19090_v47 }
 0x4f9   :  { %16280 = vmatmul.mubr.msk.f32.gmra.mxu0 %vm400_vm3, %v19084_v40  ;;  %16289 = vmatprep.subr.mxu0 %v18742_v21 }
 0x4fa   :  { %16290 = vmatpush3.msra.mxu0 %v19088_v44  ;;  %16282 = vmatprep.mubr.msk.f32.mxu0 %vm18743_vm2, %v18742_v21 }
 0x4fb   :  { %16300 = vmatprep.subr.mxu0 %v18742_v21 }
 0x4fd   :  { %16283 = vmatmul.mubr.msk.f32.gmra.mxu0 %vm400_vm3, %v19086_v42 }
 0x4fe   :  { %16291 = vmatprep.mubr.msk.f32.mxu0 %vm18743_vm2, %v18742_v21 }
 0x5b5   :  { %v973_v33 = vpop.f32.mrf.mxu0 }
 0x5b6   :  { %v987_v34 = vmul.f32 0.35355338, %v973_v33  ;;  %v14434_v33 = vld [vmem:[%s23029_s4 + $0x50] sm:$0xff] }
 0x5b7   :  { %v16278_v35 = vpop.f32.mrf.mxu0 }
 0x5b8   :  { %v990_v36 = vadd.f32 %v987_v34, %v19064_v20  ;;  %v14433_v35 = vld [vmem:[%s23029_s4 + $0x48] sm:$0xff] }
 0x5b9   :  { %v978_v37 = vpop.f32.mrf.mxu0 }
 0x5ba   :  { %v988_v38 = vmul.f32 0.35355338, %v978_v37  ;;  %v993_v39 = vsel %vm505_vm5, %v990_v36, -inf  ;;  %v14432_v37 = vld [vmem:[%s23029_s4 + $0x40] sm:$0xff] }
 0x5bb   :  { %994 = vmax.xlane.f32.xlu0 %v993_v39  ;;  %v16281_v40 = vpop.f32.mrf.mxu0 }
 0x5bc   :  { %v991_v41 = vadd.f32 %v988_v38, %v19070_v26 }
 0x5bd   :  { %v983_v43 = vpop.f32.mrf.mxu0 }
 0x5be   :  { %v989_v44 = vmul.f32 0.35355338, %v983_v43  ;;  %v996_v42 = vsel %vm505_vm5, %v991_v41, -inf }
 0x5bf   :  { %997 = vmax.xlane.f32.xlu1 %v996_v42  ;;  %v16284_v45 = vpop.f32.mrf.mxu0 }
 0x5c0   :  { %v992_v47 = vadd.f32 %v989_v44, %v19077_v32 }
 0x5c2   :  { %v999_v48 = vsel %vm512_vm6, %v992_v47, -inf }
 0x5c3   :  { %1000 = vmax.xlane.f32.xlu0 %v999_v48 }
 0x644   :  { %v995_v49 = vpop.xlane.xlu0 %994 }
 0x645   :  { %v1002_v50 = vsub.f32 %v990_v36, %v995_v49 }
 0x647   :  { %v1005_v51 = vmul.f32 1.442695, %v1002_v50 }
 0x648   :  { %v998_v52 = vpop.xlane.xlu1 %997 }
 0x649   :  { %18379 = vpow2.f32 %v1005_v51  ;;  %v1003_v54 = vsub.f32 %v991_v41, %v998_v52 }
 0x64b   :  { %v1007_v56 = vmul.f32 1.442695, %v1003_v54 }
 0x64c   :  { %v1001_v57 = vpop.xlane.xlu0 %1000 }
 0x64d   :  { %18381 = vpow2.f32 %v1007_v56  ;;  %v1004_v58 = vsub.f32 %v992_v47, %v1001_v57 }
 0x64f   :  { %v1009_v59 = vmul.f32 1.442695, %v1004_v58 }
 0x651   :  { %18383 = vpow2.f32 %v1009_v59 }
 0x656   :  { %v18380_v60 = vpop.eup %18379 }
 0x657   :  { %v1011_v61 = vsel %vm505_vm5, %v18380_v60, 0.0 }
 0x658   :  { %1012 = vadd.xlane.f32.xlu1 %v1011_v61 }
 0x65a   :  { %v18382_v62 = vpop.eup %18381 }
 0x65b   :  { %v1014_v63 = vsel %vm505_vm5, %v18382_v62, 0.0 }
 0x65c   :  { %1015 = vadd.xlane.f32.xlu0 %v1014_v63 }
 0x65e   :  { %v18384_v0 = vpop.eup %18383 }
 0x65f   :  { %v1017_v1 = vsel %vm512_vm6, %v18384_v0, 0.0 }
 0x660   :  { %1018 = vadd.xlane.f32.xlu1 %v1017_v1 }
 0x6e1   :  { %v1013_v2 = vpop.xlane.xlu1 %1012 }
 0x6e2   :  { %18385 = vrcp.f32 %v1013_v2 }
 0x6e5   :  { %v1016_v3 = vpop.xlane.xlu0 %1015 }
 0x6e6   :  { %18387 = vrcp.f32 %v1016_v3 }
 0x6e9   :  { %v1019_v4 = vpop.xlane.xlu1 %1018 }
 0x6ea   :  { %18389 = vrcp.f32 %v1019_v4 }
 0x6ef   :  { %v18386_v5 = vpop.eup %18385 }
 0x6f0   :  { %v1023_v6 = vmul.f32 %v18386_v5, %v18380_v60 }
 0x6f2   :  { %16292 = vmatmul.mubr.msk.f32.vlgmr.msra.gmra.mxu0 %vm505_vm5, %v1023_v6 }
 0x6f3   :  { %v18388_v8 = vpop.eup %18387  ;;  %16301 = vmatpush3.msra.mxu0 %v14411_v7  ;;  %16302 = vmatprep.mubr.msk.f32.mxu0 %vm18743_vm2, %v18742_v21 }
 0x6f4   :  { %v1024_v9 = vmul.f32 %v18388_v8, %v18382_v62  ;;  %16322 = vmatprep.subr.mxu0 %v18742_v21 }
 0x6f6   :  { %16295 = vmatmul.mubr.msk.f32.vlgmr.msra.gmra.mxu1 %vm505_vm5, %v1024_v9 }
 0x6f7   :  { %v18390_v11 = vpop.eup %18389  ;;  %16297 = vmatprep.mubr.msk.f32.mxu1 %vm18743_vm2, %v18742_v21  ;;  %16312 = vmatpush3.msra.mxu1 %v633_v10 }
 0x6f8   :  { %v1025_v12 = vmul.f32 %v18390_v11, %v18384_v0  ;;  %16339 = vmatprep.subr.mxu1 %v18742_v21 }
 0x6fa   :  { %16298 = vmatmul.mubr.msk.f32.gmra.mxu1 %vm505_vm5, %v1025_v12 }
 0x6fb   :  { %16313 = vmatprep.mubr.msk.f32.mxu1 %vm18743_vm2, %v18742_v21 }
 0x6fe   :  { %16314 = vmatmul.mubr.msk.f32.vlgmr.msra.gmra.mxu1 %vm400_vm3, %v19141_v17  ;;  %v14421_v17 = vld [vmem:[%s23025_s24 + $0x58] sm:$0xff] }
 0x6ff   :  { %16316 = vmatprep.mubr.msk.f32.mxu1 %vm18743_vm2, %v18742_v21  ;;  %16340 = vmatpush3.msra.mxu1 %v14428_v13 }
 0x700   :  { %16341 = vmatprep.subr.mxu1 %v18742_v21 }
 0x701   :  { %16342 = vmatpush3.msra.mxu1 %v14427_v14 }
 0x702   :  { %16317 = vmatmul.mubr.msk.f32.gmra.mxu1 %vm400_vm3, %v19143_v19  ;;  %16343 = vmatprep.subr.mxu1 %v18742_v21  ;;  %v14420_v19 = vld [vmem:[%s23025_s24 + $0x50] sm:$0xff] }
 0x703   :  { %16319 = vmatprep.mubr.msk.f32.mxu1 %vm18743_vm2, %v18742_v21  ;;  %16344 = vmatpush3.msra.mxu1 %v14426_v15 }
 0x704   :  { %16345 = vmatprep.subr.mxu1 %v18742_v21 }
 0x705   :  { %16346 = vmatpush3.msra.mxu1 %v14425_v16 }
 0x706   :  { %16320 = vmatmul.mubr.msk.f32.gmra.mxu1 %vm400_vm3, %v19145_v23  ;;  %16373 = vmatprep.subr.mxu1 %v18742_v21  ;;  %v14419_v23 = vld [vmem:[%s23025_s24 + $0x48] sm:$0xff] }
 0x707   :  { %16347 = vmatprep.mubr.msk.f32.mxu1 %vm18743_vm2, %v18742_v21 }
 0x70a   :  { %16348 = vmatmul.mubr.msk.f32.vlgmr.msra.gmra.mxu1 %vm79_vm0, %v18926_v46 }
 0x70b   :  { %16350 = vmatprep.mubr.msk.f32.mxu1 %vm18743_vm2, %v18742_v21 }
 0x70e   :  { %16351 = vmatmul.mubr.msk.f32.gmra.mxu1 %vm79_vm0, %v18944_v53 }
 0x70f   :  { %16353 = vmatprep.mubr.msk.f32.mxu1 %vm18743_vm2, %v18742_v21 }
 0x712   :  { %16354 = vmatmul.mubr.msk.f32.gmra.mxu1 %vm79_vm0, %v18958_v55 }
 0x713   :  { %16379 = vmatprep.mubr.msk.f32.mxu1 %vm18743_vm2, %v18742_v21 }
 0x7b2   :  { %v1104_v18 = vpop.f32.mrf.mxu0 }
 0x7b3   :  { %16303 = vmatmul.mubr.msk.f32.vlgmr.msra.gmra.mxu0 %vm400_vm3, %v1104_v18 }
 0x7b4   :  { %v16293_v22 = vpop.f32.mrf.mxu0  ;;  %16323 = vmatpush3.msra.mxu0 %v14421_v17  ;;  %16305 = vmatprep.mubr.msk.f32.mxu0 %vm18743_vm2, %v18742_v21 }
 0x7b5   :  { %16324 = vmatprep.subr.mxu0 %v18742_v21 }
 0x7b6   :  { %v1109_v24 = vpop.f32.mrf.mxu1  ;;  %16325 = vmatpush3.msra.mxu0 %v14420_v19 }
 0x7b7   :  { %16306 = vmatmul.mubr.msk.f32.gmra.mxu0 %vm400_vm3, %v1109_v24  ;;  %16326 = vmatprep.subr.mxu0 %v18742_v21 }
 0x7b8   :  { %v16296_v27 = vpop.f32.mrf.mxu1  ;;  %16308 = vmatprep.mubr.msk.f32.mxu0 %vm18743_vm2, %v18742_v21  ;;  %16327 = vmatpush3.msra.mxu0 %v14419_v23 }
 0x7b9   :  { %16328 = vmatprep.subr.mxu0 %v18742_v21 }
 0x7ba   :  { %v1114_v28 = vpop.f32.mrf.mxu1  ;;  %16329 = vmatpush3.msra.mxu0 %v14418_v25 }
 0x7bb   :  { %16309 = vmatmul.mubr.msk.f32.gmra.mxu0 %vm400_vm3, %v1114_v28  ;;  %16356 = vmatprep.subr.mxu0 %v18742_v21 }
 0x7bc   :  { %v16299_v29 = vpop.f32.mrf.mxu1  ;;  %16330 = vmatprep.mubr.msk.f32.mxu0 %vm18743_vm2, %v18742_v21 }
 0x7be   :  { %v19266_v31 = vpop.f32.mrf.mxu1 }
 0x7bf   :  { %16331 = vmatmul.mubr.msk.f32.vlgmr.msra.gmra.mxu0 %vm79_vm0, %v18926_v46 }
 0x7c0   :  { %v16315_v34 = vpop.f32.mrf.mxu1  ;;  %16333 = vmatprep.mubr.msk.f32.mxu0 %vm18743_vm2, %v18742_v21  ;;  %16357 = vmatpush3.msra.mxu0 %v14435_v30 }
 0x7c1   :  { %16358 = vmatprep.subr.mxu0 %v18742_v21 }
 0x7c2   :  { %v19279_v36 = vpop.f32.mrf.mxu1  ;;  %16359 = vmatpush3.msra.mxu0 %v14434_v33 }
 0x7c3   :  { %16334 = vmatmul.mubr.msk.f32.gmra.mxu0 %vm79_vm0, %v18944_v53  ;;  %16360 = vmatprep.subr.mxu0 %v18742_v21 }
 0x7c4   :  { %v16318_v38 = vpop.f32.mrf.mxu1  ;;  %16336 = vmatprep.mubr.msk.f32.mxu0 %vm18743_vm2, %v18742_v21  ;;  %16361 = vmatpush3.msra.mxu0 %v14433_v35 }
 0x7c5   :  { %16362 = vmatprep.subr.mxu0 %v18742_v21 }
 0x7c6   :  { %v19290_v39 = vpop.f32.mrf.mxu1  ;;  %16363 = vmatpush3.msra.mxu0 %v14432_v37 }
 0x7c7   :  { %16337 = vmatmul.mubr.msk.f32.gmra.mxu0 %vm79_vm0, %v18958_v55  ;;  %16388 = vmatprep.subr.mxu0 %v18742_v21 }
 0x7c8   :  { %v16321_v40 = vpop.f32.mrf.mxu1  ;;  %16364 = vmatprep.mubr.msk.f32.mxu0 %vm18743_vm2, %v18742_v21 }
 0x7ca   :  { %v1454_v41 = vpop.f32.mrf.mxu1 }
 0x7cb   :  { %16365 = vmatmul.mubr.msk.f32.vlgmr.msra.gmra.mxu0 %vm79_vm0, %v18926_v46 }
 0x7cc   :  { %v16349_v43 = vpop.f32.mrf.mxu1  ;;  %16367 = vmatprep.mubr.msk.f32.mxu0 %vm18743_vm2, %v18742_v21 }
 0x7ce   :  { %v1459_v44 = vpop.f32.mrf.mxu1 }
 0x7cf   :  { %16368 = vmatmul.mubr.msk.f32.gmra.mxu0 %vm79_vm0, %v18944_v53 }
 0x7d0   :  { %v16352_v42 = vpop.f32.mrf.mxu1  ;;  %16370 = vmatprep.mubr.msk.f32.mxu0 %vm18743_vm2, %v18742_v21 }
 0x7d2   :  { %v1464_v45 = vpop.f32.mrf.mxu1 }
 0x7d3   :  { %16371 = vmatmul.mubr.msk.f32.gmra.mxu0 %vm79_vm0, %v18958_v55  ;;  %16374 = vmatpush3.xpose.msk.msra.mxu1 %vm400_vm3, %v1464_v45 }
 0x7d4   :  { %v16355_v47 = vpop.f32.mrf.mxu1  ;;  %16375 = vmatprep.subr.mxu1 %v18742_v21  ;;  %16394 = vmatprep.mubr.msk.f32.mxu0 %vm18743_vm2, %v18742_v21 }
 0x7d7   :  { %16376 = vmatpush3.xpose.msk.msra.mxu1 %vm400_vm3, %v1459_v44 }
 0x7d8   :  { %16377 = vmatprep.subr.mxu1 %v18742_v21 }
 0x7db   :  { %16378 = vmatpush3.xpose.msk.msra.mxu1 %vm400_vm3, %v1454_v41  ;;  %v14449_v41 = vld [vmem:[%s22994_s7 + $0x10] sm:$0xff] }
 0x7dc   :  { %16403 = vmatprep.subr.mxu1 %v18742_v21 }
 0x873   :  { %v19315_v48 = vpop.f32.mrf.mxu0 }
 0x875   :  { %v16304_v49 = vpop.f32.mrf.mxu0 }
 0x876   :  { %v14456_v49 = vld [vmem:[%s23025_s24 + $0x78] sm:$0xff] }
 0x877   :  { %v19317_v50 = vpop.f32.mrf.mxu0 }
 0x879   :  { %v16307_v51 = vpop.f32.mrf.mxu0 }
 0x87a   :  { %v14455_v51 = vld [vmem:[%s23025_s24 + $0x70] sm:$0xff] }
 0x87b   :  { %v19319_v52 = vpop.f32.mrf.mxu0 }
 0x87d   :  { %v16310_v54 = vpop.f32.mrf.mxu0 }
 0x87f   :  { %v1369_v56 = vpop.f32.mrf.mxu0 }
 0x880   :  { %16380 = vmatmul.mubr.msk.f32.vlgmr.msra.gmra.mxu1 %vm400_vm3, %v1369_v56 }
 0x881   :  { %v16332_v57 = vpop.f32.mrf.mxu0  ;;  %16382 = vmatprep.mubr.msk.f32.mxu1 %vm18743_vm2, %v18742_v21  ;;  %16404 = vmatpush3.msra.mxu1 %v14449_v41 }
 0x882   :  { %16431 = vmatprep.subr.mxu1 %v18742_v21  ;;  %v14454_v57 = vld [vmem:[%s23025_s24 + $0x68] sm:$0xff] }
 0x883   :  { %v1374_v58 = vpop.f32.mrf.mxu0 }
 0x884   :  { %16383 = vmatmul.mubr.msk.f32.gmra.mxu1 %vm400_vm3, %v1374_v58  ;;  %v14453_v58 = vld [vmem:[%s23025_s24 + $0x60] sm:$0xff] }
 0x885   :  { %v16335_v59 = vpop.f32.mrf.mxu0  ;;  %16385 = vmatprep.mubr.msk.f32.mxu1 %vm18743_vm2, %v18742_v21 }
 0x887   :  { %v1379_v60 = vpop.f32.mrf.mxu0 }
 0x888   :  { %16386 = vmatmul.mubr.msk.f32.gmra.mxu1 %vm400_vm3, %v1379_v60 }
 0x889   :  { %v16338_v61 = vpop.f32.mrf.mxu0  ;;  %16405 = vmatprep.mubr.msk.f32.mxu1 %vm18743_vm2, %v18742_v21 }
 0x88a   :  { %v14470_v61 = vld [vmem:[%s23029_s4 + $0x78] sm:$0xff] }
 0x88b   :  { %v1539_v62 = vpop.f32.mrf.mxu0 }
 0x88d   :  { %v16366_v63 = vpop.f32.mrf.mxu0 }
 0x88e   :  { %v14468_v63 = vld [vmem:[%s23029_s4 + $0x68] sm:$0xff] }
 0x88f   :  { %v1544_v0 = vpop.f32.mrf.mxu0 }
 0x891   :  { %v16369_v1 = vpop.f32.mrf.mxu0 }
 0x892   :  { %v14463_v1 = vld [vmem:[%s23026_s26 + $0x78] sm:$0xff] }
 0x893   :  { %v1549_v2 = vpop.f32.mrf.mxu0 }
 0x894   :  { %16389 = vmatpush3.msk.msra.mxu0 %vm549_vm4, %v1549_v2 }
 0x895   :  { %v16372_v3 = vpop.f32.mrf.mxu0  ;;  %16390 = vmatprep.subr.mxu0 %v18742_v21 }
 0x896   :  { %16391 = vmatpush3.msra.mxu0 %v1544_v0  ;;  %v14467_v0 = vld [vmem:[%s23029_s4 + $0x60] sm:$0xff]  ;;  %v14462_v3 = vld [vmem:[%s23026_s26 + $0x70] sm:$0xff] }
 0x897   :  { %16392 = vmatprep.subr.mxu0 %v18742_v21 }
 0x898   :  { %16393 = vmatpush3.msra.mxu0 %v1539_v62  ;;  %v14469_v62 = vld [vmem:[%s23029_s4 + $0x70] sm:$0xff] }
 0x899   :  { %16414 = vmatprep.subr.mxu0 %v18742_v21 }
 0x940   :  { %v1637_v4 = vpop.f32.mrf.mxu1 }
 0x941   :  { %v1651_v5 = vmul.f32 0.35355338, %v1637_v4 }
 0x942   :  { %v16381_v6 = vpop.f32.mrf.mxu1 }
 0x943   :  { %v1654_v7 = vadd.f32 %v1651_v5, %v19064_v20  ;;  %v14461_v5 = vld [vmem:[%s23026_s26 + $0x68] sm:$0xff] }
 0x944   :  { %v1642_v8 = vpop.f32.mrf.mxu1 }
 0x945   :  { %v1652_v9 = vmul.f32 0.35355338, %v1642_v8  ;;  %v1657_v10 = vsel %vm505_vm5, %v1654_v7, -inf }
 0x946   :  { %1658 = vmax.xlane.f32.xlu0 %v1657_v10  ;;  %v16384_v11 = vpop.f32.mrf.mxu1 }
 0x947   :  { %v1655_v12 = vadd.f32 %v1652_v9, %v19070_v26 }
 0x948   :  { %v1647_v13 = vpop.f32.mrf.mxu1 }
 0x949   :  { %v1653_v14 = vmul.f32 0.35355338, %v1647_v13  ;;  %v1660_v15 = vsel %vm505_vm5, %v1655_v12, -inf }
 0x94a   :  { %1661 = vmax.xlane.f32.xlu1 %v1660_v15  ;;  %v16387_v16 = vpop.f32.mrf.mxu1 }
 0x94b   :  { %v1656_v17 = vadd.f32 %v1653_v14, %v19077_v32 }
 0x94d   :  { %v1663_v18 = vsel %vm512_vm6, %v1656_v17, -inf }
 0x94e   :  { %1664 = vmax.xlane.f32.xlu0 %v1663_v18 }
 0x9cf   :  { %v1659_v19 = vpop.xlane.xlu0 %1658 }
 0x9d0   :  { %v1666_v22 = vsub.f32 %v1654_v7, %v1659_v19  ;;  %v14460_v7 = vld [vmem:[%s23026_s26 + $0x60] sm:$0xff] }
 0x9d2   :  { %v1669_v23 = vmul.f32 1.442695, %v1666_v22 }
 0x9d3   :  { %v1662_v24 = vpop.xlane.xlu1 %1661 }
 0x9d4   :  { %18391 = vpow2.f32 %v1669_v23  ;;  %v1667_v25 = vsub.f32 %v1655_v12, %v1662_v24 }
 0x9d6   :  { %v1671_v27 = vmul.f32 1.442695, %v1667_v25 }
 0x9d7   :  { %v1665_v28 = vpop.xlane.xlu0 %1664 }
 0x9d8   :  { %18393 = vpow2.f32 %v1671_v27  ;;  %v1668_v29 = vsub.f32 %v1656_v17, %v1665_v28  ;;  %v1290_v27 = vadd.f32 %v19279_v36, %v19317_v50 }
 0x9da   :  { %v1673_v30 = vmul.f32 1.442695, %v1668_v29 }
 0x9dc   :  { %18395 = vpow2.f32 %v1673_v30 }
 0x9e1   :  { %v18392_v33 = vpop.eup %18391 }
 0x9e2   :  { %v1675_v34 = vsel %vm505_vm5, %v18392_v33, 0.0 }
 0x9e3   :  { %1676 = vadd.xlane.f32.xlu1 %v1675_v34 }
 0x9e5   :  { %v18394_v35 = vpop.eup %18393 }
 0x9e6   :  { %v1678_v37 = vsel %vm505_vm5, %v18394_v35, 0.0 }
 0x9e7   :  { %1679 = vadd.xlane.f32.xlu0 %v1678_v37 }
 0x9e9   :  { %v18396_v38 = vpop.eup %18395 }
 0x9ea   :  { %v1681_v40 = vsel %vm512_vm6, %v18396_v38, 0.0 }
 0x9eb   :  { %1682 = vadd.xlane.f32.xlu1 %v1681_v40 }
 0xa6c   :  { %v1677_v43 = vpop.xlane.xlu1 %1676 }
 0xa6d   :  { %18397 = vrcp.f32 %v1677_v43 }
 0xa70   :  { %v1680_v44 = vpop.xlane.xlu0 %1679 }
 0xa71   :  { %18399 = vrcp.f32 %v1680_v44 }
 0xa74   :  { %v1683_v42 = vpop.xlane.xlu1 %1682 }
 0xa75   :  { %18401 = vrcp.f32 %v1683_v42 }
 0xa7a   :  { %v18398_v45 = vpop.eup %18397 }
 0xa7b   :  { %v1687_v47 = vmul.f32 %v18398_v45, %v18392_v33  ;;  %v1295_v33 = vadd.f32 %v19290_v39, %v19319_v52 }
 0xa7d   :  { %16395 = vmatmul.mubr.msk.f32.vlgmr.msra.gmra.mxu0 %vm505_vm5, %v1687_v47 }
 0xa7e   :  { %v18400_v54 = vpop.eup %18399  ;;  %16397 = vmatprep.mubr.msk.f32.mxu0 %vm18743_vm2, %v18742_v21  ;;  %16415 = vmatpush3.msra.mxu0 %v14456_v49 }
 0xa7f   :  { %v1688_v56 = vmul.f32 %v18400_v54, %v18394_v35  ;;  %16416 = vmatprep.subr.mxu0 %v18742_v21 }
 0xa80   :  { %16417 = vmatpush3.msra.mxu0 %v14455_v51 }
 0xa81   :  { %16398 = vmatmul.mubr.msk.f32.gmra.mxu0 %vm505_vm5, %v1688_v56  ;;  %16418 = vmatprep.subr.mxu0 %v18742_v21 }
 0xa82   :  { %v18402_v59 = vpop.eup %18401  ;;  %16400 = vmatprep.mubr.msk.f32.mxu0 %vm18743_vm2, %v18742_v21  ;;  %16419 = vmatpush3.msra.mxu0 %v14454_v57 }
 0xa83   :  { %v1689_v60 = vmul.f32 %v18402_v59, %v18396_v38  ;;  %16420 = vmatprep.subr.mxu0 %v18742_v21 }
 0xa84   :  { %16421 = vmatpush3.msra.mxu0 %v14453_v58 }
 0xa85   :  { %16401 = vmatmul.mubr.msk.f32.gmra.mxu0 %vm505_vm5, %v1689_v60  ;;  %16448 = vmatprep.subr.mxu0 %v18742_v21 }
 0xa86   :  { %16422 = vmatprep.mubr.msk.f32.mxu0 %vm18743_vm2, %v18742_v21 }
 0xa89   :  { %16423 = vmatmul.mubr.msk.f32.vlgmr.msra.gmra.mxu0 %vm79_vm0, %v18926_v46 }
 0xa8a   :  { %16425 = vmatprep.mubr.msk.f32.mxu0 %vm18743_vm2, %v18742_v21  ;;  %16449 = vmatpush3.msra.mxu0 %v14470_v61 }
 0xa8b   :  { %16450 = vmatprep.subr.mxu0 %v18742_v21 }
 0xa8c   :  { %16451 = vmatpush3.msra.mxu0 %v14469_v62 }
 0xa8d   :  { %16426 = vmatmul.mubr.msk.f32.gmra.mxu0 %vm79_vm0, %v18944_v53  ;;  %16452 = vmatprep.subr.mxu0 %v18742_v21 }
 0xa8e   :  { %16428 = vmatprep.mubr.msk.f32.mxu0 %vm18743_vm2, %v18742_v21  ;;  %16453 = vmatpush3.msra.mxu0 %v14468_v63 }
 0xa8f   :  { %16454 = vmatprep.subr.mxu0 %v18742_v21 }
 0xa90   :  { %16455 = vmatpush3.msra.mxu0 %v14467_v0 }
 0xa91   :  { %16429 = vmatmul.mubr.msk.f32.gmra.mxu0 %vm79_vm0, %v18958_v55  ;;  %16480 = vmatprep.subr.mxu0 %v18742_v21 }
 0xa92   :  { %16456 = vmatprep.mubr.msk.f32.mxu0 %vm18743_vm2, %v18742_v21 }
 0xa95   :  { %16457 = vmatmul.mubr.msk.f32.vlgmr.msra.gmra.mxu0 %vm79_vm0, %v18926_v46 }
 0xa96   :  { %16459 = vmatprep.mubr.msk.f32.mxu0 %vm18743_vm2, %v18742_v21 }
 0xa99   :  { %16460 = vmatmul.mubr.msk.f32.gmra.mxu0 %vm79_vm0, %v18944_v53 }
 0xa9a   :  { %16462 = vmatprep.mubr.msk.f32.mxu0 %vm18743_vm2, %v18742_v21 }
 0xa9d   :  { %16463 = vmatmul.mubr.msk.f32.gmra.mxu0 %vm79_vm0, %v18958_v55 }
 0xa9e   :  { %16486 = vmatprep.mubr.msk.f32.mxu0 %vm18743_vm2, %v18742_v21 }
 0xb3d   :  { %v1768_v2 = vpop.f32.mrf.mxu0 }
 0xb3e   :  { %16406 = vmatmul.mubr.msk.f32.vlgmr.msra.gmra.mxu1 %vm400_vm3, %v1768_v2 }
 0xb3f   :  { %v16396_v4 = vpop.f32.mrf.mxu0  ;;  %16432 = vmatpush3.msra.mxu1 %v14463_v1  ;;  %16408 = vmatprep.mubr.msk.f32.mxu1 %vm18743_vm2, %v18742_v21 }
 0xb40   :  { %16433 = vmatprep.subr.mxu1 %v18742_v21 }
 0xb41   :  { %v1773_v6 = vpop.f32.mrf.mxu0  ;;  %16434 = vmatpush3.msra.mxu1 %v14462_v3 }
 0xb42   :  { %16409 = vmatmul.mubr.msk.f32.gmra.mxu1 %vm400_vm3, %v1773_v6  ;;  %16435 = vmatprep.subr.mxu1 %v18742_v21 }
 0xb43   :  { %v16399_v8 = vpop.f32.mrf.mxu0  ;;  %16411 = vmatprep.mubr.msk.f32.mxu1 %vm18743_vm2, %v18742_v21  ;;  %16436 = vmatpush3.msra.mxu1 %v14461_v5 }
 0xb44   :  { %16437 = vmatprep.subr.mxu1 %v18742_v21  ;;  %v14484_v8 = vld [vmem:[%s22994_s7 + $0x18] sm:$0xff] }
 0xb45   :  { %v1778_v9 = vpop.f32.mrf.mxu0  ;;  %16438 = vmatpush3.msra.mxu1 %v14460_v7 }
 0xb46   :  { %16412 = vmatmul.mubr.msk.f32.gmra.mxu1 %vm400_vm3, %v1778_v9  ;;  %16465 = vmatprep.subr.mxu1 %v18742_v21 }
 0xb47   :  { %v16402_v10 = vpop.f32.mrf.mxu0  ;;  %16439 = vmatprep.mubr.msk.f32.mxu1 %vm18743_vm2, %v18742_v21 }
 0xb49   :  { %v1947_v11 = vpop.f32.mrf.mxu0 }
 0xb4a   :  { %16440 = vmatmul.mubr.msk.f32.vlgmr.msra.gmra.mxu1 %vm79_vm0, %v18926_v46 }
 0xb4b   :  { %v16424_v12 = vpop.f32.mrf.mxu0  ;;  %16442 = vmatprep.mubr.msk.f32.mxu1 %vm18743_vm2, %v18742_v21 }
 0xb4d   :  { %v1952_v13 = vpop.f32.mrf.mxu0 }
 0xb4e   :  { %16443 = vmatmul.mubr.msk.f32.gmra.mxu1 %vm79_vm0, %v18944_v53 }
 0xb4f   :  { %v16427_v14 = vpop.f32.mrf.mxu0  ;;  %16445 = vmatprep.mubr.msk.f32.mxu1 %vm18743_vm2, %v18742_v21 }
 0xb51   :  { %v1957_v15 = vpop.f32.mrf.mxu0 }
 0xb52   :  { %16446 = vmatmul.mubr.msk.f32.gmra.mxu1 %vm79_vm0, %v18958_v55  ;;  %v1285_v55 = vadd.f32 %v19266_v31, %v19315_v48 }
 0xb53   :  { %v16430_v16 = vpop.f32.mrf.mxu0  ;;  %16471 = vmatprep.mubr.msk.f32.mxu1 %vm18743_vm2, %v18742_v21 }
 0xb55   :  { %v2117_v46 = vpop.f32.mrf.mxu0 }
 0xb57   :  { %v16458_v17 = vpop.f32.mrf.mxu0 }
 0xb59   :  { %v2122_v18 = vpop.f32.mrf.mxu0 }
 0xb5b   :  { %v16461_v19 = vpop.f32.mrf.mxu0 }
 0xb5d   :  { %v2127_v22 = vpop.f32.mrf.mxu0 }
 0xb5e   :  { %16481 = vmatpush3.msk.msra.mxu0 %vm549_vm4, %v2127_v22 }
 0xb5f   :  { %v16464_v53 = vpop.f32.mrf.mxu0  ;;  %16482 = vmatprep.subr.mxu0 %v18742_v21 }
 0xb60   :  { %16483 = vmatpush3.msra.mxu0 %v2122_v18 }
 0xb61   :  { %16484 = vmatprep.subr.mxu0 %v18742_v21 }
 0xb62   :  { %16485 = vmatpush3.msra.mxu0 %v2117_v46 }
 0xb63   :  { %16506 = vmatprep.subr.mxu0 %v18742_v21 }
 0xbfe   :  { %v1859_v23 = vpop.f32.mrf.mxu1 }
 0xbff   :  { %v19455_v24 = vadd.f32 %v1859_v23, %v1285_v55 }
 0xc00   :  { %v16407_v25 = vpop.f32.mrf.mxu1 }
 0xc02   :  { %v1864_v28 = vpop.f32.mrf.mxu1 }
 0xc03   :  { %v19459_v29 = vadd.f32 %v1864_v28, %v1290_v27  ;;  %v14488_v27 = vld [vmem:[%s22995_s8] ss:$0 sm:$0xff] }
 0xc04   :  { %v16410_v30 = vpop.f32.mrf.mxu1 }
 0xc05   :  { %v18727_v30 = vld [vmem:[%s23024_s29] sm:$0xff] }
 0xc06   :  { %v1869_v34 = vpop.f32.mrf.mxu1 }
 0xc07   :  { %v19463_v35 = vadd.f32 %v1869_v34, %v1295_v33 }
 0xc08   :  { %v16413_v37 = vpop.f32.mrf.mxu1 }
 0xc0a   :  { %v2032_v38 = vpop.f32.mrf.mxu1 }
 0xc0c   :  { %v16441_v31 = vpop.f32.mrf.mxu1 }
 0xc0e   :  { %v2037_v48 = vpop.f32.mrf.mxu1 }
 0xc10   :  { %v16444_v40 = vpop.f32.mrf.mxu1 }
 0xc12   :  { %v2042_v41 = vpop.f32.mrf.mxu1 }
 0xc13   :  { %16466 = vmatpush3.xpose.msk.msra.mxu1 %vm400_vm3, %v2042_v41 }
 0xc14   :  { %v16447_v43 = vpop.f32.mrf.mxu1  ;;  %16467 = vmatprep.subr.mxu1 %v18742_v21 }
 0xc17   :  { %16468 = vmatpush3.xpose.msk.msra.mxu1 %vm400_vm3, %v2037_v48 }
 0xc18   :  { %16469 = vmatprep.subr.mxu1 %v18742_v21 }
 0xc1b   :  { %16470 = vmatpush3.xpose.msk.msra.mxu1 %vm400_vm3, %v2032_v38 }
 0xc1c   :  { %16495 = vmatprep.subr.mxu1 %v18742_v21 }
 0xc1e   :  { %16472 = vmatmul.mubr.msk.f32.vlgmr.msra.gmra.mxu1 %vm400_vm3, %v1947_v11 }
 0xc1f   :  { %16474 = vmatprep.mubr.msk.f32.mxu1 %vm18743_vm2, %v18742_v21  ;;  %16496 = vmatpush3.msra.mxu1 %v14484_v8 }
 0xc20   :  { %16523 = vmatprep.subr.mxu1 %v18742_v21 }
 0xc22   :  { %16475 = vmatmul.mubr.msk.f32.gmra.mxu1 %vm400_vm3, %v1952_v13 }
 0xc23   :  { %16477 = vmatprep.mubr.msk.f32.mxu1 %vm18743_vm2, %v18742_v21 }
 0xc26   :  { %16478 = vmatmul.mubr.msk.f32.gmra.mxu1 %vm400_vm3, %v1957_v15 }
 0xc27   :  { %16497 = vmatprep.mubr.msk.f32.mxu1 %vm18743_vm2, %v18742_v21 }
 0xcde   :  { %v2215_v36 = vpop.f32.mrf.mxu1 }
 0xcdf   :  { %v2229_v39 = vmul.f32 0.35355338, %v2215_v36 }
 0xce0   :  { %v16473_v50 = vpop.f32.mrf.mxu1 }
 0xce1   :  { %v2232_v52 = vadd.f32 %v2229_v39, %v19064_v20 }
 0xce2   :  { %v2220_v44 = vpop.f32.mrf.mxu1 }
 0xce3   :  { %v2230_v42 = vmul.f32 0.35355338, %v2220_v44  ;;  %v2235_v45 = vsel %vm505_vm5, %v2232_v52, -inf }
 0xce4   :  { %2236 = vmax.xlane.f32.xlu0 %v2235_v45  ;;  %v16476_v47 = vpop.f32.mrf.mxu1 }
 0xce5   :  { %v2233_v49 = vadd.f32 %v2230_v42, %v19070_v26 }
 0xce6   :  { %v2225_v51 = vpop.f32.mrf.mxu1 }
 0xce7   :  { %v2231_v54 = vmul.f32 0.35355338, %v2225_v51  ;;  %v2238_v56 = vsel %vm505_vm5, %v2233_v49, -inf }
 0xce8   :  { %2239 = vmax.xlane.f32.xlu1 %v2238_v56  ;;  %v16479_v57 = vpop.f32.mrf.mxu1 }
 0xce9   :  { %v2234_v58 = vadd.f32 %v2231_v54, %v19077_v32 }
 0xceb   :  { %v2241_v59 = vsel %vm512_vm6, %v2234_v58, -inf }
 0xcec   :  { %2242 = vmax.xlane.f32.xlu0 %v2241_v59 }
 0xd6d   :  { %v2237_v20 = vpop.xlane.xlu0 %2236 }
 0xd6e   :  { %v2244_v60 = vsub.f32 %v2232_v52, %v2237_v20 }
 0xd70   :  { %v2247_v61 = vmul.f32 1.442695, %v2244_v60 }
 0xd71   :  { %v2240_v62 = vpop.xlane.xlu1 %2239 }
 0xd72   :  { %18403 = vpow2.f32 %v2247_v61  ;;  %v2245_v63 = vsub.f32 %v2233_v49, %v2240_v62 }
 0xd74   :  { %v2249_v0 = vmul.f32 1.442695, %v2245_v63 }
 0xd75   :  { %v2243_v1 = vpop.xlane.xlu0 %2242 }
 0xd76   :  { %18405 = vpow2.f32 %v2249_v0  ;;  %v2246_v26 = vsub.f32 %v2234_v58, %v2243_v1  ;;  %v2529_v0 = vld [vmem:[%s22996_s11 + $0x18] sm:$0xff]  ;;  %v2528_v1 = vld [vmem:[%s22996_s11 + $0x10] sm:$0xff] }
 0xd78   :  { %v2251_v2 = vmul.f32 1.442695, %v2246_v26  ;;  %v2527_v26 = vld [vmem:[%s22996_s11 + $0x8] sm:$0xff] }
 0xd7a   :  { %18407 = vpow2.f32 %v2251_v2  ;;  %v2526_v2 = vld [vmem:[%s22996_s11] sm:$0xff] }
 0xd7f   :  { %v18404_v3 = vpop.eup %18403 }
 0xd80   :  { %v2253_v4 = vsel %vm505_vm5, %v18404_v3, 0.0 }
 0xd81   :  { %2254 = vadd.xlane.f32.xlu1 %v2253_v4 }
 0xd83   :  { %v18406_v32 = vpop.eup %18405 }
 0xd84   :  { %v2256_v5 = vsel %vm505_vm5, %v18406_v32, 0.0 }
 0xd85   :  { %2257 = vadd.xlane.f32.xlu0 %v2256_v5 }
 0xd87   :  { %v18408_v6 = vpop.eup %18407 }
 0xd88   :  { %v2259_v7 = vsel %vm512_vm6, %v18408_v6, 0.0 }
 0xd89   :  { %2260 = vadd.xlane.f32.xlu1 %v2259_v7 }
 0xe0a   :  { %v2255_v9 = vpop.xlane.xlu1 %2254 }
 0xe0b   :  { %18409 = vrcp.f32 %v2255_v9 }
 0xe0e   :  { %v2258_v10 = vpop.xlane.xlu0 %2257 }
 0xe0f   :  { %18411 = vrcp.f32 %v2258_v10 }
 0xe12   :  { %v2261_v11 = vpop.xlane.xlu1 %2260 }
 0xe13   :  { %18413 = vrcp.f32 %v2261_v11 }
 0xe18   :  { %v18410_v12 = vpop.eup %18409 }
 0xe19   :  { %v2265_v13 = vmul.f32 %v18410_v12, %v18404_v3  ;;  %v14489_v12 = vld [vmem:[%s22997_s9] ss:$0 sm:$0xff] }
 0xe1b   :  { %16487 = vmatmul.mubr.msk.f32.vlgmr.msra.gmra.mxu0 %vm505_vm5, %v2265_v13 }
 0xe1c   :  { %v18412_v14 = vpop.eup %18411  ;;  %16489 = vmatprep.mubr.msk.f32.mxu0 %vm18743_vm2, %v18742_v21  ;;  %16507 = vmatpush3.msra.mxu0 %v2529_v0 }
 0xe1d   :  { %v2266_v15 = vmul.f32 %v18412_v14, %v18406_v32  ;;  %16508 = vmatprep.subr.mxu0 %v18742_v21  ;;  %v14490_v14 = vld [vmem:[%s22998_s10] ss:$0 sm:$0xff] }
 0xe1e   :  { %16509 = vmatpush3.msra.mxu0 %v2528_v1 }
 0xe1f   :  { %16490 = vmatmul.mubr.msk.f32.gmra.mxu0 %vm505_vm5, %v2266_v15  ;;  %16510 = vmatprep.subr.mxu0 %v18742_v21 }
 0xe20   :  { %v18414_v16 = vpop.eup %18413  ;;  %16492 = vmatprep.mubr.msk.f32.mxu0 %vm18743_vm2, %v18742_v21  ;;  %16511 = vmatpush3.msra.mxu0 %v2527_v26 }
 0xe21   :  { %v2267_v46 = vmul.f32 %v18414_v16, %v18408_v6  ;;  %16512 = vmatprep.subr.mxu0 %v18742_v21 }
 0xe22   :  { %16513 = vmatpush3.msra.mxu0 %v2526_v2 }
 0xe23   :  { %16493 = vmatmul.mubr.msk.f32.gmra.mxu0 %vm505_vm5, %v2267_v46  ;;  %16564 = vmatprep.subr.mxu0 %v18742_v21 }
 0xe24   :  { %16514 = vmatprep.mubr.msk.f32.mxu0 %vm18743_vm2, %v18742_v21 }
 0xedb   :  { %v2346_v17 = vpop.f32.mrf.mxu0 }
 0xedc   :  { %16498 = vmatmul.mubr.msk.f32.vlgmr.msra.gmra.mxu1 %vm400_vm3, %v2346_v17 }
 0xedd   :  { %v16488_v18 = vpop.f32.mrf.mxu0  ;;  %16500 = vmatprep.mubr.msk.f32.mxu1 %vm18743_vm2, %v18742_v21 }
 0xedf   :  { %v2351_v19 = vpop.f32.mrf.mxu0 }
 0xee0   :  { %16501 = vmatmul.mubr.msk.f32.gmra.mxu1 %vm400_vm3, %v2351_v19 }
 0xee1   :  { %v16491_v22 = vpop.f32.mrf.mxu0  ;;  %16503 = vmatprep.mubr.msk.f32.mxu1 %vm18743_vm2, %v18742_v21 }
 0xee3   :  { %v2356_v53 = vpop.f32.mrf.mxu0 }
 0xee4   :  { %16504 = vmatmul.mubr.msk.f32.gmra.mxu1 %vm400_vm3, %v2356_v53 }
 0xee5   :  { %v16494_v55 = vpop.f32.mrf.mxu0  ;;  %16555 = vmatprep.mubr.msk.f32.mxu1 %vm18743_vm2, %v18742_v21 }
 0xf9c   :  { %v2437_v23 = vpop.f32.mrf.mxu1 }
 0xf9d   :  { %v2451_v25 = vadd.f32 %v2437_v23, %v19455_v24  ;;  %v18728_v24 = vld [vmem:[%s23024_s29 + $0x8] sm:$0xff] }
 0xf9e   :  { %v16499_v28 = vpop.f32.mrf.mxu1 }
 0xf9f   :  { %v2454_v33 = vadd.f32 %v18727_v30, %v2451_v25  ;;  %v2722_v25 = vld [vmem:[%s22999_s13 + $0x78] sm:$0xff]  ;;  %v2720_v28 = vld [vmem:[%s22999_s13 + $0x68] sm:$0xff]  ;;  %v2719_v30 = vld [vmem:[%s22999_s13 + $0x60] sm:$0xff] }
 0xfa0   :  { %v2442_v34 = vpop.f32.mrf.mxu1  ;;  %16524 = vmatpush3.msra.mxu1 %v2722_v25 }
 0xfa1   :  { %v19518_v37 = vadd.f32 %v14488_v27, %v2454_v33  ;;  %v2452_v38 = vadd.f32 %v2442_v34, %v19459_v29  ;;  %v18729_v29 = vld [vmem:[%s23024_s29 + $0x10] sm:$0x3f]  ;;  %16525 = vmatprep.subr.mxu1 %v18742_v21  ;;  %v2718_v33 = vld [vmem:[%s22999_s13 + $0x58] sm:$0xff] }
 0xfa2   :  { %v16502_v31 = vpop.f32.mrf.mxu1  ;;  %v2717_v34 = vld [vmem:[%s22999_s13 + $0x50] sm:$0xff] }
 0xfa3   :  { %v2455_v48 = vadd.f32 %v18728_v24, %v2452_v38  ;;  %v2469_v40 = vsel %vm79_vm0, %v19518_v37, 0.0  ;;  %v2716_v38 = vld [vmem:[%s22999_s13 + $0x48] sm:$0xff]  ;;  %v2715_v31 = vld [vmem:[%s22999_s13 + $0x40] sm:$0xff]  ;;  %v2714_v24 = vld [vmem:[%s22999_s13 + $0x38] sm:$0xff] }
 0xfa4   :  { %2470 = vadd.xlane.f32.xlu0 %v2469_v40  ;;  %v2447_v41 = vpop.f32.mrf.mxu1  ;;  %v2712_v40 = vld [vmem:[%s22999_s13 + $0x28] sm:$0xff] }
 0xfa5   :  { %v19526_v43 = vadd.f32 %v14488_v27, %v2455_v48  ;;  %v2453_v36 = vadd.f32 %v2447_v41, %v19463_v35  ;;  %v2713_v48 = vld [vmem:[%s22999_s13 + $0x30] sm:$0xff]  ;;  %v2711_v41 = vld [vmem:[%s22999_s13 + $0x20] sm:$0xff] }
 0xfa6   :  { %v16505_v39 = vpop.f32.mrf.mxu1 }
 0xfa7   :  { %v2456_v50 = vadd.f32 %v18729_v29, %v2453_v36  ;;  %v2472_v52 = vsel %vm79_vm0, %v19526_v43, 0.0  ;;  %v2710_v36 = vld [vmem:[%s22999_s13 + $0x18] sm:$0xff]  ;;  %v2709_v39 = vld [vmem:[%s22999_s13 + $0x10] sm:$0xff]  ;;  %v2708_v29 = vld [vmem:[%s22999_s13 + $0x8] sm:$0xff] }
 0xfa8   :  { %2473 = vadd.xlane.f32.xlu1 %v2472_v52  ;;  %v14491_v52 = vld [vmem:[%s23000_s12] ss:$0 sm:$0xff] }
 0xfa9   :  { %v19534_v44 = vadd.f32 %v14488_v27, %v2456_v50  ;;  %v2721_v27 = vld [vmem:[%s22999_s13 + $0x70] sm:$0xff]  ;;  %v2707_v50 = vld [vmem:[%s22999_s13] sm:$0xff] }
 0xfaa   :  { %16526 = vmatpush3.msra.mxu1 %v2721_v27 }
 0xfab   :  { %v2475_v42 = vsel %vm86_vm1, %v19534_v44, 0.0  ;;  %16527 = vmatprep.subr.mxu1 %v18742_v21 }
 0xfac   :  { %2476 = vadd.xlane.f32.xlu0 %v2475_v42  ;;  %16528 = vmatpush3.msra.mxu1 %v2720_v28 }
 0xfad   :  { %16529 = vmatprep.subr.mxu1 %v18742_v21 }
 0xfae   :  { %16530 = vmatpush3.msra.mxu1 %v2719_v30 }
 0xfaf   :  { %16531 = vmatprep.subr.mxu1 %v18742_v21 }
 0xfb0   :  { %16532 = vmatpush3.msra.mxu1 %v2718_v33 }
 0xfb1   :  { %16533 = vmatprep.subr.mxu1 %v18742_v21 }
 0xfb2   :  { %16534 = vmatpush3.msra.mxu1 %v2717_v34 }
 0xfb3   :  { %16535 = vmatprep.subr.mxu1 %v18742_v21 }
 0xfb4   :  { %16536 = vmatpush3.msra.mxu1 %v2716_v38 }
 0xfb5   :  { %16537 = vmatprep.subr.mxu1 %v18742_v21 }
 0xfb6   :  { %16538 = vmatpush3.msra.mxu1 %v2715_v31 }
 0xfb7   :  { %16539 = vmatprep.subr.mxu1 %v18742_v21 }
 0xfb8   :  { %16540 = vmatpush3.msra.mxu1 %v2714_v24 }
 0xfb9   :  { %16541 = vmatprep.subr.mxu1 %v18742_v21 }
 0xfba   :  { %16542 = vmatpush3.msra.mxu1 %v2713_v48 }
 0xfbb   :  { %16543 = vmatprep.subr.mxu1 %v18742_v21 }
 0xfbc   :  { %16544 = vmatpush3.msra.mxu1 %v2712_v40 }
 0xfbd   :  { %16545 = vmatprep.subr.mxu1 %v18742_v21 }
 0xfbe   :  { %16546 = vmatpush3.msra.mxu1 %v2711_v41 }
 0xfbf   :  { %16547 = vmatprep.subr.mxu1 %v18742_v21 }
 0xfc0   :  { %16548 = vmatpush3.msra.mxu1 %v2710_v36 }
 0xfc1   :  { %16549 = vmatprep.subr.mxu1 %v18742_v21 }
 0xfc2   :  { %16550 = vmatpush3.msra.mxu1 %v2709_v39 }
 0xfc3   :  { %16551 = vmatprep.subr.mxu1 %v18742_v21 }
 0xfc4   :  { %16552 = vmatpush3.msra.mxu1 %v2708_v29 }
 0xfc5   :  { %16553 = vmatprep.subr.mxu1 %v18742_v21 }
 0xfc6   :  { %16554 = vmatpush3.msra.mxu1 %v2707_v50 }
 0xfc7   :  { %16598 = vmatprep.subr.mxu1 %v18742_v21 }
0x102d   :  { %v2471_v45 = vpop.xlane.xlu0 %2470 }
0x102e   :  { %v2478_v47 = vmul.f32 0.03125, %v2471_v45 }
0x1030   :  { %v2481_v35 = vsub.f32 %v19518_v37, %v2478_v47 }
0x1031   :  { %v2474_v49 = vpop.xlane.xlu1 %2473 }
0x1032   :  { %v2479_v51 = vmul.f32 0.03125, %v2474_v49  ;;  %v2484_v54 = vmul.f32 %v2481_v35, %v2481_v35 }
0x1034   :  { %v2482_v56 = vsub.f32 %v19526_v43, %v2479_v51  ;;  %v2487_v57 = vsel %vm79_vm0, %v2484_v54, 0.0 }
0x1035   :  { %2488 = vadd.xlane.f32.xlu1 %v2487_v57  ;;  %v2477_v58 = vpop.xlane.xlu0 %2476 }
0x1036   :  { %v2480_v59 = vmul.f32 0.03125, %v2477_v58  ;;  %v2485_v20 = vmul.f32 %v2482_v56, %v2482_v56 }
0x1038   :  { %v2483_v60 = vsub.f32 %v19534_v44, %v2480_v59  ;;  %v2490_v61 = vsel %vm79_vm0, %v2485_v20, 0.0 }
0x1039   :  { %2491 = vadd.xlane.f32.xlu0 %v2490_v61 }
0x103a   :  { %v2486_v62 = vmul.f32 %v2483_v60, %v2483_v60 }
0x103c   :  { %v2493_v63 = vsel %vm86_vm1, %v2486_v62, 0.0 }
0x103d   :  { %2494 = vadd.xlane.f32.xlu1 %v2493_v63 }
0x10be   :  { %v2489_v3 = vpop.xlane.xlu1 %2488 }
0x10bf   :  { %v2496_v4 = vmul.f32 0.03125, %v2489_v3 }
0x10c1   :  { %v2499_v32 = vadd.f32 1e-05, %v2496_v4 }
0x10c2   :  { %v2492_v5 = vpop.xlane.xlu0 %2491 }
0x10c3   :  { %18415 = vrsqrt.f32 %v2499_v32  ;;  %v2497_v6 = vmul.f32 0.03125, %v2492_v5 }
0x10c5   :  { %v2500_v7 = vadd.f32 1e-05, %v2497_v6 }
0x10c6   :  { %v2495_v8 = vpop.xlane.xlu1 %2494 }
0x10c7   :  { %18417 = vrsqrt.f32 %v2500_v7  ;;  %v2498_v9 = vmul.f32 0.03125, %v2495_v8 }
0x10c9   :  { %v2501_v10 = vadd.f32 1e-05, %v2498_v9 }
0x10cb   :  { %18419 = vrsqrt.f32 %v2501_v10 }
0x10d0   :  { %v18416_v11 = vpop.eup %18415 }
0x10d1   :  { %v2505_v13 = vmul.f32 %v18416_v11, %v2481_v35 }
0x10d3   :  { %v2514_v15 = vmul.f32 %v14489_v12, %v2505_v13 }
0x10d4   :  { %v18418_v16 = vpop.eup %18417 }
0x10d5   :  { %v2523_v46 = vadd.f32 %v14490_v14, %v2514_v15  ;;  %v2506_v17 = vmul.f32 %v18418_v16, %v2482_v56 }
0x10d7   :  { %16515 = vmatmul.mubr.msk.f32.vlgmr.msra.gmra.mxu0 %vm79_vm0, %v2523_v46  ;;  %v2515_v18 = vmul.f32 %v14489_v12, %v2506_v17 }
0x10d8   :  { %v18420_v19 = vpop.eup %18419  ;;  %16517 = vmatprep.mubr.msk.f32.mxu0 %vm18743_vm2, %v18742_v21 }
0x10d9   :  { %v2524_v22 = vadd.f32 %v14490_v14, %v2515_v18  ;;  %v2507_v53 = vmul.f32 %v18420_v19, %v2483_v60 }
0x10db   :  { %16518 = vmatmul.mubr.msk.f32.gmra.mxu0 %vm79_vm0, %v2524_v22  ;;  %v2516_v55 = vmul.f32 %v14489_v12, %v2507_v53 }
0x10dc   :  { %16520 = vmatprep.mubr.msk.f32.mxu0 %vm18743_vm2, %v18742_v21 }
0x10dd   :  { %v2525_v23 = vadd.f32 %v14490_v14, %v2516_v55 }
0x10df   :  { %16521 = vmatmul.mubr.msk.f32.gmra.mxu0 %vm79_vm0, %v2525_v23 }
0x10e0   :  { %16572 = vmatprep.mubr.msk.f32.mxu0 %vm18743_vm2, %v18742_v21 }
0x1197   :  { %v2612_v42 = vpop.f32.mrf.mxu0 }
0x1198   :  { %v19642_v45 = vadd.f32 %v14491_v52, %v2612_v42 }
0x1199   :  { %v16516_v47 = vpop.f32.mrf.mxu0 }
0x119a   :  { %v19645_v35 = vmul.f32 0.70710677, %v19642_v45 }
0x119b   :  { %v2617_v49 = vpop.f32.mrf.mxu0 }
0x119c   :  { %v2632_v51 = vand.u32 2147483647, %v19645_v35  ;;  %v19648_v54 = vadd.f32 %v14491_v52, %v2617_v49  ;;  %vm2692_vm7 = vcmp.ge.f32.partialorder %v19645_v35, 0.0 }
0x119d   :  { %v16519_v56 = vpop.f32.mrf.mxu0 }
0x119e   :  { %v2635_v57 = vmul.f32 0.3275911, %v2632_v51  ;;  %v19651_v58 = vmul.f32 0.70710677, %v19648_v54  ;;  %v2674_v3 = vsub.f32 0.0, %v2632_v51 }
0x119f   :  { %v2622_v59 = vpop.f32.mrf.mxu0 }
0x11a0   :  { %v2638_v20 = vadd.f32 1.0, %v2635_v57  ;;  %v2633_v60 = vand.u32 2147483647, %v19651_v58  ;;  %v19654_v61 = vadd.f32 %v14491_v52, %v2622_v59  ;;  %v2677_v32 = vmul.f32 %v2674_v3, %v2632_v51 }
0x11a1   :  { %v16522_v62 = vpop.f32.mrf.mxu0  ;;  %vm2693_vm8 = vcmp.ge.f32.partialorder %v19651_v58, 0.0 }
0x11a2   :  { %18421 = vrcp.f32 %v2638_v20  ;;  %v2636_v63 = vmul.f32 0.3275911, %v2633_v60  ;;  %v19657_v0 = vmul.f32 0.70710677, %v19654_v61  ;;  %v2675_v5 = vsub.f32 0.0, %v2633_v60 }
0x11a3   :  { %v2680_v8 = vmul.f32 1.442695, %v2677_v32  ;;  %v2626_v20 = vmul.f32 0.5, %v19642_v45 }
0x11a4   :  { %v2639_v1 = vadd.f32 1.0, %v2636_v63  ;;  %v2634_v26 = vand.u32 2147483647, %v19657_v0  ;;  %v2678_v9 = vmul.f32 %v2675_v5, %v2633_v60  ;;  %vm2694_vm9 = vcmp.ge.f32.partialorder %v19657_v0, 0.0 }
0x11a6   :  { %18423 = vrcp.f32 %v2639_v1  ;;  %v2637_v2 = vmul.f32 0.3275911, %v2634_v26  ;;  %v2676_v10 = vsub.f32 0.0, %v2634_v26  ;;  %v2682_v14 = vmul.f32 1.442695, %v2678_v9 }
0x11a7   :  { %v14495_v9 = vld [vmem:[%s23001_s14] ss:$0 sm:$0xff] }
0x11a8   :  { %v2640_v4 = vadd.f32 1.0, %v2637_v2  ;;  %v2679_v16 = vmul.f32 %v2676_v10, %v2634_v26 }
0x11aa   :  { %18425 = vrcp.f32 %v2640_v4  ;;  %v2684_v53 = vmul.f32 1.442695, %v2679_v16  ;;  %v2627_v4 = vmul.f32 0.5, %v19648_v54 }
0x11ab   :  { %18427 = vpow2.f32 %v2680_v8 }
0x11ac   :  { %18429 = vpow2.f32 %v2682_v14 }
0x11ad   :  { %18431 = vpow2.f32 %v2684_v53 }
0x11af   :  { %v18422_v6 = vpop.eup %18421 }
0x11b0   :  { %v2647_v7 = vmul.f32 1.0614054, %v18422_v6 }
0x11b2   :  { %v2650_v11 = vadd.f32 -1.4531521, %v2647_v7  ;;  %v2628_v7 = vmul.f32 0.5, %v19654_v61 }
0x11b3   :  { %v18424_v12 = vpop.eup %18423 }
0x11b4   :  { %v2653_v13 = vmul.f32 %v18422_v6, %v2650_v11  ;;  %v2648_v15 = vmul.f32 1.0614054, %v18424_v12 }
0x11b6   :  { %v2656_v46 = vadd.f32 1.4214138, %v2653_v13  ;;  %v2651_v17 = vadd.f32 -1.4531521, %v2648_v15 }
0x11b7   :  { %v18426_v18 = vpop.eup %18425 }
0x11b8   :  { %v2659_v19 = vmul.f32 %v18422_v6, %v2656_v46  ;;  %v2654_v22 = vmul.f32 %v18424_v12, %v2651_v17  ;;  %v2649_v55 = vmul.f32 1.0614054, %v18426_v18  ;;  %v18428_v40 = vpop.eup %18427 }
0x11b9   :  { %v18430_v42 = vpop.eup %18429 }
0x11ba   :  { %v2662_v23 = vadd.f32 -0.28449672, %v2659_v19  ;;  %v2657_v25 = vadd.f32 1.4214138, %v2654_v22  ;;  %v2652_v27 = vadd.f32 -1.4531521, %v2649_v55  ;;  %v18432_v63 = vpop.eup %18431 }
0x11bc   :  { %v2665_v28 = vmul.f32 %v18422_v6, %v2662_v23  ;;  %v2660_v30 = vmul.f32 %v18424_v12, %v2657_v25  ;;  %v2655_v33 = vmul.f32 %v18426_v18, %v2652_v27 }
0x11be   :  { %v2668_v34 = vadd.f32 0.2548296, %v2665_v28  ;;  %v2663_v38 = vadd.f32 -0.28449672, %v2660_v30  ;;  %v2658_v31 = vadd.f32 1.4214138, %v2655_v33 }
0x11c0   :  { %v2671_v24 = vmul.f32 %v18422_v6, %v2668_v34  ;;  %v2666_v48 = vmul.f32 %v18424_v12, %v2663_v38  ;;  %v2661_v41 = vmul.f32 %v18426_v18, %v2658_v31 }
0x11c2   :  { %v2686_v36 = vmul.f32 %v18428_v40, %v2671_v24  ;;  %v2669_v39 = vadd.f32 0.2548296, %v2666_v48  ;;  %v2664_v29 = vadd.f32 -0.28449672, %v2661_v41  ;;  %v14503_v48 = vld [vmem:[%s23025_s24 + $0x98] sm:$0xff]  ;;  %v14502_v41 = vld [vmem:[%s23025_s24 + $0x90] sm:$0xff] }
0x11c3   :  { %v14517_v40 = vld [vmem:[%s23029_s4 + $0x98] sm:$0xff]  ;;  %16565 = vmatpush3.msra.mxu0 %v14503_v48  ;;  %v14546_v48 = vld [vmem:[%s23029_s4 + $0xa0] sm:$0xff] }
0x11c4   :  { %v2689_v50 = vsub.f32 1.0, %v2686_v36  ;;  %v2672_v52 = vmul.f32 %v18424_v12, %v2669_v39  ;;  %v2667_v47 = vmul.f32 %v18426_v18, %v2664_v29  ;;  %16566 = vmatprep.subr.mxu0 %v18742_v21  ;;  %v14516_v36 = vld [vmem:[%s23029_s4 + $0x90] sm:$0xff]  ;;  %v14501_v39 = vld [vmem:[%s23025_s24 + $0x88] sm:$0xff] }
0x11c5   :  { %16567 = vmatpush3.msra.mxu0 %v14502_v41  ;;  %v14515_v29 = vld [vmem:[%s23029_s4 + $0x88] sm:$0xff] }
0x11c6   :  { %v2695_v49 = vsub.f32 0.0, %v2689_v50  ;;  %v2687_v51 = vmul.f32 %v18430_v42, %v2672_v52  ;;  %v2670_v56 = vadd.f32 0.2548296, %v2667_v47  ;;  %16568 = vmatprep.subr.mxu0 %v18742_v21  ;;  %v14514_v52 = vld [vmem:[%s23029_s4 + $0x80] sm:$0xff] }
0x11c7   :  { %16569 = vmatpush3.msra.mxu0 %v14501_v39  ;;  %v19870_v39 = vld [vmem:[%s23030_s30] sm:$0xff] }
0x11c8   :  { %v2698_v57 = vsel %vm2692_vm7, %v2689_v50, %v2695_v49  ;;  %v2690_v59 = vsub.f32 1.0, %v2687_v51  ;;  %v2673_v62 = vmul.f32 %v18426_v18, %v2670_v56  ;;  %16570 = vmatprep.subr.mxu0 %v18742_v21  ;;  %v14500_v50 = vld [vmem:[%s23025_s24 + $0x80] sm:$0xff] }
0x11c9   :  { %v2701_v60 = vadd.f32 1.0, %v2698_v57  ;;  %16571 = vmatpush3.msra.mxu0 %v14500_v50 }
0x11ca   :  { %v2696_v1 = vsub.f32 0.0, %v2690_v59  ;;  %v2688_v2 = vmul.f32 %v18432_v63, %v2673_v62  ;;  %16581 = vmatprep.subr.mxu0 %v18742_v21  ;;  %v14498_v63 = vld [vmem:[%s23027_s2 + $0x1] ss:$0 sm:$0xff] }
0x11cb   :  { %v2704_v26 = vmul.f32 %v2701_v60, %v2626_v20 }
0x11cc   :  { %v2699_v3 = vsel %vm2693_vm8, %v2690_v59, %v2696_v1  ;;  %v2691_v5 = vsub.f32 1.0, %v2688_v2 }
0x11cd   :  { %16556 = vmatmul.mubr.f32.vlgmr.msra.gmra.mxu1 %v2704_v26  ;;  %v2702_v32 = vadd.f32 1.0, %v2699_v3  ;;  %v14499_v26 = vld [vmem:[%s23028_s3 + $0x1] ss:$0 sm:$0xff] }
0x11ce   :  { %16558 = vmatprep.mubr.msk.f32.mxu1 %vm18743_vm2, %v18742_v21  ;;  %v2697_v6 = vsub.f32 0.0, %v2691_v5  ;;  %16599 = vmatpush3.msra.mxu1 %v14517_v40 }
0x11cf   :  { %v2705_v35 = vmul.f32 %v2702_v32, %v2627_v4  ;;  %16600 = vmatprep.subr.mxu1 %v18742_v21 }
0x11d0   :  { %v2700_v45 = vsel %vm2694_vm9, %v2691_v5, %v2697_v6  ;;  %16601 = vmatpush3.msra.mxu1 %v14516_v36  ;;  %v14510_v5 = vld [vmem:[%s23026_s26 + $0x98] sm:$0xff]  ;;  %v14509_v6 = vld [vmem:[%s23026_s26 + $0x90] sm:$0xff] }
0x11d1   :  { %16559 = vmatmul.mubr.f32.gmra.mxu1 %v2705_v35  ;;  %v2703_v58 = vadd.f32 1.0, %v2700_v45  ;;  %16602 = vmatprep.subr.mxu1 %v18742_v21 }
0x11d2   :  { %16561 = vmatprep.mubr.msk.f32.mxu1 %vm18743_vm2, %v18742_v21  ;;  %16603 = vmatpush3.msra.mxu1 %v14515_v29 }
0x11d3   :  { %v2706_v8 = vmul.f32 %v2703_v58, %v2628_v7  ;;  %16604 = vmatprep.subr.mxu1 %v18742_v21 }
0x11d4   :  { %16605 = vmatpush3.msra.mxu1 %v14514_v52 }
0x11d5   :  { %16562 = vmatmul.mubr.f32.gmra.mxu1 %v2706_v8  ;;  %16630 = vmatprep.subr.mxu1 %v18742_v21  ;;  %v14508_v8 = vld [vmem:[%s23026_s26 + $0x88] sm:$0xff] }
0x11d6   :  { %16606 = vmatprep.mubr.msk.f32.mxu1 %vm18743_vm2, %v18742_v21 }
0x128d   :  { %v2789_v54 = vpop.f32.mrf.mxu1 }
0x128e   :  { %v2803_v0 = vadd.f32 %v2789_v54, %v19518_v37 }
0x128f   :  { %v16557_v10 = vpop.f32.mrf.mxu1 }
0x1290   :  { %v19676_v11 = vadd.f32 %v14495_v9, %v2803_v0 }
0x1291   :  { %v2794_v61 = vpop.f32.mrf.mxu1 }
0x1292   :  { %v2804_v12 = vadd.f32 %v2794_v61, %v19526_v43  ;;  %v2820_v13 = vsel %vm79_vm0, %v19676_v11, 0.0 }
0x1293   :  { %2821 = vadd.xlane.f32.xlu0 %v2820_v13  ;;  %v16560_v14 = vpop.f32.mrf.mxu1 }
0x1294   :  { %v19681_v15 = vadd.f32 %v14495_v9, %v2804_v12 }
0x1295   :  { %v2799_v16 = vpop.f32.mrf.mxu1 }
0x1296   :  { %v2823_v46 = vsel %vm79_vm0, %v19681_v15, 0.0  ;;  %v2805_v17 = vadd.f32 %v2799_v16, %v19534_v44 }
0x1297   :  { %2824 = vadd.xlane.f32.xlu1 %v2823_v46  ;;  %v16563_v37 = vpop.f32.mrf.mxu1 }
0x1298   :  { %v19686_v18 = vadd.f32 %v14495_v9, %v2805_v17  ;;  %v14507_v9 = vld [vmem:[%s23026_s26 + $0x80] sm:$0xff] }
0x129a   :  { %v2826_v43 = vsel %vm86_vm1, %v19686_v18, 0.0 }
0x129b   :  { %2827 = vadd.xlane.f32.xlu0 %v2826_v43 }
0x131c   :  { %v2822_v19 = vpop.xlane.xlu0 %2821 }
0x131d   :  { %v2829_v22 = vmul.f32 0.03125, %v2822_v19 }
0x131f   :  { %v2832_v53 = vsub.f32 %v19676_v11, %v2829_v22 }
0x1320   :  { %v2825_v55 = vpop.xlane.xlu1 %2824 }
0x1321   :  { %v2830_v23 = vmul.f32 0.03125, %v2825_v55  ;;  %v2835_v25 = vmul.f32 %v2832_v53, %v2832_v53 }
0x1323   :  { %v2833_v27 = vsub.f32 %v19681_v15, %v2830_v23  ;;  %v2838_v28 = vsel %vm79_vm0, %v2835_v25, 0.0 }
0x1324   :  { %2839 = vadd.xlane.f32.xlu1 %v2838_v28  ;;  %v2828_v44 = vpop.xlane.xlu0 %2827 }
0x1325   :  { %v2836_v30 = vmul.f32 %v2833_v27, %v2833_v27  ;;  %v2831_v33 = vmul.f32 0.03125, %v2828_v44  ;;  %v14535_v44 = vld [vmem:[%s23025_s24 + $0xb8] sm:$0xff] }
0x1327   :  { %v2841_v34 = vsel %vm79_vm0, %v2836_v30, 0.0  ;;  %v2834_v38 = vsub.f32 %v19686_v18, %v2831_v33  ;;  %v14534_v30 = vld [vmem:[%s23025_s24 + $0xb0] sm:$0xff]  ;;  %v14533_v33 = vld [vmem:[%s23025_s24 + $0xa8] sm:$0xff] }
0x1328   :  { %2842 = vadd.xlane.f32.xlu0 %v2841_v34  ;;  %v14532_v34 = vld [vmem:[%s23025_s24 + $0xa0] sm:$0xff] }
0x1329   :  { %v2837_v31 = vmul.f32 %v2834_v38, %v2834_v38 }
0x132b   :  { %v2844_v24 = vsel %vm86_vm1, %v2837_v31, 0.0  ;;  %v14548_v31 = vld [vmem:[%s23029_s4 + $0xb0] sm:$0xff] }
0x132c   :  { %2845 = vadd.xlane.f32.xlu1 %v2844_v24  ;;  %v14547_v24 = vld [vmem:[%s23029_s4 + $0xa8] sm:$0xff] }
0x13ad   :  { %v2840_v42 = vpop.xlane.xlu1 %2839 }
0x13ae   :  { %v2847_v47 = vmul.f32 0.03125, %v2840_v42 }
0x13b0   :  { %v2850_v49 = vadd.f32 1e-05, %v2847_v47 }
0x13b1   :  { %v2843_v51 = vpop.xlane.xlu0 %2842 }
0x13b2   :  { %18433 = vrsqrt.f32 %v2850_v49  ;;  %v2848_v56 = vmul.f32 0.03125, %v2843_v51  ;;  %v19877_v49 = vld [vmem:[%s23030_s30 + $0x8] sm:$0xff] }
0x13b4   :  { %v2851_v57 = vadd.f32 1e-05, %v2848_v56 }
0x13b5   :  { %v2846_v59 = vpop.xlane.xlu1 %2845 }
0x13b6   :  { %18435 = vrsqrt.f32 %v2851_v57  ;;  %v2849_v20 = vmul.f32 0.03125, %v2846_v59 }
0x13b8   :  { %v2852_v60 = vadd.f32 1e-05, %v2849_v20 }
0x13ba   :  { %18437 = vrsqrt.f32 %v2852_v60  ;;  %v19884_v60 = vld [vmem:[%s23030_s30 + $0x10] sm:$0x3f] }
0x13bf   :  { %v18434_v62 = vpop.eup %18433 }
0x13c0   :  { %v2856_v1 = vmul.f32 %v18434_v62, %v2832_v53 }
0x13c2   :  { %v2865_v2 = vmul.f32 %v14498_v63, %v2856_v1 }
0x13c3   :  { %v18436_v3 = vpop.eup %18435 }
0x13c4   :  { %v19734_v4 = vadd.f32 %v14499_v26, %v2865_v2  ;;  %v2857_v32 = vmul.f32 %v18436_v3, %v2833_v27 }
0x13c6   :  { %v2866_v35 = vmul.f32 %v14498_v63, %v2857_v32  ;;  %16573 = vmatmul.mubr.msk.f32.vlgmr.msra.gmra.mxu0 %vm79_vm0, %v19734_v4  ;;  %16607 = vmatmul.mubr.msk.f32.vlgmr.msra.gmra.mxu1 %vm79_vm0, %v19734_v4 }
0x13c7   :  { %16582 = vmatpush3.msra.mxu0 %v14510_v5  ;;  %16575 = vmatprep.mubr.msk.f32.mxu0 %vm18743_vm2, %v18742_v21  ;;  %v18438_v45 = vpop.eup %18437 }
0x13c8   :  { %v19748_v7 = vadd.f32 %v14499_v26, %v2866_v35  ;;  %16583 = vmatprep.subr.mxu0 %v18742_v21  ;;  %16609 = vmatprep.mubr.msk.f32.mxu1 %vm18743_vm2, %v18742_v21  ;;  %v2858_v58 = vmul.f32 %v18438_v45, %v2834_v38  ;;  %v14549_v38 = vld [vmem:[%s23029_s4 + $0xb8] sm:$0xff] }
0x13c9   :  { %16584 = vmatpush3.msra.mxu0 %v14509_v6 }
0x13ca   :  { %16576 = vmatmul.mubr.msk.f32.gmra.mxu0 %vm79_vm0, %v19748_v7  ;;  %16610 = vmatmul.mubr.msk.f32.gmra.mxu1 %vm79_vm0, %v19748_v7  ;;  %v2867_v54 = vmul.f32 %v14498_v63, %v2858_v58 }
0x13cb   :  { %16585 = vmatprep.subr.mxu0 %v18742_v21  ;;  %16578 = vmatprep.mubr.msk.f32.mxu0 %vm18743_vm2, %v18742_v21 }
0x13cc   :  { %16586 = vmatpush3.msra.mxu0 %v14508_v8  ;;  %16612 = vmatprep.mubr.msk.f32.mxu1 %vm18743_vm2, %v18742_v21  ;;  %v19768_v0 = vadd.f32 %v14499_v26, %v2867_v54 }
0x13cd   :  { %16587 = vmatprep.subr.mxu0 %v18742_v21 }
0x13ce   :  { %16588 = vmatpush3.msra.mxu0 %v14507_v9  ;;  %16613 = vmatmul.mubr.msk.f32.gmra.mxu1 %vm79_vm0, %v19768_v0 }
0x13cf   :  { %16579 = vmatmul.mubr.msk.f32.gmra.mxu0 %vm79_vm0, %v19768_v0  ;;  %16615 = vmatprep.subr.mxu0 %v18742_v21 }
0x13d0   :  { %16589 = vmatprep.mubr.msk.f32.mxu0 %vm18743_vm2, %v18742_v21  ;;  %16636 = vmatprep.mubr.msk.f32.mxu1 %vm18743_vm2, %v18742_v21 }
0x13d3   :  { %16590 = vmatmul.mubr.msk.f32.vlgmr.msra.gmra.mxu0 %vm79_vm0, %v19734_v4 }
0x13d4   :  { %16592 = vmatprep.mubr.msk.f32.mxu0 %vm18743_vm2, %v18742_v21 }
0x13d7   :  { %16593 = vmatmul.mubr.msk.f32.gmra.mxu0 %vm79_vm0, %v19748_v7 }
0x13d8   :  { %16595 = vmatprep.mubr.msk.f32.mxu0 %vm18743_vm2, %v18742_v21 }
0x13db   :  { %16596 = vmatmul.mubr.msk.f32.gmra.mxu0 %vm79_vm0, %v19768_v0 }
0x13dc   :  { %16621 = vmatprep.mubr.msk.f32.mxu0 %vm18743_vm2, %v18742_v21 }
0x1486   :  { %v2957_v10 = vpop.f32.mrf.mxu0  ;;  %v3127_v61 = vpop.f32.mrf.mxu1 }
0x1488   :  { %v16574_v12 = vpop.f32.mrf.mxu0  ;;  %v16608_v13 = vpop.f32.mrf.mxu1 }
0x148a   :  { %v2962_v14 = vpop.f32.mrf.mxu0  ;;  %v3132_v16 = vpop.f32.mrf.mxu1 }
0x148c   :  { %v16577_v46 = vpop.f32.mrf.mxu0  ;;  %v16611_v17 = vpop.f32.mrf.mxu1 }
0x148e   :  { %v3137_v43 = vpop.f32.mrf.mxu1 }
0x148f   :  { %v2967_v37 = vpop.f32.mrf.mxu0  ;;  %16631 = vmatpush3.msk.msra.mxu1 %vm549_vm4, %v3137_v43 }
0x1490   :  { %v16614_v22 = vpop.f32.mrf.mxu1  ;;  %16632 = vmatprep.subr.mxu1 %v18742_v21 }
0x1491   :  { %v16580_v19 = vpop.f32.mrf.mxu0  ;;  %16633 = vmatpush3.msra.mxu1 %v3132_v16 }
0x1492   :  { %16634 = vmatprep.subr.mxu1 %v18742_v21 }
0x1493   :  { %v3042_v53 = vpop.f32.mrf.mxu0  ;;  %16635 = vmatpush3.msra.mxu1 %v3127_v61 }
0x1494   :  { %16662 = vmatprep.subr.mxu1 %v18742_v21 }
0x1495   :  { %v16591_v55 = vpop.f32.mrf.mxu0 }
0x1497   :  { %v3047_v23 = vpop.f32.mrf.mxu0 }
0x1499   :  { %v16594_v25 = vpop.f32.mrf.mxu0 }
0x149b   :  { %v3052_v27 = vpop.f32.mrf.mxu0 }
0x149c   :  { %16616 = vmatpush3.xpose.msk.msra.mxu0 %vm400_vm3, %v3052_v27 }
0x149d   :  { %v16597_v28 = vpop.f32.mrf.mxu0  ;;  %16617 = vmatprep.subr.mxu0 %v18742_v21 }
0x14a0   :  { %16618 = vmatpush3.xpose.msk.msra.mxu0 %vm400_vm3, %v3047_v23 }
0x14a1   :  { %16619 = vmatprep.subr.mxu0 %v18742_v21 }
0x14a4   :  { %16620 = vmatpush3.xpose.msk.msra.mxu0 %vm400_vm3, %v3042_v53 }
0x14a5   :  { %16645 = vmatprep.subr.mxu0 %v18742_v21 }
0x14a7   :  { %16622 = vmatmul.mubr.msk.f32.vlgmr.msra.gmra.mxu0 %vm400_vm3, %v2957_v10 }
0x14a8   :  { %16624 = vmatprep.mubr.msk.f32.mxu0 %vm18743_vm2, %v18742_v21  ;;  %16646 = vmatpush3.msra.mxu0 %v14535_v44 }
0x14a9   :  { %16647 = vmatprep.subr.mxu0 %v18742_v21 }
0x14aa   :  { %16648 = vmatpush3.msra.mxu0 %v14534_v30  ;;  %v14542_v30 = vld [vmem:[%s23026_s26 + $0xb8] sm:$0xff] }
0x14ab   :  { %16625 = vmatmul.mubr.msk.f32.gmra.mxu0 %vm400_vm3, %v2962_v14  ;;  %16649 = vmatprep.subr.mxu0 %v18742_v21 }
0x14ac   :  { %16627 = vmatprep.mubr.msk.f32.mxu0 %vm18743_vm2, %v18742_v21  ;;  %16650 = vmatpush3.msra.mxu0 %v14533_v33  ;;  %v14541_v33 = vld [vmem:[%s23026_s26 + $0xb0] sm:$0xff] }
0x14ad   :  { %16651 = vmatprep.subr.mxu0 %v18742_v21 }
0x14ae   :  { %16652 = vmatpush3.msra.mxu0 %v14532_v34 }
0x14af   :  { %16628 = vmatmul.mubr.msk.f32.gmra.mxu0 %vm400_vm3, %v2967_v37  ;;  %16679 = vmatprep.subr.mxu0 %v18742_v21 }
0x14b0   :  { %16653 = vmatprep.mubr.msk.f32.mxu0 %vm18743_vm2, %v18742_v21 }
0x14b3   :  { %16654 = vmatmul.mubr.msk.f32.vlgmr.msra.gmra.mxu0 %vm79_vm0, %v19734_v4 }
0x14b4   :  { %16656 = vmatprep.mubr.msk.f32.mxu0 %vm18743_vm2, %v18742_v21  ;;  %16680 = vmatpush3.msra.mxu0 %v14549_v38 }
0x14b5   :  { %16681 = vmatprep.subr.mxu0 %v18742_v21 }
0x14b6   :  { %16682 = vmatpush3.msra.mxu0 %v14548_v31  ;;  %v14540_v31 = vld [vmem:[%s23026_s26 + $0xa8] sm:$0xff] }
0x14b7   :  { %16657 = vmatmul.mubr.msk.f32.gmra.mxu0 %vm79_vm0, %v19748_v7  ;;  %16683 = vmatprep.subr.mxu0 %v18742_v21 }
0x14b8   :  { %16659 = vmatprep.mubr.msk.f32.mxu0 %vm18743_vm2, %v18742_v21  ;;  %16684 = vmatpush3.msra.mxu0 %v14547_v24  ;;  %v14539_v24 = vld [vmem:[%s23026_s26 + $0xa0] sm:$0xff] }
0x14b9   :  { %16685 = vmatprep.subr.mxu0 %v18742_v21 }
0x14ba   :  { %16686 = vmatpush3.msra.mxu0 %v14546_v48 }
0x14bb   :  { %16660 = vmatmul.mubr.msk.f32.gmra.mxu0 %vm79_vm0, %v19768_v0  ;;  %16711 = vmatprep.subr.mxu0 %v18742_v21 }
0x14bc   :  { %16687 = vmatprep.mubr.msk.f32.mxu0 %vm18743_vm2, %v18742_v21 }
0x14bf   :  { %16688 = vmatmul.mubr.msk.f32.vlgmr.msra.gmra.mxu0 %vm79_vm0, %v19734_v4 }
0x14c0   :  { %16690 = vmatprep.mubr.msk.f32.mxu0 %vm18743_vm2, %v18742_v21 }
0x14c3   :  { %16691 = vmatmul.mubr.msk.f32.gmra.mxu0 %vm79_vm0, %v19748_v7 }
0x14c4   :  { %16693 = vmatprep.mubr.msk.f32.mxu0 %vm18743_vm2, %v18742_v21 }
0x14c7   :  { %16694 = vmatmul.mubr.msk.f32.gmra.mxu0 %vm79_vm0, %v19768_v0 }
0x14c8   :  { %16717 = vmatprep.mubr.msk.f32.mxu0 %vm18743_vm2, %v18742_v21 }
0x1567   :  { %v3225_v40 = vpop.f32.mrf.mxu0 }
0x1568   :  { %v3239_v41 = vmul.f32 0.35355338, %v3225_v40 }
0x1569   :  { %v16623_v36 = vpop.f32.mrf.mxu0 }
0x156a   :  { %v3242_v29 = vadd.f32 %v19870_v39, %v3239_v41 }
0x156b   :  { %v3230_v50 = vpop.f32.mrf.mxu0 }
0x156c   :  { %v3240_v52 = vmul.f32 0.35355338, %v3230_v50  ;;  %v3245_v42 = vsel %vm505_vm5, %v3242_v29, -inf }
0x156d   :  { %3246 = vmax.xlane.f32.xlu0 %v3245_v42  ;;  %v16626_v47 = vpop.f32.mrf.mxu0 }
0x156e   :  { %v3243_v51 = vadd.f32 %v19877_v49, %v3240_v52 }
0x156f   :  { %v3235_v56 = vpop.f32.mrf.mxu0 }
0x1570   :  { %v3241_v57 = vmul.f32 0.35355338, %v3235_v56  ;;  %v3248_v59 = vsel %vm505_vm5, %v3243_v51, -inf }
0x1571   :  { %3249 = vmax.xlane.f32.xlu1 %v3248_v59  ;;  %v16629_v20 = vpop.f32.mrf.mxu0 }
0x1572   :  { %v3244_v62 = vadd.f32 %v19884_v60, %v3241_v57 }
0x1573   :  { %v19887_v63 = vpop.f32.mrf.mxu0 }
0x1574   :  { %v3251_v1 = vsel %vm512_vm6, %v3244_v62, -inf }
0x1575   :  { %3252 = vmax.xlane.f32.xlu0 %v3251_v1  ;;  %v16655_v26 = vpop.f32.mrf.mxu0 }
0x1577   :  { %v19890_v2 = vpop.f32.mrf.mxu0 }
0x1579   :  { %v16658_v3 = vpop.f32.mrf.mxu0 }
0x157b   :  { %v19892_v32 = vpop.f32.mrf.mxu0 }
0x157d   :  { %v16661_v5 = vpop.f32.mrf.mxu0 }
0x157f   :  { %v3613_v35 = vpop.f32.mrf.mxu0 }
0x1581   :  { %v16689_v6 = vpop.f32.mrf.mxu0 }
0x1583   :  { %v3618_v45 = vpop.f32.mrf.mxu0 }
0x1585   :  { %v16692_v58 = vpop.f32.mrf.mxu0 }
0x1587   :  { %v3623_v8 = vpop.f32.mrf.mxu0 }
0x1588   :  { %16712 = vmatpush3.msk.msra.mxu0 %vm549_vm4, %v3623_v8 }
0x1589   :  { %v16695_v54 = vpop.f32.mrf.mxu0  ;;  %16713 = vmatprep.subr.mxu0 %v18742_v21 }
0x158a   :  { %16714 = vmatpush3.msra.mxu0 %v3618_v45 }
0x158b   :  { %16715 = vmatprep.subr.mxu0 %v18742_v21 }
0x158c   :  { %16716 = vmatpush3.msra.mxu0 %v3613_v35 }
0x158d   :  { %16737 = vmatprep.subr.mxu0 %v18742_v21 }
0x15f6   :  { %v3247_v9 = vpop.xlane.xlu0 %3246 }
0x15f7   :  { %v3254_v10 = vsub.f32 %v3242_v29, %v3247_v9 }
0x15f9   :  { %v3257_v61 = vmul.f32 1.442695, %v3254_v10 }
0x15fa   :  { %v3250_v12 = vpop.xlane.xlu1 %3249 }
0x15fb   :  { %18439 = vpow2.f32 %v3257_v61  ;;  %v3255_v13 = vsub.f32 %v3243_v51, %v3250_v12 }
0x15fd   :  { %v3259_v14 = vmul.f32 1.442695, %v3255_v13 }
0x15fe   :  { %v3253_v16 = vpop.xlane.xlu0 %3252 }
0x15ff   :  { %18441 = vpow2.f32 %v3259_v14  ;;  %v3256_v46 = vsub.f32 %v3244_v62, %v3253_v16 }
0x1601   :  { %v3261_v17 = vmul.f32 1.442695, %v3256_v46 }
0x1603   :  { %18443 = vpow2.f32 %v3261_v17 }
0x1608   :  { %v18440_v37 = vpop.eup %18439 }
0x1609   :  { %v3263_v43 = vsel %vm505_vm5, %v18440_v37, 0.0 }
0x160a   :  { %3264 = vadd.xlane.f32.xlu1 %v3263_v43 }
0x160c   :  { %v18442_v19 = vpop.eup %18441 }
0x160d   :  { %v3266_v22 = vsel %vm505_vm5, %v18442_v19, 0.0 }
0x160e   :  { %3267 = vadd.xlane.f32.xlu0 %v3266_v22 }
0x1610   :  { %v18444_v53 = vpop.eup %18443 }
0x1611   :  { %v3269_v55 = vsel %vm512_vm6, %v18444_v53, 0.0 }
0x1612   :  { %3270 = vadd.xlane.f32.xlu1 %v3269_v55 }
0x1693   :  { %v3265_v23 = vpop.xlane.xlu1 %3264 }
0x1694   :  { %18445 = vrcp.f32 %v3265_v23 }
0x1697   :  { %v3268_v25 = vpop.xlane.xlu0 %3267 }
0x1698   :  { %18447 = vrcp.f32 %v3268_v25  ;;  %v14563_v25 = vld [vmem:[%s22994_s7 + $0x28] sm:$0xff] }
0x169b   :  { %v3271_v27 = vpop.xlane.xlu1 %3270 }
0x169c   :  { %18449 = vrcp.f32 %v3271_v27 }
0x16a1   :  { %v18446_v28 = vpop.eup %18445 }
0x16a2   :  { %v3275_v44 = vmul.f32 %v18446_v28, %v18440_v37 }
0x16a4   :  { %16637 = vmatmul.mubr.msk.f32.vlgmr.msra.gmra.mxu1 %vm505_vm5, %v3275_v44 }
0x16a5   :  { %v18448_v34 = vpop.eup %18447  ;;  %16663 = vmatpush3.msra.mxu1 %v14542_v30  ;;  %16639 = vmatprep.mubr.msk.f32.mxu1 %vm18743_vm2, %v18742_v21 }
0x16a6   :  { %16664 = vmatprep.subr.mxu1 %v18742_v21  ;;  %v3276_v38 = vmul.f32 %v18448_v34, %v18442_v19  ;;  %v14531_v34 = vld [vmem:[%s22994_s7 + $0x20] sm:$0xff] }
0x16a7   :  { %16665 = vmatpush3.msra.mxu1 %v14541_v33 }
0x16a8   :  { %16640 = vmatmul.mubr.msk.f32.gmra.mxu1 %vm505_vm5, %v3276_v38  ;;  %16666 = vmatprep.subr.mxu1 %v18742_v21 }
0x16a9   :  { %v18450_v48 = vpop.eup %18449  ;;  %16642 = vmatprep.mubr.msk.f32.mxu1 %vm18743_vm2, %v18742_v21  ;;  %16667 = vmatpush3.msra.mxu1 %v14540_v31 }
0x16aa   :  { %v3277_v40 = vmul.f32 %v18450_v48, %v18444_v53  ;;  %16668 = vmatprep.subr.mxu1 %v18742_v21 }
0x16ab   :  { %16669 = vmatpush3.msra.mxu1 %v14539_v24 }
0x16ac   :  { %16643 = vmatmul.mubr.msk.f32.gmra.mxu1 %vm505_vm5, %v3277_v40  ;;  %16696 = vmatprep.subr.mxu1 %v18742_v21  ;;  %v14580_v40 = vld [vmem:[%s23026_s26 + $0xd8] sm:$0xff] }
0x16ad   :  { %16670 = vmatprep.mubr.msk.f32.mxu1 %vm18743_vm2, %v18742_v21 }
0x16b0   :  { %16671 = vmatmul.mubr.msk.f32.vlgmr.msra.gmra.mxu1 %vm79_vm0, %v19734_v4 }
0x16b1   :  { %16673 = vmatprep.mubr.msk.f32.mxu1 %vm18743_vm2, %v18742_v21 }
0x16b4   :  { %16674 = vmatmul.mubr.msk.f32.gmra.mxu1 %vm79_vm0, %v19748_v7 }
0x16b5   :  { %16676 = vmatprep.mubr.msk.f32.mxu1 %vm18743_vm2, %v18742_v21 }
0x16b8   :  { %16677 = vmatmul.mubr.msk.f32.gmra.mxu1 %vm79_vm0, %v19768_v0 }
0x16b9   :  { %16702 = vmatprep.mubr.msk.f32.mxu1 %vm18743_vm2, %v18742_v21 }
0x1764   :  { %v19938_v41 = vpop.f32.mrf.mxu1 }
0x1766   :  { %v16638_v36 = vpop.f32.mrf.mxu1 }
0x1767   :  { %v14579_v36 = vld [vmem:[%s23026_s26 + $0xd0] sm:$0xff] }
0x1768   :  { %v19940_v29 = vpop.f32.mrf.mxu1 }
0x176a   :  { %v16641_v50 = vpop.f32.mrf.mxu1 }
0x176b   :  { %v14578_v50 = vld [vmem:[%s23026_s26 + $0xc8] sm:$0xff] }
0x176c   :  { %v19942_v52 = vpop.f32.mrf.mxu1 }
0x176e   :  { %v16644_v42 = vpop.f32.mrf.mxu1 }
0x176f   :  { %v14572_v42 = vld [vmem:[%s23025_s24 + $0xd0] sm:$0xff] }
0x1770   :  { %v3528_v47 = vpop.f32.mrf.mxu1 }
0x1772   :  { %v16672_v51 = vpop.f32.mrf.mxu1 }
0x1773   :  { %v14571_v51 = vld [vmem:[%s23025_s24 + $0xc8] sm:$0xff] }
0x1774   :  { %v3533_v56 = vpop.f32.mrf.mxu1 }
0x1776   :  { %v16675_v57 = vpop.f32.mrf.mxu1 }
0x1777   :  { %v14570_v57 = vld [vmem:[%s23025_s24 + $0xc0] sm:$0xff] }
0x1778   :  { %v3538_v59 = vpop.f32.mrf.mxu1 }
0x1779   :  { %16697 = vmatpush3.xpose.msk.msra.mxu1 %vm400_vm3, %v3538_v59 }
0x177a   :  { %v16678_v20 = vpop.f32.mrf.mxu1  ;;  %16698 = vmatprep.subr.mxu1 %v18742_v21 }
0x177d   :  { %16699 = vmatpush3.xpose.msk.msra.mxu1 %vm400_vm3, %v3533_v56 }
0x177e   :  { %16700 = vmatprep.subr.mxu1 %v18742_v21 }
0x1781   :  { %16701 = vmatpush3.xpose.msk.msra.mxu1 %vm400_vm3, %v3528_v47 }
0x1782   :  { %16726 = vmatprep.subr.mxu1 %v18742_v21 }
0x1784   :  { %16703 = vmatmul.mubr.msk.f32.vlgmr.msra.gmra.mxu1 %vm400_vm3, %v19887_v63 }
0x1785   :  { %16705 = vmatprep.mubr.msk.f32.mxu1 %vm18743_vm2, %v18742_v21  ;;  %16727 = vmatpush3.msra.mxu1 %v14563_v25 }
0x1786   :  { %16748 = vmatprep.subr.mxu1 %v18742_v21 }
0x1788   :  { %16706 = vmatmul.mubr.msk.f32.gmra.mxu1 %vm400_vm3, %v19890_v2 }
0x1789   :  { %16708 = vmatprep.mubr.msk.f32.mxu1 %vm18743_vm2, %v18742_v21 }
0x178c   :  { %16709 = vmatmul.mubr.msk.f32.gmra.mxu1 %vm400_vm3, %v19892_v32 }
0x178d   :  { %16728 = vmatprep.mubr.msk.f32.mxu1 %vm18743_vm2, %v18742_v21 }
0x1844   :  { %v3711_v62 = vpop.f32.mrf.mxu1 }
0x1845   :  { %v3725_v1 = vmul.f32 0.35355338, %v3711_v62 }
0x1846   :  { %v16704_v26 = vpop.f32.mrf.mxu1 }
0x1847   :  { %v3728_v63 = vadd.f32 %v19870_v39, %v3725_v1  ;;  %v14587_v1 = vld [vmem:[%s23029_s4 + $0xd8] sm:$0xff] }
0x1848   :  { %v3716_v3 = vpop.f32.mrf.mxu1 }
0x1849   :  { %v3726_v5 = vmul.f32 0.35355338, %v3716_v3  ;;  %v3731_v35 = vsel %vm505_vm5, %v3728_v63, -inf }
0x184a   :  { %3732 = vmax.xlane.f32.xlu0 %v3731_v35  ;;  %v16707_v2 = vpop.f32.mrf.mxu1 }
0x184b   :  { %v3729_v6 = vadd.f32 %v19877_v49, %v3726_v5  ;;  %v14585_v5 = vld [vmem:[%s23029_s4 + $0xc8] sm:$0xff]  ;;  %v14584_v2 = vld [vmem:[%s23029_s4 + $0xc0] sm:$0xff] }
0x184c   :  { %v3721_v45 = vpop.f32.mrf.mxu1 }
0x184d   :  { %v3727_v58 = vmul.f32 0.35355338, %v3721_v45  ;;  %v3734_v32 = vsel %vm505_vm5, %v3729_v6, -inf }
0x184e   :  { %3735 = vmax.xlane.f32.xlu1 %v3734_v32  ;;  %v16710_v8 = vpop.f32.mrf.mxu1 }
0x184f   :  { %v3730_v54 = vadd.f32 %v19884_v60, %v3727_v58 }
0x1851   :  { %v3737_v9 = vsel %vm512_vm6, %v3730_v54, -inf }
0x1852   :  { %3738 = vmax.xlane.f32.xlu0 %v3737_v9 }
0x18d3   :  { %v3733_v10 = vpop.xlane.xlu0 %3732 }
0x18d4   :  { %v3740_v61 = vsub.f32 %v3728_v63, %v3733_v10  ;;  %v14586_v63 = vld [vmem:[%s23029_s4 + $0xd0] sm:$0xff] }
0x18d6   :  { %v3743_v12 = vmul.f32 1.442695, %v3740_v61 }
0x18d7   :  { %v3736_v13 = vpop.xlane.xlu1 %3735 }
0x18d8   :  { %18451 = vpow2.f32 %v3743_v12  ;;  %v3741_v14 = vsub.f32 %v3729_v6, %v3736_v13 }
0x18da   :  { %v3745_v16 = vmul.f32 1.442695, %v3741_v14 }
0x18db   :  { %v3739_v46 = vpop.xlane.xlu0 %3738 }
0x18dc   :  { %18453 = vpow2.f32 %v3745_v16  ;;  %v3742_v17 = vsub.f32 %v3730_v54, %v3739_v46 }
0x18de   :  { %v3747_v37 = vmul.f32 1.442695, %v3742_v17 }
0x18e0   :  { %18455 = vpow2.f32 %v3747_v37 }
0x18e5   :  { %v18452_v43 = vpop.eup %18451 }
0x18e6   :  { %v3749_v19 = vsel %vm505_vm5, %v18452_v43, 0.0 }
0x18e7   :  { %3750 = vadd.xlane.f32.xlu1 %v3749_v19 }
0x18e9   :  { %v18454_v22 = vpop.eup %18453 }
0x18ea   :  { %v3752_v53 = vsel %vm505_vm5, %v18454_v22, 0.0 }
0x18eb   :  { %3753 = vadd.xlane.f32.xlu0 %v3752_v53 }
0x18ed   :  { %v18456_v55 = vpop.eup %18455 }
0x18ee   :  { %v3755_v23 = vsel %vm512_vm6, %v18456_v55, 0.0 }
0x18ef   :  { %3756 = vadd.xlane.f32.xlu1 %v3755_v23 }
0x1970   :  { %v3751_v27 = vpop.xlane.xlu1 %3750 }
0x1971   :  { %18457 = vrcp.f32 %v3751_v27 }
0x1974   :  { %v3754_v28 = vpop.xlane.xlu0 %3753 }
0x1975   :  { %18459 = vrcp.f32 %v3754_v28 }
0x1978   :  { %v3757_v44 = vpop.xlane.xlu1 %3756 }
0x1979   :  { %18461 = vrcp.f32 %v3757_v44 }
0x197e   :  { %v18458_v30 = vpop.eup %18457 }
0x197f   :  { %v3761_v33 = vmul.f32 %v18458_v30, %v18452_v43 }
0x1981   :  { %16718 = vmatmul.mubr.msk.f32.vlgmr.msra.gmra.mxu0 %vm505_vm5, %v3761_v33 }
0x1982   :  { %v18460_v38 = vpop.eup %18459  ;;  %16720 = vmatprep.mubr.msk.f32.mxu0 %vm18743_vm2, %v18742_v21  ;;  %16738 = vmatpush3.msra.mxu0 %v14531_v34 }
0x1983   :  { %v3762_v31 = vmul.f32 %v18460_v38, %v18454_v22  ;;  %16765 = vmatprep.subr.mxu0 %v18742_v21 }
0x1985   :  { %16721 = vmatmul.mubr.msk.f32.gmra.mxu0 %vm505_vm5, %v3762_v31 }
0x1986   :  { %v18462_v24 = vpop.eup %18461  ;;  %16723 = vmatprep.mubr.msk.f32.mxu0 %vm18743_vm2, %v18742_v21 }
0x1987   :  { %v3763_v48 = vmul.f32 %v18462_v24, %v18456_v55 }
0x1989   :  { %16724 = vmatmul.mubr.msk.f32.gmra.mxu0 %vm505_vm5, %v3763_v48 }
0x198a   :  { %16739 = vmatprep.mubr.msk.f32.mxu0 %vm18743_vm2, %v18742_v21 }
0x198d   :  { %16740 = vmatmul.mubr.msk.f32.vlgmr.msra.gmra.mxu0 %vm400_vm3, %v19938_v41  ;;  %v14577_v41 = vld [vmem:[%s23026_s26 + $0xc0] sm:$0xff] }
0x198e   :  { %16742 = vmatprep.mubr.msk.f32.mxu0 %vm18743_vm2, %v18742_v21  ;;  %16766 = vmatpush3.msra.mxu0 %v14580_v40 }
0x198f   :  { %16767 = vmatprep.subr.mxu0 %v18742_v21 }
0x1990   :  { %16768 = vmatpush3.msra.mxu0 %v14579_v36 }
0x1991   :  { %16743 = vmatmul.mubr.msk.f32.gmra.mxu0 %vm400_vm3, %v19940_v29  ;;  %16769 = vmatprep.subr.mxu0 %v18742_v21  ;;  %v14573_v29 = vld [vmem:[%s23025_s24 + $0xd8] sm:$0xff] }
0x1992   :  { %16745 = vmatprep.mubr.msk.f32.mxu0 %vm18743_vm2, %v18742_v21  ;;  %16770 = vmatpush3.msra.mxu0 %v14578_v50 }
0x1993   :  { %16771 = vmatprep.subr.mxu0 %v18742_v21 }
0x1994   :  { %16772 = vmatpush3.msra.mxu0 %v14577_v41 }
0x1995   :  { %16746 = vmatmul.mubr.msk.f32.gmra.mxu0 %vm400_vm3, %v19942_v52  ;;  %16799 = vmatprep.subr.mxu0 %v18742_v21 }
0x1996   :  { %16773 = vmatprep.mubr.msk.f32.mxu0 %vm18743_vm2, %v18742_v21 }
0x1999   :  { %16774 = vmatmul.mubr.msk.f32.vlgmr.msra.gmra.mxu0 %vm79_vm0, %v19734_v4 }
0x199a   :  { %16776 = vmatprep.mubr.msk.f32.mxu0 %vm18743_vm2, %v18742_v21 }
0x199d   :  { %16777 = vmatmul.mubr.msk.f32.gmra.mxu0 %vm79_vm0, %v19748_v7 }
0x199e   :  { %16779 = vmatprep.mubr.msk.f32.mxu0 %vm18743_vm2, %v18742_v21 }
0x19a1   :  { %16780 = vmatmul.mubr.msk.f32.gmra.mxu0 %vm79_vm0, %v19768_v0 }
0x19a2   :  { %16805 = vmatprep.mubr.msk.f32.mxu0 %vm18743_vm2, %v18742_v21 }
0x1a41   :  { %v3842_v52 = vpop.f32.mrf.mxu0 }
0x1a42   :  { %16729 = vmatmul.mubr.msk.f32.vlgmr.msra.gmra.mxu1 %vm400_vm3, %v3842_v52 }
0x1a43   :  { %v16719_v47 = vpop.f32.mrf.mxu0  ;;  %16749 = vmatpush3.msra.mxu1 %v14573_v29  ;;  %16731 = vmatprep.mubr.msk.f32.mxu1 %vm18743_vm2, %v18742_v21 }
0x1a44   :  { %16750 = vmatprep.subr.mxu1 %v18742_v21 }
0x1a45   :  { %v3847_v56 = vpop.f32.mrf.mxu0  ;;  %16751 = vmatpush3.msra.mxu1 %v14572_v42 }
0x1a46   :  { %16732 = vmatmul.mubr.msk.f32.gmra.mxu1 %vm400_vm3, %v3847_v56  ;;  %16752 = vmatprep.subr.mxu1 %v18742_v21 }
0x1a47   :  { %v16722_v59 = vpop.f32.mrf.mxu0  ;;  %16734 = vmatprep.mubr.msk.f32.mxu1 %vm18743_vm2, %v18742_v21  ;;  %16753 = vmatpush3.msra.mxu1 %v14571_v51 }
0x1a48   :  { %16754 = vmatprep.subr.mxu1 %v18742_v21 }
0x1a49   :  { %v3852_v20 = vpop.f32.mrf.mxu0  ;;  %16755 = vmatpush3.msra.mxu1 %v14570_v57 }
0x1a4a   :  { %16735 = vmatmul.mubr.msk.f32.gmra.mxu1 %vm400_vm3, %v3852_v20  ;;  %16782 = vmatprep.subr.mxu1 %v18742_v21 }
0x1a4b   :  { %v16725_v62 = vpop.f32.mrf.mxu0  ;;  %16756 = vmatprep.mubr.msk.f32.mxu1 %vm18743_vm2, %v18742_v21 }
0x1a4d   :  { %v20056_v26 = vpop.f32.mrf.mxu0 }
0x1a4e   :  { %16757 = vmatmul.mubr.msk.f32.vlgmr.msra.gmra.mxu1 %vm79_vm0, %v19734_v4 }
0x1a4f   :  { %v16741_v3 = vpop.f32.mrf.mxu0  ;;  %16759 = vmatprep.mubr.msk.f32.mxu1 %vm18743_vm2, %v18742_v21  ;;  %16783 = vmatpush3.msra.mxu1 %v14587_v1 }
0x1a50   :  { %16784 = vmatprep.subr.mxu1 %v18742_v21 }
0x1a51   :  { %v20069_v35 = vpop.f32.mrf.mxu0  ;;  %16785 = vmatpush3.msra.mxu1 %v14586_v63 }
0x1a52   :  { %16760 = vmatmul.mubr.msk.f32.gmra.mxu1 %vm79_vm0, %v19748_v7  ;;  %16786 = vmatprep.subr.mxu1 %v18742_v21 }
0x1a53   :  { %v16744_v6 = vpop.f32.mrf.mxu0  ;;  %16762 = vmatprep.mubr.msk.f32.mxu1 %vm18743_vm2, %v18742_v21  ;;  %16787 = vmatpush3.msra.mxu1 %v14585_v5 }
0x1a54   :  { %16788 = vmatprep.subr.mxu1 %v18742_v21 }
0x1a55   :  { %v20080_v45 = vpop.f32.mrf.mxu0  ;;  %16789 = vmatpush3.msra.mxu1 %v14584_v2 }
0x1a56   :  { %16763 = vmatmul.mubr.msk.f32.gmra.mxu1 %vm79_vm0, %v19768_v0  ;;  %16814 = vmatprep.subr.mxu1 %v18742_v21 }
0x1a57   :  { %v16747_v58 = vpop.f32.mrf.mxu0  ;;  %16790 = vmatprep.mubr.msk.f32.mxu1 %vm18743_vm2, %v18742_v21 }
0x1a59   :  { %v4192_v32 = vpop.f32.mrf.mxu0 }
0x1a5a   :  { %16791 = vmatmul.mubr.msk.f32.vlgmr.msra.gmra.mxu1 %vm79_vm0, %v19734_v4 }
0x1a5b   :  { %v16775_v8 = vpop.f32.mrf.mxu0  ;;  %16793 = vmatprep.mubr.msk.f32.mxu1 %vm18743_vm2, %v18742_v21 }
0x1a5d   :  { %v4197_v54 = vpop.f32.mrf.mxu0 }
0x1a5e   :  { %16794 = vmatmul.mubr.msk.f32.gmra.mxu1 %vm79_vm0, %v19748_v7 }
0x1a5f   :  { %v16778_v9 = vpop.f32.mrf.mxu0  ;;  %16796 = vmatprep.mubr.msk.f32.mxu1 %vm18743_vm2, %v18742_v21 }
0x1a60   :  { %v14601_v9 = vld [vmem:[%s22994_s7 + $0x30] sm:$0xff] }
0x1a61   :  { %v4202_v10 = vpop.f32.mrf.mxu0 }
0x1a62   :  { %16797 = vmatmul.mubr.msk.f32.gmra.mxu1 %vm79_vm0, %v19768_v0  ;;  %16800 = vmatpush3.xpose.msk.msra.mxu0 %vm400_vm3, %v4202_v10 }
0x1a63   :  { %v16781_v61 = vpop.f32.mrf.mxu0  ;;  %16801 = vmatprep.subr.mxu0 %v18742_v21  ;;  %16820 = vmatprep.mubr.msk.f32.mxu1 %vm18743_vm2, %v18742_v21 }
0x1a66   :  { %16802 = vmatpush3.xpose.msk.msra.mxu0 %vm400_vm3, %v4197_v54 }
0x1a67   :  { %16803 = vmatprep.subr.mxu0 %v18742_v21 }
0x1a6a   :  { %16804 = vmatpush3.xpose.msk.msra.mxu0 %vm400_vm3, %v4192_v32 }
0x1a6b   :  { %16829 = vmatprep.subr.mxu0 %v18742_v21 }
0x1b02   :  { %v20105_v12 = vpop.f32.mrf.mxu1 }
0x1b04   :  { %v16730_v13 = vpop.f32.mrf.mxu1 }
0x1b06   :  { %v20107_v14 = vpop.f32.mrf.mxu1 }
0x1b08   :  { %v16733_v16 = vpop.f32.mrf.mxu1 }
0x1b0a   :  { %v20109_v46 = vpop.f32.mrf.mxu1 }
0x1b0c   :  { %v16736_v17 = vpop.f32.mrf.mxu1 }
0x1b0e   :  { %v4107_v37 = vpop.f32.mrf.mxu1 }
0x1b0f   :  { %16806 = vmatmul.mubr.msk.f32.vlgmr.msra.gmra.mxu0 %vm400_vm3, %v4107_v37  ;;  %v14608_v37 = vld [vmem:[%s23025_s24 + $0xf8] sm:$0xff] }
0x1b10   :  { %v16758_v43 = vpop.f32.mrf.mxu1  ;;  %16808 = vmatprep.mubr.msk.f32.mxu0 %vm18743_vm2, %v18742_v21  ;;  %16830 = vmatpush3.msra.mxu0 %v14601_v9 }
0x1b11   :  { %16857 = vmatprep.subr.mxu0 %v18742_v21  ;;  %v14607_v43 = vld [vmem:[%s23025_s24 + $0xf0] sm:$0xff] }
0x1b12   :  { %v4112_v19 = vpop.f32.mrf.mxu1 }
0x1b13   :  { %16809 = vmatmul.mubr.msk.f32.gmra.mxu0 %vm400_vm3, %v4112_v19 }
0x1b14   :  { %v16761_v22 = vpop.f32.mrf.mxu1  ;;  %16811 = vmatprep.mubr.msk.f32.mxu0 %vm18743_vm2, %v18742_v21 }
0x1b16   :  { %v4117_v53 = vpop.f32.mrf.mxu1 }
0x1b17   :  { %16812 = vmatmul.mubr.msk.f32.gmra.mxu0 %vm400_vm3, %v4117_v53  ;;  %v14606_v53 = vld [vmem:[%s23025_s24 + $0xe8] sm:$0xff] }
0x1b18   :  { %v16764_v55 = vpop.f32.mrf.mxu1  ;;  %16831 = vmatprep.mubr.msk.f32.mxu0 %vm18743_vm2, %v18742_v21 }
0x1b19   :  { %v14605_v55 = vld [vmem:[%s23025_s24 + $0xe0] sm:$0xff] }
0x1b1a   :  { %v4277_v23 = vpop.f32.mrf.mxu1 }
0x1b1c   :  { %v16792_v25 = vpop.f32.mrf.mxu1 }
0x1b1e   :  { %v4282_v27 = vpop.f32.mrf.mxu1 }
0x1b20   :  { %v16795_v28 = vpop.f32.mrf.mxu1 }
0x1b21   :  { %v14621_v28 = vld [vmem:[%s23029_s4 + $0xf0] sm:$0xff] }
0x1b22   :  { %v4287_v44 = vpop.f32.mrf.mxu1 }
0x1b23   :  { %16815 = vmatpush3.msk.msra.mxu1 %vm549_vm4, %v4287_v44  ;;  %v14620_v44 = vld [vmem:[%s23029_s4 + $0xe8] sm:$0xff] }
0x1b24   :  { %v16798_v30 = vpop.f32.mrf.mxu1  ;;  %16816 = vmatprep.subr.mxu1 %v18742_v21 }
0x1b25   :  { %16817 = vmatpush3.msra.mxu1 %v4282_v27  ;;  %v14622_v27 = vld [vmem:[%s23029_s4 + $0xf8] sm:$0xff]  ;;  %v14619_v30 = vld [vmem:[%s23029_s4 + $0xe0] sm:$0xff] }
0x1b26   :  { %16818 = vmatprep.subr.mxu1 %v18742_v21 }
0x1b27   :  { %16819 = vmatpush3.msra.mxu1 %v4277_v23 }
0x1b28   :  { %16840 = vmatprep.subr.mxu1 %v18742_v21 }
0x1bcf   :  { %v4375_v33 = vpop.f32.mrf.mxu0 }
0x1bd0   :  { %v4389_v34 = vmul.f32 0.35355338, %v4375_v33  ;;  %v14615_v33 = vld [vmem:[%s23026_s26 + $0xf8] sm:$0xff] }
0x1bd1   :  { %v16807_v38 = vpop.f32.mrf.mxu0 }
0x1bd2   :  { %v4392_v31 = vadd.f32 %v19870_v39, %v4389_v34  ;;  %v14614_v38 = vld [vmem:[%s23026_s26 + $0xf0] sm:$0xff] }
0x1bd3   :  { %v4380_v24 = vpop.f32.mrf.mxu0 }
0x1bd4   :  { %v4390_v48 = vmul.f32 0.35355338, %v4380_v24  ;;  %v4395_v40 = vsel %vm505_vm5, %v4392_v31, -inf  ;;  %v14613_v24 = vld [vmem:[%s23026_s26 + $0xe8] sm:$0xff] }
0x1bd5   :  { %4396 = vmax.xlane.f32.xlu0 %v4395_v40  ;;  %v16810_v36 = vpop.f32.mrf.mxu0  ;;  %v14612_v40 = vld [vmem:[%s23026_s26 + $0xe0] sm:$0xff] }
0x1bd6   :  { %v4393_v50 = vadd.f32 %v19877_v49, %v4390_v48 }
0x1bd7   :  { %v4385_v41 = vpop.f32.mrf.mxu0 }
0x1bd8   :  { %v4391_v29 = vmul.f32 0.35355338, %v4385_v41  ;;  %v4398_v52 = vsel %vm505_vm5, %v4393_v50, -inf }
0x1bd9   :  { %4399 = vmax.xlane.f32.xlu1 %v4398_v52  ;;  %v16813_v42 = vpop.f32.mrf.mxu0 }
0x1bda   :  { %v4394_v47 = vadd.f32 %v19884_v60, %v4391_v29 }
0x1bdc   :  { %v4401_v51 = vsel %vm512_vm6, %v4394_v47, -inf }
0x1bdd   :  { %4402 = vmax.xlane.f32.xlu0 %v4401_v51 }
0x1c5e   :  { %v4397_v56 = vpop.xlane.xlu0 %4396 }
0x1c5f   :  { %v4404_v57 = vsub.f32 %v4392_v31, %v4397_v56 }
0x1c61   :  { %v4407_v59 = vmul.f32 1.442695, %v4404_v57 }
0x1c62   :  { %v4400_v20 = vpop.xlane.xlu1 %4399 }
0x1c63   :  { %18463 = vpow2.f32 %v4407_v59  ;;  %v4405_v62 = vsub.f32 %v4393_v50, %v4400_v20 }
0x1c65   :  { %v4409_v1 = vmul.f32 1.442695, %v4405_v62 }
0x1c66   :  { %v4403_v63 = vpop.xlane.xlu0 %4402 }
0x1c67   :  { %18465 = vpow2.f32 %v4409_v1  ;;  %v4406_v3 = vsub.f32 %v4394_v47, %v4403_v63 }
0x1c69   :  { %v4411_v5 = vmul.f32 1.442695, %v4406_v3 }
0x1c6b   :  { %18467 = vpow2.f32 %v4411_v5  ;;  %v4028_v5 = vadd.f32 %v20069_v35, %v20107_v14 }
0x1c70   :  { %v18464_v2 = vpop.eup %18463 }
0x1c71   :  { %v4413_v6 = vsel %vm505_vm5, %v18464_v2, 0.0 }
0x1c72   :  { %4414 = vadd.xlane.f32.xlu1 %v4413_v6 }
0x1c74   :  { %v18466_v58 = vpop.eup %18465 }
0x1c75   :  { %v4416_v32 = vsel %vm505_vm5, %v18466_v58, 0.0 }
0x1c76   :  { %4417 = vadd.xlane.f32.xlu0 %v4416_v32  ;;  %v4033_v32 = vadd.f32 %v20080_v45, %v20109_v46 }
0x1c78   :  { %v18468_v8 = vpop.eup %18467 }
0x1c79   :  { %v4419_v54 = vsel %vm512_vm6, %v18468_v8, 0.0 }
0x1c7a   :  { %4420 = vadd.xlane.f32.xlu1 %v4419_v54 }
0x1cfb   :  { %v4415_v10 = vpop.xlane.xlu1 %4414 }
0x1cfc   :  { %18469 = vrcp.f32 %v4415_v10 }
0x1cff   :  { %v4418_v61 = vpop.xlane.xlu0 %4417 }
0x1d00   :  { %18471 = vrcp.f32 %v4418_v61 }
0x1d03   :  { %v4421_v13 = vpop.xlane.xlu1 %4420 }
0x1d04   :  { %18473 = vrcp.f32 %v4421_v13 }
0x1d09   :  { %v18470_v16 = vpop.eup %18469 }
0x1d0a   :  { %v4425_v17 = vmul.f32 %v18470_v16, %v18464_v2 }
0x1d0c   :  { %16821 = vmatmul.mubr.msk.f32.vlgmr.msra.gmra.mxu1 %vm505_vm5, %v4425_v17 }
0x1d0d   :  { %v18472_v19 = vpop.eup %18471  ;;  %16823 = vmatprep.mubr.msk.f32.mxu1 %vm18743_vm2, %v18742_v21  ;;  %16841 = vmatpush3.msra.mxu1 %v14608_v37 }
0x1d0e   :  { %v4426_v22 = vmul.f32 %v18472_v19, %v18466_v58  ;;  %16842 = vmatprep.subr.mxu1 %v18742_v21 }
0x1d0f   :  { %16843 = vmatpush3.msra.mxu1 %v14607_v43 }
0x1d10   :  { %16824 = vmatmul.mubr.msk.f32.gmra.mxu1 %vm505_vm5, %v4426_v22  ;;  %16844 = vmatprep.subr.mxu1 %v18742_v21 }
0x1d11   :  { %v18474_v23 = vpop.eup %18473  ;;  %16826 = vmatprep.mubr.msk.f32.mxu1 %vm18743_vm2, %v18742_v21  ;;  %16845 = vmatpush3.msra.mxu1 %v14606_v53 }
0x1d12   :  { %v4427_v25 = vmul.f32 %v18474_v23, %v18468_v8  ;;  %16846 = vmatprep.subr.mxu1 %v18742_v21 }
0x1d13   :  { %16847 = vmatpush3.msra.mxu1 %v14605_v55 }
0x1d14   :  { %16827 = vmatmul.mubr.msk.f32.gmra.mxu1 %vm505_vm5, %v4427_v25  ;;  %16874 = vmatprep.subr.mxu1 %v18742_v21 }
0x1d15   :  { %16848 = vmatprep.mubr.msk.f32.mxu1 %vm18743_vm2, %v18742_v21 }
0x1d18   :  { %16849 = vmatmul.mubr.msk.f32.vlgmr.msra.gmra.mxu1 %vm79_vm0, %v19734_v4 }
0x1d19   :  { %16851 = vmatprep.mubr.msk.f32.mxu1 %vm18743_vm2, %v18742_v21  ;;  %16875 = vmatpush3.msra.mxu1 %v14622_v27 }
0x1d1a   :  { %16876 = vmatprep.subr.mxu1 %v18742_v21 }
0x1d1b   :  { %16877 = vmatpush3.msra.mxu1 %v14621_v28 }
0x1d1c   :  { %16852 = vmatmul.mubr.msk.f32.gmra.mxu1 %vm79_vm0, %v19748_v7  ;;  %16878 = vmatprep.subr.mxu1 %v18742_v21 }
0x1d1d   :  { %16854 = vmatprep.mubr.msk.f32.mxu1 %vm18743_vm2, %v18742_v21  ;;  %16879 = vmatpush3.msra.mxu1 %v14620_v44 }
0x1d1e   :  { %16880 = vmatprep.subr.mxu1 %v18742_v21 }
0x1d1f   :  { %16881 = vmatpush3.msra.mxu1 %v14619_v30 }
0x1d20   :  { %16855 = vmatmul.mubr.msk.f32.gmra.mxu1 %vm79_vm0, %v19768_v0  ;;  %16906 = vmatprep.subr.mxu1 %v18742_v21 }
0x1d21   :  { %16882 = vmatprep.mubr.msk.f32.mxu1 %vm18743_vm2, %v18742_v21 }
0x1d24   :  { %16883 = vmatmul.mubr.msk.f32.vlgmr.msra.gmra.mxu1 %vm79_vm0, %v19734_v4 }
0x1d25   :  { %16885 = vmatprep.mubr.msk.f32.mxu1 %vm18743_vm2, %v18742_v21 }
0x1d28   :  { %16886 = vmatmul.mubr.msk.f32.gmra.mxu1 %vm79_vm0, %v19748_v7 }
0x1d29   :  { %16888 = vmatprep.mubr.msk.f32.mxu1 %vm18743_vm2, %v18742_v21 }
0x1d2c   :  { %16889 = vmatmul.mubr.msk.f32.gmra.mxu1 %vm79_vm0, %v19768_v0 }
0x1d2d   :  { %16912 = vmatprep.mubr.msk.f32.mxu1 %vm18743_vm2, %v18742_v21 }
0x1dcc   :  { %v4506_v34 = vpop.f32.mrf.mxu1 }
0x1dcd   :  { %16832 = vmatmul.mubr.msk.f32.vlgmr.msra.gmra.mxu0 %vm400_vm3, %v4506_v34 }
0x1dce   :  { %v16822_v31 = vpop.f32.mrf.mxu1  ;;  %16858 = vmatpush3.msra.mxu0 %v14615_v33  ;;  %16834 = vmatprep.mubr.msk.f32.mxu0 %vm18743_vm2, %v18742_v21 }
0x1dcf   :  { %16859 = vmatprep.subr.mxu0 %v18742_v21 }
0x1dd0   :  { %v4511_v48 = vpop.f32.mrf.mxu1  ;;  %16860 = vmatpush3.msra.mxu0 %v14614_v38 }
0x1dd1   :  { %16835 = vmatmul.mubr.msk.f32.gmra.mxu0 %vm400_vm3, %v4511_v48  ;;  %16861 = vmatprep.subr.mxu0 %v18742_v21 }
0x1dd2   :  { %v16825_v36 = vpop.f32.mrf.mxu1  ;;  %16837 = vmatprep.mubr.msk.f32.mxu0 %vm18743_vm2, %v18742_v21  ;;  %16862 = vmatpush3.msra.mxu0 %v14613_v24 }
0x1dd3   :  { %16863 = vmatprep.subr.mxu0 %v18742_v21 }
0x1dd4   :  { %v4516_v50 = vpop.f32.mrf.mxu1  ;;  %16864 = vmatpush3.msra.mxu0 %v14612_v40 }
0x1dd5   :  { %16838 = vmatmul.mubr.msk.f32.gmra.mxu0 %vm400_vm3, %v4516_v50  ;;  %16891 = vmatprep.subr.mxu0 %v18742_v21 }
0x1dd6   :  { %v16828_v41 = vpop.f32.mrf.mxu1  ;;  %16865 = vmatprep.mubr.msk.f32.mxu0 %vm18743_vm2, %v18742_v21 }
0x1dd8   :  { %v4685_v29 = vpop.f32.mrf.mxu1 }
0x1dd9   :  { %16866 = vmatmul.mubr.msk.f32.vlgmr.msra.gmra.mxu0 %vm79_vm0, %v19734_v4 }
0x1dda   :  { %v16850_v52 = vpop.f32.mrf.mxu1  ;;  %16868 = vmatprep.mubr.msk.f32.mxu0 %vm18743_vm2, %v18742_v21 }
0x1ddc   :  { %v4690_v42 = vpop.f32.mrf.mxu1 }
0x1ddd   :  { %16869 = vmatmul.mubr.msk.f32.gmra.mxu0 %vm79_vm0, %v19748_v7 }
0x1dde   :  { %v16853_v47 = vpop.f32.mrf.mxu1  ;;  %16871 = vmatprep.mubr.msk.f32.mxu0 %vm18743_vm2, %v18742_v21 }
0x1de0   :  { %v4695_v51 = vpop.f32.mrf.mxu1 }
0x1de1   :  { %16872 = vmatmul.mubr.msk.f32.gmra.mxu0 %vm79_vm0, %v19768_v0  ;;  %v4023_v0 = vadd.f32 %v20056_v26, %v20105_v12 }
0x1de2   :  { %v16856_v56 = vpop.f32.mrf.mxu1  ;;  %16897 = vmatprep.mubr.msk.f32.mxu0 %vm18743_vm2, %v18742_v21 }
0x1de4   :  { %v4855_v4 = vpop.f32.mrf.mxu1 }
0x1de6   :  { %v16884_v57 = vpop.f32.mrf.mxu1 }
0x1de8   :  { %v4860_v59 = vpop.f32.mrf.mxu1 }
0x1dea   :  { %v16887_v20 = vpop.f32.mrf.mxu1 }
0x1dec   :  { %v4865_v62 = vpop.f32.mrf.mxu1 }
0x1ded   :  { %16907 = vmatpush3.msk.msra.mxu1 %vm549_vm4, %v4865_v62 }
0x1dee   :  { %v16890_v7 = vpop.f32.mrf.mxu1  ;;  %16908 = vmatprep.subr.mxu1 %v18742_v21 }
0x1def   :  { %16909 = vmatpush3.msra.mxu1 %v4860_v59 }
0x1df0   :  { %16910 = vmatprep.subr.mxu1 %v18742_v21 }
0x1df1   :  { %16911 = vmatpush3.msra.mxu1 %v4855_v4 }
0x1df2   :  { %16932 = vmatprep.subr.mxu1 %v18742_v21 }
0x1e8d   :  { %v4597_v1 = vpop.f32.mrf.mxu0 }
0x1e8e   :  { %v20245_v63 = vadd.f32 %v4597_v1, %v4023_v0 }
0x1e8f   :  { %v16833_v3 = vpop.f32.mrf.mxu0 }
0x1e91   :  { %v4602_v2 = vpop.f32.mrf.mxu0 }
0x1e92   :  { %v20249_v6 = vadd.f32 %v4602_v2, %v4028_v5 }
0x1e93   :  { %v16836_v58 = vpop.f32.mrf.mxu0 }
0x1e95   :  { %v4607_v8 = vpop.f32.mrf.mxu0 }
0x1e96   :  { %v20253_v54 = vadd.f32 %v4607_v8, %v4033_v32  ;;  %v14641_v32 = vld [vmem:[%s22995_s8 + $0x1] ss:$0 sm:$0xff] }
0x1e97   :  { %v16839_v9 = vpop.f32.mrf.mxu0 }
0x1e99   :  { %v4770_v10 = vpop.f32.mrf.mxu0 }
0x1e9b   :  { %v16867_v26 = vpop.f32.mrf.mxu0 }
0x1e9d   :  { %v4775_v12 = vpop.f32.mrf.mxu0 }
0x1e9f   :  { %v16870_v61 = vpop.f32.mrf.mxu0 }
0x1ea1   :  { %v4780_v13 = vpop.f32.mrf.mxu0 }
0x1ea2   :  { %16892 = vmatpush3.xpose.msk.msra.mxu0 %vm400_vm3, %v4780_v13 }
0x1ea3   :  { %v16873_v16 = vpop.f32.mrf.mxu0  ;;  %16893 = vmatprep.subr.mxu0 %v18742_v21 }
0x1ea6   :  { %16894 = vmatpush3.xpose.msk.msra.mxu0 %vm400_vm3, %v4775_v12 }
0x1ea7   :  { %16895 = vmatprep.subr.mxu0 %v18742_v21 }
0x1eaa   :  { %16896 = vmatpush3.xpose.msk.msra.mxu0 %vm400_vm3, %v4770_v10 }
0x1eab   :  { %16921 = vmatprep.subr.mxu0 %v18742_v21 }
0x1ead   :  { %16898 = vmatmul.mubr.msk.f32.vlgmr.msra.gmra.mxu0 %vm400_vm3, %v4685_v29  ;;  %v14636_v29 = vld [vmem:[%s22994_s7 + $0x38] sm:$0xff] }
0x1eae   :  { %16900 = vmatprep.mubr.msk.f32.mxu0 %vm18743_vm2, %v18742_v21  ;;  %16922 = vmatpush3.msra.mxu0 %v14636_v29 }
0x1eaf   :  { %16949 = vmatprep.subr.mxu0 %v18742_v21 }
0x1eb1   :  { %16901 = vmatmul.mubr.msk.f32.gmra.mxu0 %vm400_vm3, %v4690_v42 }
0x1eb2   :  { %16903 = vmatprep.mubr.msk.f32.mxu0 %vm18743_vm2, %v18742_v21 }
0x1eb5   :  { %16904 = vmatmul.mubr.msk.f32.gmra.mxu0 %vm400_vm3, %v4695_v51 }
0x1eb6   :  { %16923 = vmatprep.mubr.msk.f32.mxu0 %vm18743_vm2, %v18742_v21 }
0x1f6d   :  { %v4953_v35 = vpop.f32.mrf.mxu0 }
0x1f6e   :  { %v4967_v45 = vmul.f32 0.35355338, %v4953_v35 }
0x1f6f   :  { %v16899_v14 = vpop.f32.mrf.mxu0 }
0x1f70   :  { %v4970_v46 = vadd.f32 %v19870_v39, %v4967_v45 }
0x1f71   :  { %v4958_v17 = vpop.f32.mrf.mxu0 }
0x1f72   :  { %v4968_v37 = vmul.f32 0.35355338, %v4958_v17  ;;  %v4973_v43 = vsel %vm505_vm5, %v4970_v46, -inf }
0x1f73   :  { %4974 = vmax.xlane.f32.xlu0 %v4973_v43  ;;  %v16902_v19 = vpop.f32.mrf.mxu0 }
0x1f74   :  { %v4971_v22 = vadd.f32 %v19877_v49, %v4968_v37 }
0x1f75   :  { %v4963_v53 = vpop.f32.mrf.mxu0 }
0x1f76   :  { %v4969_v55 = vmul.f32 0.35355338, %v4963_v53  ;;  %v4976_v23 = vsel %vm505_vm5, %v4971_v22, -inf }
0x1f77   :  { %4977 = vmax.xlane.f32.xlu1 %v4976_v23  ;;  %v16905_v25 = vpop.f32.mrf.mxu0 }
0x1f78   :  { %v4972_v27 = vadd.f32 %v19884_v60, %v4969_v55 }
0x1f7a   :  { %v4979_v28 = vsel %vm512_vm6, %v4972_v27, -inf }
0x1f7b   :  { %4980 = vmax.xlane.f32.xlu0 %v4979_v28 }
0x1ffc   :  { %v4975_v39 = vpop.xlane.xlu0 %4974 }
0x1ffd   :  { %v4982_v44 = vsub.f32 %v4970_v46, %v4975_v39 }
0x1fff   :  { %v4985_v30 = vmul.f32 1.442695, %v4982_v44 }
0x2000   :  { %v4978_v33 = vpop.xlane.xlu1 %4977 }
0x2001   :  { %18475 = vpow2.f32 %v4985_v30  ;;  %v4983_v34 = vsub.f32 %v4971_v22, %v4978_v33 }
0x2003   :  { %v4987_v38 = vmul.f32 1.442695, %v4983_v34 }
0x2004   :  { %v4981_v31 = vpop.xlane.xlu0 %4980 }
0x2005   :  { %18477 = vpow2.f32 %v4987_v38  ;;  %v4984_v49 = vsub.f32 %v4972_v27, %v4981_v31  ;;  %v14649_v38 = vld [vmem:[%s22996_s11 + $0x38] sm:$0xff]  ;;  %v14648_v31 = vld [vmem:[%s22996_s11 + $0x30] sm:$0xff] }
0x2007   :  { %v4989_v24 = vmul.f32 1.442695, %v4984_v49  ;;  %v14647_v49 = vld [vmem:[%s22996_s11 + $0x28] sm:$0xff] }
0x2009   :  { %18479 = vpow2.f32 %v4989_v24  ;;  %v14646_v24 = vld [vmem:[%s22996_s11 + $0x20] sm:$0xff] }
0x200e   :  { %v18476_v48 = vpop.eup %18475 }
0x200f   :  { %v4991_v40 = vsel %vm505_vm5, %v18476_v48, 0.0 }
0x2010   :  { %4992 = vadd.xlane.f32.xlu1 %v4991_v40 }
0x2012   :  { %v18478_v60 = vpop.eup %18477 }
0x2013   :  { %v4994_v36 = vsel %vm505_vm5, %v18478_v60, 0.0 }
0x2014   :  { %4995 = vadd.xlane.f32.xlu0 %v4994_v36 }
0x2016   :  { %v18480_v50 = vpop.eup %18479 }
0x2017   :  { %v4997_v41 = vsel %vm512_vm6, %v18480_v50, 0.0 }
0x2018   :  { %4998 = vadd.xlane.f32.xlu1 %v4997_v41 }
0x2099   :  { %v4993_v52 = vpop.xlane.xlu1 %4992 }
0x209a   :  { %18481 = vrcp.f32 %v4993_v52 }
0x209d   :  { %v4996_v42 = vpop.xlane.xlu0 %4995 }
0x209e   :  { %18483 = vrcp.f32 %v4996_v42 }
0x20a1   :  { %v4999_v47 = vpop.xlane.xlu1 %4998 }
0x20a2   :  { %18485 = vrcp.f32 %v4999_v47 }
0x20a7   :  { %v18482_v51 = vpop.eup %18481 }
0x20a8   :  { %v5003_v56 = vmul.f32 %v18482_v51, %v18476_v48  ;;  %v14644_v51 = vld [vmem:[%s22997_s9 + $0x1] ss:$0 sm:$0xff] }
0x20aa   :  { %16913 = vmatmul.mubr.msk.f32.vlgmr.msra.gmra.mxu1 %vm505_vm5, %v5003_v56 }
0x20ab   :  { %v18484_v4 = vpop.eup %18483  ;;  %16915 = vmatprep.mubr.msk.f32.mxu1 %vm18743_vm2, %v18742_v21  ;;  %16933 = vmatpush3.msra.mxu1 %v14649_v38 }
0x20ac   :  { %v5004_v57 = vmul.f32 %v18484_v4, %v18478_v60  ;;  %16934 = vmatprep.subr.mxu1 %v18742_v21  ;;  %v14645_v4 = vld [vmem:[%s22998_s10 + $0x1] ss:$0 sm:$0xff] }
0x20ad   :  { %16935 = vmatpush3.msra.mxu1 %v14648_v31 }
0x20ae   :  { %16916 = vmatmul.mubr.msk.f32.gmra.mxu1 %vm505_vm5, %v5004_v57  ;;  %16936 = vmatprep.subr.mxu1 %v18742_v21 }
0x20af   :  { %v18486_v59 = vpop.eup %18485  ;;  %16918 = vmatprep.mubr.msk.f32.mxu1 %vm18743_vm2, %v18742_v21  ;;  %16937 = vmatpush3.msra.mxu1 %v14647_v49 }
0x20b0   :  { %v5005_v20 = vmul.f32 %v18486_v59, %v18480_v50  ;;  %16938 = vmatprep.subr.mxu1 %v18742_v21 }
0x20b1   :  { %16939 = vmatpush3.msra.mxu1 %v14646_v24 }
0x20b2   :  { %16919 = vmatmul.mubr.msk.f32.gmra.mxu1 %vm505_vm5, %v5005_v20  ;;  %16990 = vmatprep.subr.mxu1 %v18742_v21 }
0x20b3   :  { %16940 = vmatprep.mubr.msk.f32.mxu1 %vm18743_vm2, %v18742_v21 }
0x216a   :  { %v5084_v62 = vpop.f32.mrf.mxu1 }
0x216b   :  { %16924 = vmatmul.mubr.msk.f32.vlgmr.msra.gmra.mxu0 %vm400_vm3, %v5084_v62 }
0x216c   :  { %v16914_v7 = vpop.f32.mrf.mxu1  ;;  %16926 = vmatprep.mubr.msk.f32.mxu0 %vm18743_vm2, %v18742_v21 }
0x216e   :  { %v5089_v0 = vpop.f32.mrf.mxu1 }
0x216f   :  { %16927 = vmatmul.mubr.msk.f32.gmra.mxu0 %vm400_vm3, %v5089_v0 }
0x2170   :  { %v16917_v1 = vpop.f32.mrf.mxu1  ;;  %16929 = vmatprep.mubr.msk.f32.mxu0 %vm18743_vm2, %v18742_v21 }
0x2172   :  { %v5094_v3 = vpop.f32.mrf.mxu1 }
0x2173   :  { %16930 = vmatmul.mubr.msk.f32.gmra.mxu0 %vm400_vm3, %v5094_v3 }
0x2174   :  { %v16920_v5 = vpop.f32.mrf.mxu1  ;;  %16981 = vmatprep.mubr.msk.f32.mxu0 %vm18743_vm2, %v18742_v21 }
0x222b   :  { %v5175_v2 = vpop.f32.mrf.mxu0 }
0x222c   :  { %v5189_v58 = vadd.f32 %v5175_v2, %v20245_v63 }
0x222d   :  { %v16925_v8 = vpop.f32.mrf.mxu0 }
0x222e   :  { %v5192_v9 = vadd.f32 %v5189_v58, %v19676_v11  ;;  %v14670_v58 = vld [vmem:[%s22999_s13 + $0xf8] sm:$0xff]  ;;  %v14668_v8 = vld [vmem:[%s22999_s13 + $0xe8] sm:$0xff] }
0x222f   :  { %v5180_v10 = vpop.f32.mrf.mxu0  ;;  %16950 = vmatpush3.msra.mxu0 %v14670_v58 }
0x2230   :  { %v20306_v26 = vadd.f32 %v14641_v32, %v5192_v9  ;;  %v5190_v12 = vadd.f32 %v5180_v10, %v20249_v6  ;;  %16951 = vmatprep.subr.mxu0 %v18742_v21  ;;  %v14667_v9 = vld [vmem:[%s22999_s13 + $0xe0] sm:$0xff]  ;;  %v14666_v10 = vld [vmem:[%s22999_s13 + $0xd8] sm:$0xff] }
0x2231   :  { %v16928_v61 = vpop.f32.mrf.mxu0 }
0x2232   :  { %v5193_v13 = vadd.f32 %v5190_v12, %v19681_v15  ;;  %v5210_v16 = vsel %vm79_vm0, %v20306_v26, 0.0  ;;  %v14665_v12 = vld [vmem:[%s22999_s13 + $0xd0] sm:$0xff]  ;;  %v14664_v61 = vld [vmem:[%s22999_s13 + $0xc8] sm:$0xff] }
0x2233   :  { %5211 = vadd.xlane.f32.xlu0 %v5210_v16  ;;  %v5185_v63 = vpop.f32.mrf.mxu0  ;;  %v14662_v16 = vld [vmem:[%s22999_s13 + $0xb8] sm:$0xff] }
0x2234   :  { %v20312_v35 = vadd.f32 %v14641_v32, %v5193_v13  ;;  %v5191_v45 = vadd.f32 %v5185_v63, %v20253_v54  ;;  %v14663_v13 = vld [vmem:[%s22999_s13 + $0xc0] sm:$0xff]  ;;  %v14661_v63 = vld [vmem:[%s22999_s13 + $0xb0] sm:$0xff] }
0x2235   :  { %v16931_v14 = vpop.f32.mrf.mxu0 }
0x2236   :  { %v5194_v46 = vadd.f32 %v5191_v45, %v19686_v18  ;;  %v5213_v17 = vsel %vm79_vm0, %v20312_v35, 0.0  ;;  %v14660_v45 = vld [vmem:[%s22999_s13 + $0xa8] sm:$0xff]  ;;  %v14659_v14 = vld [vmem:[%s22999_s13 + $0xa0] sm:$0xff] }
0x2237   :  { %5214 = vadd.xlane.f32.xlu1 %v5213_v17  ;;  %v14657_v17 = vld [vmem:[%s22999_s13 + $0x90] sm:$0xff] }
0x2238   :  { %v20318_v6 = vadd.f32 %v14641_v32, %v5194_v46  ;;  %v14669_v32 = vld [vmem:[%s22999_s13 + $0xf0] sm:$0xff]  ;;  %v14658_v46 = vld [vmem:[%s22999_s13 + $0x98] sm:$0xff] }
0x2239   :  { %16952 = vmatpush3.msra.mxu0 %v14669_v32 }
0x223a   :  { %v5216_v37 = vsel %vm86_vm1, %v20318_v6, 0.0  ;;  %16953 = vmatprep.subr.mxu0 %v18742_v21 }
0x223b   :  { %5217 = vadd.xlane.f32.xlu0 %v5216_v37  ;;  %16954 = vmatpush3.msra.mxu0 %v14668_v8  ;;  %v14656_v37 = vld [vmem:[%s22999_s13 + $0x88] sm:$0xff] }
0x223c   :  { %16955 = vmatprep.subr.mxu0 %v18742_v21 }
0x223d   :  { %16956 = vmatpush3.msra.mxu0 %v14667_v9 }
0x223e   :  { %16957 = vmatprep.subr.mxu0 %v18742_v21 }
0x223f   :  { %16958 = vmatpush3.msra.mxu0 %v14666_v10 }
0x2240   :  { %16959 = vmatprep.subr.mxu0 %v18742_v21 }
0x2241   :  { %16960 = vmatpush3.msra.mxu0 %v14665_v12 }
0x2242   :  { %16961 = vmatprep.subr.mxu0 %v18742_v21 }
0x2243   :  { %16962 = vmatpush3.msra.mxu0 %v14664_v61 }
0x2244   :  { %16963 = vmatprep.subr.mxu0 %v18742_v21 }
0x2245   :  { %16964 = vmatpush3.msra.mxu0 %v14663_v13 }
0x2246   :  { %16965 = vmatprep.subr.mxu0 %v18742_v21 }
0x2247   :  { %16966 = vmatpush3.msra.mxu0 %v14662_v16 }
0x2248   :  { %16967 = vmatprep.subr.mxu0 %v18742_v21 }
0x2249   :  { %16968 = vmatpush3.msra.mxu0 %v14661_v63 }
0x224a   :  { %16969 = vmatprep.subr.mxu0 %v18742_v21 }
0x224b   :  { %16970 = vmatpush3.msra.mxu0 %v14660_v45 }
0x224c   :  { %16971 = vmatprep.subr.mxu0 %v18742_v21 }
0x224d   :  { %16972 = vmatpush3.msra.mxu0 %v14659_v14 }
0x224e   :  { %16973 = vmatprep.subr.mxu0 %v18742_v21 }
0x224f   :  { %16974 = vmatpush3.msra.mxu0 %v14658_v46 }
0x2250   :  { %16975 = vmatprep.subr.mxu0 %v18742_v21 }
0x2251   :  { %16976 = vmatpush3.msra.mxu0 %v14657_v17 }
0x2252   :  { %16977 = vmatprep.subr.mxu0 %v18742_v21 }
0x2253   :  { %16978 = vmatpush3.msra.mxu0 %v14656_v37 }
0x2254   :  { %16979 = vmatprep.subr.mxu0 %v18742_v21 }
0x22bc   :  { %v5212_v43 = vpop.xlane.xlu0 %5211 }
0x22bd   :  { %v5219_v19 = vmul.f32 0.03125, %v5212_v43  ;;  %v14655_v43 = vld [vmem:[%s22999_s13 + $0x80] sm:$0xff] }
0x22be   :  { %16980 = vmatpush3.msra.mxu0 %v14655_v43 }
0x22bf   :  { %v5222_v22 = vsub.f32 %v20306_v26, %v5219_v19  ;;  %17024 = vmatprep.subr.mxu0 %v18742_v21  ;;  %v14651_v19 = vld [vmem:[%s23000_s12 + $0x1] ss:$0 sm:$0xff] }
0x22c0   :  { %v5215_v53 = vpop.xlane.xlu1 %5214 }
0x22c1   :  { %v5220_v55 = vmul.f32 0.03125, %v5215_v53  ;;  %v5225_v54 = vmul.f32 %v5222_v22, %v5222_v22 }
0x22c3   :  { %v5223_v23 = vsub.f32 %v20312_v35, %v5220_v55  ;;  %v5228_v25 = vsel %vm79_vm0, %v5225_v54, 0.0 }
0x22c4   :  { %5229 = vadd.xlane.f32.xlu1 %v5228_v25  ;;  %v5218_v27 = vpop.xlane.xlu0 %5217 }
0x22c5   :  { %v5221_v28 = vmul.f32 0.03125, %v5218_v27  ;;  %v5226_v39 = vmul.f32 %v5223_v23, %v5223_v23 }
0x22c7   :  { %v5224_v44 = vsub.f32 %v20318_v6, %v5221_v28  ;;  %v5231_v30 = vsel %vm79_vm0, %v5226_v39, 0.0 }
0x22c8   :  { %5232 = vadd.xlane.f32.xlu0 %v5231_v30 }
0x22c9   :  { %v5227_v33 = vmul.f32 %v5224_v44, %v5224_v44 }
0x22cb   :  { %v5234_v34 = vsel %vm86_vm1, %v5227_v33, 0.0 }
0x22cc   :  { %5235 = vadd.xlane.f32.xlu1 %v5234_v34 }
0x234d   :  { %v5230_v48 = vpop.xlane.xlu1 %5229 }
0x234e   :  { %v5237_v40 = vmul.f32 0.03125, %v5230_v48 }
0x2350   :  { %v5240_v60 = vadd.f32 1e-05, %v5237_v40 }
0x2351   :  { %v5233_v36 = vpop.xlane.xlu0 %5232 }
0x2352   :  { %18487 = vrsqrt.f32 %v5240_v60  ;;  %v5238_v50 = vmul.f32 0.03125, %v5233_v36 }
0x2354   :  { %v5241_v41 = vadd.f32 1e-05, %v5238_v50 }
0x2355   :  { %v5236_v29 = vpop.xlane.xlu1 %5235 }
0x2356   :  { %18489 = vrsqrt.f32 %v5241_v41  ;;  %v5239_v52 = vmul.f32 0.03125, %v5236_v29 }
0x2358   :  { %v5242_v42 = vadd.f32 1e-05, %v5239_v52 }
0x235a   :  { %18491 = vrsqrt.f32 %v5242_v42 }
0x235f   :  { %v18488_v47 = vpop.eup %18487 }
0x2360   :  { %v5246_v56 = vmul.f32 %v18488_v47, %v5222_v22 }
0x2362   :  { %v5255_v57 = vmul.f32 %v14644_v51, %v5246_v56 }
0x2363   :  { %v18490_v59 = vpop.eup %18489 }
0x2364   :  { %v5264_v20 = vadd.f32 %v14645_v4, %v5255_v57  ;;  %v5247_v62 = vmul.f32 %v18490_v59, %v5223_v23 }
0x2366   :  { %16941 = vmatmul.mubr.msk.f32.vlgmr.msra.gmra.mxu1 %vm79_vm0, %v5264_v20  ;;  %v5256_v7 = vmul.f32 %v14644_v51, %v5247_v62 }
0x2367   :  { %v18492_v0 = vpop.eup %18491  ;;  %16943 = vmatprep.mubr.msk.f32.mxu1 %vm18743_vm2, %v18742_v21 }
0x2368   :  { %v5265_v1 = vadd.f32 %v14645_v4, %v5256_v7  ;;  %v5248_v3 = vmul.f32 %v18492_v0, %v5224_v44 }
0x236a   :  { %16944 = vmatmul.mubr.msk.f32.gmra.mxu1 %vm79_vm0, %v5265_v1  ;;  %v5257_v5 = vmul.f32 %v14644_v51, %v5248_v3 }
0x236b   :  { %16946 = vmatprep.mubr.msk.f32.mxu1 %vm18743_vm2, %v18742_v21 }
0x236c   :  { %v5266_v2 = vadd.f32 %v14645_v4, %v5257_v5 }
0x236e   :  { %16947 = vmatmul.mubr.msk.f32.gmra.mxu1 %vm79_vm0, %v5266_v2 }
0x236f   :  { %16998 = vmatprep.mubr.msk.f32.mxu1 %vm18743_vm2, %v18742_v21 }
0x2426   :  { %v5355_v22 = vpop.f32.mrf.mxu1 }
0x2427   :  { %v20426_v53 = vadd.f32 %v14651_v19, %v5355_v22 }
0x2428   :  { %v16942_v55 = vpop.f32.mrf.mxu1 }
0x2429   :  { %v20429_v54 = vmul.f32 0.70710677, %v20426_v53 }
0x242a   :  { %v5360_v23 = vpop.f32.mrf.mxu1 }
0x242b   :  { %v5375_v25 = vand.u32 2147483647, %v20429_v54  ;;  %v20432_v27 = vadd.f32 %v14651_v19, %v5360_v23  ;;  %vm5435_vm10 = vcmp.ge.f32.partialorder %v20429_v54, 0.0 }
0x242c   :  { %v16945_v28 = vpop.f32.mrf.mxu1 }
0x242d   :  { %v5378_v39 = vmul.f32 0.3275911, %v5375_v25  ;;  %v20435_v44 = vmul.f32 0.70710677, %v20432_v27  ;;  %v5417_v36 = vsub.f32 0.0, %v5375_v25 }
0x242e   :  { %v5365_v30 = vpop.f32.mrf.mxu1 }
0x242f   :  { %v5381_v33 = vadd.f32 1.0, %v5378_v39  ;;  %v5376_v34 = vand.u32 2147483647, %v20435_v44  ;;  %v20438_v38 = vadd.f32 %v14651_v19, %v5365_v30  ;;  %v5420_v41 = vmul.f32 %v5417_v36, %v5375_v25 }
0x2430   :  { %v16948_v31 = vpop.f32.mrf.mxu1  ;;  %vm5436_vm11 = vcmp.ge.f32.partialorder %v20435_v44, 0.0 }
0x2431   :  { %18493 = vrcp.f32 %v5381_v33  ;;  %v5379_v49 = vmul.f32 0.3275911, %v5376_v34  ;;  %v20441_v24 = vmul.f32 0.70710677, %v20438_v38  ;;  %v5418_v29 = vsub.f32 0.0, %v5376_v34 }
0x2432   :  { %v5423_v47 = vmul.f32 1.442695, %v5420_v41 }
0x2433   :  { %v5382_v48 = vadd.f32 1.0, %v5379_v49  ;;  %v5377_v40 = vand.u32 2147483647, %v20441_v24  ;;  %v5421_v51 = vmul.f32 %v5418_v29, %v5376_v34  ;;  %v5369_v49 = vmul.f32 0.5, %v20426_v53 }
0x2434   :  { %vm5437_vm12 = vcmp.ge.f32.partialorder %v20441_v24, 0.0 }
0x2435   :  { %18495 = vrcp.f32 %v5382_v48  ;;  %v5380_v60 = vmul.f32 0.3275911, %v5377_v40  ;;  %v5419_v56 = vsub.f32 0.0, %v5377_v40  ;;  %v5425_v62 = vmul.f32 1.442695, %v5421_v51 }
0x2437   :  { %v5383_v50 = vadd.f32 1.0, %v5380_v60  ;;  %v5422_v7 = vmul.f32 %v5419_v56, %v5377_v40  ;;  %v5371_v56 = vmul.f32 0.5, %v20438_v38 }
0x2439   :  { %18497 = vrcp.f32 %v5383_v50  ;;  %v5427_v32 = vmul.f32 1.442695, %v5422_v7 }
0x243a   :  { %18499 = vpow2.f32 %v5423_v47 }
0x243b   :  { %18501 = vpow2.f32 %v5425_v62 }
0x243c   :  { %18503 = vpow2.f32 %v5427_v32 }
0x243e   :  { %v18494_v52 = vpop.eup %18493 }
0x243f   :  { %v5390_v42 = vmul.f32 1.0614054, %v18494_v52 }
0x2441   :  { %v5393_v4 = vadd.f32 -1.4531521, %v5390_v42 }
0x2442   :  { %v18496_v57 = vpop.eup %18495 }
0x2443   :  { %v5396_v59 = vmul.f32 %v18494_v52, %v5393_v4  ;;  %v5391_v20 = vmul.f32 1.0614054, %v18496_v57 }
0x2445   :  { %v5399_v0 = vadd.f32 1.4214138, %v5396_v59  ;;  %v5394_v1 = vadd.f32 -1.4531521, %v5391_v20 }
0x2446   :  { %v18498_v3 = vpop.eup %18497 }
0x2447   :  { %v5402_v5 = vmul.f32 %v18494_v52, %v5399_v0  ;;  %v5397_v2 = vmul.f32 %v18496_v57, %v5394_v1  ;;  %v5392_v58 = vmul.f32 1.0614054, %v18498_v3  ;;  %v18500_v17 = vpop.eup %18499 }
0x2448   :  { %v18502_v25 = vpop.eup %18501 }
0x2449   :  { %v5405_v8 = vadd.f32 -0.28449672, %v5402_v5  ;;  %v5400_v9 = vadd.f32 1.4214138, %v5397_v2  ;;  %v5395_v10 = vadd.f32 -1.4531521, %v5392_v58  ;;  %v18504_v60 = vpop.eup %18503 }
0x244b   :  { %v5408_v12 = vmul.f32 %v18494_v52, %v5405_v8  ;;  %v5403_v61 = vmul.f32 %v18496_v57, %v5400_v9  ;;  %v5398_v13 = vmul.f32 %v18498_v3, %v5395_v10 }
0x244d   :  { %v5411_v16 = vadd.f32 0.2548296, %v5408_v12  ;;  %v5406_v63 = vadd.f32 -0.28449672, %v5403_v61  ;;  %v5401_v45 = vadd.f32 1.4214138, %v5398_v13 }
0x244f   :  { %v5414_v14 = vmul.f32 %v18494_v52, %v5411_v16  ;;  %v5409_v46 = vmul.f32 %v18496_v57, %v5406_v63  ;;  %v5404_v37 = vmul.f32 %v18498_v3, %v5401_v45  ;;  %v5370_v52 = vmul.f32 0.5, %v20432_v27 }
0x2451   :  { %v5429_v43 = vmul.f32 %v18500_v17, %v5414_v14  ;;  %v5412_v19 = vadd.f32 0.2548296, %v5409_v46  ;;  %v5407_v22 = vadd.f32 -0.28449672, %v5404_v37 }
0x2453   :  { %v5432_v55 = vsub.f32 1.0, %v5429_v43  ;;  %v5415_v23 = vmul.f32 %v18496_v57, %v5412_v19  ;;  %v5410_v28 = vmul.f32 %v18498_v3, %v5407_v22  ;;  %v14672_v57 = vld [vmem:[%s23001_s14 + $0x1] ss:$0 sm:$0xff]  ;;  %v14680_v43 = vld [vmem:[%s23025_s24 + $0x118] sm:$0xff]  ;;  %v14679_v22 = vld [vmem:[%s23025_s24 + $0x110] sm:$0xff] }
0x2454   :  { %v14694_v19 = vld [vmem:[%s23029_s4 + $0x118] sm:$0xff]  ;;  %16991 = vmatpush3.msra.mxu1 %v14680_v43 }
0x2455   :  { %v5438_v39 = vsub.f32 0.0, %v5432_v55  ;;  %v5430_v30 = vmul.f32 %v18502_v25, %v5415_v23  ;;  %v5413_v33 = vadd.f32 0.2548296, %v5410_v28  ;;  %16992 = vmatprep.subr.mxu1 %v18742_v21  ;;  %v14678_v23 = vld [vmem:[%s23025_s24 + $0x108] sm:$0xff]  ;;  %v14677_v28 = vld [vmem:[%s23025_s24 + $0x100] sm:$0xff]  ;;  %v14726_v43 = vld [vmem:[%s23029_s4 + $0x138] sm:$0xff] }
0x2456   :  { %16993 = vmatpush3.msra.mxu1 %v14679_v22  ;;  %v14692_v25 = vld [vmem:[%s23029_s4 + $0x108] sm:$0xff] }
0x2457   :  { %v5441_v34 = vsel %vm5435_vm10, %v5432_v55, %v5438_v39  ;;  %v5433_v31 = vsub.f32 1.0, %v5430_v30  ;;  %v5416_v40 = vmul.f32 %v18498_v3, %v5413_v33  ;;  %v14693_v55 = vld [vmem:[%s23029_s4 + $0x110] sm:$0xff]  ;;  %16994 = vmatprep.subr.mxu1 %v18742_v21  ;;  %v14691_v39 = vld [vmem:[%s23029_s4 + $0x100] sm:$0xff]  ;;  %v14724_v22 = vld [vmem:[%s23029_s4 + $0x128] sm:$0xff] }
0x2458   :  { %v5444_v48 = vadd.f32 1.0, %v5441_v34  ;;  %16995 = vmatpush3.msra.mxu1 %v14678_v23 }
0x2459   :  { %v5439_v36 = vsub.f32 0.0, %v5433_v31  ;;  %v5431_v41 = vmul.f32 %v18504_v60, %v5416_v40  ;;  %16996 = vmatprep.subr.mxu1 %v18742_v21 }
0x245a   :  { %v5447_v50 = vmul.f32 %v5444_v48, %v5369_v49  ;;  %16997 = vmatpush3.msra.mxu1 %v14677_v28 }
0x245b   :  { %v5442_v29 = vsel %vm5436_vm11, %v5433_v31, %v5439_v36  ;;  %v5434_v47 = vsub.f32 1.0, %v5431_v41  ;;  %17007 = vmatprep.subr.mxu1 %v18742_v21  ;;  %v14675_v41 = vld [vmem:[%s23027_s2 + $0x2] ss:$0 sm:$0xff] }
0x245c   :  { %v5445_v42 = vadd.f32 1.0, %v5442_v29  ;;  %16982 = vmatmul.mubr.f32.vlgmr.msra.gmra.mxu0 %v5447_v50 }
0x245d   :  { %16984 = vmatprep.mubr.msk.f32.mxu0 %vm18743_vm2, %v18742_v21  ;;  %v5440_v51 = vsub.f32 0.0, %v5434_v47  ;;  %17025 = vmatpush3.msra.mxu0 %v14694_v19  ;;  %v14725_v19 = vld [vmem:[%s23029_s4 + $0x130] sm:$0xff] }
0x245e   :  { %v5448_v54 = vmul.f32 %v5445_v42, %v5370_v52  ;;  %17026 = vmatprep.subr.mxu0 %v18742_v21  ;;  %v14676_v52 = vld [vmem:[%s23028_s3 + $0x2] ss:$0 sm:$0xff] }
0x245f   :  { %v5443_v53 = vsel %vm5437_vm12, %v5434_v47, %v5440_v51  ;;  %17027 = vmatpush3.msra.mxu0 %v14693_v55  ;;  %v14723_v55 = vld [vmem:[%s23029_s4 + $0x120] sm:$0xff] }
0x2460   :  { %16985 = vmatmul.mubr.f32.gmra.mxu0 %v5448_v54  ;;  %v5446_v4 = vadd.f32 1.0, %v5443_v53  ;;  %17028 = vmatprep.subr.mxu0 %v18742_v21  ;;  %v14687_v53 = vld [vmem:[%s23026_s26 + $0x118] sm:$0xff] }
0x2461   :  { %16987 = vmatprep.mubr.msk.f32.mxu0 %vm18743_vm2, %v18742_v21  ;;  %17029 = vmatpush3.msra.mxu0 %v14692_v25 }
0x2462   :  { %v5449_v44 = vmul.f32 %v5446_v4, %v5371_v56  ;;  %17030 = vmatprep.subr.mxu0 %v18742_v21  ;;  %v14686_v4 = vld [vmem:[%s23026_s26 + $0x110] sm:$0xff] }
0x2463   :  { %17031 = vmatpush3.msra.mxu0 %v14691_v39  ;;  %v20654_v39 = vld [vmem:[%s23030_s30] sm:$0xff] }
0x2464   :  { %16988 = vmatmul.mubr.f32.gmra.mxu0 %v5449_v44  ;;  %17056 = vmatprep.subr.mxu0 %v18742_v21 }
0x2465   :  { %17032 = vmatprep.mubr.msk.f32.mxu0 %vm18743_vm2, %v18742_v21 }
0x251c   :  { %v5533_v27 = vpop.f32.mrf.mxu0 }
0x251d   :  { %v5547_v24 = vadd.f32 %v5533_v27, %v20306_v26 }
0x251e   :  { %v16983_v59 = vpop.f32.mrf.mxu0 }
0x251f   :  { %v20460_v20 = vadd.f32 %v14672_v57, %v5547_v24  ;;  %v14685_v24 = vld [vmem:[%s23026_s26 + $0x108] sm:$0xff] }
0x2520   :  { %v5538_v38 = vpop.f32.mrf.mxu0 }
0x2521   :  { %v5548_v62 = vadd.f32 %v5538_v38, %v20312_v35  ;;  %v5565_v7 = vsel %vm79_vm0, %v20460_v20, 0.0  ;;  %v14684_v38 = vld [vmem:[%s23026_s26 + $0x100] sm:$0xff] }
0x2522   :  { %5566 = vadd.xlane.f32.xlu0 %v5565_v7  ;;  %v16986_v0 = vpop.f32.mrf.mxu0 }
0x2523   :  { %v20465_v1 = vadd.f32 %v14672_v57, %v5548_v62 }
0x2524   :  { %v5543_v3 = vpop.f32.mrf.mxu0 }
0x2525   :  { %v5568_v5 = vsel %vm79_vm0, %v20465_v1, 0.0  ;;  %v5549_v2 = vadd.f32 %v5543_v3, %v20318_v6 }
0x2526   :  { %5569 = vadd.xlane.f32.xlu1 %v5568_v5  ;;  %v16989_v26 = vpop.f32.mrf.mxu0 }
0x2527   :  { %v20470_v58 = vadd.f32 %v14672_v57, %v5549_v2 }
0x2529   :  { %v5571_v35 = vsel %vm86_vm1, %v20470_v58, 0.0 }
0x252a   :  { %5572 = vadd.xlane.f32.xlu0 %v5571_v35 }
0x25ab   :  { %v5567_v32 = vpop.xlane.xlu0 %5566 }
0x25ac   :  { %v5574_v8 = vmul.f32 0.03125, %v5567_v32 }
0x25ae   :  { %v5577_v9 = vsub.f32 %v20460_v20, %v5574_v8 }
0x25af   :  { %v5570_v10 = vpop.xlane.xlu1 %5569 }
0x25b0   :  { %v5575_v12 = vmul.f32 0.03125, %v5570_v10  ;;  %v5580_v61 = vmul.f32 %v5577_v9, %v5577_v9 }
0x25b2   :  { %v5578_v13 = vsub.f32 %v20465_v1, %v5575_v12  ;;  %v5583_v16 = vsel %vm79_vm0, %v5580_v61, 0.0 }
0x25b3   :  { %5584 = vadd.xlane.f32.xlu1 %v5583_v16  ;;  %v5573_v6 = vpop.xlane.xlu0 %5572 }
0x25b4   :  { %v5581_v63 = vmul.f32 %v5578_v13, %v5578_v13  ;;  %v5576_v45 = vmul.f32 0.03125, %v5573_v6 }
0x25b6   :  { %v5586_v14 = vsel %vm79_vm0, %v5581_v63, 0.0  ;;  %v5579_v46 = vsub.f32 %v20470_v58, %v5576_v45 }
0x25b7   :  { %5587 = vadd.xlane.f32.xlu0 %v5586_v14  ;;  %v14712_v14 = vld [vmem:[%s23025_s24 + $0x138] sm:$0xff] }
0x25b8   :  { %v5582_v17 = vmul.f32 %v5579_v46, %v5579_v46 }
0x25ba   :  { %v5589_v37 = vsel %vm86_vm1, %v5582_v17, 0.0  ;;  %v14710_v17 = vld [vmem:[%s23025_s24 + $0x128] sm:$0xff] }
0x25bb   :  { %5590 = vadd.xlane.f32.xlu1 %v5589_v37  ;;  %v14709_v37 = vld [vmem:[%s23025_s24 + $0x120] sm:$0xff] }
0x263c   :  { %v5585_v30 = vpop.xlane.xlu1 %5584 }
0x263d   :  { %v5592_v33 = vmul.f32 0.03125, %v5585_v30 }
0x263f   :  { %v5595_v34 = vadd.f32 1e-05, %v5592_v33 }
0x2640   :  { %v5588_v31 = vpop.xlane.xlu0 %5587 }
0x2641   :  { %18505 = vrsqrt.f32 %v5595_v34  ;;  %v5593_v49 = vmul.f32 0.03125, %v5588_v31 }
0x2643   :  { %v5596_v48 = vadd.f32 1e-05, %v5593_v49 }
0x2644   :  { %v5591_v40 = vpop.xlane.xlu1 %5590 }
0x2645   :  { %18507 = vrsqrt.f32 %v5596_v48  ;;  %v5594_v60 = vmul.f32 0.03125, %v5591_v40  ;;  %v20661_v48 = vld [vmem:[%s23030_s30 + $0x8] sm:$0xff] }
0x2647   :  { %v5597_v36 = vadd.f32 1e-05, %v5594_v60 }
0x2649   :  { %18509 = vrsqrt.f32 %v5597_v36 }
0x264e   :  { %v18506_v50 = vpop.eup %18505 }
0x264f   :  { %v5601_v29 = vmul.f32 %v18506_v50, %v5577_v9 }
0x2651   :  { %v5610_v42 = vmul.f32 %v14675_v41, %v5601_v29  ;;  %v20668_v29 = vld [vmem:[%s23030_s30 + $0x10] sm:$0x3f] }
0x2652   :  { %v18508_v47 = vpop.eup %18507 }
0x2653   :  { %v20518_v54 = vadd.f32 %v14676_v52, %v5610_v42  ;;  %v5602_v51 = vmul.f32 %v18508_v47, %v5578_v13 }
0x2655   :  { %v5611_v56 = vmul.f32 %v14675_v41, %v5602_v51  ;;  %16999 = vmatmul.mubr.msk.f32.vlgmr.msra.gmra.mxu1 %vm79_vm0, %v20518_v54  ;;  %17033 = vmatmul.mubr.msk.f32.vlgmr.msra.gmra.mxu0 %vm79_vm0, %v20518_v54 }
0x2656   :  { %17008 = vmatpush3.msra.mxu1 %v14687_v53  ;;  %17001 = vmatprep.mubr.msk.f32.mxu1 %vm18743_vm2, %v18742_v21  ;;  %v18510_v44 = vpop.eup %18509 }
0x2657   :  { %v20532_v27 = vadd.f32 %v14676_v52, %v5611_v56  ;;  %17009 = vmatprep.subr.mxu1 %v18742_v21  ;;  %17035 = vmatprep.mubr.msk.f32.mxu0 %vm18743_vm2, %v18742_v21  ;;  %v5603_v57 = vmul.f32 %v18510_v44, %v5579_v46  ;;  %v14711_v46 = vld [vmem:[%s23025_s24 + $0x130] sm:$0xff] }
0x2658   :  { %17010 = vmatpush3.msra.mxu1 %v14686_v4 }
0x2659   :  { %17002 = vmatmul.mubr.msk.f32.gmra.mxu1 %vm79_vm0, %v20532_v27  ;;  %17036 = vmatmul.mubr.msk.f32.gmra.mxu0 %vm79_vm0, %v20532_v27  ;;  %v5612_v59 = vmul.f32 %v14675_v41, %v5603_v57 }
0x265a   :  { %17011 = vmatprep.subr.mxu1 %v18742_v21  ;;  %17004 = vmatprep.mubr.msk.f32.mxu1 %vm18743_vm2, %v18742_v21 }
0x265b   :  { %17012 = vmatpush3.msra.mxu1 %v14685_v24  ;;  %17038 = vmatprep.mubr.msk.f32.mxu0 %vm18743_vm2, %v18742_v21  ;;  %v20552_v62 = vadd.f32 %v14676_v52, %v5612_v59 }
0x265c   :  { %17013 = vmatprep.subr.mxu1 %v18742_v21 }
0x265d   :  { %17014 = vmatpush3.msra.mxu1 %v14684_v38  ;;  %17039 = vmatmul.mubr.msk.f32.gmra.mxu0 %vm79_vm0, %v20552_v62 }
0x265e   :  { %17005 = vmatmul.mubr.msk.f32.gmra.mxu1 %vm79_vm0, %v20552_v62  ;;  %17041 = vmatprep.subr.mxu1 %v18742_v21 }
0x265f   :  { %17015 = vmatprep.mubr.msk.f32.mxu1 %vm18743_vm2, %v18742_v21  ;;  %17062 = vmatprep.mubr.msk.f32.mxu0 %vm18743_vm2, %v18742_v21 }
0x2662   :  { %17016 = vmatmul.mubr.msk.f32.vlgmr.msra.gmra.mxu1 %vm79_vm0, %v20518_v54 }
0x2663   :  { %17018 = vmatprep.mubr.msk.f32.mxu1 %vm18743_vm2, %v18742_v21 }
0x2666   :  { %17019 = vmatmul.mubr.msk.f32.gmra.mxu1 %vm79_vm0, %v20532_v27 }
0x2667   :  { %17021 = vmatprep.mubr.msk.f32.mxu1 %vm18743_vm2, %v18742_v21 }
0x266a   :  { %17022 = vmatmul.mubr.msk.f32.gmra.mxu1 %vm79_vm0, %v20552_v62 }
0x266b   :  { %17047 = vmatprep.mubr.msk.f32.mxu1 %vm18743_vm2, %v18742_v21 }
0x2715   :  { %v5702_v7 = vpop.f32.mrf.mxu1  ;;  %v5872_v0 = vpop.f32.mrf.mxu0 }
0x2717   :  { %v17000_v3 = vpop.f32.mrf.mxu1  ;;  %v17034_v5 = vpop.f32.mrf.mxu0 }
0x2719   :  { %v5707_v2 = vpop.f32.mrf.mxu1  ;;  %v5877_v26 = vpop.f32.mrf.mxu0 }
0x271b   :  { %v17003_v35 = vpop.f32.mrf.mxu1  ;;  %v17037_v32 = vpop.f32.mrf.mxu0 }
0x271d   :  { %v5882_v9 = vpop.f32.mrf.mxu0 }
0x271e   :  { %v5712_v8 = vpop.f32.mrf.mxu1  ;;  %17057 = vmatpush3.msk.msra.mxu0 %vm549_vm4, %v5882_v9 }
0x271f   :  { %v17040_v12 = vpop.f32.mrf.mxu0  ;;  %17058 = vmatprep.subr.mxu0 %v18742_v21 }
0x2720   :  { %v17006_v10 = vpop.f32.mrf.mxu1  ;;  %17059 = vmatpush3.msra.mxu0 %v5877_v26 }
0x2721   :  { %17060 = vmatprep.subr.mxu0 %v18742_v21 }
0x2722   :  { %v5787_v61 = vpop.f32.mrf.mxu1  ;;  %17061 = vmatpush3.msra.mxu0 %v5872_v0 }
0x2723   :  { %17088 = vmatprep.subr.mxu0 %v18742_v21 }
0x2724   :  { %v17017_v13 = vpop.f32.mrf.mxu1 }
0x2726   :  { %v5792_v16 = vpop.f32.mrf.mxu1 }
0x2728   :  { %v17020_v6 = vpop.f32.mrf.mxu1 }
0x272a   :  { %v5797_v63 = vpop.f32.mrf.mxu1 }
0x272b   :  { %17042 = vmatpush3.xpose.msk.msra.mxu1 %vm400_vm3, %v5797_v63 }
0x272c   :  { %v17023_v45 = vpop.f32.mrf.mxu1  ;;  %17043 = vmatprep.subr.mxu1 %v18742_v21 }
0x272f   :  { %17044 = vmatpush3.xpose.msk.msra.mxu1 %vm400_vm3, %v5792_v16 }
0x2730   :  { %17045 = vmatprep.subr.mxu1 %v18742_v21 }
0x2733   :  { %17046 = vmatpush3.xpose.msk.msra.mxu1 %vm400_vm3, %v5787_v61 }
0x2734   :  { %17071 = vmatprep.subr.mxu1 %v18742_v21 }
0x2736   :  { %17048 = vmatmul.mubr.msk.f32.vlgmr.msra.gmra.mxu1 %vm400_vm3, %v5702_v7 }
0x2737   :  { %17050 = vmatprep.mubr.msk.f32.mxu1 %vm18743_vm2, %v18742_v21  ;;  %17072 = vmatpush3.msra.mxu1 %v14712_v14 }
0x2738   :  { %17073 = vmatprep.subr.mxu1 %v18742_v21 }
0x2739   :  { %17074 = vmatpush3.msra.mxu1 %v14711_v46 }
0x273a   :  { %17051 = vmatmul.mubr.msk.f32.gmra.mxu1 %vm400_vm3, %v5707_v2  ;;  %17075 = vmatprep.subr.mxu1 %v18742_v21 }
0x273b   :  { %17053 = vmatprep.mubr.msk.f32.mxu1 %vm18743_vm2, %v18742_v21  ;;  %17076 = vmatpush3.msra.mxu1 %v14710_v17 }
0x273c   :  { %17077 = vmatprep.subr.mxu1 %v18742_v21 }
0x273d   :  { %17078 = vmatpush3.msra.mxu1 %v14709_v37 }
0x273e   :  { %17054 = vmatmul.mubr.msk.f32.gmra.mxu1 %vm400_vm3, %v5712_v8  ;;  %17105 = vmatprep.subr.mxu1 %v18742_v21 }
0x273f   :  { %17079 = vmatprep.mubr.msk.f32.mxu1 %vm18743_vm2, %v18742_v21 }
0x2742   :  { %17080 = vmatmul.mubr.msk.f32.vlgmr.msra.gmra.mxu1 %vm79_vm0, %v20518_v54 }
0x2743   :  { %17082 = vmatprep.mubr.msk.f32.mxu1 %vm18743_vm2, %v18742_v21  ;;  %17106 = vmatpush3.msra.mxu1 %v14726_v43  ;;  %v14719_v43 = vld [vmem:[%s23026_s26 + $0x138] sm:$0xff] }
0x2744   :  { %17107 = vmatprep.subr.mxu1 %v18742_v21 }
0x2745   :  { %17108 = vmatpush3.msra.mxu1 %v14725_v19  ;;  %v14718_v19 = vld [vmem:[%s23026_s26 + $0x130] sm:$0xff] }
0x2746   :  { %17083 = vmatmul.mubr.msk.f32.gmra.mxu1 %vm79_vm0, %v20532_v27  ;;  %17109 = vmatprep.subr.mxu1 %v18742_v21 }
0x2747   :  { %17085 = vmatprep.mubr.msk.f32.mxu1 %vm18743_vm2, %v18742_v21  ;;  %17110 = vmatpush3.msra.mxu1 %v14724_v22 }
0x2748   :  { %17111 = vmatprep.subr.mxu1 %v18742_v21 }
0x2749   :  { %17112 = vmatpush3.msra.mxu1 %v14723_v55 }
0x274a   :  { %17086 = vmatmul.mubr.msk.f32.gmra.mxu1 %vm79_vm0, %v20552_v62  ;;  %17137 = vmatprep.subr.mxu1 %v18742_v21 }
0x274b   :  { %17113 = vmatprep.mubr.msk.f32.mxu1 %vm18743_vm2, %v18742_v21 }
0x274e   :  { %17114 = vmatmul.mubr.msk.f32.vlgmr.msra.gmra.mxu1 %vm79_vm0, %v20518_v54 }
0x274f   :  { %17116 = vmatprep.mubr.msk.f32.mxu1 %vm18743_vm2, %v18742_v21 }
0x2752   :  { %17117 = vmatmul.mubr.msk.f32.gmra.mxu1 %vm79_vm0, %v20532_v27 }
0x2753   :  { %17119 = vmatprep.mubr.msk.f32.mxu1 %vm18743_vm2, %v18742_v21 }
0x2756   :  { %17120 = vmatmul.mubr.msk.f32.gmra.mxu1 %vm79_vm0, %v20552_v62 }
0x2757   :  { %17143 = vmatprep.mubr.msk.f32.mxu1 %vm18743_vm2, %v18742_v21 }
0x27f6   :  { %v5970_v23 = vpop.f32.mrf.mxu1 }
0x27f7   :  { %v5984_v25 = vmul.f32 0.35355338, %v5970_v23  ;;  %v14717_v23 = vld [vmem:[%s23026_s26 + $0x128] sm:$0xff] }
0x27f8   :  { %v17049_v28 = vpop.f32.mrf.mxu1 }
0x27f9   :  { %v5987_v30 = vadd.f32 %v20654_v39, %v5984_v25  ;;  %v14716_v25 = vld [vmem:[%s23026_s26 + $0x120] sm:$0xff] }
0x27fa   :  { %v5975_v33 = vpop.f32.mrf.mxu1 }
0x27fb   :  { %v5985_v34 = vmul.f32 0.35355338, %v5975_v33  ;;  %v5990_v31 = vsel %vm505_vm5, %v5987_v30, -inf }
0x27fc   :  { %5991 = vmax.xlane.f32.xlu0 %v5990_v31  ;;  %v17052_v49 = vpop.f32.mrf.mxu1 }
0x27fd   :  { %v5988_v40 = vadd.f32 %v20661_v48, %v5985_v34 }
0x27fe   :  { %v5980_v60 = vpop.f32.mrf.mxu1 }
0x27ff   :  { %v5986_v36 = vmul.f32 0.35355338, %v5980_v60  ;;  %v5993_v50 = vsel %vm505_vm5, %v5988_v40, -inf }
0x2800   :  { %5994 = vmax.xlane.f32.xlu1 %v5993_v50  ;;  %v17055_v41 = vpop.f32.mrf.mxu1 }
0x2801   :  { %v5989_v52 = vadd.f32 %v20668_v29, %v5986_v36 }
0x2802   :  { %v20671_v42 = vpop.f32.mrf.mxu1 }
0x2803   :  { %v5996_v47 = vsel %vm512_vm6, %v5989_v52, -inf }
0x2804   :  { %5997 = vmax.xlane.f32.xlu0 %v5996_v47  ;;  %v17081_v51 = vpop.f32.mrf.mxu1 }
0x2806   :  { %v20674_v53 = vpop.f32.mrf.mxu1 }
0x2808   :  { %v17084_v56 = vpop.f32.mrf.mxu1 }
0x280a   :  { %v20676_v4 = vpop.f32.mrf.mxu1 }
0x280c   :  { %v17087_v44 = vpop.f32.mrf.mxu1 }
0x280e   :  { %v6358_v57 = vpop.f32.mrf.mxu1 }
0x2810   :  { %v17115_v24 = vpop.f32.mrf.mxu1 }
0x2812   :  { %v6363_v59 = vpop.f32.mrf.mxu1 }
0x2814   :  { %v17118_v38 = vpop.f32.mrf.mxu1 }
0x2816   :  { %v6368_v7 = vpop.f32.mrf.mxu1 }
0x2817   :  { %17138 = vmatpush3.msk.msra.mxu1 %vm549_vm4, %v6368_v7 }
0x2818   :  { %v17121_v0 = vpop.f32.mrf.mxu1  ;;  %17139 = vmatprep.subr.mxu1 %v18742_v21 }
0x2819   :  { %17140 = vmatpush3.msra.mxu1 %v6363_v59 }
0x281a   :  { %17141 = vmatprep.subr.mxu1 %v18742_v21 }
0x281b   :  { %17142 = vmatpush3.msra.mxu1 %v6358_v57 }
0x281c   :  { %17163 = vmatprep.subr.mxu1 %v18742_v21 }
0x2885   :  { %v5992_v3 = vpop.xlane.xlu0 %5991 }
0x2886   :  { %v5999_v5 = vsub.f32 %v5987_v30, %v5992_v3 }
0x2888   :  { %v6002_v2 = vmul.f32 1.442695, %v5999_v5 }
0x2889   :  { %v5995_v26 = vpop.xlane.xlu1 %5994 }
0x288a   :  { %18511 = vpow2.f32 %v6002_v2  ;;  %v6000_v35 = vsub.f32 %v5988_v40, %v5995_v26 }
0x288c   :  { %v6004_v32 = vmul.f32 1.442695, %v6000_v35 }
0x288d   :  { %v5998_v8 = vpop.xlane.xlu0 %5997 }
0x288e   :  { %18513 = vpow2.f32 %v6004_v32  ;;  %v6001_v9 = vsub.f32 %v5989_v52, %v5998_v8 }
0x2890   :  { %v6006_v10 = vmul.f32 1.442695, %v6001_v9 }
0x2892   :  { %18515 = vpow2.f32 %v6006_v10 }
0x2897   :  { %v18512_v12 = vpop.eup %18511 }
0x2898   :  { %v6008_v61 = vsel %vm505_vm5, %v18512_v12, 0.0 }
0x2899   :  { %6009 = vadd.xlane.f32.xlu1 %v6008_v61 }
0x289b   :  { %v18514_v13 = vpop.eup %18513 }
0x289c   :  { %v6011_v16 = vsel %vm505_vm5, %v18514_v13, 0.0 }
0x289d   :  { %6012 = vadd.xlane.f32.xlu0 %v6011_v16 }
0x289f   :  { %v18516_v6 = vpop.eup %18515 }
0x28a0   :  { %v6014_v63 = vsel %vm512_vm6, %v18516_v6, 0.0 }
0x28a1   :  { %6015 = vadd.xlane.f32.xlu1 %v6014_v63 }
0x2922   :  { %v6010_v45 = vpop.xlane.xlu1 %6009 }
0x2923   :  { %18517 = vrcp.f32 %v6010_v45 }
0x2926   :  { %v6013_v14 = vpop.xlane.xlu0 %6012 }
0x2927   :  { %18519 = vrcp.f32 %v6013_v14 }
0x292a   :  { %v6016_v46 = vpop.xlane.xlu1 %6015 }
0x292b   :  { %18521 = vrcp.f32 %v6016_v46 }
0x2930   :  { %v18518_v17 = vpop.eup %18517 }
0x2931   :  { %v6020_v37 = vmul.f32 %v18518_v17, %v18512_v12 }
0x2933   :  { %17063 = vmatmul.mubr.msk.f32.vlgmr.msra.gmra.mxu0 %vm505_vm5, %v6020_v37  ;;  %v14740_v37 = vld [vmem:[%s22994_s7 + $0x48] sm:$0xff] }
0x2934   :  { %v18520_v22 = vpop.eup %18519  ;;  %17089 = vmatpush3.msra.mxu0 %v14719_v43  ;;  %17065 = vmatprep.mubr.msk.f32.mxu0 %vm18743_vm2, %v18742_v21 }
0x2935   :  { %17090 = vmatprep.subr.mxu0 %v18742_v21  ;;  %v6021_v55 = vmul.f32 %v18520_v22, %v18514_v13 }
0x2936   :  { %17091 = vmatpush3.msra.mxu0 %v14718_v19 }
0x2937   :  { %17066 = vmatmul.mubr.msk.f32.gmra.mxu0 %vm505_vm5, %v6021_v55  ;;  %17092 = vmatprep.subr.mxu0 %v18742_v21 }
0x2938   :  { %v18522_v28 = vpop.eup %18521  ;;  %17068 = vmatprep.mubr.msk.f32.mxu0 %vm18743_vm2, %v18742_v21  ;;  %17093 = vmatpush3.msra.mxu0 %v14717_v23 }
0x2939   :  { %v6022_v30 = vmul.f32 %v18522_v28, %v18516_v6  ;;  %17094 = vmatprep.subr.mxu0 %v18742_v21 }
0x293a   :  { %17095 = vmatpush3.msra.mxu0 %v14716_v25  ;;  %v14708_v25 = vld [vmem:[%s22994_s7 + $0x40] sm:$0xff] }
0x293b   :  { %17069 = vmatmul.mubr.msk.f32.gmra.mxu0 %vm505_vm5, %v6022_v30  ;;  %17122 = vmatprep.subr.mxu0 %v18742_v21 }
0x293c   :  { %17096 = vmatprep.mubr.msk.f32.mxu0 %vm18743_vm2, %v18742_v21 }
0x293f   :  { %17097 = vmatmul.mubr.msk.f32.vlgmr.msra.gmra.mxu0 %vm79_vm0, %v20518_v54 }
0x2940   :  { %17099 = vmatprep.mubr.msk.f32.mxu0 %vm18743_vm2, %v18742_v21 }
0x2943   :  { %17100 = vmatmul.mubr.msk.f32.gmra.mxu0 %vm79_vm0, %v20532_v27 }
0x2944   :  { %17102 = vmatprep.mubr.msk.f32.mxu0 %vm18743_vm2, %v18742_v21 }
0x2947   :  { %17103 = vmatmul.mubr.msk.f32.gmra.mxu0 %vm79_vm0, %v20552_v62 }
0x2948   :  { %17128 = vmatprep.mubr.msk.f32.mxu0 %vm18743_vm2, %v18742_v21 }
0x29f3   :  { %v20722_v33 = vpop.f32.mrf.mxu0 }
0x29f5   :  { %v17064_v34 = vpop.f32.mrf.mxu0 }
0x29f7   :  { %v20724_v31 = vpop.f32.mrf.mxu0 }
0x29f9   :  { %v17067_v49 = vpop.f32.mrf.mxu0 }
0x29fb   :  { %v20726_v40 = vpop.f32.mrf.mxu0 }
0x29fd   :  { %v17070_v60 = vpop.f32.mrf.mxu0 }
0x29fe   :  { %v14757_v60 = vld [vmem:[%s23026_s26 + $0x158] sm:$0xff] }
0x29ff   :  { %v6273_v36 = vpop.f32.mrf.mxu0 }
0x2a01   :  { %v17098_v50 = vpop.f32.mrf.mxu0 }
0x2a02   :  { %v14755_v50 = vld [vmem:[%s23026_s26 + $0x148] sm:$0xff] }
0x2a03   :  { %v6278_v41 = vpop.f32.mrf.mxu0 }
0x2a05   :  { %v17101_v52 = vpop.f32.mrf.mxu0 }
0x2a07   :  { %v6283_v47 = vpop.f32.mrf.mxu0 }
0x2a08   :  { %17123 = vmatpush3.xpose.msk.msra.mxu0 %vm400_vm3, %v6283_v47  ;;  %v14748_v47 = vld [vmem:[%s23025_s24 + $0x148] sm:$0xff] }
0x2a09   :  { %v17104_v51 = vpop.f32.mrf.mxu0  ;;  %17124 = vmatprep.subr.mxu0 %v18742_v21 }
0x2a0c   :  { %17125 = vmatpush3.xpose.msk.msra.mxu0 %vm400_vm3, %v6278_v41  ;;  %v14749_v41 = vld [vmem:[%s23025_s24 + $0x150] sm:$0xff] }
0x2a0d   :  { %17126 = vmatprep.subr.mxu0 %v18742_v21 }
0x2a10   :  { %17127 = vmatpush3.xpose.msk.msra.mxu0 %vm400_vm3, %v6273_v36  ;;  %v14756_v36 = vld [vmem:[%s23026_s26 + $0x150] sm:$0xff] }
0x2a11   :  { %17152 = vmatprep.subr.mxu0 %v18742_v21 }
0x2a13   :  { %17129 = vmatmul.mubr.msk.f32.vlgmr.msra.gmra.mxu0 %vm400_vm3, %v20671_v42 }
0x2a14   :  { %17131 = vmatprep.mubr.msk.f32.mxu0 %vm18743_vm2, %v18742_v21  ;;  %17153 = vmatpush3.msra.mxu0 %v14740_v37 }
0x2a15   :  { %17174 = vmatprep.subr.mxu0 %v18742_v21 }
0x2a17   :  { %17132 = vmatmul.mubr.msk.f32.gmra.mxu0 %vm400_vm3, %v20674_v53 }
0x2a18   :  { %17134 = vmatprep.mubr.msk.f32.mxu0 %vm18743_vm2, %v18742_v21 }
0x2a1b   :  { %17135 = vmatmul.mubr.msk.f32.gmra.mxu0 %vm400_vm3, %v20676_v4 }
0x2a1c   :  { %17154 = vmatprep.mubr.msk.f32.mxu0 %vm18743_vm2, %v18742_v21 }
0x2ad3   :  { %v6456_v56 = vpop.f32.mrf.mxu0 }
0x2ad4   :  { %v6470_v44 = vmul.f32 0.35355338, %v6456_v56  ;;  %v14747_v56 = vld [vmem:[%s23025_s24 + $0x140] sm:$0xff] }
0x2ad5   :  { %v17130_v57 = vpop.f32.mrf.mxu0 }
0x2ad6   :  { %v6473_v42 = vadd.f32 %v20654_v39, %v6470_v44 }
0x2ad7   :  { %v6461_v24 = vpop.f32.mrf.mxu0 }
0x2ad8   :  { %v6471_v59 = vmul.f32 0.35355338, %v6461_v24  ;;  %v6476_v38 = vsel %vm505_vm5, %v6473_v42, -inf  ;;  %v14764_v24 = vld [vmem:[%s23029_s4 + $0x158] sm:$0xff] }
0x2ad9   :  { %6477 = vmax.xlane.f32.xlu0 %v6476_v38  ;;  %v17133_v53 = vpop.f32.mrf.mxu0  ;;  %v14763_v38 = vld [vmem:[%s23029_s4 + $0x150] sm:$0xff] }
0x2ada   :  { %v6474_v7 = vadd.f32 %v20661_v48, %v6471_v59 }
0x2adb   :  { %v6466_v0 = vpop.f32.mrf.mxu0 }
0x2adc   :  { %v6472_v3 = vmul.f32 0.35355338, %v6466_v0  ;;  %v6479_v4 = vsel %vm505_vm5, %v6474_v7, -inf }
0x2add   :  { %6480 = vmax.xlane.f32.xlu1 %v6479_v4  ;;  %v17136_v5 = vpop.f32.mrf.mxu0 }
0x2ade   :  { %v6475_v2 = vadd.f32 %v20668_v29, %v6472_v3  ;;  %v14761_v3 = vld [vmem:[%s23029_s4 + $0x140] sm:$0xff] }
0x2ae0   :  { %v6482_v26 = vsel %vm512_vm6, %v6475_v2, -inf }
0x2ae1   :  { %6483 = vmax.xlane.f32.xlu0 %v6482_v26 }
0x2b62   :  { %v6478_v35 = vpop.xlane.xlu0 %6477 }
0x2b63   :  { %v6485_v32 = vsub.f32 %v6473_v42, %v6478_v35 }
0x2b65   :  { %v6488_v8 = vmul.f32 1.442695, %v6485_v32 }
0x2b66   :  { %v6481_v9 = vpop.xlane.xlu1 %6480 }
0x2b67   :  { %18523 = vpow2.f32 %v6488_v8  ;;  %v6486_v10 = vsub.f32 %v6474_v7, %v6481_v9  ;;  %v14762_v7 = vld [vmem:[%s23029_s4 + $0x148] sm:$0xff] }
0x2b69   :  { %v6490_v12 = vmul.f32 1.442695, %v6486_v10 }
0x2b6a   :  { %v6484_v61 = vpop.xlane.xlu0 %6483 }
0x2b6b   :  { %18525 = vpow2.f32 %v6490_v12  ;;  %v6487_v13 = vsub.f32 %v6475_v2, %v6484_v61 }
0x2b6d   :  { %v6492_v16 = vmul.f32 1.442695, %v6487_v13 }
0x2b6f   :  { %18527 = vpow2.f32 %v6492_v16 }
0x2b74   :  { %v18524_v6 = vpop.eup %18523 }
0x2b75   :  { %v6494_v63 = vsel %vm505_vm5, %v18524_v6, 0.0 }
0x2b76   :  { %6495 = vadd.xlane.f32.xlu1 %v6494_v63 }
0x2b78   :  { %v18526_v45 = vpop.eup %18525 }
0x2b79   :  { %v6497_v14 = vsel %vm505_vm5, %v18526_v45, 0.0 }
0x2b7a   :  { %6498 = vadd.xlane.f32.xlu0 %v6497_v14 }
0x2b7c   :  { %v18528_v46 = vpop.eup %18527 }
0x2b7d   :  { %v6500_v17 = vsel %vm512_vm6, %v18528_v46, 0.0 }
0x2b7e   :  { %6501 = vadd.xlane.f32.xlu1 %v6500_v17 }
0x2bff   :  { %v6496_v43 = vpop.xlane.xlu1 %6495 }
0x2c00   :  { %18529 = vrcp.f32 %v6496_v43 }
0x2c03   :  { %v6499_v19 = vpop.xlane.xlu0 %6498 }
0x2c04   :  { %18531 = vrcp.f32 %v6499_v19 }
0x2c07   :  { %v6502_v22 = vpop.xlane.xlu1 %6501 }
0x2c08   :  { %18533 = vrcp.f32 %v6502_v22 }
0x2c0d   :  { %v18530_v55 = vpop.eup %18529 }
0x2c0e   :  { %v6506_v23 = vmul.f32 %v18530_v55, %v18524_v6 }
0x2c10   :  { %17144 = vmatmul.mubr.msk.f32.vlgmr.msra.gmra.mxu1 %vm505_vm5, %v6506_v23 }
0x2c11   :  { %v18532_v28 = vpop.eup %18531  ;;  %17146 = vmatprep.mubr.msk.f32.mxu1 %vm18743_vm2, %v18742_v21  ;;  %17164 = vmatpush3.msra.mxu1 %v14708_v25 }
0x2c12   :  { %v6507_v30 = vmul.f32 %v18532_v28, %v18526_v45  ;;  %17191 = vmatprep.subr.mxu1 %v18742_v21 }
0x2c14   :  { %17147 = vmatmul.mubr.msk.f32.gmra.mxu1 %vm505_vm5, %v6507_v30 }
0x2c15   :  { %v18534_v34 = vpop.eup %18533  ;;  %17149 = vmatprep.mubr.msk.f32.mxu1 %vm18743_vm2, %v18742_v21 }
0x2c16   :  { %v6508_v49 = vmul.f32 %v18534_v34, %v18528_v46 }
0x2c18   :  { %17150 = vmatmul.mubr.msk.f32.gmra.mxu1 %vm505_vm5, %v6508_v49 }
0x2c19   :  { %17165 = vmatprep.mubr.msk.f32.mxu1 %vm18743_vm2, %v18742_v21 }
0x2c1c   :  { %17166 = vmatmul.mubr.msk.f32.vlgmr.msra.gmra.mxu1 %vm400_vm3, %v20722_v33  ;;  %v14754_v33 = vld [vmem:[%s23026_s26 + $0x140] sm:$0xff] }
0x2c1d   :  { %17168 = vmatprep.mubr.msk.f32.mxu1 %vm18743_vm2, %v18742_v21  ;;  %17192 = vmatpush3.msra.mxu1 %v14757_v60 }
0x2c1e   :  { %17193 = vmatprep.subr.mxu1 %v18742_v21 }
0x2c1f   :  { %17194 = vmatpush3.msra.mxu1 %v14756_v36 }
0x2c20   :  { %17169 = vmatmul.mubr.msk.f32.gmra.mxu1 %vm400_vm3, %v20724_v31  ;;  %17195 = vmatprep.subr.mxu1 %v18742_v21  ;;  %v14750_v31 = vld [vmem:[%s23025_s24 + $0x158] sm:$0xff] }
0x2c21   :  { %17171 = vmatprep.mubr.msk.f32.mxu1 %vm18743_vm2, %v18742_v21  ;;  %17196 = vmatpush3.msra.mxu1 %v14755_v50 }
0x2c22   :  { %17197 = vmatprep.subr.mxu1 %v18742_v21 }
0x2c23   :  { %17198 = vmatpush3.msra.mxu1 %v14754_v33 }
0x2c24   :  { %17172 = vmatmul.mubr.msk.f32.gmra.mxu1 %vm400_vm3, %v20726_v40  ;;  %17225 = vmatprep.subr.mxu1 %v18742_v21 }
0x2c25   :  { %17199 = vmatprep.mubr.msk.f32.mxu1 %vm18743_vm2, %v18742_v21 }
0x2c28   :  { %17200 = vmatmul.mubr.msk.f32.vlgmr.msra.gmra.mxu1 %vm79_vm0, %v20518_v54 }
0x2c29   :  { %17202 = vmatprep.mubr.msk.f32.mxu1 %vm18743_vm2, %v18742_v21 }
0x2c2c   :  { %17203 = vmatmul.mubr.msk.f32.gmra.mxu1 %vm79_vm0, %v20532_v27 }
0x2c2d   :  { %17205 = vmatprep.mubr.msk.f32.mxu1 %vm18743_vm2, %v18742_v21 }
0x2c30   :  { %17206 = vmatmul.mubr.msk.f32.gmra.mxu1 %vm79_vm0, %v20552_v62 }
0x2c31   :  { %17231 = vmatprep.mubr.msk.f32.mxu1 %vm18743_vm2, %v18742_v21 }
0x2cd0   :  { %v6587_v40 = vpop.f32.mrf.mxu1 }
0x2cd1   :  { %17155 = vmatmul.mubr.msk.f32.vlgmr.msra.gmra.mxu0 %vm400_vm3, %v6587_v40 }
0x2cd2   :  { %v17145_v52 = vpop.f32.mrf.mxu1  ;;  %17175 = vmatpush3.msra.mxu0 %v14750_v31  ;;  %17157 = vmatprep.mubr.msk.f32.mxu0 %vm18743_vm2, %v18742_v21 }
0x2cd3   :  { %17176 = vmatprep.subr.mxu0 %v18742_v21 }
0x2cd4   :  { %v6592_v51 = vpop.f32.mrf.mxu1  ;;  %17177 = vmatpush3.msra.mxu0 %v14749_v41 }
0x2cd5   :  { %17158 = vmatmul.mubr.msk.f32.gmra.mxu0 %vm400_vm3, %v6592_v51  ;;  %17178 = vmatprep.subr.mxu0 %v18742_v21 }
0x2cd6   :  { %v17148_v44 = vpop.f32.mrf.mxu1  ;;  %17160 = vmatprep.mubr.msk.f32.mxu0 %vm18743_vm2, %v18742_v21  ;;  %17179 = vmatpush3.msra.mxu0 %v14748_v47 }
0x2cd7   :  { %17180 = vmatprep.subr.mxu0 %v18742_v21 }
0x2cd8   :  { %v6597_v57 = vpop.f32.mrf.mxu1  ;;  %17181 = vmatpush3.msra.mxu0 %v14747_v56 }
0x2cd9   :  { %17161 = vmatmul.mubr.msk.f32.gmra.mxu0 %vm400_vm3, %v6597_v57  ;;  %17208 = vmatprep.subr.mxu0 %v18742_v21 }
0x2cda   :  { %v17151_v42 = vpop.f32.mrf.mxu1  ;;  %17182 = vmatprep.mubr.msk.f32.mxu0 %vm18743_vm2, %v18742_v21 }
0x2cdc   :  { %v20840_v59 = vpop.f32.mrf.mxu1 }
0x2cdd   :  { %17183 = vmatmul.mubr.msk.f32.vlgmr.msra.gmra.mxu0 %vm79_vm0, %v20518_v54 }
0x2cde   :  { %v17167_v53 = vpop.f32.mrf.mxu1  ;;  %17185 = vmatprep.mubr.msk.f32.mxu0 %vm18743_vm2, %v18742_v21  ;;  %17209 = vmatpush3.msra.mxu0 %v14764_v24 }
0x2cdf   :  { %17210 = vmatprep.subr.mxu0 %v18742_v21 }
0x2ce0   :  { %v20853_v0 = vpop.f32.mrf.mxu1  ;;  %17211 = vmatpush3.msra.mxu0 %v14763_v38 }
0x2ce1   :  { %17186 = vmatmul.mubr.msk.f32.gmra.mxu0 %vm79_vm0, %v20532_v27  ;;  %17212 = vmatprep.subr.mxu0 %v18742_v21 }
0x2ce2   :  { %v17170_v4 = vpop.f32.mrf.mxu1  ;;  %17188 = vmatprep.mubr.msk.f32.mxu0 %vm18743_vm2, %v18742_v21  ;;  %17213 = vmatpush3.msra.mxu0 %v14762_v7 }
0x2ce3   :  { %17214 = vmatprep.subr.mxu0 %v18742_v21 }
0x2ce4   :  { %v20864_v5 = vpop.f32.mrf.mxu1  ;;  %17215 = vmatpush3.msra.mxu0 %v14761_v3 }
0x2ce5   :  { %17189 = vmatmul.mubr.msk.f32.gmra.mxu0 %vm79_vm0, %v20552_v62  ;;  %17240 = vmatprep.subr.mxu0 %v18742_v21 }
0x2ce6   :  { %v17173_v2 = vpop.f32.mrf.mxu1  ;;  %17216 = vmatprep.mubr.msk.f32.mxu0 %vm18743_vm2, %v18742_v21 }
0x2ce8   :  { %v6937_v26 = vpop.f32.mrf.mxu1 }
0x2ce9   :  { %17217 = vmatmul.mubr.msk.f32.vlgmr.msra.gmra.mxu0 %vm79_vm0, %v20518_v54 }
0x2cea   :  { %v17201_v35 = vpop.f32.mrf.mxu1  ;;  %17219 = vmatprep.mubr.msk.f32.mxu0 %vm18743_vm2, %v18742_v21 }
0x2cec   :  { %v6942_v32 = vpop.f32.mrf.mxu1 }
0x2ced   :  { %17220 = vmatmul.mubr.msk.f32.gmra.mxu0 %vm79_vm0, %v20532_v27 }
0x2cee   :  { %v17204_v8 = vpop.f32.mrf.mxu1  ;;  %17222 = vmatprep.mubr.msk.f32.mxu0 %vm18743_vm2, %v18742_v21 }
0x2cf0   :  { %v6947_v9 = vpop.f32.mrf.mxu1 }
0x2cf1   :  { %17223 = vmatmul.mubr.msk.f32.gmra.mxu0 %vm79_vm0, %v20552_v62  ;;  %17226 = vmatpush3.xpose.msk.msra.mxu1 %vm400_vm3, %v6947_v9 }
0x2cf2   :  { %v17207_v10 = vpop.f32.mrf.mxu1  ;;  %17227 = vmatprep.subr.mxu1 %v18742_v21  ;;  %17246 = vmatprep.mubr.msk.f32.mxu0 %vm18743_vm2, %v18742_v21 }
0x2cf5   :  { %17228 = vmatpush3.xpose.msk.msra.mxu1 %vm400_vm3, %v6942_v32 }
0x2cf6   :  { %17229 = vmatprep.subr.mxu1 %v18742_v21 }
0x2cf9   :  { %17230 = vmatpush3.xpose.msk.msra.mxu1 %vm400_vm3, %v6937_v26 }
0x2cfa   :  { %17255 = vmatprep.subr.mxu1 %v18742_v21 }
0x2d91   :  { %v20889_v12 = vpop.f32.mrf.mxu0 }
0x2d93   :  { %v17156_v61 = vpop.f32.mrf.mxu0 }
0x2d94   :  { %v14778_v61 = vld [vmem:[%s22994_s7 + $0x50] sm:$0xff] }
0x2d95   :  { %v20891_v13 = vpop.f32.mrf.mxu0 }
0x2d97   :  { %v17159_v16 = vpop.f32.mrf.mxu0 }
0x2d99   :  { %v20893_v6 = vpop.f32.mrf.mxu0 }
0x2d9b   :  { %v17162_v63 = vpop.f32.mrf.mxu0 }
0x2d9d   :  { %v6852_v45 = vpop.f32.mrf.mxu0 }
0x2d9e   :  { %17232 = vmatmul.mubr.msk.f32.vlgmr.msra.gmra.mxu1 %vm400_vm3, %v6852_v45 }
0x2d9f   :  { %v17184_v14 = vpop.f32.mrf.mxu0  ;;  %17234 = vmatprep.mubr.msk.f32.mxu1 %vm18743_vm2, %v18742_v21  ;;  %17256 = vmatpush3.msra.mxu1 %v14778_v61  ;;  %v6778_v61 = vadd.f32 %v20864_v5, %v20893_v6 }
0x2da0   :  { %17283 = vmatprep.subr.mxu1 %v18742_v21 }
0x2da1   :  { %v6857_v46 = vpop.f32.mrf.mxu0 }
0x2da2   :  { %17235 = vmatmul.mubr.msk.f32.gmra.mxu1 %vm400_vm3, %v6857_v46 }
0x2da3   :  { %v17187_v17 = vpop.f32.mrf.mxu0  ;;  %17237 = vmatprep.mubr.msk.f32.mxu1 %vm18743_vm2, %v18742_v21 }
0x2da4   :  { %v14785_v17 = vld [vmem:[%s23025_s24 + $0x178] sm:$0xff] }
0x2da5   :  { %v6862_v37 = vpop.f32.mrf.mxu0 }
0x2da6   :  { %17238 = vmatmul.mubr.msk.f32.gmra.mxu1 %vm400_vm3, %v6862_v37  ;;  %v14784_v37 = vld [vmem:[%s23025_s24 + $0x170] sm:$0xff] }
0x2da7   :  { %v17190_v43 = vpop.f32.mrf.mxu0  ;;  %17257 = vmatprep.mubr.msk.f32.mxu1 %vm18743_vm2, %v18742_v21 }
0x2da9   :  { %v7022_v19 = vpop.f32.mrf.mxu0 }
0x2dab   :  { %v17218_v22 = vpop.f32.mrf.mxu0 }
0x2dac   :  { %v14783_v22 = vld [vmem:[%s23025_s24 + $0x168] sm:$0xff] }
0x2dad   :  { %v7027_v55 = vpop.f32.mrf.mxu0 }
0x2daf   :  { %v17221_v23 = vpop.f32.mrf.mxu0 }
0x2db1   :  { %v7032_v25 = vpop.f32.mrf.mxu0 }
0x2db2   :  { %17241 = vmatpush3.msk.msra.mxu0 %vm549_vm4, %v7032_v25 }
0x2db3   :  { %v17224_v28 = vpop.f32.mrf.mxu0  ;;  %17242 = vmatprep.subr.mxu0 %v18742_v21 }
0x2db4   :  { %17243 = vmatpush3.msra.mxu0 %v7027_v55  ;;  %v14782_v55 = vld [vmem:[%s23025_s24 + $0x160] sm:$0xff]  ;;  %v14799_v28 = vld [vmem:[%s23029_s4 + $0x178] sm:$0xff] }
0x2db5   :  { %17244 = vmatprep.subr.mxu0 %v18742_v21 }
0x2db6   :  { %17245 = vmatpush3.msra.mxu0 %v7022_v19 }
0x2db7   :  { %17266 = vmatprep.subr.mxu0 %v18742_v21 }
0x2e5e   :  { %v7120_v30 = vpop.f32.mrf.mxu1 }
0x2e5f   :  { %v7134_v34 = vmul.f32 0.35355338, %v7120_v30  ;;  %v14798_v30 = vld [vmem:[%s23029_s4 + $0x170] sm:$0xff] }
0x2e60   :  { %v17233_v49 = vpop.f32.mrf.mxu1 }
0x2e61   :  { %v7137_v60 = vadd.f32 %v20654_v39, %v7134_v34  ;;  %v14797_v34 = vld [vmem:[%s23029_s4 + $0x168] sm:$0xff]  ;;  %v14796_v49 = vld [vmem:[%s23029_s4 + $0x160] sm:$0xff] }
0x2e62   :  { %v7125_v36 = vpop.f32.mrf.mxu1 }
0x2e63   :  { %v7135_v50 = vmul.f32 0.35355338, %v7125_v36  ;;  %v7140_v33 = vsel %vm505_vm5, %v7137_v60, -inf }
0x2e64   :  { %7141 = vmax.xlane.f32.xlu0 %v7140_v33  ;;  %v17236_v31 = vpop.f32.mrf.mxu1 }
0x2e65   :  { %v7138_v40 = vadd.f32 %v20661_v48, %v7135_v50  ;;  %v14791_v50 = vld [vmem:[%s23026_s26 + $0x170] sm:$0xff]  ;;  %v14790_v31 = vld [vmem:[%s23026_s26 + $0x168] sm:$0xff] }
0x2e66   :  { %v7130_v41 = vpop.f32.mrf.mxu1 }
0x2e67   :  { %v7136_v52 = vmul.f32 0.35355338, %v7130_v41  ;;  %v7143_v47 = vsel %vm505_vm5, %v7138_v40, -inf  ;;  %v14789_v41 = vld [vmem:[%s23026_s26 + $0x160] sm:$0xff] }
0x2e68   :  { %7144 = vmax.xlane.f32.xlu1 %v7143_v47  ;;  %v17239_v51 = vpop.f32.mrf.mxu1 }
0x2e69   :  { %v7139_v56 = vadd.f32 %v20668_v29, %v7136_v52 }
0x2e6b   :  { %v7146_v44 = vsel %vm512_vm6, %v7139_v56, -inf }
0x2e6c   :  { %7147 = vmax.xlane.f32.xlu0 %v7146_v44 }
0x2eed   :  { %v7142_v57 = vpop.xlane.xlu0 %7141 }
0x2eee   :  { %v7149_v42 = vsub.f32 %v7137_v60, %v7142_v57  ;;  %v14792_v60 = vld [vmem:[%s23026_s26 + $0x178] sm:$0xff] }
0x2ef0   :  { %v7152_v24 = vmul.f32 1.442695, %v7149_v42 }
0x2ef1   :  { %v7145_v38 = vpop.xlane.xlu1 %7144 }
0x2ef2   :  { %18535 = vpow2.f32 %v7152_v24  ;;  %v7150_v53 = vsub.f32 %v7138_v40, %v7145_v38 }
0x2ef4   :  { %v7154_v7 = vmul.f32 1.442695, %v7150_v53 }
0x2ef5   :  { %v7148_v3 = vpop.xlane.xlu0 %7147 }
0x2ef6   :  { %18537 = vpow2.f32 %v7154_v7  ;;  %v7151_v4 = vsub.f32 %v7139_v56, %v7148_v3 }
0x2ef8   :  { %v7156_v2 = vmul.f32 1.442695, %v7151_v4 }
0x2efa   :  { %18539 = vpow2.f32 %v7156_v2 }
0x2eff   :  { %v18536_v26 = vpop.eup %18535 }
0x2f00   :  { %v7158_v35 = vsel %vm505_vm5, %v18536_v26, 0.0 }
0x2f01   :  { %7159 = vadd.xlane.f32.xlu1 %v7158_v35 }
0x2f03   :  { %v18538_v32 = vpop.eup %18537 }
0x2f04   :  { %v7161_v8 = vsel %vm505_vm5, %v18538_v32, 0.0 }
0x2f05   :  { %7162 = vadd.xlane.f32.xlu0 %v7161_v8 }
0x2f07   :  { %v18540_v9 = vpop.eup %18539 }
0x2f08   :  { %v7164_v10 = vsel %vm512_vm6, %v18540_v9, 0.0 }
0x2f09   :  { %7165 = vadd.xlane.f32.xlu1 %v7164_v10 }
0x2f8a   :  { %v7160_v16 = vpop.xlane.xlu1 %7159 }
0x2f8b   :  { %18541 = vrcp.f32 %v7160_v16 }
0x2f8e   :  { %v7163_v63 = vpop.xlane.xlu0 %7162 }
0x2f8f   :  { %18543 = vrcp.f32 %v7163_v63 }
0x2f92   :  { %v7166_v45 = vpop.xlane.xlu1 %7165 }
0x2f93   :  { %18545 = vrcp.f32 %v7166_v45 }
0x2f98   :  { %v18542_v14 = vpop.eup %18541 }
0x2f99   :  { %v7170_v46 = vmul.f32 %v18542_v14, %v18536_v26 }
0x2f9b   :  { %17247 = vmatmul.mubr.msk.f32.vlgmr.msra.gmra.mxu0 %vm505_vm5, %v7170_v46 }
0x2f9c   :  { %v18544_v43 = vpop.eup %18543  ;;  %17249 = vmatprep.mubr.msk.f32.mxu0 %vm18743_vm2, %v18742_v21  ;;  %17267 = vmatpush3.msra.mxu0 %v14785_v17 }
0x2f9d   :  { %v7171_v19 = vmul.f32 %v18544_v43, %v18538_v32  ;;  %17268 = vmatprep.subr.mxu0 %v18742_v21  ;;  %v6773_v32 = vadd.f32 %v20853_v0, %v20891_v13 }
0x2f9e   :  { %17269 = vmatpush3.msra.mxu0 %v14784_v37 }
0x2f9f   :  { %17250 = vmatmul.mubr.msk.f32.gmra.mxu0 %vm505_vm5, %v7171_v19  ;;  %17270 = vmatprep.subr.mxu0 %v18742_v21 }
0x2fa0   :  { %v18546_v23 = vpop.eup %18545  ;;  %17252 = vmatprep.mubr.msk.f32.mxu0 %vm18743_vm2, %v18742_v21  ;;  %17271 = vmatpush3.msra.mxu0 %v14783_v22 }
0x2fa1   :  { %v7172_v25 = vmul.f32 %v18546_v23, %v18540_v9  ;;  %17272 = vmatprep.subr.mxu0 %v18742_v21 }
0x2fa2   :  { %17273 = vmatpush3.msra.mxu0 %v14782_v55 }
0x2fa3   :  { %17253 = vmatmul.mubr.msk.f32.gmra.mxu0 %vm505_vm5, %v7172_v25  ;;  %17300 = vmatprep.subr.mxu0 %v18742_v21 }
0x2fa4   :  { %17274 = vmatprep.mubr.msk.f32.mxu0 %vm18743_vm2, %v18742_v21 }
0x2fa7   :  { %17275 = vmatmul.mubr.msk.f32.vlgmr.msra.gmra.mxu0 %vm79_vm0, %v20518_v54 }
0x2fa8   :  { %17277 = vmatprep.mubr.msk.f32.mxu0 %vm18743_vm2, %v18742_v21  ;;  %17301 = vmatpush3.msra.mxu0 %v14799_v28 }
0x2fa9   :  { %17302 = vmatprep.subr.mxu0 %v18742_v21 }
0x2faa   :  { %17303 = vmatpush3.msra.mxu0 %v14798_v30 }
0x2fab   :  { %17278 = vmatmul.mubr.msk.f32.gmra.mxu0 %vm79_vm0, %v20532_v27  ;;  %17304 = vmatprep.subr.mxu0 %v18742_v21 }
0x2fac   :  { %17280 = vmatprep.mubr.msk.f32.mxu0 %vm18743_vm2, %v18742_v21  ;;  %17305 = vmatpush3.msra.mxu0 %v14797_v34 }
0x2fad   :  { %17306 = vmatprep.subr.mxu0 %v18742_v21 }
0x2fae   :  { %17307 = vmatpush3.msra.mxu0 %v14796_v49 }
0x2faf   :  { %17281 = vmatmul.mubr.msk.f32.gmra.mxu0 %vm79_vm0, %v20552_v62  ;;  %17332 = vmatprep.subr.mxu0 %v18742_v21 }
0x2fb0   :  { %17308 = vmatprep.mubr.msk.f32.mxu0 %vm18743_vm2, %v18742_v21 }
0x2fb3   :  { %17309 = vmatmul.mubr.msk.f32.vlgmr.msra.gmra.mxu0 %vm79_vm0, %v20518_v54 }
0x2fb4   :  { %17311 = vmatprep.mubr.msk.f32.mxu0 %vm18743_vm2, %v18742_v21 }
0x2fb7   :  { %17312 = vmatmul.mubr.msk.f32.gmra.mxu0 %vm79_vm0, %v20532_v27 }
0x2fb8   :  { %17314 = vmatprep.mubr.msk.f32.mxu0 %vm18743_vm2, %v18742_v21 }
0x2fbb   :  { %17315 = vmatmul.mubr.msk.f32.gmra.mxu0 %vm79_vm0, %v20552_v62 }
0x2fbc   :  { %17338 = vmatprep.mubr.msk.f32.mxu0 %vm18743_vm2, %v18742_v21 }
0x305b   :  { %v7251_v36 = vpop.f32.mrf.mxu0 }
0x305c   :  { %17258 = vmatmul.mubr.msk.f32.vlgmr.msra.gmra.mxu1 %vm400_vm3, %v7251_v36 }
0x305d   :  { %v17248_v33 = vpop.f32.mrf.mxu0  ;;  %17284 = vmatpush3.msra.mxu1 %v14792_v60  ;;  %17260 = vmatprep.mubr.msk.f32.mxu1 %vm18743_vm2, %v18742_v21 }
0x305e   :  { %17285 = vmatprep.subr.mxu1 %v18742_v21 }
0x305f   :  { %v7256_v40 = vpop.f32.mrf.mxu0  ;;  %17286 = vmatpush3.msra.mxu1 %v14791_v50 }
0x3060   :  { %17261 = vmatmul.mubr.msk.f32.gmra.mxu1 %vm400_vm3, %v7256_v40  ;;  %17287 = vmatprep.subr.mxu1 %v18742_v21 }
0x3061   :  { %v17251_v52 = vpop.f32.mrf.mxu0  ;;  %17263 = vmatprep.mubr.msk.f32.mxu1 %vm18743_vm2, %v18742_v21  ;;  %17288 = vmatpush3.msra.mxu1 %v14790_v31 }
0x3062   :  { %17289 = vmatprep.subr.mxu1 %v18742_v21 }
0x3063   :  { %v7261_v47 = vpop.f32.mrf.mxu0  ;;  %17290 = vmatpush3.msra.mxu1 %v14789_v41 }
0x3064   :  { %17264 = vmatmul.mubr.msk.f32.gmra.mxu1 %vm400_vm3, %v7261_v47  ;;  %17317 = vmatprep.subr.mxu1 %v18742_v21 }
0x3065   :  { %v17254_v51 = vpop.f32.mrf.mxu0  ;;  %17291 = vmatprep.mubr.msk.f32.mxu1 %vm18743_vm2, %v18742_v21 }
0x3067   :  { %v7430_v56 = vpop.f32.mrf.mxu0 }
0x3068   :  { %17292 = vmatmul.mubr.msk.f32.vlgmr.msra.gmra.mxu1 %vm79_vm0, %v20518_v54 }
0x3069   :  { %v17276_v44 = vpop.f32.mrf.mxu0  ;;  %17294 = vmatprep.mubr.msk.f32.mxu1 %vm18743_vm2, %v18742_v21 }
0x306b   :  { %v7435_v57 = vpop.f32.mrf.mxu0 }
0x306c   :  { %17295 = vmatmul.mubr.msk.f32.gmra.mxu1 %vm79_vm0, %v20532_v27 }
0x306d   :  { %v17279_v42 = vpop.f32.mrf.mxu0  ;;  %17297 = vmatprep.mubr.msk.f32.mxu1 %vm18743_vm2, %v18742_v21 }
0x306e   :  { %v14813_v42 = vld [vmem:[%s22994_s7 + $0x58] sm:$0xff] }
0x306f   :  { %v7440_v24 = vpop.f32.mrf.mxu0 }
0x3070   :  { %17298 = vmatmul.mubr.msk.f32.gmra.mxu1 %vm79_vm0, %v20552_v62  ;;  %v6768_v62 = vadd.f32 %v20840_v59, %v20889_v12 }
0x3071   :  { %v17282_v38 = vpop.f32.mrf.mxu0  ;;  %17323 = vmatprep.mubr.msk.f32.mxu1 %vm18743_vm2, %v18742_v21 }
0x3073   :  { %v7600_v54 = vpop.f32.mrf.mxu0 }
0x3075   :  { %v17310_v53 = vpop.f32.mrf.mxu0 }
0x3077   :  { %v7605_v7 = vpop.f32.mrf.mxu0 }
0x3079   :  { %v17313_v3 = vpop.f32.mrf.mxu0 }
0x307b   :  { %v7610_v4 = vpop.f32.mrf.mxu0 }
0x307c   :  { %17333 = vmatpush3.msk.msra.mxu0 %vm549_vm4, %v7610_v4 }
0x307d   :  { %v17316_v27 = vpop.f32.mrf.mxu0  ;;  %17334 = vmatprep.subr.mxu0 %v18742_v21 }
0x307e   :  { %17335 = vmatpush3.msra.mxu0 %v7605_v7 }
0x307f   :  { %17336 = vmatprep.subr.mxu0 %v18742_v21 }
0x3080   :  { %17337 = vmatpush3.msra.mxu0 %v7600_v54 }
0x3081   :  { %17358 = vmatprep.subr.mxu0 %v18742_v21 }
0x311c   :  { %v7342_v2 = vpop.f32.mrf.mxu1 }
0x311d   :  { %v21029_v26 = vadd.f32 %v7342_v2, %v6768_v62 }
0x311e   :  { %v17259_v35 = vpop.f32.mrf.mxu1 }
0x3120   :  { %v7347_v8 = vpop.f32.mrf.mxu1 }
0x3121   :  { %v21033_v9 = vadd.f32 %v7347_v8, %v6773_v32 }
0x3122   :  { %v17262_v10 = vpop.f32.mrf.mxu1 }
0x3124   :  { %v7352_v16 = vpop.f32.mrf.mxu1 }
0x3125   :  { %v21037_v63 = vadd.f32 %v7352_v16, %v6778_v61 }
0x3126   :  { %v17265_v45 = vpop.f32.mrf.mxu1 }
0x3128   :  { %v7515_v14 = vpop.f32.mrf.mxu1 }
0x312a   :  { %v17293_v59 = vpop.f32.mrf.mxu1 }
0x312c   :  { %v7520_v12 = vpop.f32.mrf.mxu1 }
0x312e   :  { %v17296_v46 = vpop.f32.mrf.mxu1 }
0x3130   :  { %v7525_v17 = vpop.f32.mrf.mxu1 }
0x3131   :  { %17318 = vmatpush3.xpose.msk.msra.mxu1 %vm400_vm3, %v7525_v17 }
0x3132   :  { %v17299_v37 = vpop.f32.mrf.mxu1  ;;  %17319 = vmatprep.subr.mxu1 %v18742_v21 }
0x3135   :  { %17320 = vmatpush3.xpose.msk.msra.mxu1 %vm400_vm3, %v7520_v12 }
0x3136   :  { %17321 = vmatprep.subr.mxu1 %v18742_v21 }
0x3139   :  { %17322 = vmatpush3.xpose.msk.msra.mxu1 %vm400_vm3, %v7515_v14  ;;  %v14818_v14 = vld [vmem:[%s22995_s8 + $0x2] ss:$0 sm:$0xff] }
0x313a   :  { %17347 = vmatprep.subr.mxu1 %v18742_v21 }
0x313c   :  { %17324 = vmatmul.mubr.msk.f32.vlgmr.msra.gmra.mxu1 %vm400_vm3, %v7430_v56 }
0x313d   :  { %17326 = vmatprep.mubr.msk.f32.mxu1 %vm18743_vm2, %v18742_v21  ;;  %17348 = vmatpush3.msra.mxu1 %v14813_v42 }
0x313e   :  { %17375 = vmatprep.subr.mxu1 %v18742_v21 }
0x3140   :  { %17327 = vmatmul.mubr.msk.f32.gmra.mxu1 %vm400_vm3, %v7435_v57 }
0x3141   :  { %17329 = vmatprep.mubr.msk.f32.mxu1 %vm18743_vm2, %v18742_v21 }
0x3144   :  { %17330 = vmatmul.mubr.msk.f32.gmra.mxu1 %vm400_vm3, %v7440_v24 }
0x3145   :  { %17349 = vmatprep.mubr.msk.f32.mxu1 %vm18743_vm2, %v18742_v21 }
0x31fc   :  { %v7698_v0 = vpop.f32.mrf.mxu1 }
0x31fd   :  { %v7712_v5 = vmul.f32 0.35355338, %v7698_v0 }
0x31fe   :  { %v17325_v13 = vpop.f32.mrf.mxu1 }
0x31ff   :  { %v7715_v6 = vadd.f32 %v20654_v39, %v7712_v5 }
0x3200   :  { %v7703_v43 = vpop.f32.mrf.mxu1 }
0x3201   :  { %v7713_v19 = vmul.f32 0.35355338, %v7703_v43  ;;  %v7718_v22 = vsel %vm505_vm5, %v7715_v6, -inf }
0x3202   :  { %7719 = vmax.xlane.f32.xlu0 %v7718_v22  ;;  %v17328_v55 = vpop.f32.mrf.mxu1 }
0x3203   :  { %v7716_v23 = vadd.f32 %v20661_v48, %v7713_v19 }
0x3204   :  { %v7708_v25 = vpop.f32.mrf.mxu1 }
0x3205   :  { %v7714_v28 = vmul.f32 0.35355338, %v7708_v25  ;;  %v7721_v30 = vsel %vm505_vm5, %v7716_v23, -inf }
0x3206   :  { %7722 = vmax.xlane.f32.xlu1 %v7721_v30  ;;  %v17331_v34 = vpop.f32.mrf.mxu1 }
0x3207   :  { %v7717_v49 = vadd.f32 %v20668_v29, %v7714_v28 }
0x3209   :  { %v7724_v60 = vsel %vm512_vm6, %v7717_v49, -inf }
0x320a   :  { %7725 = vmax.xlane.f32.xlu0 %v7724_v60 }
0x328b   :  { %v7720_v39 = vpop.xlane.xlu0 %7719 }
0x328c   :  { %v7727_v36 = vsub.f32 %v7715_v6, %v7720_v39 }
0x328e   :  { %v7730_v50 = vmul.f32 1.442695, %v7727_v36 }
0x328f   :  { %v7723_v33 = vpop.xlane.xlu1 %7722 }
0x3290   :  { %18547 = vpow2.f32 %v7730_v50  ;;  %v7728_v31 = vsub.f32 %v7716_v23, %v7723_v33 }
0x3292   :  { %v7732_v40 = vmul.f32 1.442695, %v7728_v31 }
0x3293   :  { %v7726_v41 = vpop.xlane.xlu0 %7725 }
0x3294   :  { %18549 = vpow2.f32 %v7732_v40  ;;  %v7729_v48 = vsub.f32 %v7717_v49, %v7726_v41 }
0x3296   :  { %v7734_v52 = vmul.f32 1.442695, %v7729_v48 }
0x3298   :  { %18551 = vpow2.f32 %v7734_v52  ;;  %v14826_v52 = vld [vmem:[%s22996_s11 + $0x58] sm:$0xff] }
0x329d   :  { %v18548_v47 = vpop.eup %18547 }
0x329e   :  { %v7736_v51 = vsel %vm505_vm5, %v18548_v47, 0.0 }
0x329f   :  { %7737 = vadd.xlane.f32.xlu1 %v7736_v51  ;;  %v14824_v51 = vld [vmem:[%s22996_s11 + $0x48] sm:$0xff] }
0x32a1   :  { %v18550_v29 = vpop.eup %18549 }
0x32a2   :  { %v7739_v56 = vsel %vm505_vm5, %v18550_v29, 0.0 }
0x32a3   :  { %7740 = vadd.xlane.f32.xlu0 %v7739_v56 }
0x32a5   :  { %v18552_v44 = vpop.eup %18551 }
0x32a6   :  { %v7742_v57 = vsel %vm512_vm6, %v18552_v44, 0.0 }
0x32a7   :  { %7743 = vadd.xlane.f32.xlu1 %v7742_v57 }
0x3328   :  { %v7738_v24 = vpop.xlane.xlu1 %7737 }
0x3329   :  { %18553 = vrcp.f32 %v7738_v24 }
0x332c   :  { %v7741_v38 = vpop.xlane.xlu0 %7740 }
0x332d   :  { %18555 = vrcp.f32 %v7741_v38 }
0x3330   :  { %v7744_v54 = vpop.xlane.xlu1 %7743 }
0x3331   :  { %18557 = vrcp.f32 %v7744_v54 }
0x3336   :  { %v18554_v53 = vpop.eup %18553 }
0x3337   :  { %v7748_v7 = vmul.f32 %v18554_v53, %v18548_v47  ;;  %v14825_v47 = vld [vmem:[%s22996_s11 + $0x50] sm:$0xff] }
0x3339   :  { %17339 = vmatmul.mubr.msk.f32.vlgmr.msra.gmra.mxu0 %vm505_vm5, %v7748_v7 }
0x333a   :  { %v18556_v3 = vpop.eup %18555  ;;  %17341 = vmatprep.mubr.msk.f32.mxu0 %vm18743_vm2, %v18742_v21  ;;  %17359 = vmatpush3.msra.mxu0 %v14826_v52 }
0x333b   :  { %v7749_v4 = vmul.f32 %v18556_v3, %v18550_v29  ;;  %17360 = vmatprep.subr.mxu0 %v18742_v21  ;;  %v14823_v29 = vld [vmem:[%s22996_s11 + $0x40] sm:$0xff] }
0x333c   :  { %17361 = vmatpush3.msra.mxu0 %v14825_v47 }
0x333d   :  { %17342 = vmatmul.mubr.msk.f32.gmra.mxu0 %vm505_vm5, %v7749_v4  ;;  %17362 = vmatprep.subr.mxu0 %v18742_v21  ;;  %v14821_v4 = vld [vmem:[%s22997_s9 + $0x2] ss:$0 sm:$0xff] }
0x333e   :  { %v18558_v27 = vpop.eup %18557  ;;  %17344 = vmatprep.mubr.msk.f32.mxu0 %vm18743_vm2, %v18742_v21  ;;  %17363 = vmatpush3.msra.mxu0 %v14824_v51 }
0x333f   :  { %v7750_v62 = vmul.f32 %v18558_v27, %v18552_v44  ;;  %17364 = vmatprep.subr.mxu0 %v18742_v21 }
0x3340   :  { %17365 = vmatpush3.msra.mxu0 %v14823_v29 }
0x3341   :  { %17345 = vmatmul.mubr.msk.f32.gmra.mxu0 %vm505_vm5, %v7750_v62  ;;  %17416 = vmatprep.subr.mxu0 %v18742_v21  ;;  %v14822_v62 = vld [vmem:[%s22998_s10 + $0x2] ss:$0 sm:$0xff] }
0x3342   :  { %17366 = vmatprep.mubr.msk.f32.mxu0 %vm18743_vm2, %v18742_v21 }
0x33f9   :  { %v7829_v2 = vpop.f32.mrf.mxu0 }
0x33fa   :  { %17350 = vmatmul.mubr.msk.f32.vlgmr.msra.gmra.mxu1 %vm400_vm3, %v7829_v2 }
0x33fb   :  { %v17340_v35 = vpop.f32.mrf.mxu0  ;;  %17352 = vmatprep.mubr.msk.f32.mxu1 %vm18743_vm2, %v18742_v21 }
0x33fd   :  { %v7834_v32 = vpop.f32.mrf.mxu0 }
0x33fe   :  { %17353 = vmatmul.mubr.msk.f32.gmra.mxu1 %vm400_vm3, %v7834_v32 }
0x33ff   :  { %v17343_v8 = vpop.f32.mrf.mxu0  ;;  %17355 = vmatprep.mubr.msk.f32.mxu1 %vm18743_vm2, %v18742_v21 }
0x3401   :  { %v7839_v10 = vpop.f32.mrf.mxu0 }
0x3402   :  { %17356 = vmatmul.mubr.msk.f32.gmra.mxu1 %vm400_vm3, %v7839_v10  ;;  %v8313_v10 = vld [vmem:[%s23002_s16 + $0x18] sm:$0xff] }
0x3403   :  { %v17346_v61 = vpop.f32.mrf.mxu0  ;;  %17407 = vmatprep.mubr.msk.f32.mxu1 %vm18743_vm2, %v18742_v21 }
0x34ba   :  { %v7920_v16 = vpop.f32.mrf.mxu1 }
0x34bb   :  { %v7934_v45 = vadd.f32 %v7920_v16, %v21029_v26  ;;  %v8312_v16 = vld [vmem:[%s23002_s16 + $0x10] sm:$0xff] }
0x34bc   :  { %v17351_v59 = vpop.f32.mrf.mxu1 }
0x34bd   :  { %v7937_v12 = vadd.f32 %v7934_v45, %v20460_v20 }
0x34be   :  { %v7925_v46 = vpop.f32.mrf.mxu1 }
0x34bf   :  { %v21090_v17 = vadd.f32 %v14818_v14, %v7937_v12  ;;  %v7935_v37 = vadd.f32 %v7925_v46, %v21033_v9  ;;  %v8311_v12 = vld [vmem:[%s23002_s16 + $0x8] sm:$0xff] }
0x34c0   :  { %v17354_v0 = vpop.f32.mrf.mxu1 }
0x34c1   :  { %v7938_v5 = vadd.f32 %v7935_v37, %v20465_v1  ;;  %v7955_v13 = vsel %vm79_vm0, %v21090_v17, 0.0  ;;  %v8310_v37 = vld [vmem:[%s23002_s16] sm:$0xff] }
0x34c2   :  { %7956 = vadd.xlane.f32.xlu0 %v7955_v13  ;;  %v7930_v26 = vpop.f32.mrf.mxu1  ;;  %v14843_v13 = vld [vmem:[%s22999_s13 + $0x158] sm:$0xff] }
0x34c3   :  { %v21096_v6 = vadd.f32 %v14818_v14, %v7938_v5  ;;  %v7936_v43 = vadd.f32 %v7930_v26, %v21037_v63  ;;  %v14847_v5 = vld [vmem:[%s22999_s13 + $0x178] sm:$0xff]  ;;  %v14842_v26 = vld [vmem:[%s22999_s13 + $0x150] sm:$0xff] }
0x34c4   :  { %v17357_v19 = vpop.f32.mrf.mxu1  ;;  %17376 = vmatpush3.msra.mxu1 %v14847_v5 }
0x34c5   :  { %v7939_v22 = vadd.f32 %v7936_v43, %v20470_v58  ;;  %v7958_v55 = vsel %vm79_vm0, %v21096_v6, 0.0  ;;  %17377 = vmatprep.subr.mxu1 %v18742_v21  ;;  %v14841_v43 = vld [vmem:[%s22999_s13 + $0x148] sm:$0xff]  ;;  %v14840_v19 = vld [vmem:[%s22999_s13 + $0x140] sm:$0xff] }
0x34c6   :  { %7959 = vadd.xlane.f32.xlu1 %v7958_v55  ;;  %v14838_v55 = vld [vmem:[%s22999_s13 + $0x130] sm:$0xff] }
0x34c7   :  { %v21102_v9 = vadd.f32 %v14818_v14, %v7939_v22  ;;  %v14839_v22 = vld [vmem:[%s22999_s13 + $0x138] sm:$0xff] }
0x34c9   :  { %v7961_v23 = vsel %vm86_vm1, %v21102_v9, 0.0 }
0x34ca   :  { %7962 = vadd.xlane.f32.xlu0 %v7961_v23  ;;  %v14837_v23 = vld [vmem:[%s22999_s13 + $0x128] sm:$0xff] }
0x354b   :  { %v7957_v25 = vpop.xlane.xlu0 %7956 }
0x354c   :  { %v7964_v28 = vmul.f32 0.03125, %v7957_v25  ;;  %v14836_v25 = vld [vmem:[%s22999_s13 + $0x120] sm:$0xff] }
0x354e   :  { %v7967_v30 = vsub.f32 %v21090_v17, %v7964_v28  ;;  %v14835_v28 = vld [vmem:[%s22999_s13 + $0x118] sm:$0xff] }
0x354f   :  { %v7960_v34 = vpop.xlane.xlu1 %7959 }
0x3550   :  { %v7965_v49 = vmul.f32 0.03125, %v7960_v34  ;;  %v7970_v63 = vmul.f32 %v7967_v30, %v7967_v30  ;;  %v14833_v34 = vld [vmem:[%s22999_s13 + $0x108] sm:$0xff] }
0x3552   :  { %v7968_v60 = vsub.f32 %v21096_v6, %v7965_v49  ;;  %v7973_v39 = vsel %vm79_vm0, %v7970_v63, 0.0  ;;  %v14832_v49 = vld [vmem:[%s22999_s13 + $0x100] sm:$0xff]  ;;  %v8309_v63 = vld [vmem:[%s23003_s15 + $0x18] sm:$0xff] }
0x3553   :  { %7974 = vadd.xlane.f32.xlu1 %v7973_v39  ;;  %v7963_v36 = vpop.xlane.xlu0 %7962  ;;  %v14828_v39 = vld [vmem:[%s23000_s12 + $0x2] ss:$0 sm:$0xff] }
0x3554   :  { %v7966_v50 = vmul.f32 0.03125, %v7963_v36  ;;  %v7971_v33 = vmul.f32 %v7968_v60, %v7968_v60 }
0x3556   :  { %v7969_v31 = vsub.f32 %v21102_v9, %v7966_v50  ;;  %v7976_v40 = vsel %vm79_vm0, %v7971_v33, 0.0 }
0x3557   :  { %7977 = vadd.xlane.f32.xlu0 %v7976_v40 }
0x3558   :  { %v7972_v41 = vmul.f32 %v7969_v31, %v7969_v31 }
0x355a   :  { %v7979_v48 = vsel %vm86_vm1, %v7972_v41, 0.0 }
0x355b   :  { %7980 = vadd.xlane.f32.xlu1 %v7979_v48 }
0x35dc   :  { %v7975_v56 = vpop.xlane.xlu1 %7974 }
0x35dd   :  { %v7982_v44 = vmul.f32 0.03125, %v7975_v56 }
0x35df   :  { %v7985_v57 = vadd.f32 1e-05, %v7982_v44 }
0x35e0   :  { %v7978_v42 = vpop.xlane.xlu0 %7977 }
0x35e1   :  { %18559 = vrsqrt.f32 %v7985_v57  ;;  %v7983_v24 = vmul.f32 0.03125, %v7978_v42 }
0x35e3   :  { %v7986_v38 = vadd.f32 1e-05, %v7983_v24 }
0x35e4   :  { %v7981_v54 = vpop.xlane.xlu1 %7980 }
0x35e5   :  { %18561 = vrsqrt.f32 %v7986_v38  ;;  %v7984_v53 = vmul.f32 0.03125, %v7981_v54 }
0x35e7   :  { %v7987_v7 = vadd.f32 1e-05, %v7984_v53 }
0x35e9   :  { %18563 = vrsqrt.f32 %v7987_v7 }
0x35ee   :  { %v18560_v3 = vpop.eup %18559 }
0x35ef   :  { %v7991_v27 = vmul.f32 %v18560_v3, %v7967_v30  ;;  %v14834_v30 = vld [vmem:[%s22999_s13 + $0x110] sm:$0xff] }
0x35f1   :  { %v8000_v2 = vmul.f32 %v14821_v4, %v7991_v27 }
0x35f2   :  { %v18562_v35 = vpop.eup %18561 }
0x35f3   :  { %v8009_v32 = vadd.f32 %v14822_v62, %v8000_v2  ;;  %v7992_v8 = vmul.f32 %v18562_v35, %v7968_v60  ;;  %v8308_v60 = vld [vmem:[%s23003_s15 + $0x10] sm:$0xff] }
0x35f5   :  { %17367 = vmatmul.mubr.msk.f32.vlgmr.msra.gmra.mxu0 %vm79_vm0, %v8009_v32  ;;  %v8001_v61 = vmul.f32 %v14821_v4, %v7992_v8 }
0x35f6   :  { %v18564_v45 = vpop.eup %18563  ;;  %17369 = vmatprep.mubr.msk.f32.mxu0 %vm18743_vm2, %v18742_v21  ;;  %17417 = vmatpush3.msra.mxu0 %v8313_v10 }
0x35f7   :  { %v7993_v14 = vmul.f32 %v18564_v45, %v7969_v31  ;;  %v8010_v59 = vadd.f32 %v14822_v62, %v8001_v61  ;;  %17418 = vmatprep.subr.mxu0 %v18742_v21 }
0x35f8   :  { %17419 = vmatpush3.msra.mxu0 %v8312_v16 }
0x35f9   :  { %17370 = vmatmul.mubr.msk.f32.gmra.mxu0 %vm79_vm0, %v8010_v59  ;;  %v8002_v46 = vmul.f32 %v14821_v4, %v7993_v14  ;;  %17420 = vmatprep.subr.mxu0 %v18742_v21 }
0x35fa   :  { %17372 = vmatprep.mubr.msk.f32.mxu0 %vm18743_vm2, %v18742_v21  ;;  %17421 = vmatpush3.msra.mxu0 %v8311_v12 }
0x35fb   :  { %v8011_v0 = vadd.f32 %v14822_v62, %v8002_v46  ;;  %17422 = vmatprep.subr.mxu0 %v18742_v21 }
0x35fc   :  { %17423 = vmatpush3.msra.mxu0 %v8310_v37 }
0x35fd   :  { %17373 = vmatmul.mubr.msk.f32.gmra.mxu0 %vm79_vm0, %v8011_v0  ;;  %17433 = vmatprep.subr.mxu0 %v18742_v21 }
0x35fe   :  { %17424 = vmatprep.mubr.msk.f32.mxu0 %vm18743_vm2, %v18742_v21 }
0x3601   :  { %17425 = vmatmul.mubr.msk.f32.vlgmr.msra.gmra.mxu0 %vm79_vm0, %v20460_v20  ;;  %v14846_v20 = vld [vmem:[%s22999_s13 + $0x170] sm:$0xff] }
0x3602   :  { %17427 = vmatprep.mubr.msk.f32.mxu0 %vm18743_vm2, %v18742_v21  ;;  %17378 = vmatpush3.msra.mxu1 %v14846_v20 }
0x3603   :  { %17379 = vmatprep.subr.mxu1 %v18742_v21  ;;  %17434 = vmatpush3.msra.mxu0 %v8309_v63 }
0x3604   :  { %17435 = vmatprep.subr.mxu0 %v18742_v21 }
0x3605   :  { %17428 = vmatmul.mubr.msk.f32.gmra.mxu0 %vm79_vm0, %v20465_v1  ;;  %v14845_v1 = vld [vmem:[%s22999_s13 + $0x168] sm:$0xff] }
0x3606   :  { %17430 = vmatprep.mubr.msk.f32.mxu0 %vm18743_vm2, %v18742_v21  ;;  %17380 = vmatpush3.msra.mxu1 %v14845_v1 }
0x3607   :  { %17381 = vmatprep.subr.mxu1 %v18742_v21  ;;  %17436 = vmatpush3.msra.mxu0 %v8308_v60 }
0x3608   :  { %17437 = vmatprep.subr.mxu0 %v18742_v21 }
0x3609   :  { %17431 = vmatmul.mubr.msk.f32.gmra.mxu0 %vm79_vm0, %v20470_v58  ;;  %v14844_v58 = vld [vmem:[%s22999_s13 + $0x160] sm:$0xff] }
0x360a   :  { %17441 = vmatprep.mubr.msk.f32.mxu0 %vm18743_vm2, %v18742_v21  ;;  %17382 = vmatpush3.msra.mxu1 %v14844_v58 }
0x360b   :  { %17383 = vmatprep.subr.mxu1 %v18742_v21 }
0x360c   :  { %17384 = vmatpush3.msra.mxu1 %v14843_v13 }
0x360d   :  { %17385 = vmatprep.subr.mxu1 %v18742_v21 }
0x360e   :  { %17386 = vmatpush3.msra.mxu1 %v14842_v26 }
0x360f   :  { %17387 = vmatprep.subr.mxu1 %v18742_v21 }
0x3610   :  { %17388 = vmatpush3.msra.mxu1 %v14841_v43 }
0x3611   :  { %17389 = vmatprep.subr.mxu1 %v18742_v21 }
0x3612   :  { %17390 = vmatpush3.msra.mxu1 %v14840_v19 }
0x3613   :  { %17391 = vmatprep.subr.mxu1 %v18742_v21 }
0x3614   :  { %17392 = vmatpush3.msra.mxu1 %v14839_v22 }
0x3615   :  { %17393 = vmatprep.subr.mxu1 %v18742_v21 }
0x3616   :  { %17394 = vmatpush3.msra.mxu1 %v14838_v55 }
0x3617   :  { %17395 = vmatprep.subr.mxu1 %v18742_v21 }
0x3618   :  { %17396 = vmatpush3.msra.mxu1 %v14837_v23 }
0x3619   :  { %17397 = vmatprep.subr.mxu1 %v18742_v21 }
0x361a   :  { %17398 = vmatpush3.msra.mxu1 %v14836_v25 }
0x361b   :  { %17399 = vmatprep.subr.mxu1 %v18742_v21 }
0x361c   :  { %17400 = vmatpush3.msra.mxu1 %v14835_v28 }
0x361d   :  { %17401 = vmatprep.subr.mxu1 %v18742_v21 }
0x361e   :  { %17402 = vmatpush3.msra.mxu1 %v14834_v30 }
0x361f   :  { %17403 = vmatprep.subr.mxu1 %v18742_v21 }
0x3620   :  { %17404 = vmatpush3.msra.mxu1 %v14833_v34 }
0x3621   :  { %17405 = vmatprep.subr.mxu1 %v18742_v21 }
0x3622   :  { %17406 = vmatpush3.msra.mxu1 %v14832_v49 }
0x3623   :  { %17450 = vmatprep.subr.mxu1 %v18742_v21 }
0x36b5   :  { %v8100_v36 = vpop.f32.mrf.mxu0 }
0x36b6   :  { %v21246_v50 = vadd.f32 %v14828_v39, %v8100_v36 }
0x36b7   :  { %v17368_v33 = vpop.f32.mrf.mxu0 }
0x36b8   :  { %v21249_v31 = vmul.f32 0.70710677, %v21246_v50 }
0x36b9   :  { %v8105_v40 = vpop.f32.mrf.mxu0 }
0x36ba   :  { %v8120_v41 = vand.u32 2147483647, %v21249_v31  ;;  %v21252_v48 = vadd.f32 %v14828_v39, %v8105_v40  ;;  %vm8180_vm13 = vcmp.ge.f32.partialorder %v21249_v31, 0.0 }
0x36bb   :  { %v17371_v52 = vpop.f32.mrf.mxu0 }
0x36bc   :  { %v8123_v47 = vmul.f32 0.3275911, %v8120_v41  ;;  %v21255_v51 = vmul.f32 0.70710677, %v21252_v48  ;;  %v8162_v62 = vsub.f32 0.0, %v8120_v41 }
0x36bd   :  { %v8110_v29 = vpop.f32.mrf.mxu0 }
0x36be   :  { %v8126_v56 = vadd.f32 1.0, %v8123_v47  ;;  %v8121_v44 = vand.u32 2147483647, %v21255_v51  ;;  %v21258_v57 = vadd.f32 %v14828_v39, %v8110_v29  ;;  %v8165_v8 = vmul.f32 %v8162_v62, %v8120_v41 }
0x36bf   :  { %v17374_v42 = vpop.f32.mrf.mxu0  ;;  %vm8181_vm14 = vcmp.ge.f32.partialorder %v21255_v51, 0.0 }
0x36c0   :  { %18565 = vrcp.f32 %v8126_v56  ;;  %v8124_v24 = vmul.f32 0.3275911, %v8121_v44  ;;  %v21261_v38 = vmul.f32 0.70710677, %v21258_v57  ;;  %v8163_v10 = vsub.f32 0.0, %v8121_v44 }
0x36c1   :  { %v21263_v54 = vpop.f32.mrf.mxu0  ;;  %v8168_v14 = vmul.f32 1.442695, %v8165_v8 }
0x36c2   :  { %v8127_v53 = vadd.f32 1.0, %v8124_v24  ;;  %v8122_v7 = vand.u32 2147483647, %v21261_v38  ;;  %v8166_v59 = vmul.f32 %v8163_v10, %v8121_v44  ;;  %vm8182_vm15 = vcmp.ge.f32.partialorder %v21261_v38, 0.0  ;;  %v8306_v38 = vld [vmem:[%s23003_s15] sm:$0xff] }
0x36c3   :  { %v17426_v3 = vpop.f32.mrf.mxu0 }
0x36c4   :  { %18567 = vrcp.f32 %v8127_v53  ;;  %v8125_v4 = vmul.f32 0.3275911, %v8122_v7  ;;  %v8164_v12 = vsub.f32 0.0, %v8122_v7  ;;  %v8170_v20 = vmul.f32 1.442695, %v8166_v59 }
0x36c5   :  { %v21266_v27 = vpop.f32.mrf.mxu0  ;;  %v8115_v59 = vmul.f32 0.5, %v21252_v48  ;;  %v8307_v48 = vld [vmem:[%s23003_s15 + $0x8] sm:$0xff] }
0x36c6   :  { %v8128_v2 = vadd.f32 1.0, %v8125_v4  ;;  %v8167_v1 = vmul.f32 %v8164_v12, %v8122_v7  ;;  %17438 = vmatpush3.msra.mxu0 %v8307_v48 }
0x36c7   :  { %v17429_v35 = vpop.f32.mrf.mxu0  ;;  %17439 = vmatprep.subr.mxu0 %v18742_v21 }
0x36c8   :  { %18569 = vrcp.f32 %v8128_v2  ;;  %v8172_v55 = vmul.f32 1.442695, %v8167_v1  ;;  %v8114_v2 = vmul.f32 0.5, %v21246_v50  ;;  %17440 = vmatpush3.msra.mxu0 %v8306_v38 }
0x36c9   :  { %v21268_v32 = vpop.f32.mrf.mxu0  ;;  %18571 = vpow2.f32 %v8168_v14  ;;  %17467 = vmatprep.subr.mxu0 %v18742_v21 }
0x36ca   :  { %18573 = vpow2.f32 %v8170_v20  ;;  %v14849_v20 = vld [vmem:[%s23001_s14 + $0x2] ss:$0 sm:$0xff] }
0x36cb   :  { %v17432_v61 = vpop.f32.mrf.mxu0  ;;  %18575 = vpow2.f32 %v8172_v55 }
0x36cd   :  { %v18566_v16 = vpop.eup %18565 }
0x36ce   :  { %v8135_v45 = vmul.f32 1.0614054, %v18566_v16 }
0x36d0   :  { %v8138_v46 = vadd.f32 -1.4531521, %v8135_v45 }
0x36d1   :  { %v18568_v37 = vpop.eup %18567 }
0x36d2   :  { %v8141_v0 = vmul.f32 %v18566_v16, %v8138_v46  ;;  %v8136_v5 = vmul.f32 1.0614054, %v18568_v37 }
0x36d4   :  { %v8144_v58 = vadd.f32 1.4214138, %v8141_v0  ;;  %v8139_v13 = vadd.f32 -1.4531521, %v8136_v5  ;;  %v8116_v0 = vmul.f32 0.5, %v21258_v57 }
0x36d5   :  { %v18570_v26 = vpop.eup %18569 }
0x36d6   :  { %v8147_v43 = vmul.f32 %v18566_v16, %v8144_v58  ;;  %v8142_v19 = vmul.f32 %v18568_v37, %v8139_v13  ;;  %v8137_v22 = vmul.f32 1.0614054, %v18570_v26  ;;  %v18572_v40 = vpop.eup %18571 }
0x36d7   :  { %v18574_v42 = vpop.eup %18573 }
0x36d8   :  { %v8150_v23 = vadd.f32 -0.28449672, %v8147_v43  ;;  %v8145_v25 = vadd.f32 1.4214138, %v8142_v19  ;;  %v8140_v28 = vadd.f32 -1.4531521, %v8137_v22  ;;  %v18576_v10 = vpop.eup %18575 }
0x36da   :  { %v8153_v30 = vmul.f32 %v18566_v16, %v8150_v23  ;;  %v8148_v34 = vmul.f32 %v18568_v37, %v8145_v25  ;;  %v8143_v49 = vmul.f32 %v18570_v26, %v8140_v28  ;;  %v14856_v28 = vld [vmem:[%s23004_s17] ss:$0 sm:$0xff] }
0x36dc   :  { %v8156_v63 = vadd.f32 0.2548296, %v8153_v30  ;;  %v8151_v60 = vadd.f32 -0.28449672, %v8148_v34  ;;  %v8146_v39 = vadd.f32 1.4214138, %v8143_v49 }
0x36de   :  { %v8159_v36 = vmul.f32 %v18566_v16, %v8156_v63  ;;  %v8154_v33 = vmul.f32 %v18568_v37, %v8151_v60  ;;  %v8149_v41 = vmul.f32 %v18570_v26, %v8146_v39 }
0x36e0   :  { %v8174_v52 = vmul.f32 %v18572_v40, %v8159_v36  ;;  %v8157_v47 = vadd.f32 0.2548296, %v8154_v33  ;;  %v8152_v29 = vadd.f32 -0.28449672, %v8149_v41 }
0x36e2   :  { %v8177_v56 = vsub.f32 1.0, %v8174_v52  ;;  %v8160_v44 = vmul.f32 %v18568_v37, %v8157_v47  ;;  %v8155_v24 = vmul.f32 %v18570_v26, %v8152_v29 }
0x36e4   :  { %v8183_v53 = vsub.f32 0.0, %v8177_v56  ;;  %v8175_v7 = vmul.f32 %v18574_v42, %v8160_v44  ;;  %v8158_v3 = vadd.f32 0.2548296, %v8155_v24 }
0x36e6   :  { %v8186_v4 = vsel %vm8180_vm13, %v8177_v56, %v8183_v53  ;;  %v8178_v62 = vsub.f32 1.0, %v8175_v7  ;;  %v8161_v8 = vmul.f32 %v18570_v26, %v8158_v3 }
0x36e7   :  { %v8189_v35 = vadd.f32 1.0, %v8186_v4 }
0x36e8   :  { %v8184_v61 = vsub.f32 0.0, %v8178_v62  ;;  %v8176_v45 = vmul.f32 %v18576_v10, %v8161_v8  ;;  %v14871_v10 = vld [vmem:[%s23026_s26 + $0x198] sm:$0xff] }
0x36e9   :  { %v8192_v16 = vmul.f32 %v8189_v35, %v8114_v2 }
0x36ea   :  { %v8187_v14 = vsel %vm8181_vm14, %v8178_v62, %v8184_v61  ;;  %v8179_v46 = vsub.f32 1.0, %v8176_v45  ;;  %v14864_v61 = vld [vmem:[%s23025_s24 + $0x198] sm:$0xff]  ;;  %v14863_v45 = vld [vmem:[%s23025_s24 + $0x190] sm:$0xff] }
0x36eb   :  { %v8190_v12 = vadd.f32 1.0, %v8187_v14  ;;  %17408 = vmatmul.mubr.f32.vlgmr.msra.gmra.mxu1 %v8192_v16  ;;  %v14870_v16 = vld [vmem:[%s23026_s26 + $0x190] sm:$0xff]  ;;  %v14869_v14 = vld [vmem:[%s23026_s26 + $0x188] sm:$0xff] }
0x36ec   :  { %17410 = vmatprep.mubr.msk.f32.mxu1 %vm18743_vm2, %v18742_v21  ;;  %v8185_v37 = vsub.f32 0.0, %v8179_v46  ;;  %17451 = vmatpush3.msra.mxu1 %v14864_v61  ;;  %v14909_v61 = vld [vmem:[%s23029_s4 + $0x1b0] sm:$0xff] }
0x36ed   :  { %v8193_v31 = vmul.f32 %v8190_v12, %v8115_v59  ;;  %17452 = vmatprep.subr.mxu1 %v18742_v21  ;;  %v14862_v59 = vld [vmem:[%s23025_s24 + $0x188] sm:$0xff]  ;;  %v14868_v12 = vld [vmem:[%s23026_s26 + $0x180] sm:$0xff] }
0x36ee   :  { %v8188_v50 = vsel %vm8182_vm15, %v8179_v46, %v8185_v37  ;;  %17453 = vmatpush3.msra.mxu1 %v14863_v45  ;;  %v14861_v46 = vld [vmem:[%s23025_s24 + $0x180] sm:$0xff] }
0x36ef   :  { %17411 = vmatmul.mubr.f32.gmra.mxu1 %v8193_v31  ;;  %v8191_v5 = vadd.f32 1.0, %v8188_v50  ;;  %17454 = vmatprep.subr.mxu1 %v18742_v21  ;;  %v14907_v45 = vld [vmem:[%s23029_s4 + $0x1a0] sm:$0xff] }
0x36f0   :  { %17413 = vmatprep.mubr.msk.f32.mxu1 %vm18743_vm2, %v18742_v21  ;;  %17455 = vmatpush3.msra.mxu1 %v14862_v59 }
0x36f1   :  { %v8194_v51 = vmul.f32 %v8191_v5, %v8116_v0  ;;  %17456 = vmatprep.subr.mxu1 %v18742_v21 }
0x36f2   :  { %17457 = vmatpush3.msra.mxu1 %v14861_v46  ;;  %v21503_v46 = vld [vmem:[%s23030_s30] sm:$0xff] }
0x36f3   :  { %17414 = vmatmul.mubr.f32.gmra.mxu1 %v8194_v51  ;;  %17484 = vmatprep.subr.mxu1 %v18742_v21 }
0x36f4   :  { %17458 = vmatprep.mubr.msk.f32.mxu1 %vm18743_vm2, %v18742_v21 }
0x37ab   :  { %v8278_v57 = vpop.f32.mrf.mxu1 }
0x37ac   :  { %v8292_v1 = vadd.f32 %v8278_v57, %v21090_v17 }
0x37ad   :  { %v17409_v58 = vpop.f32.mrf.mxu1 }
0x37ae   :  { %v8303_v13 = vadd.f32 %v14849_v20, %v8292_v1  ;;  %v14859_v1 = vld [vmem:[%s23027_s2 + $0x3] ss:$0 sm:$0xff] }
0x37af   :  { %v8283_v26 = vpop.f32.mrf.mxu1 }
0x37b0   :  { %v8293_v43 = vadd.f32 %v8283_v26, %v21096_v6  ;;  %17442 = vmatmul.mubr.msk.f32.vlgmr.msra.gmra.mxu0 %vm79_vm0, %v8303_v13  ;;  %v14860_v13 = vld [vmem:[%s23028_s3 + $0x3] ss:$0 sm:$0xff] }
0x37b1   :  { %v17412_v19 = vpop.f32.mrf.mxu1  ;;  %17444 = vmatprep.mubr.msk.f32.mxu0 %vm18743_vm2, %v18742_v21  ;;  %17468 = vmatpush3.msra.mxu0 %v14871_v10  ;;  %v14910_v10 = vld [vmem:[%s23029_s4 + $0x1b8] sm:$0xff] }
0x37b2   :  { %v8304_v22 = vadd.f32 %v14849_v20, %v8293_v43  ;;  %17469 = vmatprep.subr.mxu0 %v18742_v21 }
0x37b3   :  { %v8288_v55 = vpop.f32.mrf.mxu1  ;;  %17470 = vmatpush3.msra.mxu0 %v14870_v16  ;;  %v14908_v16 = vld [vmem:[%s23029_s4 + $0x1a8] sm:$0xff] }
0x37b4   :  { %17445 = vmatmul.mubr.msk.f32.gmra.mxu0 %vm79_vm0, %v8304_v22  ;;  %v8294_v23 = vadd.f32 %v8288_v55, %v21102_v9  ;;  %17471 = vmatprep.subr.mxu0 %v18742_v21  ;;  %v14878_v55 = vld [vmem:[%s23029_s4 + $0x198] sm:$0xff] }
0x37b5   :  { %17447 = vmatprep.mubr.msk.f32.mxu0 %vm18743_vm2, %v18742_v21  ;;  %v17415_v17 = vpop.f32.mrf.mxu1  ;;  %17472 = vmatpush3.msra.mxu0 %v14869_v14 }
0x37b6   :  { %v8305_v25 = vadd.f32 %v14849_v20, %v8294_v23  ;;  %17473 = vmatprep.subr.mxu0 %v18742_v21 }
0x37b7   :  { %17474 = vmatpush3.msra.mxu0 %v14868_v12 }
0x37b8   :  { %17448 = vmatmul.mubr.msk.f32.gmra.mxu0 %vm79_vm0, %v8305_v25  ;;  %17501 = vmatprep.subr.mxu0 %v18742_v21 }
0x37b9   :  { %17475 = vmatprep.mubr.msk.f32.mxu0 %vm18743_vm2, %v18742_v21 }
0x3870   :  { %v8478_v6 = vpop.f32.mrf.mxu0 }
0x3871   :  { %v8479_v30 = vadd.f32 %v8478_v6, %v21263_v54 }
0x3872   :  { %v17443_v34 = vpop.f32.mrf.mxu0 }
0x3873   :  { %v21309_v49 = vadd.f32 %v14856_v28, %v8479_v30  ;;  %v14876_v34 = vld [vmem:[%s23029_s4 + $0x188] sm:$0xff] }
0x3874   :  { %v8483_v9 = vpop.f32.mrf.mxu0 }
0x3875   :  { %v8484_v63 = vadd.f32 %v8483_v9, %v21266_v27  ;;  %v8506_v60 = vsel %vm79_vm0, %v21309_v49, 0.0 }
0x3876   :  { %8507 = vadd.xlane.f32.xlu0 %v8506_v60  ;;  %v17446_v39 = vpop.f32.mrf.mxu0 }
0x3877   :  { %v21314_v36 = vadd.f32 %v14856_v28, %v8484_v63  ;;  %v14875_v63 = vld [vmem:[%s23029_s4 + $0x180] sm:$0xff] }
0x3878   :  { %v8488_v33 = vpop.f32.mrf.mxu0 }
0x3879   :  { %v8509_v40 = vsel %vm79_vm0, %v21314_v36, 0.0  ;;  %v8489_v41 = vadd.f32 %v8488_v33, %v21268_v32 }
0x387a   :  { %8510 = vadd.xlane.f32.xlu1 %v8509_v40  ;;  %v17449_v54 = vpop.f32.mrf.mxu0 }
0x387b   :  { %v21319_v52 = vadd.f32 %v14856_v28, %v8489_v41  ;;  %v14877_v28 = vld [vmem:[%s23029_s4 + $0x190] sm:$0xff] }
0x387d   :  { %v8512_v27 = vsel %vm86_vm1, %v21319_v52, 0.0 }
0x387e   :  { %8513 = vadd.xlane.f32.xlu0 %v8512_v27 }
0x38ff   :  { %v8508_v47 = vpop.xlane.xlu0 %8507 }
0x3900   :  { %v8515_v29 = vmul.f32 0.03125, %v8508_v47 }
0x3902   :  { %v8518_v56 = vsub.f32 %v21309_v49, %v8515_v29 }
0x3903   :  { %v8511_v44 = vpop.xlane.xlu1 %8510 }
0x3904   :  { %v8516_v42 = vmul.f32 0.03125, %v8511_v44  ;;  %v8521_v24 = vmul.f32 %v8518_v56, %v8518_v56 }
0x3906   :  { %v8519_v53 = vsub.f32 %v21314_v36, %v8516_v42  ;;  %v8524_v7 = vsel %vm79_vm0, %v8521_v24, 0.0 }
0x3907   :  { %8525 = vadd.xlane.f32.xlu1 %v8524_v7  ;;  %v8514_v32 = vpop.xlane.xlu0 %8513 }
0x3908   :  { %v8522_v3 = vmul.f32 %v8519_v53, %v8519_v53  ;;  %v8517_v4 = vmul.f32 0.03125, %v8514_v32 }
0x390a   :  { %v8527_v62 = vsel %vm79_vm0, %v8522_v3, 0.0  ;;  %v8520_v2 = vsub.f32 %v21319_v52, %v8517_v4  ;;  %v14896_v3 = vld [vmem:[%s23025_s24 + $0x1b8] sm:$0xff] }
0x390b   :  { %8528 = vadd.xlane.f32.xlu0 %v8527_v62 }
0x390c   :  { %v8523_v35 = vmul.f32 %v8520_v2, %v8520_v2 }
0x390e   :  { %v8530_v8 = vsel %vm86_vm1, %v8523_v35, 0.0  ;;  %v14894_v35 = vld [vmem:[%s23025_s24 + $0x1a8] sm:$0xff] }
0x390f   :  { %8531 = vadd.xlane.f32.xlu1 %v8530_v8  ;;  %v14893_v8 = vld [vmem:[%s23025_s24 + $0x1a0] sm:$0xff] }
0x3990   :  { %v8526_v31 = vpop.xlane.xlu1 %8525 }
0x3991   :  { %v8533_v37 = vmul.f32 0.03125, %v8526_v31 }
0x3993   :  { %v8536_v50 = vadd.f32 1e-05, %v8533_v37 }
0x3994   :  { %v8529_v0 = vpop.xlane.xlu0 %8528 }
0x3995   :  { %18577 = vrsqrt.f32 %v8536_v50  ;;  %v8534_v5 = vmul.f32 0.03125, %v8529_v0 }
0x3997   :  { %v8537_v51 = vadd.f32 1e-05, %v8534_v5 }
0x3998   :  { %v8532_v48 = vpop.xlane.xlu1 %8531 }
0x3999   :  { %18579 = vrsqrt.f32 %v8537_v51  ;;  %v8535_v38 = vmul.f32 0.03125, %v8532_v48  ;;  %v21510_v51 = vld [vmem:[%s23030_s30 + $0x8] sm:$0xff] }
0x399b   :  { %v8538_v57 = vadd.f32 1e-05, %v8535_v38 }
0x399d   :  { %18581 = vrsqrt.f32 %v8538_v57 }
0x39a2   :  { %v18578_v20 = vpop.eup %18577 }
0x39a3   :  { %v8542_v58 = vmul.f32 %v18578_v20, %v8518_v56 }
0x39a5   :  { %v8551_v26 = vmul.f32 %v14859_v1, %v8542_v58  ;;  %v21517_v58 = vld [vmem:[%s23030_s30 + $0x10] sm:$0x3f] }
0x39a6   :  { %v18580_v43 = vpop.eup %18579 }
0x39a7   :  { %v21367_v19 = vadd.f32 %v14860_v13, %v8551_v26  ;;  %v8543_v22 = vmul.f32 %v18580_v43, %v8519_v53 }
0x39a9   :  { %v8552_v23 = vmul.f32 %v14859_v1, %v8543_v22  ;;  %17459 = vmatmul.mubr.msk.f32.vlgmr.msra.gmra.mxu1 %vm79_vm0, %v21367_v19  ;;  %17476 = vmatmul.mubr.msk.f32.vlgmr.msra.gmra.mxu0 %vm79_vm0, %v21367_v19 }
0x39aa   :  { %17461 = vmatprep.mubr.msk.f32.mxu1 %vm18743_vm2, %v18742_v21  ;;  %17478 = vmatprep.mubr.msk.f32.mxu0 %vm18743_vm2, %v18742_v21  ;;  %v18582_v17 = vpop.eup %18581 }
0x39ab   :  { %v21380_v25 = vadd.f32 %v14860_v13, %v8552_v23  ;;  %17485 = vmatpush3.msra.mxu1 %v14878_v55  ;;  %v8544_v6 = vmul.f32 %v18582_v17, %v8520_v2  ;;  %v14895_v2 = vld [vmem:[%s23025_s24 + $0x1b0] sm:$0xff] }
0x39ac   :  { %17486 = vmatprep.subr.mxu1 %v18742_v21 }
0x39ad   :  { %17462 = vmatmul.mubr.msk.f32.gmra.mxu1 %vm79_vm0, %v21380_v25  ;;  %17479 = vmatmul.mubr.msk.f32.gmra.mxu0 %vm79_vm0, %v21380_v25  ;;  %v8553_v30 = vmul.f32 %v14859_v1, %v8544_v6 }
0x39ae   :  { %17464 = vmatprep.mubr.msk.f32.mxu1 %vm18743_vm2, %v18742_v21  ;;  %17481 = vmatprep.mubr.msk.f32.mxu0 %vm18743_vm2, %v18742_v21 }
0x39af   :  { %17487 = vmatpush3.msra.mxu1 %v14877_v28  ;;  %v21397_v9 = vadd.f32 %v14860_v13, %v8553_v30 }
0x39b0   :  { %17488 = vmatprep.subr.mxu1 %v18742_v21 }
0x39b1   :  { %17489 = vmatpush3.msra.mxu1 %v14876_v34  ;;  %17482 = vmatmul.mubr.msk.f32.gmra.mxu0 %vm79_vm0, %v21397_v9 }
0x39b2   :  { %17465 = vmatmul.mubr.msk.f32.gmra.mxu1 %vm79_vm0, %v21397_v9  ;;  %17490 = vmatprep.subr.mxu1 %v18742_v21 }
0x39b3   :  { %17492 = vmatprep.mubr.msk.f32.mxu1 %vm18743_vm2, %v18742_v21  ;;  %17491 = vmatpush3.msra.mxu1 %v14875_v63 }
0x39b4   :  { %17507 = vmatprep.mubr.msk.f32.mxu0 %vm18743_vm2, %v18742_v21  ;;  %17516 = vmatprep.subr.mxu1 %v18742_v21 }
0x39b6   :  { %17493 = vmatmul.mubr.msk.f32.vlgmr.msra.gmra.mxu1 %vm79_vm0, %v21367_v19 }
0x39b7   :  { %17495 = vmatprep.mubr.msk.f32.mxu1 %vm18743_vm2, %v18742_v21 }
0x39ba   :  { %17496 = vmatmul.mubr.msk.f32.gmra.mxu1 %vm79_vm0, %v21380_v25 }
0x39bb   :  { %17498 = vmatprep.mubr.msk.f32.mxu1 %vm18743_vm2, %v18742_v21 }
0x39be   :  { %17499 = vmatmul.mubr.msk.f32.gmra.mxu1 %vm79_vm0, %v21397_v9 }
0x39bf   :  { %17522 = vmatprep.mubr.msk.f32.mxu1 %vm18743_vm2, %v18742_v21 }
0x3a69   :  { %v8643_v60 = vpop.f32.mrf.mxu1  ;;  %v8728_v39 = vpop.f32.mrf.mxu0 }
0x3a6b   :  { %v17460_v33 = vpop.f32.mrf.mxu1  ;;  %v17477_v40 = vpop.f32.mrf.mxu0 }
0x3a6d   :  { %v8648_v41 = vpop.f32.mrf.mxu1  ;;  %v8733_v54 = vpop.f32.mrf.mxu0 }
0x3a6f   :  { %v17463_v27 = vpop.f32.mrf.mxu1  ;;  %v17480_v47 = vpop.f32.mrf.mxu0 }
0x3a71   :  { %v8738_v56 = vpop.f32.mrf.mxu0 }
0x3a72   :  { %v8653_v29 = vpop.f32.mrf.mxu1  ;;  %17502 = vmatpush3.xpose.msk.msra.mxu0 %vm400_vm3, %v8738_v56 }
0x3a73   :  { %v17483_v42 = vpop.f32.mrf.mxu0  ;;  %17503 = vmatprep.subr.mxu0 %v18742_v21 }
0x3a74   :  { %v17466_v44 = vpop.f32.mrf.mxu1 }
0x3a76   :  { %v8813_v24 = vpop.f32.mrf.mxu1  ;;  %17504 = vmatpush3.xpose.msk.msra.mxu0 %vm400_vm3, %v8733_v54 }
0x3a77   :  { %17505 = vmatprep.subr.mxu0 %v18742_v21 }
0x3a78   :  { %v17494_v53 = vpop.f32.mrf.mxu1 }
0x3a7a   :  { %v8818_v7 = vpop.f32.mrf.mxu1  ;;  %17506 = vmatpush3.xpose.msk.msra.mxu0 %vm400_vm3, %v8728_v39 }
0x3a7b   :  { %17531 = vmatprep.subr.mxu0 %v18742_v21 }
0x3a7c   :  { %v17497_v32 = vpop.f32.mrf.mxu1 }
0x3a7d   :  { %17508 = vmatmul.mubr.msk.f32.vlgmr.msra.gmra.mxu0 %vm400_vm3, %v8643_v60 }
0x3a7e   :  { %v8823_v4 = vpop.f32.mrf.mxu1  ;;  %17510 = vmatprep.mubr.msk.f32.mxu0 %vm18743_vm2, %v18742_v21  ;;  %17532 = vmatpush3.msra.mxu0 %v14896_v3 }
0x3a7f   :  { %17517 = vmatpush3.msk.msra.mxu1 %vm549_vm4, %v8823_v4  ;;  %17533 = vmatprep.subr.mxu0 %v18742_v21 }
0x3a80   :  { %v17500_v62 = vpop.f32.mrf.mxu1  ;;  %17518 = vmatprep.subr.mxu1 %v18742_v21  ;;  %17534 = vmatpush3.msra.mxu0 %v14895_v2 }
0x3a81   :  { %17519 = vmatpush3.msra.mxu1 %v8818_v7  ;;  %17511 = vmatmul.mubr.msk.f32.gmra.mxu0 %vm400_vm3, %v8648_v41 }
0x3a82   :  { %17520 = vmatprep.subr.mxu1 %v18742_v21  ;;  %17513 = vmatprep.mubr.msk.f32.mxu0 %vm18743_vm2, %v18742_v21 }
0x3a83   :  { %17521 = vmatpush3.msra.mxu1 %v8813_v24  ;;  %17535 = vmatprep.subr.mxu0 %v18742_v21 }
0x3a84   :  { %17548 = vmatprep.subr.mxu1 %v18742_v21  ;;  %17536 = vmatpush3.msra.mxu0 %v14894_v35 }
0x3a85   :  { %17514 = vmatmul.mubr.msk.f32.gmra.mxu0 %vm400_vm3, %v8653_v29  ;;  %17537 = vmatprep.subr.mxu0 %v18742_v21 }
0x3a86   :  { %17539 = vmatprep.mubr.msk.f32.mxu0 %vm18743_vm2, %v18742_v21  ;;  %17538 = vmatpush3.msra.mxu0 %v14893_v8 }
0x3a87   :  { %17565 = vmatprep.subr.mxu0 %v18742_v21 }
0x3a89   :  { %17540 = vmatmul.mubr.msk.f32.vlgmr.msra.gmra.mxu0 %vm79_vm0, %v21367_v19 }
0x3a8a   :  { %17542 = vmatprep.mubr.msk.f32.mxu0 %vm18743_vm2, %v18742_v21  ;;  %17566 = vmatpush3.msra.mxu0 %v14910_v10  ;;  %v14903_v10 = vld [vmem:[%s23026_s26 + $0x1b8] sm:$0xff] }
0x3a8b   :  { %17567 = vmatprep.subr.mxu0 %v18742_v21 }
0x3a8c   :  { %17568 = vmatpush3.msra.mxu0 %v14909_v61  ;;  %v14902_v61 = vld [vmem:[%s23026_s26 + $0x1b0] sm:$0xff] }
0x3a8d   :  { %17543 = vmatmul.mubr.msk.f32.gmra.mxu0 %vm79_vm0, %v21380_v25  ;;  %17569 = vmatprep.subr.mxu0 %v18742_v21 }
0x3a8e   :  { %17545 = vmatprep.mubr.msk.f32.mxu0 %vm18743_vm2, %v18742_v21  ;;  %17570 = vmatpush3.msra.mxu0 %v14908_v16 }
0x3a8f   :  { %17571 = vmatprep.subr.mxu0 %v18742_v21 }
0x3a90   :  { %17572 = vmatpush3.msra.mxu0 %v14907_v45 }
0x3a91   :  { %17546 = vmatmul.mubr.msk.f32.gmra.mxu0 %vm79_vm0, %v21397_v9  ;;  %17597 = vmatprep.subr.mxu0 %v18742_v21 }
0x3a92   :  { %17573 = vmatprep.mubr.msk.f32.mxu0 %vm18743_vm2, %v18742_v21 }
0x3a95   :  { %17574 = vmatmul.mubr.msk.f32.vlgmr.msra.gmra.mxu0 %vm79_vm0, %v21367_v19 }
0x3a96   :  { %17576 = vmatprep.mubr.msk.f32.mxu0 %vm18743_vm2, %v18742_v21 }
0x3a99   :  { %17577 = vmatmul.mubr.msk.f32.gmra.mxu0 %vm79_vm0, %v21380_v25 }
0x3a9a   :  { %17579 = vmatprep.mubr.msk.f32.mxu0 %vm18743_vm2, %v18742_v21 }
0x3a9d   :  { %17580 = vmatmul.mubr.msk.f32.gmra.mxu0 %vm79_vm0, %v21397_v9 }
0x3a9e   :  { %17603 = vmatprep.mubr.msk.f32.mxu0 %vm18743_vm2, %v18742_v21 }
0x3b3d   :  { %v8911_v14 = vpop.f32.mrf.mxu0 }
0x3b3e   :  { %v8925_v59 = vmul.f32 0.35355338, %v8911_v14  ;;  %v14901_v14 = vld [vmem:[%s23026_s26 + $0x1a8] sm:$0xff] }
0x3b3f   :  { %v17509_v12 = vpop.f32.mrf.mxu0 }
0x3b40   :  { %v8928_v31 = vadd.f32 %v21503_v46, %v8925_v59  ;;  %v14900_v59 = vld [vmem:[%s23026_s26 + $0x1a0] sm:$0xff] }
0x3b41   :  { %v8916_v37 = vpop.f32.mrf.mxu0 }
0x3b42   :  { %v8926_v50 = vmul.f32 0.35355338, %v8916_v37  ;;  %v8931_v0 = vsel %vm505_vm5, %v8928_v31, -inf }
0x3b43   :  { %8932 = vmax.xlane.f32.xlu0 %v8931_v0  ;;  %v17512_v5 = vpop.f32.mrf.mxu0 }
0x3b44   :  { %v8929_v48 = vadd.f32 %v21510_v51, %v8926_v50 }
0x3b45   :  { %v8921_v38 = vpop.f32.mrf.mxu0 }
0x3b46   :  { %v8927_v57 = vmul.f32 0.35355338, %v8921_v38  ;;  %v8934_v20 = vsel %vm505_vm5, %v8929_v48, -inf }
0x3b47   :  { %8935 = vmax.xlane.f32.xlu1 %v8934_v20  ;;  %v17515_v1 = vpop.f32.mrf.mxu0 }
0x3b48   :  { %v8930_v13 = vadd.f32 %v21517_v58, %v8927_v57 }
0x3b49   :  { %v21520_v26 = vpop.f32.mrf.mxu0 }
0x3b4a   :  { %v8937_v43 = vsel %vm512_vm6, %v8930_v13, -inf }
0x3b4b   :  { %8938 = vmax.xlane.f32.xlu0 %v8937_v43  ;;  %v17541_v22 = vpop.f32.mrf.mxu0 }
0x3b4d   :  { %v21523_v55 = vpop.f32.mrf.mxu0 }
0x3b4f   :  { %v17544_v23 = vpop.f32.mrf.mxu0 }
0x3b51   :  { %v21525_v17 = vpop.f32.mrf.mxu0 }
0x3b53   :  { %v17547_v6 = vpop.f32.mrf.mxu0 }
0x3b55   :  { %v9299_v28 = vpop.f32.mrf.mxu0 }
0x3b57   :  { %v17575_v30 = vpop.f32.mrf.mxu0 }
0x3b59   :  { %v9304_v34 = vpop.f32.mrf.mxu0 }
0x3b5b   :  { %v17578_v63 = vpop.f32.mrf.mxu0 }
0x3b5d   :  { %v9309_v60 = vpop.f32.mrf.mxu0 }
0x3b5e   :  { %17598 = vmatpush3.msk.msra.mxu0 %vm549_vm4, %v9309_v60 }
0x3b5f   :  { %v17581_v39 = vpop.f32.mrf.mxu0  ;;  %17599 = vmatprep.subr.mxu0 %v18742_v21 }
0x3b60   :  { %17600 = vmatpush3.msra.mxu0 %v9304_v34 }
0x3b61   :  { %17601 = vmatprep.subr.mxu0 %v18742_v21 }
0x3b62   :  { %17602 = vmatpush3.msra.mxu0 %v9299_v28 }
0x3b63   :  { %17623 = vmatprep.subr.mxu0 %v18742_v21 }
0x3bcc   :  { %v8933_v33 = vpop.xlane.xlu0 %8932 }
0x3bcd   :  { %v8940_v40 = vsub.f32 %v8928_v31, %v8933_v33 }
0x3bcf   :  { %v8943_v41 = vmul.f32 1.442695, %v8940_v40 }
0x3bd0   :  { %v8936_v54 = vpop.xlane.xlu1 %8935 }
0x3bd1   :  { %18583 = vpow2.f32 %v8943_v41  ;;  %v8941_v27 = vsub.f32 %v8929_v48, %v8936_v54 }
0x3bd3   :  { %v8945_v47 = vmul.f32 1.442695, %v8941_v27 }
0x3bd4   :  { %v8939_v29 = vpop.xlane.xlu0 %8938 }
0x3bd5   :  { %18585 = vpow2.f32 %v8945_v47  ;;  %v8942_v56 = vsub.f32 %v8930_v13, %v8939_v29 }
0x3bd7   :  { %v8947_v44 = vmul.f32 1.442695, %v8942_v56 }
0x3bd9   :  { %18587 = vpow2.f32 %v8947_v44 }
0x3bde   :  { %v18584_v42 = vpop.eup %18583 }
0x3bdf   :  { %v8949_v24 = vsel %vm505_vm5, %v18584_v42, 0.0 }
0x3be0   :  { %8950 = vadd.xlane.f32.xlu1 %v8949_v24 }
0x3be2   :  { %v18586_v53 = vpop.eup %18585 }
0x3be3   :  { %v8952_v7 = vsel %vm505_vm5, %v18586_v53, 0.0 }
0x3be4   :  { %8953 = vadd.xlane.f32.xlu0 %v8952_v7 }
0x3be6   :  { %v18588_v32 = vpop.eup %18587 }
0x3be7   :  { %v8955_v3 = vsel %vm512_vm6, %v18588_v32, 0.0 }
0x3be8   :  { %8956 = vadd.xlane.f32.xlu1 %v8955_v3 }
0x3c69   :  { %v8951_v4 = vpop.xlane.xlu1 %8950 }
0x3c6a   :  { %18589 = vrcp.f32 %v8951_v4 }
0x3c6d   :  { %v8954_v62 = vpop.xlane.xlu0 %8953 }
0x3c6e   :  { %18591 = vrcp.f32 %v8954_v62 }
0x3c71   :  { %v8957_v2 = vpop.xlane.xlu1 %8956 }
0x3c72   :  { %18593 = vrcp.f32 %v8957_v2 }
0x3c77   :  { %v18590_v35 = vpop.eup %18589 }
0x3c78   :  { %v8961_v8 = vmul.f32 %v18590_v35, %v18584_v42 }
0x3c7a   :  { %17523 = vmatmul.mubr.msk.f32.vlgmr.msra.gmra.mxu1 %vm505_vm5, %v8961_v8  ;;  %v14924_v8 = vld [vmem:[%s22994_s7 + $0x68] sm:$0xff] }
0x3c7b   :  { %v18592_v16 = vpop.eup %18591  ;;  %17549 = vmatpush3.msra.mxu1 %v14903_v10  ;;  %17525 = vmatprep.mubr.msk.f32.mxu1 %vm18743_vm2, %v18742_v21 }
0x3c7c   :  { %17550 = vmatprep.subr.mxu1 %v18742_v21  ;;  %v8962_v45 = vmul.f32 %v18592_v16, %v18586_v53 }
0x3c7d   :  { %17551 = vmatpush3.msra.mxu1 %v14902_v61 }
0x3c7e   :  { %17526 = vmatmul.mubr.msk.f32.gmra.mxu1 %vm505_vm5, %v8962_v45  ;;  %17552 = vmatprep.subr.mxu1 %v18742_v21 }
0x3c7f   :  { %v18594_v12 = vpop.eup %18593  ;;  %17528 = vmatprep.mubr.msk.f32.mxu1 %vm18743_vm2, %v18742_v21  ;;  %17553 = vmatpush3.msra.mxu1 %v14901_v14 }
0x3c80   :  { %v8963_v31 = vmul.f32 %v18594_v12, %v18588_v32  ;;  %17554 = vmatprep.subr.mxu1 %v18742_v21 }
0x3c81   :  { %17555 = vmatpush3.msra.mxu1 %v14900_v59  ;;  %v14892_v59 = vld [vmem:[%s22994_s7 + $0x60] sm:$0xff] }
0x3c82   :  { %17529 = vmatmul.mubr.msk.f32.gmra.mxu1 %vm505_vm5, %v8963_v31  ;;  %17582 = vmatprep.subr.mxu1 %v18742_v21 }
0x3c83   :  { %17556 = vmatprep.mubr.msk.f32.mxu1 %vm18743_vm2, %v18742_v21 }
0x3c86   :  { %17557 = vmatmul.mubr.msk.f32.vlgmr.msra.gmra.mxu1 %vm79_vm0, %v21367_v19 }
0x3c87   :  { %17559 = vmatprep.mubr.msk.f32.mxu1 %vm18743_vm2, %v18742_v21 }
0x3c8a   :  { %17560 = vmatmul.mubr.msk.f32.gmra.mxu1 %vm79_vm0, %v21380_v25 }
0x3c8b   :  { %17562 = vmatprep.mubr.msk.f32.mxu1 %vm18743_vm2, %v18742_v21 }
0x3c8e   :  { %17563 = vmatmul.mubr.msk.f32.gmra.mxu1 %vm79_vm0, %v21397_v9 }
0x3c8f   :  { %17588 = vmatprep.mubr.msk.f32.mxu1 %vm18743_vm2, %v18742_v21 }
0x3d3a   :  { %v21571_v37 = vpop.f32.mrf.mxu1 }
0x3d3c   :  { %v17524_v50 = vpop.f32.mrf.mxu1 }
0x3d3e   :  { %v21573_v0 = vpop.f32.mrf.mxu1 }
0x3d40   :  { %v17527_v5 = vpop.f32.mrf.mxu1 }
0x3d42   :  { %v21575_v48 = vpop.f32.mrf.mxu1 }
0x3d44   :  { %v17530_v38 = vpop.f32.mrf.mxu1 }
0x3d45   :  { %v14941_v38 = vld [vmem:[%s23026_s26 + $0x1d8] sm:$0xff] }
0x3d46   :  { %v9214_v57 = vpop.f32.mrf.mxu1 }
0x3d48   :  { %v17558_v20 = vpop.f32.mrf.mxu1 }
0x3d49   :  { %v14939_v20 = vld [vmem:[%s23026_s26 + $0x1c8] sm:$0xff] }
0x3d4a   :  { %v9219_v1 = vpop.f32.mrf.mxu1 }
0x3d4c   :  { %v17561_v13 = vpop.f32.mrf.mxu1 }
0x3d4e   :  { %v9224_v43 = vpop.f32.mrf.mxu1 }
0x3d4f   :  { %17583 = vmatpush3.xpose.msk.msra.mxu1 %vm400_vm3, %v9224_v43  ;;  %v14932_v43 = vld [vmem:[%s23025_s24 + $0x1c8] sm:$0xff] }
0x3d50   :  { %v17564_v22 = vpop.f32.mrf.mxu1  ;;  %17584 = vmatprep.subr.mxu1 %v18742_v21 }
0x3d53   :  { %17585 = vmatpush3.xpose.msk.msra.mxu1 %vm400_vm3, %v9219_v1  ;;  %v14933_v1 = vld [vmem:[%s23025_s24 + $0x1d0] sm:$0xff] }
0x3d54   :  { %17586 = vmatprep.subr.mxu1 %v18742_v21 }
0x3d57   :  { %17587 = vmatpush3.xpose.msk.msra.mxu1 %vm400_vm3, %v9214_v57  ;;  %v14940_v57 = vld [vmem:[%s23026_s26 + $0x1d0] sm:$0xff] }
0x3d58   :  { %17612 = vmatprep.subr.mxu1 %v18742_v21 }
0x3d5a   :  { %17589 = vmatmul.mubr.msk.f32.vlgmr.msra.gmra.mxu1 %vm400_vm3, %v21520_v26 }
0x3d5b   :  { %17591 = vmatprep.mubr.msk.f32.mxu1 %vm18743_vm2, %v18742_v21  ;;  %17613 = vmatpush3.msra.mxu1 %v14924_v8 }
0x3d5c   :  { %17634 = vmatprep.subr.mxu1 %v18742_v21 }
0x3d5e   :  { %17592 = vmatmul.mubr.msk.f32.gmra.mxu1 %vm400_vm3, %v21523_v55 }
0x3d5f   :  { %17594 = vmatprep.mubr.msk.f32.mxu1 %vm18743_vm2, %v18742_v21 }
0x3d62   :  { %17595 = vmatmul.mubr.msk.f32.gmra.mxu1 %vm400_vm3, %v21525_v17 }
0x3d63   :  { %17614 = vmatprep.mubr.msk.f32.mxu1 %vm18743_vm2, %v18742_v21 }
0x3e1a   :  { %v9397_v23 = vpop.f32.mrf.mxu1 }
0x3e1b   :  { %v9411_v6 = vmul.f32 0.35355338, %v9397_v23  ;;  %v14931_v23 = vld [vmem:[%s23025_s24 + $0x1c0] sm:$0xff] }
0x3e1c   :  { %v17590_v28 = vpop.f32.mrf.mxu1 }
0x3e1d   :  { %v9414_v26 = vadd.f32 %v21503_v46, %v9411_v6 }
0x3e1e   :  { %v9402_v30 = vpop.f32.mrf.mxu1 }
0x3e1f   :  { %v9412_v34 = vmul.f32 0.35355338, %v9402_v30  ;;  %v9417_v63 = vsel %vm505_vm5, %v9414_v26, -inf  ;;  %v14948_v30 = vld [vmem:[%s23029_s4 + $0x1d8] sm:$0xff] }
0x3e20   :  { %9418 = vmax.xlane.f32.xlu0 %v9417_v63  ;;  %v17593_v55 = vpop.f32.mrf.mxu1  ;;  %v14947_v63 = vld [vmem:[%s23029_s4 + $0x1d0] sm:$0xff] }
0x3e21   :  { %v9415_v60 = vadd.f32 %v21510_v51, %v9412_v34 }
0x3e22   :  { %v9407_v39 = vpop.f32.mrf.mxu1 }
0x3e23   :  { %v9413_v33 = vmul.f32 0.35355338, %v9407_v39  ;;  %v9420_v17 = vsel %vm505_vm5, %v9415_v60, -inf }
0x3e24   :  { %9421 = vmax.xlane.f32.xlu1 %v9420_v17  ;;  %v17596_v40 = vpop.f32.mrf.mxu1 }
0x3e25   :  { %v9416_v41 = vadd.f32 %v21517_v58, %v9413_v33  ;;  %v14945_v33 = vld [vmem:[%s23029_s4 + $0x1c0] sm:$0xff] }
0x3e27   :  { %v9423_v54 = vsel %vm512_vm6, %v9416_v41, -inf }
0x3e28   :  { %9424 = vmax.xlane.f32.xlu0 %v9423_v54 }
0x3ea9   :  { %v9419_v27 = vpop.xlane.xlu0 %9418 }
0x3eaa   :  { %v9426_v47 = vsub.f32 %v9414_v26, %v9419_v27 }
0x3eac   :  { %v9429_v29 = vmul.f32 1.442695, %v9426_v47 }
0x3ead   :  { %v9422_v56 = vpop.xlane.xlu1 %9421 }
0x3eae   :  { %18595 = vpow2.f32 %v9429_v29  ;;  %v9427_v44 = vsub.f32 %v9415_v60, %v9422_v56  ;;  %v14946_v60 = vld [vmem:[%s23029_s4 + $0x1c8] sm:$0xff] }
0x3eb0   :  { %v9431_v42 = vmul.f32 1.442695, %v9427_v44 }
0x3eb1   :  { %v9425_v24 = vpop.xlane.xlu0 %9424 }
0x3eb2   :  { %18597 = vpow2.f32 %v9431_v42  ;;  %v9428_v53 = vsub.f32 %v9416_v41, %v9425_v24 }
0x3eb4   :  { %v9433_v7 = vmul.f32 1.442695, %v9428_v53 }
0x3eb6   :  { %18599 = vpow2.f32 %v9433_v7 }
0x3ebb   :  { %v18596_v32 = vpop.eup %18595 }
0x3ebc   :  { %v9435_v3 = vsel %vm505_vm5, %v18596_v32, 0.0 }
0x3ebd   :  { %9436 = vadd.xlane.f32.xlu1 %v9435_v3 }
0x3ebf   :  { %v18598_v4 = vpop.eup %18597 }
0x3ec0   :  { %v9438_v62 = vsel %vm505_vm5, %v18598_v4, 0.0 }
0x3ec1   :  { %9439 = vadd.xlane.f32.xlu0 %v9438_v62 }
0x3ec3   :  { %v18600_v2 = vpop.eup %18599 }
0x3ec4   :  { %v9441_v35 = vsel %vm512_vm6, %v18600_v2, 0.0 }
0x3ec5   :  { %9442 = vadd.xlane.f32.xlu1 %v9441_v35 }
0x3f46   :  { %v9437_v10 = vpop.xlane.xlu1 %9436 }
0x3f47   :  { %18601 = vrcp.f32 %v9437_v10 }
0x3f4a   :  { %v9440_v61 = vpop.xlane.xlu0 %9439 }
0x3f4b   :  { %18603 = vrcp.f32 %v9440_v61 }
0x3f4e   :  { %v9443_v16 = vpop.xlane.xlu1 %9442 }
0x3f4f   :  { %18605 = vrcp.f32 %v9443_v16 }
0x3f54   :  { %v18602_v45 = vpop.eup %18601 }
0x3f55   :  { %v9447_v14 = vmul.f32 %v18602_v45, %v18596_v32 }
0x3f57   :  { %17604 = vmatmul.mubr.msk.f32.vlgmr.msra.gmra.mxu0 %vm505_vm5, %v9447_v14 }
0x3f58   :  { %v18604_v12 = vpop.eup %18603  ;;  %17606 = vmatprep.mubr.msk.f32.mxu0 %vm18743_vm2, %v18742_v21  ;;  %17624 = vmatpush3.msra.mxu0 %v14892_v59 }
0x3f59   :  { %v9448_v31 = vmul.f32 %v18604_v12, %v18598_v4  ;;  %17651 = vmatprep.subr.mxu0 %v18742_v21 }
0x3f5b   :  { %17607 = vmatmul.mubr.msk.f32.gmra.mxu0 %vm505_vm5, %v9448_v31 }
0x3f5c   :  { %v18606_v50 = vpop.eup %18605  ;;  %17609 = vmatprep.mubr.msk.f32.mxu0 %vm18743_vm2, %v18742_v21 }
0x3f5d   :  { %v9449_v5 = vmul.f32 %v18606_v50, %v18600_v2 }
0x3f5f   :  { %17610 = vmatmul.mubr.msk.f32.gmra.mxu0 %vm505_vm5, %v9449_v5 }
0x3f60   :  { %17625 = vmatprep.mubr.msk.f32.mxu0 %vm18743_vm2, %v18742_v21 }
0x3f63   :  { %17626 = vmatmul.mubr.msk.f32.vlgmr.msra.gmra.mxu0 %vm400_vm3, %v21571_v37  ;;  %v14938_v37 = vld [vmem:[%s23026_s26 + $0x1c0] sm:$0xff] }
0x3f64   :  { %17628 = vmatprep.mubr.msk.f32.mxu0 %vm18743_vm2, %v18742_v21  ;;  %17652 = vmatpush3.msra.mxu0 %v14941_v38 }
0x3f65   :  { %17653 = vmatprep.subr.mxu0 %v18742_v21 }
0x3f66   :  { %17654 = vmatpush3.msra.mxu0 %v14940_v57 }
0x3f67   :  { %17629 = vmatmul.mubr.msk.f32.gmra.mxu0 %vm400_vm3, %v21573_v0  ;;  %17655 = vmatprep.subr.mxu0 %v18742_v21  ;;  %v14934_v0 = vld [vmem:[%s23025_s24 + $0x1d8] sm:$0xff] }
0x3f68   :  { %17631 = vmatprep.mubr.msk.f32.mxu0 %vm18743_vm2, %v18742_v21  ;;  %17656 = vmatpush3.msra.mxu0 %v14939_v20 }
0x3f69   :  { %17657 = vmatprep.subr.mxu0 %v18742_v21 }
0x3f6a   :  { %17658 = vmatpush3.msra.mxu0 %v14938_v37 }
0x3f6b   :  { %17632 = vmatmul.mubr.msk.f32.gmra.mxu0 %vm400_vm3, %v21575_v48  ;;  %17685 = vmatprep.subr.mxu0 %v18742_v21 }
0x3f6c   :  { %17659 = vmatprep.mubr.msk.f32.mxu0 %vm18743_vm2, %v18742_v21 }
0x3f6f   :  { %17660 = vmatmul.mubr.msk.f32.vlgmr.msra.gmra.mxu0 %vm79_vm0, %v21367_v19 }
0x3f70   :  { %17662 = vmatprep.mubr.msk.f32.mxu0 %vm18743_vm2, %v18742_v21 }
0x3f73   :  { %17663 = vmatmul.mubr.msk.f32.gmra.mxu0 %vm79_vm0, %v21380_v25 }
0x3f74   :  { %17665 = vmatprep.mubr.msk.f32.mxu0 %vm18743_vm2, %v18742_v21 }
0x3f77   :  { %17666 = vmatmul.mubr.msk.f32.gmra.mxu0 %vm79_vm0, %v21397_v9 }
0x3f78   :  { %17691 = vmatprep.mubr.msk.f32.mxu0 %vm18743_vm2, %v18742_v21 }
0x4017   :  { %v9528_v48 = vpop.f32.mrf.mxu0 }
0x4018   :  { %17615 = vmatmul.mubr.msk.f32.vlgmr.msra.gmra.mxu1 %vm400_vm3, %v9528_v48 }
0x4019   :  { %v17605_v13 = vpop.f32.mrf.mxu0  ;;  %17635 = vmatpush3.msra.mxu1 %v14934_v0  ;;  %17617 = vmatprep.mubr.msk.f32.mxu1 %vm18743_vm2, %v18742_v21 }
0x401a   :  { %17636 = vmatprep.subr.mxu1 %v18742_v21 }
0x401b   :  { %v9533_v22 = vpop.f32.mrf.mxu0  ;;  %17637 = vmatpush3.msra.mxu1 %v14933_v1 }
0x401c   :  { %17618 = vmatmul.mubr.msk.f32.gmra.mxu1 %vm400_vm3, %v9533_v22  ;;  %17638 = vmatprep.subr.mxu1 %v18742_v21 }
0x401d   :  { %v17608_v6 = vpop.f32.mrf.mxu0  ;;  %17620 = vmatprep.mubr.msk.f32.mxu1 %vm18743_vm2, %v18742_v21  ;;  %17639 = vmatpush3.msra.mxu1 %v14932_v43 }
0x401e   :  { %17640 = vmatprep.subr.mxu1 %v18742_v21 }
0x401f   :  { %v9538_v28 = vpop.f32.mrf.mxu0  ;;  %17641 = vmatpush3.msra.mxu1 %v14931_v23 }
0x4020   :  { %17621 = vmatmul.mubr.msk.f32.gmra.mxu1 %vm400_vm3, %v9538_v28  ;;  %17668 = vmatprep.subr.mxu1 %v18742_v21 }
0x4021   :  { %v17611_v26 = vpop.f32.mrf.mxu0  ;;  %17642 = vmatprep.mubr.msk.f32.mxu1 %vm18743_vm2, %v18742_v21 }
0x4023   :  { %v21689_v34 = vpop.f32.mrf.mxu0 }
0x4024   :  { %17643 = vmatmul.mubr.msk.f32.vlgmr.msra.gmra.mxu1 %vm79_vm0, %v21367_v19 }
0x4025   :  { %v17627_v55 = vpop.f32.mrf.mxu0  ;;  %17645 = vmatprep.mubr.msk.f32.mxu1 %vm18743_vm2, %v18742_v21  ;;  %17669 = vmatpush3.msra.mxu1 %v14948_v30 }
0x4026   :  { %17670 = vmatprep.subr.mxu1 %v18742_v21 }
0x4027   :  { %v21702_v39 = vpop.f32.mrf.mxu0  ;;  %17671 = vmatpush3.msra.mxu1 %v14947_v63 }
0x4028   :  { %17646 = vmatmul.mubr.msk.f32.gmra.mxu1 %vm79_vm0, %v21380_v25  ;;  %17672 = vmatprep.subr.mxu1 %v18742_v21 }
0x4029   :  { %v17630_v17 = vpop.f32.mrf.mxu0  ;;  %17648 = vmatprep.mubr.msk.f32.mxu1 %vm18743_vm2, %v18742_v21  ;;  %17673 = vmatpush3.msra.mxu1 %v14946_v60 }
0x402a   :  { %17674 = vmatprep.subr.mxu1 %v18742_v21 }
0x402b   :  { %v21713_v40 = vpop.f32.mrf.mxu0  ;;  %17675 = vmatpush3.msra.mxu1 %v14945_v33 }
0x402c   :  { %17649 = vmatmul.mubr.msk.f32.gmra.mxu1 %vm79_vm0, %v21397_v9  ;;  %17700 = vmatprep.subr.mxu1 %v18742_v21 }
0x402d   :  { %v17633_v41 = vpop.f32.mrf.mxu0  ;;  %17676 = vmatprep.mubr.msk.f32.mxu1 %vm18743_vm2, %v18742_v21 }
0x402f   :  { %v9878_v54 = vpop.f32.mrf.mxu0 }
0x4030   :  { %17677 = vmatmul.mubr.msk.f32.vlgmr.msra.gmra.mxu1 %vm79_vm0, %v21367_v19 }
0x4031   :  { %v17661_v27 = vpop.f32.mrf.mxu0  ;;  %17679 = vmatprep.mubr.msk.f32.mxu1 %vm18743_vm2, %v18742_v21 }
0x4033   :  { %v9883_v47 = vpop.f32.mrf.mxu0 }
0x4034   :  { %17680 = vmatmul.mubr.msk.f32.gmra.mxu1 %vm79_vm0, %v21380_v25 }
0x4035   :  { %v17664_v29 = vpop.f32.mrf.mxu0  ;;  %17682 = vmatprep.mubr.msk.f32.mxu1 %vm18743_vm2, %v18742_v21 }
0x4037   :  { %v9888_v56 = vpop.f32.mrf.mxu0 }
0x4038   :  { %17683 = vmatmul.mubr.msk.f32.gmra.mxu1 %vm79_vm0, %v21397_v9  ;;  %17686 = vmatpush3.xpose.msk.msra.mxu0 %vm400_vm3, %v9888_v56 }
0x4039   :  { %v17667_v44 = vpop.f32.mrf.mxu0  ;;  %17687 = vmatprep.subr.mxu0 %v18742_v21  ;;  %17706 = vmatprep.mubr.msk.f32.mxu1 %vm18743_vm2, %v18742_v21 }
0x403c   :  { %17688 = vmatpush3.xpose.msk.msra.mxu0 %vm400_vm3, %v9883_v47 }
0x403d   :  { %17689 = vmatprep.subr.mxu0 %v18742_v21 }
0x4040   :  { %17690 = vmatpush3.xpose.msk.msra.mxu0 %vm400_vm3, %v9878_v54 }
0x4041   :  { %17715 = vmatprep.subr.mxu0 %v18742_v21 }
0x40d8   :  { %v21738_v42 = vpop.f32.mrf.mxu1 }
0x40da   :  { %v17616_v24 = vpop.f32.mrf.mxu1 }
0x40db   :  { %v14962_v24 = vld [vmem:[%s22994_s7 + $0x70] sm:$0xff] }
0x40dc   :  { %v21740_v53 = vpop.f32.mrf.mxu1 }
0x40de   :  { %v17619_v7 = vpop.f32.mrf.mxu1 }
0x40e0   :  { %v21742_v32 = vpop.f32.mrf.mxu1 }
0x40e2   :  { %v17622_v3 = vpop.f32.mrf.mxu1 }
0x40e4   :  { %v9793_v4 = vpop.f32.mrf.mxu1 }
0x40e5   :  { %17692 = vmatmul.mubr.msk.f32.vlgmr.msra.gmra.mxu0 %vm400_vm3, %v9793_v4 }
0x40e6   :  { %v17644_v62 = vpop.f32.mrf.mxu1  ;;  %17694 = vmatprep.mubr.msk.f32.mxu0 %vm18743_vm2, %v18742_v21  ;;  %17716 = vmatpush3.msra.mxu0 %v14962_v24  ;;  %v9719_v24 = vadd.f32 %v21713_v40, %v21742_v32 }
0x40e7   :  { %17743 = vmatprep.subr.mxu0 %v18742_v21 }
0x40e8   :  { %v9798_v2 = vpop.f32.mrf.mxu1 }
0x40e9   :  { %17695 = vmatmul.mubr.msk.f32.gmra.mxu0 %vm400_vm3, %v9798_v2 }
0x40ea   :  { %v17647_v35 = vpop.f32.mrf.mxu1  ;;  %17697 = vmatprep.mubr.msk.f32.mxu0 %vm18743_vm2, %v18742_v21 }
0x40eb   :  { %v14969_v35 = vld [vmem:[%s23025_s24 + $0x1f8] sm:$0xff] }
0x40ec   :  { %v9803_v8 = vpop.f32.mrf.mxu1 }
0x40ed   :  { %17698 = vmatmul.mubr.msk.f32.gmra.mxu0 %vm400_vm3, %v9803_v8  ;;  %v14968_v8 = vld [vmem:[%s23025_s24 + $0x1f0] sm:$0xff] }
0x40ee   :  { %v17650_v10 = vpop.f32.mrf.mxu1  ;;  %17717 = vmatprep.mubr.msk.f32.mxu0 %vm18743_vm2, %v18742_v21 }
0x40f0   :  { %v9963_v61 = vpop.f32.mrf.mxu1 }
0x40f2   :  { %v17678_v16 = vpop.f32.mrf.mxu1 }
0x40f3   :  { %v14967_v16 = vld [vmem:[%s23025_s24 + $0x1e8] sm:$0xff] }
0x40f4   :  { %v9968_v45 = vpop.f32.mrf.mxu1 }
0x40f6   :  { %v17681_v14 = vpop.f32.mrf.mxu1 }
0x40f8   :  { %v9973_v59 = vpop.f32.mrf.mxu1 }
0x40f9   :  { %17701 = vmatpush3.msk.msra.mxu1 %vm549_vm4, %v9973_v59 }
0x40fa   :  { %v17684_v12 = vpop.f32.mrf.mxu1  ;;  %17702 = vmatprep.subr.mxu1 %v18742_v21 }
0x40fb   :  { %17703 = vmatpush3.msra.mxu1 %v9968_v45  ;;  %v14966_v45 = vld [vmem:[%s23025_s24 + $0x1e0] sm:$0xff]  ;;  %v14983_v12 = vld [vmem:[%s23029_s4 + $0x1f8] sm:$0xff] }
0x40fc   :  { %17704 = vmatprep.subr.mxu1 %v18742_v21 }
0x40fd   :  { %17705 = vmatpush3.msra.mxu1 %v9963_v61 }
0x40fe   :  { %17726 = vmatprep.subr.mxu1 %v18742_v21 }
0x41a5   :  { %v10061_v31 = vpop.f32.mrf.mxu0 }
0x41a6   :  { %v10075_v50 = vmul.f32 0.35355338, %v10061_v31  ;;  %v14982_v31 = vld [vmem:[%s23029_s4 + $0x1f0] sm:$0xff] }
0x41a7   :  { %v17693_v5 = vpop.f32.mrf.mxu0 }
0x41a8   :  { %v10078_v38 = vadd.f32 %v21503_v46, %v10075_v50  ;;  %v14981_v50 = vld [vmem:[%s23029_s4 + $0x1e8] sm:$0xff]  ;;  %v14980_v5 = vld [vmem:[%s23029_s4 + $0x1e0] sm:$0xff] }
0x41a9   :  { %v10066_v57 = vpop.f32.mrf.mxu0 }
0x41aa   :  { %v10076_v20 = vmul.f32 0.35355338, %v10066_v57  ;;  %v10081_v37 = vsel %vm505_vm5, %v10078_v38, -inf }
0x41ab   :  { %10082 = vmax.xlane.f32.xlu0 %v10081_v37  ;;  %v17696_v0 = vpop.f32.mrf.mxu0 }
0x41ac   :  { %v10079_v48 = vadd.f32 %v21510_v51, %v10076_v20  ;;  %v14975_v20 = vld [vmem:[%s23026_s26 + $0x1f0] sm:$0xff]  ;;  %v14974_v0 = vld [vmem:[%s23026_s26 + $0x1e8] sm:$0xff] }
0x41ad   :  { %v10071_v1 = vpop.f32.mrf.mxu0 }
0x41ae   :  { %v10077_v13 = vmul.f32 0.35355338, %v10071_v1  ;;  %v10084_v43 = vsel %vm505_vm5, %v10079_v48, -inf  ;;  %v14973_v1 = vld [vmem:[%s23026_s26 + $0x1e0] sm:$0xff] }
0x41af   :  { %10085 = vmax.xlane.f32.xlu1 %v10084_v43  ;;  %v17699_v22 = vpop.f32.mrf.mxu0 }
0x41b0   :  { %v10080_v23 = vadd.f32 %v21517_v58, %v10077_v13 }
0x41b2   :  { %v10087_v6 = vsel %vm512_vm6, %v10080_v23, -inf }
0x41b3   :  { %10088 = vmax.xlane.f32.xlu0 %v10087_v6 }
0x4234   :  { %v10083_v28 = vpop.xlane.xlu0 %10082 }
0x4235   :  { %v10090_v26 = vsub.f32 %v10078_v38, %v10083_v28  ;;  %v14976_v38 = vld [vmem:[%s23026_s26 + $0x1f8] sm:$0xff] }
0x4237   :  { %v10093_v30 = vmul.f32 1.442695, %v10090_v26 }
0x4238   :  { %v10086_v63 = vpop.xlane.xlu1 %10085 }
0x4239   :  { %18607 = vpow2.f32 %v10093_v30  ;;  %v10091_v55 = vsub.f32 %v10079_v48, %v10086_v63 }
0x423b   :  { %v10095_v60 = vmul.f32 1.442695, %v10091_v55 }
0x423c   :  { %v10089_v33 = vpop.xlane.xlu0 %10088 }
0x423d   :  { %18609 = vpow2.f32 %v10095_v60  ;;  %v10092_v17 = vsub.f32 %v10080_v23, %v10089_v33 }
0x423f   :  { %v10097_v41 = vmul.f32 1.442695, %v10092_v17 }
0x4241   :  { %18611 = vpow2.f32 %v10097_v41 }
0x4246   :  { %v18608_v54 = vpop.eup %18607 }
0x4247   :  { %v10099_v27 = vsel %vm505_vm5, %v18608_v54, 0.0 }
0x4248   :  { %10100 = vadd.xlane.f32.xlu1 %v10099_v27 }
0x424a   :  { %v18610_v47 = vpop.eup %18609 }
0x424b   :  { %v10102_v29 = vsel %vm505_vm5, %v18610_v47, 0.0 }
0x424c   :  { %10103 = vadd.xlane.f32.xlu0 %v10102_v29 }
0x424e   :  { %v18612_v56 = vpop.eup %18611 }
0x424f   :  { %v10105_v44 = vsel %vm512_vm6, %v18612_v56, 0.0 }
0x4250   :  { %10106 = vadd.xlane.f32.xlu1 %v10105_v44 }
0x42d1   :  { %v10101_v7 = vpop.xlane.xlu1 %10100 }
0x42d2   :  { %18613 = vrcp.f32 %v10101_v7 }
0x42d5   :  { %v10104_v3 = vpop.xlane.xlu0 %10103 }
0x42d6   :  { %18615 = vrcp.f32 %v10104_v3 }
0x42d9   :  { %v10107_v4 = vpop.xlane.xlu1 %10106 }
0x42da   :  { %18617 = vrcp.f32 %v10107_v4 }
0x42df   :  { %v18614_v62 = vpop.eup %18613 }
0x42e0   :  { %v10111_v2 = vmul.f32 %v18614_v62, %v18608_v54 }
0x42e2   :  { %17707 = vmatmul.mubr.msk.f32.vlgmr.msra.gmra.mxu1 %vm505_vm5, %v10111_v2 }
0x42e3   :  { %v18616_v10 = vpop.eup %18615  ;;  %17709 = vmatprep.mubr.msk.f32.mxu1 %vm18743_vm2, %v18742_v21  ;;  %17727 = vmatpush3.msra.mxu1 %v14969_v35 }
0x42e4   :  { %v10112_v61 = vmul.f32 %v18616_v10, %v18610_v47  ;;  %17728 = vmatprep.subr.mxu1 %v18742_v21  ;;  %v9714_v47 = vadd.f32 %v21702_v39, %v21740_v53 }
0x42e5   :  { %17729 = vmatpush3.msra.mxu1 %v14968_v8 }
0x42e6   :  { %17710 = vmatmul.mubr.msk.f32.gmra.mxu1 %vm505_vm5, %v10112_v61  ;;  %17730 = vmatprep.subr.mxu1 %v18742_v21 }
0x42e7   :  { %v18618_v14 = vpop.eup %18617  ;;  %17712 = vmatprep.mubr.msk.f32.mxu1 %vm18743_vm2, %v18742_v21  ;;  %17731 = vmatpush3.msra.mxu1 %v14967_v16 }
0x42e8   :  { %v10113_v59 = vmul.f32 %v18618_v14, %v18612_v56  ;;  %17732 = vmatprep.subr.mxu1 %v18742_v21 }
0x42e9   :  { %17733 = vmatpush3.msra.mxu1 %v14966_v45 }
0x42ea   :  { %17713 = vmatmul.mubr.msk.f32.gmra.mxu1 %vm505_vm5, %v10113_v59  ;;  %17760 = vmatprep.subr.mxu1 %v18742_v21 }
0x42eb   :  { %17734 = vmatprep.mubr.msk.f32.mxu1 %vm18743_vm2, %v18742_v21 }
0x42ee   :  { %17735 = vmatmul.mubr.msk.f32.vlgmr.msra.gmra.mxu1 %vm79_vm0, %v21367_v19 }
0x42ef   :  { %17737 = vmatprep.mubr.msk.f32.mxu1 %vm18743_vm2, %v18742_v21  ;;  %17761 = vmatpush3.msra.mxu1 %v14983_v12 }
0x42f0   :  { %17762 = vmatprep.subr.mxu1 %v18742_v21 }
0x42f1   :  { %17763 = vmatpush3.msra.mxu1 %v14982_v31 }
0x42f2   :  { %17738 = vmatmul.mubr.msk.f32.gmra.mxu1 %vm79_vm0, %v21380_v25  ;;  %17764 = vmatprep.subr.mxu1 %v18742_v21 }
0x42f3   :  { %17740 = vmatprep.mubr.msk.f32.mxu1 %vm18743_vm2, %v18742_v21  ;;  %17765 = vmatpush3.msra.mxu1 %v14981_v50 }
0x42f4   :  { %17766 = vmatprep.subr.mxu1 %v18742_v21 }
0x42f5   :  { %17767 = vmatpush3.msra.mxu1 %v14980_v5 }
0x42f6   :  { %17741 = vmatmul.mubr.msk.f32.gmra.mxu1 %vm79_vm0, %v21397_v9  ;;  %17792 = vmatprep.subr.mxu1 %v18742_v21 }
0x42f7   :  { %17768 = vmatprep.mubr.msk.f32.mxu1 %vm18743_vm2, %v18742_v21 }
0x42fa   :  { %17769 = vmatmul.mubr.msk.f32.vlgmr.msra.gmra.mxu1 %vm79_vm0, %v21367_v19 }
0x42fb   :  { %17771 = vmatprep.mubr.msk.f32.mxu1 %vm18743_vm2, %v18742_v21 }
0x42fe   :  { %17772 = vmatmul.mubr.msk.f32.gmra.mxu1 %vm79_vm0, %v21380_v25 }
0x42ff   :  { %17774 = vmatprep.mubr.msk.f32.mxu1 %vm18743_vm2, %v18742_v21 }
0x4302   :  { %17775 = vmatmul.mubr.msk.f32.gmra.mxu1 %vm79_vm0, %v21397_v9 }
0x4303   :  { %17798 = vmatprep.mubr.msk.f32.mxu1 %vm18743_vm2, %v18742_v21 }
0x43a2   :  { %v10192_v57 = vpop.f32.mrf.mxu1 }
0x43a3   :  { %17718 = vmatmul.mubr.msk.f32.vlgmr.msra.gmra.mxu0 %vm400_vm3, %v10192_v57 }
0x43a4   :  { %v17708_v37 = vpop.f32.mrf.mxu1  ;;  %17744 = vmatpush3.msra.mxu0 %v14976_v38  ;;  %17720 = vmatprep.mubr.msk.f32.mxu0 %vm18743_vm2, %v18742_v21 }
0x43a5   :  { %17745 = vmatprep.subr.mxu0 %v18742_v21 }
0x43a6   :  { %v10197_v48 = vpop.f32.mrf.mxu1  ;;  %17746 = vmatpush3.msra.mxu0 %v14975_v20 }
0x43a7   :  { %17721 = vmatmul.mubr.msk.f32.gmra.mxu0 %vm400_vm3, %v10197_v48  ;;  %17747 = vmatprep.subr.mxu0 %v18742_v21 }
0x43a8   :  { %v17711_v13 = vpop.f32.mrf.mxu1  ;;  %17723 = vmatprep.mubr.msk.f32.mxu0 %vm18743_vm2, %v18742_v21  ;;  %17748 = vmatpush3.msra.mxu0 %v14974_v0 }
0x43a9   :  { %17749 = vmatprep.subr.mxu0 %v18742_v21 }
0x43aa   :  { %v10202_v43 = vpop.f32.mrf.mxu1  ;;  %17750 = vmatpush3.msra.mxu0 %v14973_v1 }
0x43ab   :  { %17724 = vmatmul.mubr.msk.f32.gmra.mxu0 %vm400_vm3, %v10202_v43  ;;  %17777 = vmatprep.subr.mxu0 %v18742_v21 }
0x43ac   :  { %v17714_v22 = vpop.f32.mrf.mxu1  ;;  %17751 = vmatprep.mubr.msk.f32.mxu0 %vm18743_vm2, %v18742_v21 }
0x43ae   :  { %v10371_v23 = vpop.f32.mrf.mxu1 }
0x43af   :  { %17752 = vmatmul.mubr.msk.f32.vlgmr.msra.gmra.mxu0 %vm79_vm0, %v21367_v19 }
0x43b0   :  { %v17736_v6 = vpop.f32.mrf.mxu1  ;;  %17754 = vmatprep.mubr.msk.f32.mxu0 %vm18743_vm2, %v18742_v21 }
0x43b2   :  { %v10376_v28 = vpop.f32.mrf.mxu1 }
0x43b3   :  { %17755 = vmatmul.mubr.msk.f32.gmra.mxu0 %vm79_vm0, %v21380_v25 }
0x43b4   :  { %v17739_v26 = vpop.f32.mrf.mxu1  ;;  %17757 = vmatprep.mubr.msk.f32.mxu0 %vm18743_vm2, %v18742_v21 }
0x43b5   :  { %v14997_v26 = vld [vmem:[%s22994_s7 + $0x78] sm:$0xff] }
0x43b6   :  { %v10381_v30 = vpop.f32.mrf.mxu1 }
0x43b7   :  { %17758 = vmatmul.mubr.msk.f32.gmra.mxu0 %vm79_vm0, %v21397_v9  ;;  %v9709_v9 = vadd.f32 %v21689_v34, %v21738_v42 }
0x43b8   :  { %v17742_v63 = vpop.f32.mrf.mxu1  ;;  %17783 = vmatprep.mubr.msk.f32.mxu0 %vm18743_vm2, %v18742_v21 }
0x43ba   :  { %v10541_v19 = vpop.f32.mrf.mxu1 }
0x43bc   :  { %v17770_v55 = vpop.f32.mrf.mxu1 }
0x43be   :  { %v10546_v60 = vpop.f32.mrf.mxu1 }
0x43c0   :  { %v17773_v33 = vpop.f32.mrf.mxu1 }
0x43c2   :  { %v10551_v17 = vpop.f32.mrf.mxu1 }
0x43c3   :  { %17793 = vmatpush3.msk.msra.mxu1 %vm549_vm4, %v10551_v17 }
0x43c4   :  { %v17776_v25 = vpop.f32.mrf.mxu1  ;;  %17794 = vmatprep.subr.mxu1 %v18742_v21 }
0x43c5   :  { %17795 = vmatpush3.msra.mxu1 %v10546_v60 }
0x43c6   :  { %17796 = vmatprep.subr.mxu1 %v18742_v21 }
0x43c7   :  { %17797 = vmatpush3.msra.mxu1 %v10541_v19 }
0x43c8   :  { %17818 = vmatprep.subr.mxu1 %v18742_v21 }
0x4463   :  { %v10283_v41 = vpop.f32.mrf.mxu0 }
0x4464   :  { %v21878_v54 = vadd.f32 %v10283_v41, %v9709_v9 }
0x4465   :  { %v17719_v27 = vpop.f32.mrf.mxu0 }
0x4467   :  { %v10288_v29 = vpop.f32.mrf.mxu0 }
0x4468   :  { %v21882_v56 = vadd.f32 %v10288_v29, %v9714_v47 }
0x4469   :  { %v17722_v44 = vpop.f32.mrf.mxu0 }
0x446b   :  { %v10293_v7 = vpop.f32.mrf.mxu0 }
0x446c   :  { %v21886_v3 = vadd.f32 %v10293_v7, %v9719_v24 }
0x446d   :  { %v17725_v4 = vpop.f32.mrf.mxu0 }
0x446f   :  { %v10456_v62 = vpop.f32.mrf.mxu0 }
0x4471   :  { %v17753_v34 = vpop.f32.mrf.mxu0 }
0x4473   :  { %v10461_v42 = vpop.f32.mrf.mxu0 }
0x4475   :  { %v17756_v2 = vpop.f32.mrf.mxu0 }
0x4477   :  { %v10466_v35 = vpop.f32.mrf.mxu0 }
0x4478   :  { %17778 = vmatpush3.xpose.msk.msra.mxu0 %vm400_vm3, %v10466_v35 }
0x4479   :  { %v17759_v8 = vpop.f32.mrf.mxu0  ;;  %17779 = vmatprep.subr.mxu0 %v18742_v21 }
0x447c   :  { %17780 = vmatpush3.xpose.msk.msra.mxu0 %vm400_vm3, %v10461_v42 }
0x447d   :  { %17781 = vmatprep.subr.mxu0 %v18742_v21 }
0x4480   :  { %17782 = vmatpush3.xpose.msk.msra.mxu0 %vm400_vm3, %v10456_v62  ;;  %v15002_v62 = vld [vmem:[%s22995_s8 + $0x3] ss:$0 sm:$0xff] }
0x4481   :  { %17807 = vmatprep.subr.mxu0 %v18742_v21 }
0x4483   :  { %17784 = vmatmul.mubr.msk.f32.vlgmr.msra.gmra.mxu0 %vm400_vm3, %v10371_v23 }
0x4484   :  { %17786 = vmatprep.mubr.msk.f32.mxu0 %vm18743_vm2, %v18742_v21  ;;  %17808 = vmatpush3.msra.mxu0 %v14997_v26 }
0x4485   :  { %17835 = vmatprep.subr.mxu0 %v18742_v21 }
0x4487   :  { %17787 = vmatmul.mubr.msk.f32.gmra.mxu0 %vm400_vm3, %v10376_v28 }
0x4488   :  { %17789 = vmatprep.mubr.msk.f32.mxu0 %vm18743_vm2, %v18742_v21 }
0x448b   :  { %17790 = vmatmul.mubr.msk.f32.gmra.mxu0 %vm400_vm3, %v10381_v30 }
0x448c   :  { %17809 = vmatprep.mubr.msk.f32.mxu0 %vm18743_vm2, %v18742_v21 }
0x4543   :  { %v10639_v39 = vpop.f32.mrf.mxu0 }
0x4544   :  { %v10653_v40 = vmul.f32 0.35355338, %v10639_v39 }
0x4545   :  { %v17785_v53 = vpop.f32.mrf.mxu0 }
0x4546   :  { %v10656_v32 = vadd.f32 %v21503_v46, %v10653_v40 }
0x4547   :  { %v10644_v10 = vpop.f32.mrf.mxu0 }
0x4548   :  { %v10654_v61 = vmul.f32 0.35355338, %v10644_v10  ;;  %v10659_v16 = vsel %vm505_vm5, %v10656_v32, -inf }
0x4549   :  { %10660 = vmax.xlane.f32.xlu0 %v10659_v16  ;;  %v17788_v45 = vpop.f32.mrf.mxu0 }
0x454a   :  { %v10657_v14 = vadd.f32 %v21510_v51, %v10654_v61 }
0x454b   :  { %v10649_v59 = vpop.f32.mrf.mxu0 }
0x454c   :  { %v10655_v12 = vmul.f32 0.35355338, %v10649_v59  ;;  %v10662_v31 = vsel %vm505_vm5, %v10657_v14, -inf }
0x454d   :  { %10663 = vmax.xlane.f32.xlu1 %v10662_v31  ;;  %v17791_v50 = vpop.f32.mrf.mxu0 }
0x454e   :  { %v10658_v5 = vadd.f32 %v21517_v58, %v10655_v12 }
0x4550   :  { %v10665_v38 = vsel %vm512_vm6, %v10658_v5, -inf }
0x4551   :  { %10666 = vmax.xlane.f32.xlu0 %v10665_v38 }
0x45d2   :  { %v10661_v46 = vpop.xlane.xlu0 %10660 }
0x45d3   :  { %v10668_v57 = vsub.f32 %v10656_v32, %v10661_v46 }
0x45d5   :  { %v10671_v20 = vmul.f32 1.442695, %v10668_v57 }
0x45d6   :  { %v10664_v37 = vpop.xlane.xlu1 %10663 }
0x45d7   :  { %18619 = vpow2.f32 %v10671_v20  ;;  %v10669_v0 = vsub.f32 %v10657_v14, %v10664_v37 }
0x45d9   :  { %v10673_v48 = vmul.f32 1.442695, %v10669_v0 }
0x45da   :  { %v10667_v1 = vpop.xlane.xlu0 %10666 }
0x45db   :  { %18621 = vpow2.f32 %v10673_v48  ;;  %v10670_v51 = vsub.f32 %v10658_v5, %v10667_v1  ;;  %v15010_v48 = vld [vmem:[%s22996_s11 + $0x78] sm:$0xff]  ;;  %v15009_v1 = vld [vmem:[%s22996_s11 + $0x70] sm:$0xff] }
0x45dd   :  { %v10675_v13 = vmul.f32 1.442695, %v10670_v51  ;;  %v15008_v51 = vld [vmem:[%s22996_s11 + $0x68] sm:$0xff] }
0x45df   :  { %18623 = vpow2.f32 %v10675_v13  ;;  %v15007_v13 = vld [vmem:[%s22996_s11 + $0x60] sm:$0xff] }
0x45e4   :  { %v18620_v43 = vpop.eup %18619 }
0x45e5   :  { %v10677_v22 = vsel %vm505_vm5, %v18620_v43, 0.0 }
0x45e6   :  { %10678 = vadd.xlane.f32.xlu1 %v10677_v22 }
0x45e8   :  { %v18622_v58 = vpop.eup %18621 }
0x45e9   :  { %v10680_v23 = vsel %vm505_vm5, %v18622_v58, 0.0 }
0x45ea   :  { %10681 = vadd.xlane.f32.xlu0 %v10680_v23 }
0x45ec   :  { %v18624_v6 = vpop.eup %18623 }
0x45ed   :  { %v10683_v28 = vsel %vm512_vm6, %v18624_v6, 0.0 }
0x45ee   :  { %10684 = vadd.xlane.f32.xlu1 %v10683_v28 }
0x466f   :  { %v10679_v30 = vpop.xlane.xlu1 %10678 }
0x4670   :  { %18625 = vrcp.f32 %v10679_v30 }
0x4673   :  { %v10682_v63 = vpop.xlane.xlu0 %10681 }
0x4674   :  { %18627 = vrcp.f32 %v10682_v63 }
0x4677   :  { %v10685_v19 = vpop.xlane.xlu1 %10684 }
0x4678   :  { %18629 = vrcp.f32 %v10685_v19 }
0x467d   :  { %v18626_v55 = vpop.eup %18625 }
0x467e   :  { %v10689_v60 = vmul.f32 %v18626_v55, %v18620_v43  ;;  %v15005_v55 = vld [vmem:[%s22997_s9 + $0x3] ss:$0 sm:$0xff] }
0x4680   :  { %17799 = vmatmul.mubr.msk.f32.vlgmr.msra.gmra.mxu1 %vm505_vm5, %v10689_v60 }
0x4681   :  { %v18628_v33 = vpop.eup %18627  ;;  %17801 = vmatprep.mubr.msk.f32.mxu1 %vm18743_vm2, %v18742_v21  ;;  %17819 = vmatpush3.msra.mxu1 %v15010_v48 }
0x4682   :  { %v10690_v17 = vmul.f32 %v18628_v33, %v18622_v58  ;;  %17820 = vmatprep.subr.mxu1 %v18742_v21  ;;  %v15006_v33 = vld [vmem:[%s22998_s10 + $0x3] ss:$0 sm:$0xff] }
0x4683   :  { %17821 = vmatpush3.msra.mxu1 %v15009_v1 }
0x4684   :  { %17802 = vmatmul.mubr.msk.f32.gmra.mxu1 %vm505_vm5, %v10690_v17  ;;  %17822 = vmatprep.subr.mxu1 %v18742_v21 }
0x4685   :  { %v18630_v25 = vpop.eup %18629  ;;  %17804 = vmatprep.mubr.msk.f32.mxu1 %vm18743_vm2, %v18742_v21  ;;  %17823 = vmatpush3.msra.mxu1 %v15008_v51 }
0x4686   :  { %v10691_v9 = vmul.f32 %v18630_v25, %v18624_v6  ;;  %17824 = vmatprep.subr.mxu1 %v18742_v21 }
0x4687   :  { %17825 = vmatpush3.msra.mxu1 %v15007_v13 }
0x4688   :  { %17805 = vmatmul.mubr.msk.f32.gmra.mxu1 %vm505_vm5, %v10691_v9  ;;  %17876 = vmatprep.subr.mxu1 %v18742_v21 }
0x4689   :  { %17826 = vmatprep.mubr.msk.f32.mxu1 %vm18743_vm2, %v18742_v21 }
0x4740   :  { %v10770_v41 = vpop.f32.mrf.mxu1 }
0x4741   :  { %17810 = vmatmul.mubr.msk.f32.vlgmr.msra.gmra.mxu0 %vm400_vm3, %v10770_v41 }
0x4742   :  { %v17800_v27 = vpop.f32.mrf.mxu1  ;;  %17812 = vmatprep.mubr.msk.f32.mxu0 %vm18743_vm2, %v18742_v21 }
0x4743   :  { %v15041_v27 = vld [vmem:[%s23002_s16 + $0x38] sm:$0xff] }
0x4744   :  { %v10775_v47 = vpop.f32.mrf.mxu1 }
0x4745   :  { %17813 = vmatmul.mubr.msk.f32.gmra.mxu0 %vm400_vm3, %v10775_v47 }
0x4746   :  { %v17803_v29 = vpop.f32.mrf.mxu1  ;;  %17815 = vmatprep.mubr.msk.f32.mxu0 %vm18743_vm2, %v18742_v21 }
0x4747   :  { %v15040_v29 = vld [vmem:[%s23002_s16 + $0x30] sm:$0xff] }
0x4748   :  { %v10780_v44 = vpop.f32.mrf.mxu1 }
0x4749   :  { %17816 = vmatmul.mubr.msk.f32.gmra.mxu0 %vm400_vm3, %v10780_v44 }
0x474a   :  { %v17806_v24 = vpop.f32.mrf.mxu1  ;;  %17867 = vmatprep.mubr.msk.f32.mxu0 %vm18743_vm2, %v18742_v21 }
0x4801   :  { %v10861_v7 = vpop.f32.mrf.mxu0 }
0x4802   :  { %v10875_v4 = vadd.f32 %v10861_v7, %v21878_v54 }
0x4803   :  { %v17811_v34 = vpop.f32.mrf.mxu0 }
0x4804   :  { %v10878_v42 = vadd.f32 %v10875_v4, %v21309_v49  ;;  %v15039_v4 = vld [vmem:[%s23002_s16 + $0x28] sm:$0xff]  ;;  %v15038_v34 = vld [vmem:[%s23002_s16 + $0x20] sm:$0xff] }
0x4805   :  { %v10866_v2 = vpop.f32.mrf.mxu0 }
0x4806   :  { %v21939_v35 = vadd.f32 %v15002_v62, %v10878_v42  ;;  %v10876_v8 = vadd.f32 %v10866_v2, %v21882_v56  ;;  %v15031_v2 = vld [vmem:[%s22999_s13 + $0x1f8] sm:$0xff] }
0x4807   :  { %v17814_v39 = vpop.f32.mrf.mxu0  ;;  %17836 = vmatpush3.msra.mxu0 %v15031_v2 }
0x4808   :  { %v10879_v40 = vadd.f32 %v10876_v8, %v21314_v36  ;;  %v10896_v53 = vsel %vm79_vm0, %v21939_v35, 0.0  ;;  %17837 = vmatprep.subr.mxu0 %v18742_v21  ;;  %v15027_v8 = vld [vmem:[%s22999_s13 + $0x1d8] sm:$0xff]  ;;  %v15026_v39 = vld [vmem:[%s22999_s13 + $0x1d0] sm:$0xff] }
0x4809   :  { %10897 = vadd.xlane.f32.xlu0 %v10896_v53  ;;  %v10871_v54 = vpop.f32.mrf.mxu0  ;;  %v15024_v53 = vld [vmem:[%s22999_s13 + $0x1c0] sm:$0xff] }
0x480a   :  { %v21945_v32 = vadd.f32 %v15002_v62, %v10879_v40  ;;  %v10877_v10 = vadd.f32 %v10871_v54, %v21886_v3  ;;  %v15025_v40 = vld [vmem:[%s22999_s13 + $0x1c8] sm:$0xff]  ;;  %v15023_v54 = vld [vmem:[%s22999_s13 + $0x1b8] sm:$0xff] }
0x480b   :  { %v17817_v61 = vpop.f32.mrf.mxu0 }
0x480c   :  { %v10880_v49 = vadd.f32 %v10877_v10, %v21319_v52  ;;  %v10899_v16 = vsel %vm79_vm0, %v21945_v32, 0.0  ;;  %v15022_v10 = vld [vmem:[%s22999_s13 + $0x1b0] sm:$0xff]  ;;  %v15021_v61 = vld [vmem:[%s22999_s13 + $0x1a8] sm:$0xff] }
0x480d   :  { %10900 = vadd.xlane.f32.xlu1 %v10899_v16  ;;  %v15019_v16 = vld [vmem:[%s22999_s13 + $0x198] sm:$0xff] }
0x480e   :  { %v21951_v56 = vadd.f32 %v15002_v62, %v10880_v49  ;;  %v15020_v49 = vld [vmem:[%s22999_s13 + $0x1a0] sm:$0xff] }
0x4810   :  { %v10902_v36 = vsel %vm86_vm1, %v21951_v56, 0.0 }
0x4811   :  { %10903 = vadd.xlane.f32.xlu0 %v10902_v36  ;;  %v15018_v36 = vld [vmem:[%s22999_s13 + $0x190] sm:$0xff] }
0x4892   :  { %v10898_v45 = vpop.xlane.xlu0 %10897 }
0x4893   :  { %v10905_v14 = vmul.f32 0.03125, %v10898_v45  ;;  %v15017_v45 = vld [vmem:[%s22999_s13 + $0x188] sm:$0xff] }
0x4895   :  { %v10908_v59 = vsub.f32 %v21939_v35, %v10905_v14  ;;  %v15016_v14 = vld [vmem:[%s22999_s13 + $0x180] sm:$0xff] }
0x4896   :  { %v10901_v12 = vpop.xlane.xlu1 %10900 }
0x4897   :  { %v10906_v31 = vmul.f32 0.03125, %v10901_v12  ;;  %v10911_v3 = vmul.f32 %v10908_v59, %v10908_v59  ;;  %v15036_v12 = vld [vmem:[%s23003_s15 + $0x30] sm:$0xff] }
0x4899   :  { %v10909_v50 = vsub.f32 %v21945_v32, %v10906_v31  ;;  %v10914_v52 = vsel %vm79_vm0, %v10911_v3, 0.0  ;;  %v15012_v31 = vld [vmem:[%s23000_s12 + $0x3] ss:$0 sm:$0xff] }
0x489a   :  { %10915 = vadd.xlane.f32.xlu1 %v10914_v52  ;;  %v10904_v5 = vpop.xlane.xlu0 %10903 }
0x489b   :  { %v10907_v38 = vmul.f32 0.03125, %v10904_v5  ;;  %v10912_v46 = vmul.f32 %v10909_v50, %v10909_v50 }
0x489d   :  { %v10910_v57 = vsub.f32 %v21951_v56, %v10907_v38  ;;  %v10917_v20 = vsel %vm79_vm0, %v10912_v46, 0.0 }
0x489e   :  { %10918 = vadd.xlane.f32.xlu0 %v10917_v20 }
0x489f   :  { %v10913_v37 = vmul.f32 %v10910_v57, %v10910_v57 }
0x48a1   :  { %v10920_v0 = vsel %vm86_vm1, %v10913_v37, 0.0 }
0x48a2   :  { %10921 = vadd.xlane.f32.xlu1 %v10920_v0 }
0x4923   :  { %v10916_v43 = vpop.xlane.xlu1 %10915 }
0x4924   :  { %v10923_v22 = vmul.f32 0.03125, %v10916_v43 }
0x4926   :  { %v10926_v58 = vadd.f32 1e-05, %v10923_v22 }
0x4927   :  { %v10919_v23 = vpop.xlane.xlu0 %10918 }
0x4928   :  { %18631 = vrsqrt.f32 %v10926_v58  ;;  %v10924_v6 = vmul.f32 0.03125, %v10919_v23 }
0x492a   :  { %v10927_v28 = vadd.f32 1e-05, %v10924_v6 }
0x492b   :  { %v10922_v26 = vpop.xlane.xlu1 %10921 }
0x492c   :  { %18633 = vrsqrt.f32 %v10927_v28  ;;  %v10925_v30 = vmul.f32 0.03125, %v10922_v26 }
0x492e   :  { %v10928_v63 = vadd.f32 1e-05, %v10925_v30 }
0x4930   :  { %18635 = vrsqrt.f32 %v10928_v63 }
0x4935   :  { %v18632_v19 = vpop.eup %18631 }
0x4936   :  { %v10932_v60 = vmul.f32 %v18632_v19, %v10908_v59  ;;  %v15037_v59 = vld [vmem:[%s23003_s15 + $0x38] sm:$0xff] }
0x4938   :  { %v10941_v17 = vmul.f32 %v15005_v55, %v10932_v60 }
0x4939   :  { %v18634_v25 = vpop.eup %18633 }
0x493a   :  { %v10950_v9 = vadd.f32 %v15006_v33, %v10941_v17  ;;  %v10933_v41 = vmul.f32 %v18634_v25, %v10909_v50 }
0x493c   :  { %17827 = vmatmul.mubr.msk.f32.vlgmr.msra.gmra.mxu1 %vm79_vm0, %v10950_v9  ;;  %v10942_v47 = vmul.f32 %v15005_v55, %v10933_v41 }
0x493d   :  { %v18636_v44 = vpop.eup %18635  ;;  %17829 = vmatprep.mubr.msk.f32.mxu1 %vm18743_vm2, %v18742_v21  ;;  %17877 = vmatpush3.msra.mxu1 %v15041_v27 }
0x493e   :  { %v10934_v24 = vmul.f32 %v18636_v44, %v10910_v57  ;;  %v10951_v7 = vadd.f32 %v15006_v33, %v10942_v47  ;;  %17878 = vmatprep.subr.mxu1 %v18742_v21 }
0x493f   :  { %17879 = vmatpush3.msra.mxu1 %v15040_v29 }
0x4940   :  { %17830 = vmatmul.mubr.msk.f32.gmra.mxu1 %vm79_vm0, %v10951_v7  ;;  %v10943_v62 = vmul.f32 %v15005_v55, %v10934_v24  ;;  %17880 = vmatprep.subr.mxu1 %v18742_v21 }
0x4941   :  { %17832 = vmatprep.mubr.msk.f32.mxu1 %vm18743_vm2, %v18742_v21  ;;  %17881 = vmatpush3.msra.mxu1 %v15039_v4 }
0x4942   :  { %v10952_v42 = vadd.f32 %v15006_v33, %v10943_v62  ;;  %17882 = vmatprep.subr.mxu1 %v18742_v21 }
0x4943   :  { %17883 = vmatpush3.msra.mxu1 %v15038_v34 }
0x4944   :  { %17833 = vmatmul.mubr.msk.f32.gmra.mxu1 %vm79_vm0, %v10952_v42  ;;  %17893 = vmatprep.subr.mxu1 %v18742_v21 }
0x4945   :  { %17884 = vmatprep.mubr.msk.f32.mxu1 %vm18743_vm2, %v18742_v21 }
0x4948   :  { %17885 = vmatmul.mubr.msk.f32.vlgmr.msra.gmra.mxu1 %vm79_vm0, %v19676_v11  ;;  %v15030_v11 = vld [vmem:[%s22999_s13 + $0x1f0] sm:$0xff] }
0x4949   :  { %17887 = vmatprep.mubr.msk.f32.mxu1 %vm18743_vm2, %v18742_v21  ;;  %17838 = vmatpush3.msra.mxu0 %v15030_v11 }
0x494a   :  { %17839 = vmatprep.subr.mxu0 %v18742_v21  ;;  %17894 = vmatpush3.msra.mxu1 %v15037_v59 }
0x494b   :  { %17895 = vmatprep.subr.mxu1 %v18742_v21 }
0x494c   :  { %17888 = vmatmul.mubr.msk.f32.gmra.mxu1 %vm79_vm0, %v19681_v15  ;;  %v15029_v15 = vld [vmem:[%s22999_s13 + $0x1e8] sm:$0xff] }
0x494d   :  { %17890 = vmatprep.mubr.msk.f32.mxu1 %vm18743_vm2, %v18742_v21  ;;  %17840 = vmatpush3.msra.mxu0 %v15029_v15 }
0x494e   :  { %17841 = vmatprep.subr.mxu0 %v18742_v21  ;;  %17896 = vmatpush3.msra.mxu1 %v15036_v12 }
0x494f   :  { %17897 = vmatprep.subr.mxu1 %v18742_v21 }
0x4950   :  { %17891 = vmatmul.mubr.msk.f32.gmra.mxu1 %vm79_vm0, %v19686_v18  ;;  %v15028_v18 = vld [vmem:[%s22999_s13 + $0x1e0] sm:$0xff] }
0x4951   :  { %17901 = vmatprep.mubr.msk.f32.mxu1 %vm18743_vm2, %v18742_v21  ;;  %17842 = vmatpush3.msra.mxu0 %v15028_v18 }
0x4952   :  { %17843 = vmatprep.subr.mxu0 %v18742_v21 }
0x4953   :  { %17844 = vmatpush3.msra.mxu0 %v15027_v8 }
0x4954   :  { %17845 = vmatprep.subr.mxu0 %v18742_v21 }
0x4955   :  { %17846 = vmatpush3.msra.mxu0 %v15026_v39 }
0x4956   :  { %17847 = vmatprep.subr.mxu0 %v18742_v21 }
0x4957   :  { %17848 = vmatpush3.msra.mxu0 %v15025_v40 }
0x4958   :  { %17849 = vmatprep.subr.mxu0 %v18742_v21 }
0x4959   :  { %17850 = vmatpush3.msra.mxu0 %v15024_v53 }
0x495a   :  { %17851 = vmatprep.subr.mxu0 %v18742_v21 }
0x495b   :  { %17852 = vmatpush3.msra.mxu0 %v15023_v54 }
0x495c   :  { %17853 = vmatprep.subr.mxu0 %v18742_v21 }
0x495d   :  { %17854 = vmatpush3.msra.mxu0 %v15022_v10 }
0x495e   :  { %17855 = vmatprep.subr.mxu0 %v18742_v21 }
0x495f   :  { %17856 = vmatpush3.msra.mxu0 %v15021_v61 }
0x4960   :  { %17857 = vmatprep.subr.mxu0 %v18742_v21 }
0x4961   :  { %17858 = vmatpush3.msra.mxu0 %v15020_v49 }
0x4962   :  { %17859 = vmatprep.subr.mxu0 %v18742_v21 }
0x4963   :  { %17860 = vmatpush3.msra.mxu0 %v15019_v16 }
0x4964   :  { %17861 = vmatprep.subr.mxu0 %v18742_v21 }
0x4965   :  { %17862 = vmatpush3.msra.mxu0 %v15018_v36 }
0x4966   :  { %17863 = vmatprep.subr.mxu0 %v18742_v21 }
0x4967   :  { %17864 = vmatpush3.msra.mxu0 %v15017_v45 }
0x4968   :  { %17865 = vmatprep.subr.mxu0 %v18742_v21 }
0x4969   :  { %17866 = vmatpush3.msra.mxu0 %v15016_v14 }
0x496a   :  { %17910 = vmatprep.subr.mxu0 %v18742_v21 }
0x49fc   :  { %v11041_v3 = vpop.f32.mrf.mxu1 }
0x49fd   :  { %v22095_v50 = vadd.f32 %v15012_v31, %v11041_v3 }
0x49fe   :  { %v17828_v52 = vpop.f32.mrf.mxu1 }
0x49ff   :  { %v22098_v5 = vmul.f32 0.70710677, %v22095_v50 }
0x4a00   :  { %v11046_v38 = vpop.f32.mrf.mxu1 }
0x4a01   :  { %v11061_v46 = vand.u32 2147483647, %v22098_v5  ;;  %v22101_v57 = vadd.f32 %v15012_v31, %v11046_v38  ;;  %vm11121_vm7 = vcmp.ge.f32.partialorder %v22098_v5, 0.0 }
0x4a02   :  { %v17831_v20 = vpop.f32.mrf.mxu1 }
0x4a03   :  { %v11064_v37 = vmul.f32 0.3275911, %v11061_v46  ;;  %v22104_v0 = vmul.f32 0.70710677, %v22101_v57  ;;  %v11103_v19 = vsub.f32 0.0, %v11061_v46 }
0x4a04   :  { %v11051_v48 = vpop.f32.mrf.mxu1 }
0x4a05   :  { %v11067_v1 = vadd.f32 1.0, %v11064_v37  ;;  %v11062_v51 = vand.u32 2147483647, %v22104_v0  ;;  %v22107_v13 = vadd.f32 %v15012_v31, %v11051_v48  ;;  %v11106_v17 = vmul.f32 %v11103_v19, %v11061_v46 }
0x4a06   :  { %v17834_v43 = vpop.f32.mrf.mxu1  ;;  %vm11122_vm8 = vcmp.ge.f32.partialorder %v22104_v0, 0.0 }
0x4a07   :  { %18637 = vrcp.f32 %v11067_v1  ;;  %v11065_v22 = vmul.f32 0.3275911, %v11062_v51  ;;  %v22110_v58 = vmul.f32 0.70710677, %v22107_v13  ;;  %v11104_v25 = vsub.f32 0.0, %v11062_v51 }
0x4a08   :  { %v22112_v23 = vpop.f32.mrf.mxu1  ;;  %v11109_v47 = vmul.f32 1.442695, %v11106_v17 }
0x4a09   :  { %v11068_v6 = vadd.f32 1.0, %v11065_v22  ;;  %v11063_v28 = vand.u32 2147483647, %v22110_v58  ;;  %v11107_v29 = vmul.f32 %v11104_v25, %v11062_v51  ;;  %vm11123_vm9 = vcmp.ge.f32.partialorder %v22110_v58, 0.0  ;;  %v15034_v58 = vld [vmem:[%s23003_s15 + $0x20] sm:$0xff] }
0x4a0a   :  { %v17886_v26 = vpop.f32.mrf.mxu1 }
0x4a0b   :  { %18639 = vrcp.f32 %v11068_v6  ;;  %v11066_v30 = vmul.f32 0.3275911, %v11063_v28  ;;  %v11105_v44 = vsub.f32 0.0, %v11063_v28  ;;  %v11111_v34 = vmul.f32 1.442695, %v11107_v29 }
0x4a0c   :  { %v22115_v63 = vpop.f32.mrf.mxu1  ;;  %v11055_v26 = vmul.f32 0.5, %v22095_v50 }
0x4a0d   :  { %v11069_v55 = vadd.f32 1.0, %v11066_v30  ;;  %v11108_v42 = vmul.f32 %v11105_v44, %v11063_v28  ;;  %v11057_v44 = vmul.f32 0.5, %v22107_v13 }
0x4a0e   :  { %v17889_v60 = vpop.f32.mrf.mxu1 }
0x4a0f   :  { %18641 = vrcp.f32 %v11069_v55  ;;  %v11113_v40 = vmul.f32 1.442695, %v11108_v42 }
0x4a10   :  { %v22117_v33 = vpop.f32.mrf.mxu1  ;;  %18643 = vpow2.f32 %v11109_v47 }
0x4a11   :  { %18645 = vpow2.f32 %v11111_v34 }
0x4a12   :  { %v17892_v9 = vpop.f32.mrf.mxu1  ;;  %18647 = vpow2.f32 %v11113_v40  ;;  %v15049_v40 = vld [vmem:[%s23004_s17 + $0x1] ss:$0 sm:$0xff] }
0x4a14   :  { %v18638_v41 = vpop.eup %18637 }
0x4a15   :  { %v11076_v27 = vmul.f32 1.0614054, %v18638_v41 }
0x4a17   :  { %v11079_v24 = vadd.f32 -1.4531521, %v11076_v27 }
0x4a18   :  { %v18640_v7 = vpop.eup %18639 }
0x4a19   :  { %v11082_v4 = vmul.f32 %v18638_v41, %v11079_v24  ;;  %v11077_v62 = vmul.f32 1.0614054, %v18640_v7 }
0x4a1b   :  { %v11085_v2 = vadd.f32 1.4214138, %v11082_v4  ;;  %v11080_v11 = vadd.f32 -1.4531521, %v11077_v62 }
0x4a1c   :  { %v18642_v15 = vpop.eup %18641 }
0x4a1d   :  { %v11088_v18 = vmul.f32 %v18638_v41, %v11085_v2  ;;  %v11083_v8 = vmul.f32 %v18640_v7, %v11080_v11  ;;  %v11078_v39 = vmul.f32 1.0614054, %v18642_v15  ;;  %v18644_v31 = vpop.eup %18643 }
0x4a1e   :  { %v18646_v48 = vpop.eup %18645 }
0x4a1f   :  { %v11091_v53 = vadd.f32 -0.28449672, %v11088_v18  ;;  %v11086_v54 = vadd.f32 1.4214138, %v11083_v8  ;;  %v11081_v10 = vadd.f32 -1.4531521, %v11078_v39  ;;  %v18648_v55 = vpop.eup %18647 }
0x4a21   :  { %v11094_v61 = vmul.f32 %v18638_v41, %v11091_v53  ;;  %v11089_v49 = vmul.f32 %v18640_v7, %v11086_v54  ;;  %v11084_v16 = vmul.f32 %v18642_v15, %v11081_v10 }
0x4a23   :  { %v11097_v36 = vadd.f32 0.2548296, %v11094_v61  ;;  %v11092_v45 = vadd.f32 -0.28449672, %v11089_v49  ;;  %v11087_v14 = vadd.f32 1.4214138, %v11084_v16 }
0x4a25   :  { %v11100_v59 = vmul.f32 %v18638_v41, %v11097_v36  ;;  %v11095_v12 = vmul.f32 %v18640_v7, %v11092_v45  ;;  %v11090_v3 = vmul.f32 %v18642_v15, %v11087_v14  ;;  %v11056_v41 = vmul.f32 0.5, %v22101_v57  ;;  %v15035_v57 = vld [vmem:[%s23003_s15 + $0x28] sm:$0xff] }
0x4a26   :  { %17898 = vmatpush3.msra.mxu1 %v15035_v57 }
0x4a27   :  { %v11115_v52 = vmul.f32 %v18644_v31, %v11100_v59  ;;  %v11098_v38 = vadd.f32 0.2548296, %v11095_v12  ;;  %v11093_v46 = vadd.f32 -0.28449672, %v11090_v3  ;;  %17899 = vmatprep.subr.mxu1 %v18742_v21 }
0x4a28   :  { %17900 = vmatpush3.msra.mxu1 %v15034_v58  ;;  %v15052_v58 = vld [vmem:[%s23027_s2 + $0x4] ss:$0 sm:$0xff] }
0x4a29   :  { %v11118_v20 = vsub.f32 1.0, %v11115_v52  ;;  %v11101_v37 = vmul.f32 %v18640_v7, %v11098_v38  ;;  %v11096_v1 = vmul.f32 %v18642_v15, %v11093_v46  ;;  %17927 = vmatprep.subr.mxu1 %v18742_v21  ;;  %v15033_v7 = vld [vmem:[%s23001_s14 + $0x3] ss:$0 sm:$0xff] }
0x4a2b   :  { %v11124_v51 = vsub.f32 0.0, %v11118_v20  ;;  %v11116_v43 = vmul.f32 %v18646_v48, %v11101_v37  ;;  %v11099_v22 = vadd.f32 0.2548296, %v11096_v1 }
0x4a2d   :  { %v11127_v6 = vsel %vm11121_vm7, %v11118_v20, %v11124_v51  ;;  %v11119_v28 = vsub.f32 1.0, %v11116_v43  ;;  %v11102_v19 = vmul.f32 %v18642_v15, %v11099_v22 }
0x4a2e   :  { %v11130_v30 = vadd.f32 1.0, %v11127_v6 }
0x4a2f   :  { %v11125_v60 = vsub.f32 0.0, %v11119_v28  ;;  %v11117_v25 = vmul.f32 %v18648_v55, %v11102_v19  ;;  %v15063_v19 = vld [vmem:[%s23026_s26 + $0x210] sm:$0xff] }
0x4a30   :  { %v11133_v17 = vmul.f32 %v11130_v30, %v11055_v26  ;;  %v15064_v26 = vld [vmem:[%s23026_s26 + $0x218] sm:$0xff]  ;;  %v15056_v55 = vld [vmem:[%s23025_s24 + $0x210] sm:$0xff] }
0x4a31   :  { %v11128_v9 = vsel %vm11122_vm8, %v11119_v28, %v11125_v60  ;;  %v11120_v47 = vsub.f32 1.0, %v11117_v25  ;;  %v15057_v30 = vld [vmem:[%s23025_s24 + $0x218] sm:$0xff]  ;;  %v15062_v60 = vld [vmem:[%s23026_s26 + $0x208] sm:$0xff]  ;;  %v15061_v25 = vld [vmem:[%s23026_s26 + $0x200] sm:$0xff] }
0x4a32   :  { %v11131_v27 = vadd.f32 1.0, %v11128_v9  ;;  %17868 = vmatmul.mubr.f32.vlgmr.msra.gmra.mxu0 %v11133_v17  ;;  %v15055_v17 = vld [vmem:[%s23025_s24 + $0x208] sm:$0xff]  ;;  %v15054_v9 = vld [vmem:[%s23025_s24 + $0x200] sm:$0xff] }
0x4a33   :  { %17870 = vmatprep.mubr.msk.f32.mxu0 %vm18743_vm2, %v18742_v21  ;;  %v11126_v29 = vsub.f32 0.0, %v11120_v47  ;;  %17911 = vmatpush3.msra.mxu0 %v15057_v30 }
0x4a34   :  { %v11134_v5 = vmul.f32 %v11131_v27, %v11056_v41  ;;  %17912 = vmatprep.subr.mxu0 %v18742_v21 }
0x4a35   :  { %v11129_v50 = vsel %vm11123_vm9, %v11120_v47, %v11126_v29  ;;  %17913 = vmatpush3.msra.mxu0 %v15056_v55 }
0x4a36   :  { %17871 = vmatmul.mubr.f32.gmra.mxu0 %v11134_v5  ;;  %v11132_v24 = vadd.f32 1.0, %v11129_v50  ;;  %17914 = vmatprep.subr.mxu0 %v18742_v21 }
0x4a37   :  { %17873 = vmatprep.mubr.msk.f32.mxu0 %vm18743_vm2, %v18742_v21  ;;  %17915 = vmatpush3.msra.mxu0 %v15055_v17 }
0x4a38   :  { %v11135_v0 = vmul.f32 %v11132_v24, %v11057_v44  ;;  %17916 = vmatprep.subr.mxu0 %v18742_v21 }
0x4a39   :  { %17917 = vmatpush3.msra.mxu0 %v15054_v9 }
0x4a3a   :  { %17874 = vmatmul.mubr.f32.gmra.mxu0 %v11135_v0  ;;  %17944 = vmatprep.subr.mxu0 %v18742_v21 }
0x4a3b   :  { %17918 = vmatprep.mubr.msk.f32.mxu0 %vm18743_vm2, %v18742_v21 }
0x4af2   :  { %v11219_v13 = vpop.f32.mrf.mxu0 }
0x4af3   :  { %v11233_v4 = vadd.f32 %v11219_v13, %v21939_v35 }
0x4af4   :  { %v17869_v62 = vpop.f32.mrf.mxu0 }
0x4af5   :  { %v11244_v34 = vadd.f32 %v15033_v7, %v11233_v4 }
0x4af6   :  { %v11224_v42 = vpop.f32.mrf.mxu0 }
0x4af7   :  { %v11234_v2 = vadd.f32 %v11224_v42, %v21945_v32  ;;  %17902 = vmatmul.mubr.msk.f32.vlgmr.msra.gmra.mxu1 %vm79_vm0, %v11244_v34 }
0x4af8   :  { %v17872_v11 = vpop.f32.mrf.mxu0  ;;  %17904 = vmatprep.mubr.msk.f32.mxu1 %vm18743_vm2, %v18742_v21  ;;  %17928 = vmatpush3.msra.mxu1 %v15064_v26  ;;  %v15100_v26 = vld [vmem:[%s23029_s4 + $0x220] sm:$0xff] }
0x4af9   :  { %v11245_v15 = vadd.f32 %v15033_v7, %v11234_v2  ;;  %17929 = vmatprep.subr.mxu1 %v18742_v21  ;;  %v15071_v2 = vld [vmem:[%s23029_s4 + $0x218] sm:$0xff] }
0x4afa   :  { %v11229_v18 = vpop.f32.mrf.mxu0  ;;  %17930 = vmatpush3.msra.mxu1 %v15063_v19 }
0x4afb   :  { %17905 = vmatmul.mubr.msk.f32.gmra.mxu1 %vm79_vm0, %v11245_v15  ;;  %v11235_v8 = vadd.f32 %v11229_v18, %v21951_v56  ;;  %17931 = vmatprep.subr.mxu1 %v18742_v21 }
0x4afc   :  { %17907 = vmatprep.mubr.msk.f32.mxu1 %vm18743_vm2, %v18742_v21  ;;  %v17875_v35 = vpop.f32.mrf.mxu0  ;;  %17932 = vmatpush3.msra.mxu1 %v15062_v60  ;;  %v22352_v60 = vld [vmem:[%s23030_s30] sm:$0xff] }
0x4afd   :  { %v11246_v39 = vadd.f32 %v15033_v7, %v11235_v8  ;;  %17933 = vmatprep.subr.mxu1 %v18742_v21  ;;  %v15053_v7 = vld [vmem:[%s23028_s3 + $0x4] ss:$0 sm:$0xff]  ;;  %v15070_v35 = vld [vmem:[%s23029_s4 + $0x210] sm:$0xff] }
0x4afe   :  { %17934 = vmatpush3.msra.mxu1 %v15061_v25 }
0x4aff   :  { %17908 = vmatmul.mubr.msk.f32.gmra.mxu1 %vm79_vm0, %v11246_v39  ;;  %17961 = vmatprep.subr.mxu1 %v18742_v21 }
0x4b00   :  { %17935 = vmatprep.mubr.msk.f32.mxu1 %vm18743_vm2, %v18742_v21 }
0x4bb7   :  { %v11421_v32 = vpop.f32.mrf.mxu1 }
0x4bb8   :  { %v11422_v53 = vadd.f32 %v11421_v32, %v22112_v23  ;;  %v15069_v32 = vld [vmem:[%s23029_s4 + $0x208] sm:$0xff] }
0x4bb9   :  { %v17903_v54 = vpop.f32.mrf.mxu1 }
0x4bba   :  { %v22158_v10 = vadd.f32 %v15049_v40, %v11422_v53  ;;  %v15068_v53 = vld [vmem:[%s23029_s4 + $0x200] sm:$0xff] }
0x4bbb   :  { %v11426_v56 = vpop.f32.mrf.mxu1 }
0x4bbc   :  { %v11427_v61 = vadd.f32 %v11426_v56, %v22115_v63  ;;  %v11450_v49 = vsel %vm79_vm0, %v22158_v10, 0.0 }
0x4bbd   :  { %11451 = vadd.xlane.f32.xlu0 %v11450_v49  ;;  %v17906_v16 = vpop.f32.mrf.mxu1 }
0x4bbe   :  { %v22163_v36 = vadd.f32 %v15049_v40, %v11427_v61 }
0x4bbf   :  { %v11431_v45 = vpop.f32.mrf.mxu1 }
0x4bc0   :  { %v11453_v14 = vsel %vm79_vm0, %v22163_v36, 0.0  ;;  %v11432_v59 = vadd.f32 %v11431_v45, %v22117_v33 }
0x4bc1   :  { %11454 = vadd.xlane.f32.xlu1 %v11453_v14  ;;  %v17909_v23 = vpop.f32.mrf.mxu1 }
0x4bc2   :  { %v22168_v12 = vadd.f32 %v15049_v40, %v11432_v59 }
0x4bc4   :  { %v11456_v63 = vsel %vm86_vm1, %v22168_v12, 0.0 }
0x4bc5   :  { %11457 = vadd.xlane.f32.xlu0 %v11456_v63 }
0x4c46   :  { %v11452_v31 = vpop.xlane.xlu0 %11451 }
0x4c47   :  { %v11459_v3 = vmul.f32 0.03125, %v11452_v31 }
0x4c49   :  { %v11462_v52 = vsub.f32 %v22158_v10, %v11459_v3 }
0x4c4a   :  { %v11455_v38 = vpop.xlane.xlu1 %11454 }
0x4c4b   :  { %v11460_v46 = vmul.f32 0.03125, %v11455_v38  ;;  %v11465_v20 = vmul.f32 %v11462_v52, %v11462_v52 }
0x4c4d   :  { %v11463_v37 = vsub.f32 %v22163_v36, %v11460_v46  ;;  %v11468_v48 = vsel %vm79_vm0, %v11465_v20, 0.0 }
0x4c4e   :  { %11469 = vadd.xlane.f32.xlu1 %v11468_v48  ;;  %v11458_v33 = vpop.xlane.xlu0 %11457 }
0x4c4f   :  { %v11466_v1 = vmul.f32 %v11463_v37, %v11463_v37  ;;  %v11461_v51 = vmul.f32 0.03125, %v11458_v33 }
0x4c51   :  { %v11471_v43 = vsel %vm79_vm0, %v11466_v1, 0.0  ;;  %v11464_v22 = vsub.f32 %v22168_v12, %v11461_v51  ;;  %v15088_v1 = vld [vmem:[%s23025_s24 + $0x230] sm:$0xff]  ;;  %v15087_v51 = vld [vmem:[%s23025_s24 + $0x228] sm:$0xff] }
0x4c52   :  { %11472 = vadd.xlane.f32.xlu0 %v11471_v43  ;;  %v15086_v43 = vld [vmem:[%s23025_s24 + $0x220] sm:$0xff] }
0x4c53   :  { %v11467_v6 = vmul.f32 %v11464_v22, %v11464_v22 }
0x4c55   :  { %v11474_v28 = vsel %vm86_vm1, %v11467_v6, 0.0  ;;  %v15102_v6 = vld [vmem:[%s23029_s4 + $0x230] sm:$0xff] }
0x4c56   :  { %11475 = vadd.xlane.f32.xlu1 %v11474_v28  ;;  %v15101_v28 = vld [vmem:[%s23029_s4 + $0x228] sm:$0xff] }
0x4cd7   :  { %v11470_v41 = vpop.xlane.xlu1 %11469 }
0x4cd8   :  { %v11477_v27 = vmul.f32 0.03125, %v11470_v41 }
0x4cda   :  { %v11480_v47 = vadd.f32 1e-05, %v11477_v27 }
0x4cdb   :  { %v11473_v5 = vpop.xlane.xlu0 %11472 }
0x4cdc   :  { %18649 = vrsqrt.f32 %v11480_v47  ;;  %v11478_v29 = vmul.f32 0.03125, %v11473_v5  ;;  %v22359_v47 = vld [vmem:[%s23030_s30 + $0x8] sm:$0xff] }
0x4cde   :  { %v11481_v50 = vadd.f32 1e-05, %v11478_v29 }
0x4cdf   :  { %v11476_v44 = vpop.xlane.xlu1 %11475 }
0x4ce0   :  { %18651 = vrsqrt.f32 %v11481_v50  ;;  %v11479_v24 = vmul.f32 0.03125, %v11476_v44 }
0x4ce2   :  { %v11482_v0 = vadd.f32 1e-05, %v11479_v24 }
0x4ce4   :  { %18653 = vrsqrt.f32 %v11482_v0  ;;  %v22366_v0 = vld [vmem:[%s23030_s30 + $0x10] sm:$0x3f] }
0x4ce9   :  { %v18650_v57 = vpop.eup %18649 }
0x4cea   :  { %v11486_v13 = vmul.f32 %v18650_v57, %v11462_v52 }
0x4cec   :  { %v11495_v4 = vmul.f32 %v15052_v58, %v11486_v13 }
0x4ced   :  { %v18652_v62 = vpop.eup %18651 }
0x4cee   :  { %v22216_v34 = vadd.f32 %v15053_v7, %v11495_v4  ;;  %v11487_v42 = vmul.f32 %v18652_v62, %v11463_v37  ;;  %v15089_v37 = vld [vmem:[%s23025_s24 + $0x238] sm:$0xff] }
0x4cf0   :  { %v11496_v11 = vmul.f32 %v15052_v58, %v11487_v42  ;;  %17919 = vmatmul.mubr.msk.f32.vlgmr.msra.gmra.mxu0 %vm79_vm0, %v22216_v34  ;;  %17936 = vmatmul.mubr.msk.f32.vlgmr.msra.gmra.mxu1 %vm79_vm0, %v22216_v34 }
0x4cf1   :  { %17921 = vmatprep.mubr.msk.f32.mxu0 %vm18743_vm2, %v18742_v21  ;;  %17938 = vmatprep.mubr.msk.f32.mxu1 %vm18743_vm2, %v18742_v21  ;;  %v18654_v15 = vpop.eup %18653 }
0x4cf2   :  { %v22229_v18 = vadd.f32 %v15053_v7, %v11496_v11  ;;  %17945 = vmatpush3.msra.mxu0 %v15071_v2  ;;  %v11488_v8 = vmul.f32 %v18654_v15, %v11464_v22  ;;  %v15103_v22 = vld [vmem:[%s23029_s4 + $0x238] sm:$0xff] }
0x4cf3   :  { %17946 = vmatprep.subr.mxu0 %v18742_v21 }
0x4cf4   :  { %17922 = vmatmul.mubr.msk.f32.gmra.mxu0 %vm79_vm0, %v22229_v18  ;;  %17939 = vmatmul.mubr.msk.f32.gmra.mxu1 %vm79_vm0, %v22229_v18  ;;  %v11497_v39 = vmul.f32 %v15052_v58, %v11488_v8 }
0x4cf5   :  { %17924 = vmatprep.mubr.msk.f32.mxu0 %vm18743_vm2, %v18742_v21  ;;  %17941 = vmatprep.mubr.msk.f32.mxu1 %vm18743_vm2, %v18742_v21 }
0x4cf6   :  { %17947 = vmatpush3.msra.mxu0 %v15070_v35  ;;  %v22246_v40 = vadd.f32 %v15053_v7, %v11497_v39 }
0x4cf7   :  { %17948 = vmatprep.subr.mxu0 %v18742_v21 }
0x4cf8   :  { %17949 = vmatpush3.msra.mxu0 %v15069_v32  ;;  %17942 = vmatmul.mubr.msk.f32.gmra.mxu1 %vm79_vm0, %v22246_v40 }
0x4cf9   :  { %17925 = vmatmul.mubr.msk.f32.gmra.mxu0 %vm79_vm0, %v22246_v40  ;;  %17950 = vmatprep.subr.mxu0 %v18742_v21 }
0x4cfa   :  { %17952 = vmatprep.mubr.msk.f32.mxu0 %vm18743_vm2, %v18742_v21  ;;  %17951 = vmatpush3.msra.mxu0 %v15068_v53 }
0x4cfb   :  { %17967 = vmatprep.mubr.msk.f32.mxu1 %vm18743_vm2, %v18742_v21  ;;  %17976 = vmatprep.subr.mxu0 %v18742_v21 }
0x4cfd   :  { %17953 = vmatmul.mubr.msk.f32.vlgmr.msra.gmra.mxu0 %vm79_vm0, %v22216_v34 }
0x4cfe   :  { %17955 = vmatprep.mubr.msk.f32.mxu0 %vm18743_vm2, %v18742_v21 }
0x4d01   :  { %17956 = vmatmul.mubr.msk.f32.gmra.mxu0 %vm79_vm0, %v22229_v18 }
0x4d02   :  { %17958 = vmatprep.mubr.msk.f32.mxu0 %vm18743_vm2, %v18742_v21 }
0x4d05   :  { %17959 = vmatmul.mubr.msk.f32.gmra.mxu0 %vm79_vm0, %v22246_v40 }
0x4d06   :  { %17982 = vmatprep.mubr.msk.f32.mxu0 %vm18743_vm2, %v18742_v21 }
0x4db0   :  { %v11587_v54 = vpop.f32.mrf.mxu0  ;;  %v11672_v56 = vpop.f32.mrf.mxu1 }
0x4db2   :  { %v17920_v61 = vpop.f32.mrf.mxu0  ;;  %v17937_v49 = vpop.f32.mrf.mxu1 }
0x4db4   :  { %v11592_v16 = vpop.f32.mrf.mxu0  ;;  %v11677_v45 = vpop.f32.mrf.mxu1 }
0x4db6   :  { %v17923_v14 = vpop.f32.mrf.mxu0  ;;  %v17940_v59 = vpop.f32.mrf.mxu1 }
0x4db8   :  { %v11682_v63 = vpop.f32.mrf.mxu1 }
0x4db9   :  { %v11597_v23 = vpop.f32.mrf.mxu0  ;;  %17962 = vmatpush3.xpose.msk.msra.mxu1 %vm400_vm3, %v11682_v63 }
0x4dba   :  { %v17943_v3 = vpop.f32.mrf.mxu1  ;;  %17963 = vmatprep.subr.mxu1 %v18742_v21 }
0x4dbb   :  { %v17926_v31 = vpop.f32.mrf.mxu0 }
0x4dbd   :  { %v11757_v52 = vpop.f32.mrf.mxu0  ;;  %17964 = vmatpush3.xpose.msk.msra.mxu1 %vm400_vm3, %v11677_v45 }
0x4dbe   :  { %17965 = vmatprep.subr.mxu1 %v18742_v21 }
0x4dbf   :  { %v17954_v38 = vpop.f32.mrf.mxu0 }
0x4dc1   :  { %v11762_v46 = vpop.f32.mrf.mxu0  ;;  %17966 = vmatpush3.xpose.msk.msra.mxu1 %vm400_vm3, %v11672_v56 }
0x4dc2   :  { %17991 = vmatprep.subr.mxu1 %v18742_v21 }
0x4dc3   :  { %v17957_v20 = vpop.f32.mrf.mxu0 }
0x4dc4   :  { %17968 = vmatmul.mubr.msk.f32.vlgmr.msra.gmra.mxu1 %vm400_vm3, %v11587_v54 }
0x4dc5   :  { %v11767_v48 = vpop.f32.mrf.mxu0  ;;  %17970 = vmatprep.mubr.msk.f32.mxu1 %vm18743_vm2, %v18742_v21  ;;  %17992 = vmatpush3.msra.mxu1 %v15089_v37 }
0x4dc6   :  { %17977 = vmatpush3.msk.msra.mxu0 %vm549_vm4, %v11767_v48  ;;  %17993 = vmatprep.subr.mxu1 %v18742_v21 }
0x4dc7   :  { %v17960_v33 = vpop.f32.mrf.mxu0  ;;  %17978 = vmatprep.subr.mxu0 %v18742_v21  ;;  %17994 = vmatpush3.msra.mxu1 %v15088_v1  ;;  %v15096_v1 = vld [vmem:[%s23026_s26 + $0x238] sm:$0xff] }
0x4dc8   :  { %17979 = vmatpush3.msra.mxu0 %v11762_v46  ;;  %17971 = vmatmul.mubr.msk.f32.gmra.mxu1 %vm400_vm3, %v11592_v16 }
0x4dc9   :  { %17980 = vmatprep.subr.mxu0 %v18742_v21  ;;  %17973 = vmatprep.mubr.msk.f32.mxu1 %vm18743_vm2, %v18742_v21 }
0x4dca   :  { %17981 = vmatpush3.msra.mxu0 %v11757_v52  ;;  %17995 = vmatprep.subr.mxu1 %v18742_v21 }
0x4dcb   :  { %18008 = vmatprep.subr.mxu0 %v18742_v21  ;;  %17996 = vmatpush3.msra.mxu1 %v15087_v51  ;;  %v15095_v51 = vld [vmem:[%s23026_s26 + $0x230] sm:$0xff] }
0x4dcc   :  { %17974 = vmatmul.mubr.msk.f32.gmra.mxu1 %vm400_vm3, %v11597_v23  ;;  %17997 = vmatprep.subr.mxu1 %v18742_v21 }
0x4dcd   :  { %17999 = vmatprep.mubr.msk.f32.mxu1 %vm18743_vm2, %v18742_v21  ;;  %17998 = vmatpush3.msra.mxu1 %v15086_v43 }
0x4dce   :  { %18025 = vmatprep.subr.mxu1 %v18742_v21 }
0x4dd0   :  { %18000 = vmatmul.mubr.msk.f32.vlgmr.msra.gmra.mxu1 %vm79_vm0, %v22216_v34 }
0x4dd1   :  { %18002 = vmatprep.mubr.msk.f32.mxu1 %vm18743_vm2, %v18742_v21  ;;  %18026 = vmatpush3.msra.mxu1 %v15103_v22 }
0x4dd2   :  { %18027 = vmatprep.subr.mxu1 %v18742_v21 }
0x4dd3   :  { %18028 = vmatpush3.msra.mxu1 %v15102_v6  ;;  %v15094_v6 = vld [vmem:[%s23026_s26 + $0x228] sm:$0xff] }
0x4dd4   :  { %18003 = vmatmul.mubr.msk.f32.gmra.mxu1 %vm79_vm0, %v22229_v18  ;;  %18029 = vmatprep.subr.mxu1 %v18742_v21 }
0x4dd5   :  { %18005 = vmatprep.mubr.msk.f32.mxu1 %vm18743_vm2, %v18742_v21  ;;  %18030 = vmatpush3.msra.mxu1 %v15101_v28  ;;  %v15093_v28 = vld [vmem:[%s23026_s26 + $0x220] sm:$0xff] }
0x4dd6   :  { %18031 = vmatprep.subr.mxu1 %v18742_v21 }
0x4dd7   :  { %18032 = vmatpush3.msra.mxu1 %v15100_v26 }
0x4dd8   :  { %18006 = vmatmul.mubr.msk.f32.gmra.mxu1 %vm79_vm0, %v22246_v40  ;;  %18057 = vmatprep.subr.mxu1 %v18742_v21 }
0x4dd9   :  { %18033 = vmatprep.mubr.msk.f32.mxu1 %vm18743_vm2, %v18742_v21 }
0x4ddc   :  { %18034 = vmatmul.mubr.msk.f32.vlgmr.msra.gmra.mxu1 %vm79_vm0, %v22216_v34 }
0x4ddd   :  { %18036 = vmatprep.mubr.msk.f32.mxu1 %vm18743_vm2, %v18742_v21 }
0x4de0   :  { %18037 = vmatmul.mubr.msk.f32.gmra.mxu1 %vm79_vm0, %v22229_v18 }
0x4de1   :  { %18039 = vmatprep.mubr.msk.f32.mxu1 %vm18743_vm2, %v18742_v21 }
0x4de4   :  { %18040 = vmatmul.mubr.msk.f32.gmra.mxu1 %vm79_vm0, %v22246_v40 }
0x4de5   :  { %18063 = vmatprep.mubr.msk.f32.mxu1 %vm18743_vm2, %v18742_v21 }
0x4e84   :  { %v11855_v30 = vpop.f32.mrf.mxu1 }
0x4e85   :  { %v11869_v19 = vmul.f32 0.35355338, %v11855_v30 }
0x4e86   :  { %v17969_v55 = vpop.f32.mrf.mxu1 }
0x4e87   :  { %v11872_v17 = vadd.f32 %v22352_v60, %v11869_v19 }
0x4e88   :  { %v11860_v25 = vpop.f32.mrf.mxu1 }
0x4e89   :  { %v11870_v9 = vmul.f32 0.35355338, %v11860_v25  ;;  %v11875_v41 = vsel %vm505_vm5, %v11872_v17, -inf }
0x4e8a   :  { %11876 = vmax.xlane.f32.xlu0 %v11875_v41  ;;  %v17972_v27 = vpop.f32.mrf.mxu1 }
0x4e8b   :  { %v11873_v5 = vadd.f32 %v22359_v47, %v11870_v9 }
0x4e8c   :  { %v11865_v29 = vpop.f32.mrf.mxu1 }
0x4e8d   :  { %v11871_v50 = vmul.f32 0.35355338, %v11865_v29  ;;  %v11878_v44 = vsel %vm505_vm5, %v11873_v5, -inf }
0x4e8e   :  { %11879 = vmax.xlane.f32.xlu1 %v11878_v44  ;;  %v17975_v24 = vpop.f32.mrf.mxu1 }
0x4e8f   :  { %v11874_v57 = vadd.f32 %v22366_v0, %v11871_v50 }
0x4e90   :  { %v22369_v58 = vpop.f32.mrf.mxu1 }
0x4e91   :  { %v11881_v13 = vsel %vm512_vm6, %v11874_v57, -inf }
0x4e92   :  { %11882 = vmax.xlane.f32.xlu0 %v11881_v13  ;;  %v18001_v7 = vpop.f32.mrf.mxu1 }
0x4e94   :  { %v22372_v4 = vpop.f32.mrf.mxu1 }
0x4e96   :  { %v18004_v62 = vpop.f32.mrf.mxu1 }
0x4e98   :  { %v22374_v42 = vpop.f32.mrf.mxu1 }
0x4e9a   :  { %v18007_v2 = vpop.f32.mrf.mxu1 }
0x4e9c   :  { %v12243_v11 = vpop.f32.mrf.mxu1 }
0x4e9e   :  { %v18035_v15 = vpop.f32.mrf.mxu1 }
0x4ea0   :  { %v12248_v8 = vpop.f32.mrf.mxu1 }
0x4ea2   :  { %v18038_v35 = vpop.f32.mrf.mxu1 }
0x4ea4   :  { %v12253_v39 = vpop.f32.mrf.mxu1 }
0x4ea5   :  { %18058 = vmatpush3.msk.msra.mxu1 %vm549_vm4, %v12253_v39 }
0x4ea6   :  { %v18041_v32 = vpop.f32.mrf.mxu1  ;;  %18059 = vmatprep.subr.mxu1 %v18742_v21 }
0x4ea7   :  { %18060 = vmatpush3.msra.mxu1 %v12248_v8 }
0x4ea8   :  { %18061 = vmatprep.subr.mxu1 %v18742_v21 }
0x4ea9   :  { %18062 = vmatpush3.msra.mxu1 %v12243_v11 }
0x4eaa   :  { %18083 = vmatprep.subr.mxu1 %v18742_v21 }
0x4f13   :  { %v11877_v53 = vpop.xlane.xlu0 %11876 }
0x4f14   :  { %v11884_v54 = vsub.f32 %v11872_v17, %v11877_v53 }
0x4f16   :  { %v11887_v56 = vmul.f32 1.442695, %v11884_v54 }
0x4f17   :  { %v11880_v61 = vpop.xlane.xlu1 %11879 }
0x4f18   :  { %18655 = vpow2.f32 %v11887_v56  ;;  %v11885_v49 = vsub.f32 %v11873_v5, %v11880_v61 }
0x4f1a   :  { %v11889_v16 = vmul.f32 1.442695, %v11885_v49 }
0x4f1b   :  { %v11883_v45 = vpop.xlane.xlu0 %11882 }
0x4f1c   :  { %18657 = vpow2.f32 %v11889_v16  ;;  %v11886_v14 = vsub.f32 %v11874_v57, %v11883_v45 }
0x4f1e   :  { %v11891_v59 = vmul.f32 1.442695, %v11886_v14 }
0x4f20   :  { %18659 = vpow2.f32 %v11891_v59 }
0x4f25   :  { %v18656_v23 = vpop.eup %18655 }
0x4f26   :  { %v11893_v63 = vsel %vm505_vm5, %v18656_v23, 0.0 }
0x4f27   :  { %11894 = vadd.xlane.f32.xlu1 %v11893_v63 }
0x4f29   :  { %v18658_v31 = vpop.eup %18657 }
0x4f2a   :  { %v11896_v3 = vsel %vm505_vm5, %v18658_v31, 0.0 }
0x4f2b   :  { %11897 = vadd.xlane.f32.xlu0 %v11896_v3 }
0x4f2d   :  { %v18660_v52 = vpop.eup %18659 }
0x4f2e   :  { %v11899_v38 = vsel %vm512_vm6, %v18660_v52, 0.0 }
0x4f2f   :  { %11900 = vadd.xlane.f32.xlu1 %v11899_v38 }
0x4fb0   :  { %v11895_v46 = vpop.xlane.xlu1 %11894 }
0x4fb1   :  { %18661 = vrcp.f32 %v11895_v46 }
0x4fb4   :  { %v11898_v20 = vpop.xlane.xlu0 %11897 }
0x4fb5   :  { %18663 = vrcp.f32 %v11898_v20  ;;  %v15117_v20 = vld [vmem:[%s22994_s7 + $0x88] sm:$0xff] }
0x4fb8   :  { %v11901_v37 = vpop.xlane.xlu1 %11900 }
0x4fb9   :  { %18665 = vrcp.f32 %v11901_v37 }
0x4fbe   :  { %v18662_v48 = vpop.eup %18661 }
0x4fbf   :  { %v11905_v33 = vmul.f32 %v18662_v48, %v18656_v23 }
0x4fc1   :  { %17983 = vmatmul.mubr.msk.f32.vlgmr.msra.gmra.mxu0 %vm505_vm5, %v11905_v33 }
0x4fc2   :  { %v18664_v43 = vpop.eup %18663  ;;  %18009 = vmatpush3.msra.mxu0 %v15096_v1  ;;  %17985 = vmatprep.mubr.msk.f32.mxu0 %vm18743_vm2, %v18742_v21 }
0x4fc3   :  { %18010 = vmatprep.subr.mxu0 %v18742_v21  ;;  %v11906_v22 = vmul.f32 %v18664_v43, %v18658_v31  ;;  %v15085_v43 = vld [vmem:[%s22994_s7 + $0x80] sm:$0xff] }
0x4fc4   :  { %18011 = vmatpush3.msra.mxu0 %v15095_v51 }
0x4fc5   :  { %17986 = vmatmul.mubr.msk.f32.gmra.mxu0 %vm505_vm5, %v11906_v22  ;;  %18012 = vmatprep.subr.mxu0 %v18742_v21 }
0x4fc6   :  { %v18666_v26 = vpop.eup %18665  ;;  %17988 = vmatprep.mubr.msk.f32.mxu0 %vm18743_vm2, %v18742_v21  ;;  %18013 = vmatpush3.msra.mxu0 %v15094_v6 }
0x4fc7   :  { %v11907_v30 = vmul.f32 %v18666_v26, %v18660_v52  ;;  %18014 = vmatprep.subr.mxu0 %v18742_v21 }
0x4fc8   :  { %18015 = vmatpush3.msra.mxu0 %v15093_v28 }
0x4fc9   :  { %17989 = vmatmul.mubr.msk.f32.gmra.mxu0 %vm505_vm5, %v11907_v30  ;;  %18042 = vmatprep.subr.mxu0 %v18742_v21  ;;  %v15134_v30 = vld [vmem:[%s23026_s26 + $0x258] sm:$0xff] }
0x4fca   :  { %18016 = vmatprep.mubr.msk.f32.mxu0 %vm18743_vm2, %v18742_v21 }
0x4fcd   :  { %18017 = vmatmul.mubr.msk.f32.vlgmr.msra.gmra.mxu0 %vm79_vm0, %v22216_v34 }
0x4fce   :  { %18019 = vmatprep.mubr.msk.f32.mxu0 %vm18743_vm2, %v18742_v21 }
0x4fd1   :  { %18020 = vmatmul.mubr.msk.f32.gmra.mxu0 %vm79_vm0, %v22229_v18 }
0x4fd2   :  { %18022 = vmatprep.mubr.msk.f32.mxu0 %vm18743_vm2, %v18742_v21 }
0x4fd5   :  { %18023 = vmatmul.mubr.msk.f32.gmra.mxu0 %vm79_vm0, %v22246_v40 }
0x4fd6   :  { %18048 = vmatprep.mubr.msk.f32.mxu0 %vm18743_vm2, %v18742_v21 }
0x5081   :  { %v22420_v19 = vpop.f32.mrf.mxu0 }
0x5083   :  { %v17984_v55 = vpop.f32.mrf.mxu0 }
0x5084   :  { %v15133_v55 = vld [vmem:[%s23026_s26 + $0x250] sm:$0xff] }
0x5085   :  { %v22422_v17 = vpop.f32.mrf.mxu0 }
0x5087   :  { %v17987_v25 = vpop.f32.mrf.mxu0 }
0x5088   :  { %v15132_v25 = vld [vmem:[%s23026_s26 + $0x248] sm:$0xff] }
0x5089   :  { %v22424_v9 = vpop.f32.mrf.mxu0 }
0x508b   :  { %v17990_v41 = vpop.f32.mrf.mxu0 }
0x508c   :  { %v15126_v41 = vld [vmem:[%s23025_s24 + $0x250] sm:$0xff] }
0x508d   :  { %v12158_v27 = vpop.f32.mrf.mxu0 }
0x508f   :  { %v18018_v5 = vpop.f32.mrf.mxu0 }
0x5090   :  { %v15125_v5 = vld [vmem:[%s23025_s24 + $0x248] sm:$0xff] }
0x5091   :  { %v12163_v29 = vpop.f32.mrf.mxu0 }
0x5093   :  { %v18021_v50 = vpop.f32.mrf.mxu0 }
0x5094   :  { %v15124_v50 = vld [vmem:[%s23025_s24 + $0x240] sm:$0xff] }
0x5095   :  { %v12168_v44 = vpop.f32.mrf.mxu0 }
0x5096   :  { %18043 = vmatpush3.xpose.msk.msra.mxu0 %vm400_vm3, %v12168_v44 }
0x5097   :  { %v18024_v24 = vpop.f32.mrf.mxu0  ;;  %18044 = vmatprep.subr.mxu0 %v18742_v21 }
0x509a   :  { %18045 = vmatpush3.xpose.msk.msra.mxu0 %vm400_vm3, %v12163_v29 }
0x509b   :  { %18046 = vmatprep.subr.mxu0 %v18742_v21 }
0x509e   :  { %18047 = vmatpush3.xpose.msk.msra.mxu0 %vm400_vm3, %v12158_v27 }
0x509f   :  { %18072 = vmatprep.subr.mxu0 %v18742_v21 }
0x50a1   :  { %18049 = vmatmul.mubr.msk.f32.vlgmr.msra.gmra.mxu0 %vm400_vm3, %v22369_v58 }
0x50a2   :  { %18051 = vmatprep.mubr.msk.f32.mxu0 %vm18743_vm2, %v18742_v21  ;;  %18073 = vmatpush3.msra.mxu0 %v15117_v20 }
0x50a3   :  { %18094 = vmatprep.subr.mxu0 %v18742_v21 }
0x50a5   :  { %18052 = vmatmul.mubr.msk.f32.gmra.mxu0 %vm400_vm3, %v22372_v4 }
0x50a6   :  { %18054 = vmatprep.mubr.msk.f32.mxu0 %vm18743_vm2, %v18742_v21 }
0x50a9   :  { %18055 = vmatmul.mubr.msk.f32.gmra.mxu0 %vm400_vm3, %v22374_v42 }
0x50aa   :  { %18074 = vmatprep.mubr.msk.f32.mxu0 %vm18743_vm2, %v18742_v21 }
0x5161   :  { %v12341_v57 = vpop.f32.mrf.mxu0 }
0x5162   :  { %v12355_v13 = vmul.f32 0.35355338, %v12341_v57 }
0x5163   :  { %v18050_v7 = vpop.f32.mrf.mxu0 }
0x5164   :  { %v12358_v58 = vadd.f32 %v22352_v60, %v12355_v13  ;;  %v15141_v13 = vld [vmem:[%s23029_s4 + $0x258] sm:$0xff] }
0x5165   :  { %v12346_v62 = vpop.f32.mrf.mxu0 }
0x5166   :  { %v12356_v2 = vmul.f32 0.35355338, %v12346_v62  ;;  %v12361_v11 = vsel %vm505_vm5, %v12358_v58, -inf }
0x5167   :  { %12362 = vmax.xlane.f32.xlu0 %v12361_v11  ;;  %v18053_v4 = vpop.f32.mrf.mxu0 }
0x5168   :  { %v12359_v15 = vadd.f32 %v22359_v47, %v12356_v2  ;;  %v15139_v2 = vld [vmem:[%s23029_s4 + $0x248] sm:$0xff]  ;;  %v15138_v4 = vld [vmem:[%s23029_s4 + $0x240] sm:$0xff] }
0x5169   :  { %v12351_v8 = vpop.f32.mrf.mxu0 }
0x516a   :  { %v12357_v35 = vmul.f32 0.35355338, %v12351_v8  ;;  %v12364_v42 = vsel %vm505_vm5, %v12359_v15, -inf }
0x516b   :  { %12365 = vmax.xlane.f32.xlu1 %v12364_v42  ;;  %v18056_v39 = vpop.f32.mrf.mxu0 }
0x516c   :  { %v12360_v32 = vadd.f32 %v22366_v0, %v12357_v35 }
0x516e   :  { %v12367_v53 = vsel %vm512_vm6, %v12360_v32, -inf }
0x516f   :  { %12368 = vmax.xlane.f32.xlu0 %v12367_v53 }
0x51f0   :  { %v12363_v54 = vpop.xlane.xlu0 %12362 }
0x51f1   :  { %v12370_v56 = vsub.f32 %v12358_v58, %v12363_v54  ;;  %v15140_v58 = vld [vmem:[%s23029_s4 + $0x250] sm:$0xff] }
0x51f3   :  { %v12373_v61 = vmul.f32 1.442695, %v12370_v56 }
0x51f4   :  { %v12366_v49 = vpop.xlane.xlu1 %12365 }
0x51f5   :  { %18667 = vpow2.f32 %v12373_v61  ;;  %v12371_v16 = vsub.f32 %v12359_v15, %v12366_v49 }
0x51f7   :  { %v12375_v45 = vmul.f32 1.442695, %v12371_v16 }
0x51f8   :  { %v12369_v14 = vpop.xlane.xlu0 %12368 }
0x51f9   :  { %18669 = vpow2.f32 %v12375_v45  ;;  %v12372_v59 = vsub.f32 %v12360_v32, %v12369_v14 }
0x51fb   :  { %v12377_v23 = vmul.f32 1.442695, %v12372_v59 }
0x51fd   :  { %18671 = vpow2.f32 %v12377_v23 }
0x5202   :  { %v18668_v63 = vpop.eup %18667 }
0x5203   :  { %v12379_v31 = vsel %vm505_vm5, %v18668_v63, 0.0 }
0x5204   :  { %12380 = vadd.xlane.f32.xlu1 %v12379_v31 }
0x5206   :  { %v18670_v3 = vpop.eup %18669 }
0x5207   :  { %v12382_v52 = vsel %vm505_vm5, %v18670_v3, 0.0 }
0x5208   :  { %12383 = vadd.xlane.f32.xlu0 %v12382_v52 }
0x520a   :  { %v18672_v38 = vpop.eup %18671 }
0x520b   :  { %v12385_v46 = vsel %vm512_vm6, %v18672_v38, 0.0 }
0x520c   :  { %12386 = vadd.xlane.f32.xlu1 %v12385_v46 }
0x528d   :  { %v12381_v37 = vpop.xlane.xlu1 %12380 }
0x528e   :  { %18673 = vrcp.f32 %v12381_v37 }
0x5291   :  { %v12384_v48 = vpop.xlane.xlu0 %12383 }
0x5292   :  { %18675 = vrcp.f32 %v12384_v48 }
0x5295   :  { %v12387_v33 = vpop.xlane.xlu1 %12386 }
0x5296   :  { %18677 = vrcp.f32 %v12387_v33 }
0x529b   :  { %v18674_v1 = vpop.eup %18673 }
0x529c   :  { %v12391_v51 = vmul.f32 %v18674_v1, %v18668_v63 }
0x529e   :  { %18064 = vmatmul.mubr.msk.f32.vlgmr.msra.gmra.mxu1 %vm505_vm5, %v12391_v51 }
0x529f   :  { %v18676_v22 = vpop.eup %18675  ;;  %18066 = vmatprep.mubr.msk.f32.mxu1 %vm18743_vm2, %v18742_v21  ;;  %18084 = vmatpush3.msra.mxu1 %v15085_v43 }
0x52a0   :  { %v12392_v6 = vmul.f32 %v18676_v22, %v18670_v3  ;;  %18111 = vmatprep.subr.mxu1 %v18742_v21 }
0x52a2   :  { %18067 = vmatmul.mubr.msk.f32.gmra.mxu1 %vm505_vm5, %v12392_v6 }
0x52a3   :  { %v18678_v28 = vpop.eup %18677  ;;  %18069 = vmatprep.mubr.msk.f32.mxu1 %vm18743_vm2, %v18742_v21 }
0x52a4   :  { %v12393_v26 = vmul.f32 %v18678_v28, %v18672_v38 }
0x52a6   :  { %18070 = vmatmul.mubr.msk.f32.gmra.mxu1 %vm505_vm5, %v12393_v26 }
0x52a7   :  { %18085 = vmatprep.mubr.msk.f32.mxu1 %vm18743_vm2, %v18742_v21 }
0x52aa   :  { %18086 = vmatmul.mubr.msk.f32.vlgmr.msra.gmra.mxu1 %vm400_vm3, %v22420_v19  ;;  %v15131_v19 = vld [vmem:[%s23026_s26 + $0x240] sm:$0xff] }
0x52ab   :  { %18088 = vmatprep.mubr.msk.f32.mxu1 %vm18743_vm2, %v18742_v21  ;;  %18112 = vmatpush3.msra.mxu1 %v15134_v30 }
0x52ac   :  { %18113 = vmatprep.subr.mxu1 %v18742_v21 }
0x52ad   :  { %18114 = vmatpush3.msra.mxu1 %v15133_v55 }
0x52ae   :  { %18089 = vmatmul.mubr.msk.f32.gmra.mxu1 %vm400_vm3, %v22422_v17  ;;  %18115 = vmatprep.subr.mxu1 %v18742_v21  ;;  %v15127_v17 = vld [vmem:[%s23025_s24 + $0x258] sm:$0xff] }
0x52af   :  { %18091 = vmatprep.mubr.msk.f32.mxu1 %vm18743_vm2, %v18742_v21  ;;  %18116 = vmatpush3.msra.mxu1 %v15132_v25 }
0x52b0   :  { %18117 = vmatprep.subr.mxu1 %v18742_v21 }
0x52b1   :  { %18118 = vmatpush3.msra.mxu1 %v15131_v19 }
0x52b2   :  { %18092 = vmatmul.mubr.msk.f32.gmra.mxu1 %vm400_vm3, %v22424_v9  ;;  %18145 = vmatprep.subr.mxu1 %v18742_v21 }
0x52b3   :  { %18119 = vmatprep.mubr.msk.f32.mxu1 %vm18743_vm2, %v18742_v21 }
0x52b6   :  { %18120 = vmatmul.mubr.msk.f32.vlgmr.msra.gmra.mxu1 %vm79_vm0, %v22216_v34 }
0x52b7   :  { %18122 = vmatprep.mubr.msk.f32.mxu1 %vm18743_vm2, %v18742_v21 }
0x52ba   :  { %18123 = vmatmul.mubr.msk.f32.gmra.mxu1 %vm79_vm0, %v22229_v18 }
0x52bb   :  { %18125 = vmatprep.mubr.msk.f32.mxu1 %vm18743_vm2, %v18742_v21 }
0x52be   :  { %18126 = vmatmul.mubr.msk.f32.gmra.mxu1 %vm79_vm0, %v22246_v40 }
0x52bf   :  { %18151 = vmatprep.mubr.msk.f32.mxu1 %vm18743_vm2, %v18742_v21 }
0x535e   :  { %v12472_v9 = vpop.f32.mrf.mxu1 }
0x535f   :  { %18075 = vmatmul.mubr.msk.f32.vlgmr.msra.gmra.mxu0 %vm400_vm3, %v12472_v9 }
0x5360   :  { %v18065_v27 = vpop.f32.mrf.mxu1  ;;  %18095 = vmatpush3.msra.mxu0 %v15127_v17  ;;  %18077 = vmatprep.mubr.msk.f32.mxu0 %vm18743_vm2, %v18742_v21 }
0x5361   :  { %18096 = vmatprep.subr.mxu0 %v18742_v21 }
0x5362   :  { %v12477_v29 = vpop.f32.mrf.mxu1  ;;  %18097 = vmatpush3.msra.mxu0 %v15126_v41 }
0x5363   :  { %18078 = vmatmul.mubr.msk.f32.gmra.mxu0 %vm400_vm3, %v12477_v29  ;;  %18098 = vmatprep.subr.mxu0 %v18742_v21 }
0x5364   :  { %v18068_v44 = vpop.f32.mrf.mxu1  ;;  %18080 = vmatprep.mubr.msk.f32.mxu0 %vm18743_vm2, %v18742_v21  ;;  %18099 = vmatpush3.msra.mxu0 %v15125_v5 }
0x5365   :  { %18100 = vmatprep.subr.mxu0 %v18742_v21 }
0x5366   :  { %v12482_v24 = vpop.f32.mrf.mxu1  ;;  %18101 = vmatpush3.msra.mxu0 %v15124_v50 }
0x5367   :  { %18081 = vmatmul.mubr.msk.f32.gmra.mxu0 %vm400_vm3, %v12482_v24  ;;  %18128 = vmatprep.subr.mxu0 %v18742_v21 }
0x5368   :  { %v18071_v57 = vpop.f32.mrf.mxu1  ;;  %18102 = vmatprep.mubr.msk.f32.mxu0 %vm18743_vm2, %v18742_v21 }
0x536a   :  { %v22538_v7 = vpop.f32.mrf.mxu1 }
0x536b   :  { %18103 = vmatmul.mubr.msk.f32.vlgmr.msra.gmra.mxu0 %vm79_vm0, %v22216_v34 }
0x536c   :  { %v18087_v62 = vpop.f32.mrf.mxu1  ;;  %18105 = vmatprep.mubr.msk.f32.mxu0 %vm18743_vm2, %v18742_v21  ;;  %18129 = vmatpush3.msra.mxu0 %v15141_v13 }
0x536d   :  { %18130 = vmatprep.subr.mxu0 %v18742_v21 }
0x536e   :  { %v22551_v11 = vpop.f32.mrf.mxu1  ;;  %18131 = vmatpush3.msra.mxu0 %v15140_v58 }
0x536f   :  { %18106 = vmatmul.mubr.msk.f32.gmra.mxu0 %vm79_vm0, %v22229_v18  ;;  %18132 = vmatprep.subr.mxu0 %v18742_v21 }
0x5370   :  { %v18090_v15 = vpop.f32.mrf.mxu1  ;;  %18108 = vmatprep.mubr.msk.f32.mxu0 %vm18743_vm2, %v18742_v21  ;;  %18133 = vmatpush3.msra.mxu0 %v15139_v2 }
0x5371   :  { %18134 = vmatprep.subr.mxu0 %v18742_v21 }
0x5372   :  { %v22562_v8 = vpop.f32.mrf.mxu1  ;;  %18135 = vmatpush3.msra.mxu0 %v15138_v4 }
0x5373   :  { %18109 = vmatmul.mubr.msk.f32.gmra.mxu0 %vm79_vm0, %v22246_v40  ;;  %18160 = vmatprep.subr.mxu0 %v18742_v21 }
0x5374   :  { %v18093_v35 = vpop.f32.mrf.mxu1  ;;  %18136 = vmatprep.mubr.msk.f32.mxu0 %vm18743_vm2, %v18742_v21 }
0x5376   :  { %v12822_v42 = vpop.f32.mrf.mxu1 }
0x5377   :  { %18137 = vmatmul.mubr.msk.f32.vlgmr.msra.gmra.mxu0 %vm79_vm0, %v22216_v34 }
0x5378   :  { %v18121_v39 = vpop.f32.mrf.mxu1  ;;  %18139 = vmatprep.mubr.msk.f32.mxu0 %vm18743_vm2, %v18742_v21 }
0x537a   :  { %v12827_v32 = vpop.f32.mrf.mxu1 }
0x537b   :  { %18140 = vmatmul.mubr.msk.f32.gmra.mxu0 %vm79_vm0, %v22229_v18 }
0x537c   :  { %v18124_v53 = vpop.f32.mrf.mxu1  ;;  %18142 = vmatprep.mubr.msk.f32.mxu0 %vm18743_vm2, %v18742_v21 }
0x537d   :  { %v15155_v53 = vld [vmem:[%s22994_s7 + $0x90] sm:$0xff] }
0x537e   :  { %v12832_v54 = vpop.f32.mrf.mxu1 }
0x537f   :  { %18143 = vmatmul.mubr.msk.f32.gmra.mxu0 %vm79_vm0, %v22246_v40  ;;  %18146 = vmatpush3.xpose.msk.msra.mxu1 %vm400_vm3, %v12832_v54 }
0x5380   :  { %v18127_v56 = vpop.f32.mrf.mxu1  ;;  %18147 = vmatprep.subr.mxu1 %v18742_v21  ;;  %18166 = vmatprep.mubr.msk.f32.mxu0 %vm18743_vm2, %v18742_v21 }
0x5383   :  { %18148 = vmatpush3.xpose.msk.msra.mxu1 %vm400_vm3, %v12827_v32 }
0x5384   :  { %18149 = vmatprep.subr.mxu1 %v18742_v21 }
0x5387   :  { %18150 = vmatpush3.xpose.msk.msra.mxu1 %vm400_vm3, %v12822_v42 }
0x5388   :  { %18175 = vmatprep.subr.mxu1 %v18742_v21 }
0x541f   :  { %v22587_v61 = vpop.f32.mrf.mxu0 }
0x5421   :  { %v18076_v49 = vpop.f32.mrf.mxu0 }
0x5423   :  { %v22589_v16 = vpop.f32.mrf.mxu0 }
0x5425   :  { %v18079_v45 = vpop.f32.mrf.mxu0 }
0x5427   :  { %v22591_v14 = vpop.f32.mrf.mxu0 }
0x5429   :  { %v18082_v59 = vpop.f32.mrf.mxu0 }
0x542b   :  { %v12737_v23 = vpop.f32.mrf.mxu0 }
0x542c   :  { %18152 = vmatmul.mubr.msk.f32.vlgmr.msra.gmra.mxu1 %vm400_vm3, %v12737_v23  ;;  %v15162_v23 = vld [vmem:[%s23025_s24 + $0x278] sm:$0xff] }
0x542d   :  { %v18104_v63 = vpop.f32.mrf.mxu0  ;;  %18154 = vmatprep.mubr.msk.f32.mxu1 %vm18743_vm2, %v18742_v21  ;;  %18176 = vmatpush3.msra.mxu1 %v15155_v53 }
0x542e   :  { %18203 = vmatprep.subr.mxu1 %v18742_v21  ;;  %v15161_v63 = vld [vmem:[%s23025_s24 + $0x270] sm:$0xff] }
0x542f   :  { %v12742_v31 = vpop.f32.mrf.mxu0 }
0x5430   :  { %18155 = vmatmul.mubr.msk.f32.gmra.mxu1 %vm400_vm3, %v12742_v31 }
0x5431   :  { %v18107_v3 = vpop.f32.mrf.mxu0  ;;  %18157 = vmatprep.mubr.msk.f32.mxu1 %vm18743_vm2, %v18742_v21 }
0x5433   :  { %v12747_v52 = vpop.f32.mrf.mxu0 }
0x5434   :  { %18158 = vmatmul.mubr.msk.f32.gmra.mxu1 %vm400_vm3, %v12747_v52  ;;  %v15160_v52 = vld [vmem:[%s23025_s24 + $0x268] sm:$0xff] }
0x5435   :  { %v18110_v38 = vpop.f32.mrf.mxu0  ;;  %18177 = vmatprep.mubr.msk.f32.mxu1 %vm18743_vm2, %v18742_v21 }
0x5436   :  { %v15159_v38 = vld [vmem:[%s23025_s24 + $0x260] sm:$0xff] }
0x5437   :  { %v12907_v46 = vpop.f32.mrf.mxu0 }
0x5439   :  { %v18138_v20 = vpop.f32.mrf.mxu0 }
0x543b   :  { %v12912_v37 = vpop.f32.mrf.mxu0 }
0x543d   :  { %v18141_v48 = vpop.f32.mrf.mxu0 }
0x543e   :  { %v15175_v48 = vld [vmem:[%s23029_s4 + $0x270] sm:$0xff] }
0x543f   :  { %v12917_v33 = vpop.f32.mrf.mxu0 }
0x5440   :  { %18161 = vmatpush3.msk.msra.mxu0 %vm549_vm4, %v12917_v33  ;;  %v15174_v33 = vld [vmem:[%s23029_s4 + $0x268] sm:$0xff] }
0x5441   :  { %v18144_v1 = vpop.f32.mrf.mxu0  ;;  %18162 = vmatprep.subr.mxu0 %v18742_v21 }
0x5442   :  { %18163 = vmatpush3.msra.mxu0 %v12912_v37  ;;  %v15176_v37 = vld [vmem:[%s23029_s4 + $0x278] sm:$0xff]  ;;  %v15173_v1 = vld [vmem:[%s23029_s4 + $0x260] sm:$0xff] }
0x5443   :  { %18164 = vmatprep.subr.mxu0 %v18742_v21 }
0x5444   :  { %18165 = vmatpush3.msra.mxu0 %v12907_v46 }
0x5445   :  { %18186 = vmatprep.subr.mxu0 %v18742_v21 }
0x54ec   :  { %v13005_v51 = vpop.f32.mrf.mxu1 }
0x54ed   :  { %v13019_v43 = vmul.f32 0.35355338, %v13005_v51  ;;  %v15169_v51 = vld [vmem:[%s23026_s26 + $0x278] sm:$0xff] }
0x54ee   :  { %v18153_v22 = vpop.f32.mrf.mxu1 }
0x54ef   :  { %v13022_v6 = vadd.f32 %v22352_v60, %v13019_v43  ;;  %v15168_v22 = vld [vmem:[%s23026_s26 + $0x270] sm:$0xff] }
0x54f0   :  { %v13010_v28 = vpop.f32.mrf.mxu1 }
0x54f1   :  { %v13020_v26 = vmul.f32 0.35355338, %v13010_v28  ;;  %v13025_v30 = vsel %vm505_vm5, %v13022_v6, -inf  ;;  %v15167_v28 = vld [vmem:[%s23026_s26 + $0x268] sm:$0xff] }
0x54f2   :  { %13026 = vmax.xlane.f32.xlu0 %v13025_v30  ;;  %v18156_v55 = vpop.f32.mrf.mxu1  ;;  %v15166_v30 = vld [vmem:[%s23026_s26 + $0x260] sm:$0xff] }
0x54f3   :  { %v13023_v25 = vadd.f32 %v22359_v47, %v13020_v26 }
0x54f4   :  { %v13015_v19 = vpop.f32.mrf.mxu1 }
0x54f5   :  { %v13021_v17 = vmul.f32 0.35355338, %v13015_v19  ;;  %v13028_v9 = vsel %vm505_vm5, %v13023_v25, -inf }
0x54f6   :  { %13029 = vmax.xlane.f32.xlu1 %v13028_v9  ;;  %v18159_v41 = vpop.f32.mrf.mxu1 }
0x54f7   :  { %v13024_v27 = vadd.f32 %v22366_v0, %v13021_v17 }
0x54f9   :  { %v13031_v5 = vsel %vm512_vm6, %v13024_v27, -inf }
0x54fa   :  { %13032 = vmax.xlane.f32.xlu0 %v13031_v5 }
0x557b   :  { %v13027_v29 = vpop.xlane.xlu0 %13026 }
0x557c   :  { %v13034_v50 = vsub.f32 %v13022_v6, %v13027_v29 }
0x557e   :  { %v13037_v44 = vmul.f32 1.442695, %v13034_v50 }
0x557f   :  { %v13030_v24 = vpop.xlane.xlu1 %13029 }
0x5580   :  { %18679 = vpow2.f32 %v13037_v44  ;;  %v13035_v57 = vsub.f32 %v13023_v25, %v13030_v24 }
0x5582   :  { %v13039_v13 = vmul.f32 1.442695, %v13035_v57 }
0x5583   :  { %v13033_v58 = vpop.xlane.xlu0 %13032 }
0x5584   :  { %18681 = vpow2.f32 %v13039_v13  ;;  %v13036_v62 = vsub.f32 %v13024_v27, %v13033_v58 }
0x5586   :  { %v13041_v2 = vmul.f32 1.442695, %v13036_v62 }
0x5588   :  { %18683 = vpow2.f32 %v13041_v2  ;;  %v12658_v2 = vadd.f32 %v22551_v11, %v22589_v16 }
0x558d   :  { %v18680_v4 = vpop.eup %18679 }
0x558e   :  { %v13043_v15 = vsel %vm505_vm5, %v18680_v4, 0.0 }
0x558f   :  { %13044 = vadd.xlane.f32.xlu1 %v13043_v15 }
0x5591   :  { %v18682_v35 = vpop.eup %18681 }
0x5592   :  { %v13046_v42 = vsel %vm505_vm5, %v18682_v35, 0.0 }
0x5593   :  { %13047 = vadd.xlane.f32.xlu0 %v13046_v42  ;;  %v12663_v42 = vadd.f32 %v22562_v8, %v22591_v14 }
0x5595   :  { %v18684_v39 = vpop.eup %18683 }
0x5596   :  { %v13049_v32 = vsel %vm512_vm6, %v18684_v39, 0.0 }
0x5597   :  { %13050 = vadd.xlane.f32.xlu1 %v13049_v32 }
0x5618   :  { %v13045_v54 = vpop.xlane.xlu1 %13044 }
0x5619   :  { %18685 = vrcp.f32 %v13045_v54 }
0x561c   :  { %v13048_v56 = vpop.xlane.xlu0 %13047 }
0x561d   :  { %18687 = vrcp.f32 %v13048_v56 }
0x5620   :  { %v13051_v49 = vpop.xlane.xlu1 %13050 }
0x5621   :  { %18689 = vrcp.f32 %v13051_v49 }
0x5626   :  { %v18686_v45 = vpop.eup %18685 }
0x5627   :  { %v13055_v59 = vmul.f32 %v18686_v45, %v18680_v4 }
0x5629   :  { %18167 = vmatmul.mubr.msk.f32.vlgmr.msra.gmra.mxu0 %vm505_vm5, %v13055_v59 }
0x562a   :  { %v18688_v31 = vpop.eup %18687  ;;  %18169 = vmatprep.mubr.msk.f32.mxu0 %vm18743_vm2, %v18742_v21  ;;  %18187 = vmatpush3.msra.mxu0 %v15162_v23 }
0x562b   :  { %v13056_v3 = vmul.f32 %v18688_v31, %v18682_v35  ;;  %18188 = vmatprep.subr.mxu0 %v18742_v21 }
0x562c   :  { %18189 = vmatpush3.msra.mxu0 %v15161_v63 }
0x562d   :  { %18170 = vmatmul.mubr.msk.f32.gmra.mxu0 %vm505_vm5, %v13056_v3  ;;  %18190 = vmatprep.subr.mxu0 %v18742_v21 }
0x562e   :  { %v18690_v46 = vpop.eup %18689  ;;  %18172 = vmatprep.mubr.msk.f32.mxu0 %vm18743_vm2, %v18742_v21  ;;  %18191 = vmatpush3.msra.mxu0 %v15160_v52 }
0x562f   :  { %v13057_v20 = vmul.f32 %v18690_v46, %v18684_v39  ;;  %18192 = vmatprep.subr.mxu0 %v18742_v21 }
0x5630   :  { %18193 = vmatpush3.msra.mxu0 %v15159_v38 }
0x5631   :  { %18173 = vmatmul.mubr.msk.f32.gmra.mxu0 %vm505_vm5, %v13057_v20  ;;  %18220 = vmatprep.subr.mxu0 %v18742_v21 }
0x5632   :  { %18194 = vmatprep.mubr.msk.f32.mxu0 %vm18743_vm2, %v18742_v21 }
0x5635   :  { %18195 = vmatmul.mubr.msk.f32.vlgmr.msra.gmra.mxu0 %vm79_vm0, %v22216_v34 }
0x5636   :  { %18197 = vmatprep.mubr.msk.f32.mxu0 %vm18743_vm2, %v18742_v21  ;;  %18221 = vmatpush3.msra.mxu0 %v15176_v37 }
0x5637   :  { %18222 = vmatprep.subr.mxu0 %v18742_v21 }
0x5638   :  { %18223 = vmatpush3.msra.mxu0 %v15175_v48 }
0x5639   :  { %18198 = vmatmul.mubr.msk.f32.gmra.mxu0 %vm79_vm0, %v22229_v18  ;;  %18224 = vmatprep.subr.mxu0 %v18742_v21 }
0x563a   :  { %18200 = vmatprep.mubr.msk.f32.mxu0 %vm18743_vm2, %v18742_v21  ;;  %18225 = vmatpush3.msra.mxu0 %v15174_v33 }
0x563b   :  { %18226 = vmatprep.subr.mxu0 %v18742_v21 }
0x563c   :  { %18227 = vmatpush3.msra.mxu0 %v15173_v1 }
0x563d   :  { %18201 = vmatmul.mubr.msk.f32.gmra.mxu0 %vm79_vm0, %v22246_v40  ;;  %18252 = vmatprep.subr.mxu0 %v18742_v21 }
0x563e   :  { %18228 = vmatprep.mubr.msk.f32.mxu0 %vm18743_vm2, %v18742_v21 }
0x5641   :  { %18229 = vmatmul.mubr.msk.f32.vlgmr.msra.gmra.mxu0 %vm79_vm0, %v22216_v34 }
0x5642   :  { %18231 = vmatprep.mubr.msk.f32.mxu0 %vm18743_vm2, %v18742_v21 }
0x5645   :  { %18232 = vmatmul.mubr.msk.f32.gmra.mxu0 %vm79_vm0, %v22229_v18 }
0x5646   :  { %18234 = vmatprep.mubr.msk.f32.mxu0 %vm18743_vm2, %v18742_v21 }
0x5649   :  { %18235 = vmatmul.mubr.msk.f32.gmra.mxu0 %vm79_vm0, %v22246_v40 }
0x564a   :  { %18258 = vmatprep.mubr.msk.f32.mxu0 %vm18743_vm2, %v18742_v21 }
0x56e9   :  { %v13136_v43 = vpop.f32.mrf.mxu0 }
0x56ea   :  { %18178 = vmatmul.mubr.msk.f32.vlgmr.msra.gmra.mxu1 %vm400_vm3, %v13136_v43 }
0x56eb   :  { %v18168_v6 = vpop.f32.mrf.mxu0  ;;  %18204 = vmatpush3.msra.mxu1 %v15169_v51  ;;  %18180 = vmatprep.mubr.msk.f32.mxu1 %vm18743_vm2, %v18742_v21 }
0x56ec   :  { %18205 = vmatprep.subr.mxu1 %v18742_v21 }
0x56ed   :  { %v13141_v26 = vpop.f32.mrf.mxu0  ;;  %18206 = vmatpush3.msra.mxu1 %v15168_v22 }
0x56ee   :  { %18181 = vmatmul.mubr.msk.f32.gmra.mxu1 %vm400_vm3, %v13141_v26  ;;  %18207 = vmatprep.subr.mxu1 %v18742_v21 }
0x56ef   :  { %v18171_v55 = vpop.f32.mrf.mxu0  ;;  %18183 = vmatprep.mubr.msk.f32.mxu1 %vm18743_vm2, %v18742_v21  ;;  %18208 = vmatpush3.msra.mxu1 %v15167_v28 }
0x56f0   :  { %18209 = vmatprep.subr.mxu1 %v18742_v21 }
0x56f1   :  { %v13146_v25 = vpop.f32.mrf.mxu0  ;;  %18210 = vmatpush3.msra.mxu1 %v15166_v30 }
0x56f2   :  { %18184 = vmatmul.mubr.msk.f32.gmra.mxu1 %vm400_vm3, %v13146_v25  ;;  %18237 = vmatprep.subr.mxu1 %v18742_v21 }
0x56f3   :  { %v18174_v19 = vpop.f32.mrf.mxu0  ;;  %18211 = vmatprep.mubr.msk.f32.mxu1 %vm18743_vm2, %v18742_v21 }
0x56f5   :  { %v13315_v17 = vpop.f32.mrf.mxu0 }
0x56f6   :  { %18212 = vmatmul.mubr.msk.f32.vlgmr.msra.gmra.mxu1 %vm79_vm0, %v22216_v34 }
0x56f7   :  { %v18196_v9 = vpop.f32.mrf.mxu0  ;;  %18214 = vmatprep.mubr.msk.f32.mxu1 %vm18743_vm2, %v18742_v21 }
0x56f9   :  { %v13320_v41 = vpop.f32.mrf.mxu0 }
0x56fa   :  { %18215 = vmatmul.mubr.msk.f32.gmra.mxu1 %vm79_vm0, %v22229_v18 }
0x56fb   :  { %v18199_v27 = vpop.f32.mrf.mxu0  ;;  %18217 = vmatprep.mubr.msk.f32.mxu1 %vm18743_vm2, %v18742_v21 }
0x56fd   :  { %v13325_v5 = vpop.f32.mrf.mxu0 }
0x56fe   :  { %18218 = vmatmul.mubr.msk.f32.gmra.mxu1 %vm79_vm0, %v22246_v40  ;;  %v12653_v40 = vadd.f32 %v22538_v7, %v22587_v61 }
0x56ff   :  { %v18202_v29 = vpop.f32.mrf.mxu0  ;;  %18243 = vmatprep.mubr.msk.f32.mxu1 %vm18743_vm2, %v18742_v21 }
0x5701   :  { %v13485_v34 = vpop.f32.mrf.mxu0 }
0x5703   :  { %v18230_v50 = vpop.f32.mrf.mxu0 }
0x5705   :  { %v13490_v44 = vpop.f32.mrf.mxu0 }
0x5707   :  { %v18233_v24 = vpop.f32.mrf.mxu0 }
0x5709   :  { %v13495_v57 = vpop.f32.mrf.mxu0 }
0x570a   :  { %18253 = vmatpush3.msk.msra.mxu0 %vm549_vm4, %v13495_v57 }
0x570b   :  { %v18236_v18 = vpop.f32.mrf.mxu0  ;;  %18254 = vmatprep.subr.mxu0 %v18742_v21 }
0x570c   :  { %18255 = vmatpush3.msra.mxu0 %v13490_v44 }
0x570d   :  { %18256 = vmatprep.subr.mxu0 %v18742_v21 }
0x570e   :  { %18257 = vmatpush3.msra.mxu0 %v13485_v34 }
0x570f   :  { %18278 = vmatprep.subr.mxu0 %v18742_v21 }
0x57aa   :  { %v13227_v13 = vpop.f32.mrf.mxu1 }
0x57ab   :  { %v22727_v58 = vadd.f32 %v13227_v13, %v12653_v40 }
0x57ac   :  { %v18179_v62 = vpop.f32.mrf.mxu1 }
0x57ae   :  { %v13232_v4 = vpop.f32.mrf.mxu1 }
0x57af   :  { %v22731_v15 = vadd.f32 %v13232_v4, %v12658_v2 }
0x57b0   :  { %v18182_v35 = vpop.f32.mrf.mxu1 }
0x57b2   :  { %v13237_v39 = vpop.f32.mrf.mxu1 }
0x57b3   :  { %v22735_v32 = vadd.f32 %v13237_v39, %v12663_v42  ;;  %v15195_v42 = vld [vmem:[%s22995_s8 + $0x4] ss:$0 sm:$0xff] }
0x57b4   :  { %v18185_v53 = vpop.f32.mrf.mxu1 }
0x57b6   :  { %v13400_v54 = vpop.f32.mrf.mxu1 }
0x57b8   :  { %v18213_v7 = vpop.f32.mrf.mxu1 }
0x57ba   :  { %v13405_v61 = vpop.f32.mrf.mxu1 }
0x57bc   :  { %v18216_v56 = vpop.f32.mrf.mxu1 }
0x57be   :  { %v13410_v49 = vpop.f32.mrf.mxu1 }
0x57bf   :  { %18238 = vmatpush3.xpose.msk.msra.mxu1 %vm400_vm3, %v13410_v49 }
0x57c0   :  { %v18219_v45 = vpop.f32.mrf.mxu1  ;;  %18239 = vmatprep.subr.mxu1 %v18742_v21 }
0x57c3   :  { %18240 = vmatpush3.xpose.msk.msra.mxu1 %vm400_vm3, %v13405_v61 }
0x57c4   :  { %18241 = vmatprep.subr.mxu1 %v18742_v21 }
0x57c7   :  { %18242 = vmatpush3.xpose.msk.msra.mxu1 %vm400_vm3, %v13400_v54 }
0x57c8   :  { %18267 = vmatprep.subr.mxu1 %v18742_v21 }
0x57ca   :  { %18244 = vmatmul.mubr.msk.f32.vlgmr.msra.gmra.mxu1 %vm400_vm3, %v13315_v17  ;;  %v15190_v17 = vld [vmem:[%s22994_s7 + $0x98] sm:$0xff] }
0x57cb   :  { %18246 = vmatprep.mubr.msk.f32.mxu1 %vm18743_vm2, %v18742_v21  ;;  %18268 = vmatpush3.msra.mxu1 %v15190_v17 }
0x57cc   :  { %18295 = vmatprep.subr.mxu1 %v18742_v21 }
0x57ce   :  { %18247 = vmatmul.mubr.msk.f32.gmra.mxu1 %vm400_vm3, %v13320_v41 }
0x57cf   :  { %18249 = vmatprep.mubr.msk.f32.mxu1 %vm18743_vm2, %v18742_v21 }
0x57d2   :  { %18250 = vmatmul.mubr.msk.f32.gmra.mxu1 %vm400_vm3, %v13325_v5 }
0x57d3   :  { %18269 = vmatprep.mubr.msk.f32.mxu1 %vm18743_vm2, %v18742_v21 }
0x588a   :  { %v13583_v11 = vpop.f32.mrf.mxu1 }
0x588b   :  { %v13597_v8 = vmul.f32 0.35355338, %v13583_v11 }
0x588c   :  { %v18245_v16 = vpop.f32.mrf.mxu1 }
0x588d   :  { %v13600_v14 = vadd.f32 %v22352_v60, %v13597_v8 }
0x588e   :  { %v13588_v59 = vpop.f32.mrf.mxu1 }
0x588f   :  { %v13598_v23 = vmul.f32 0.35355338, %v13588_v59  ;;  %v13603_v63 = vsel %vm505_vm5, %v13600_v14, -inf }
0x5890   :  { %13604 = vmax.xlane.f32.xlu0 %v13603_v63  ;;  %v18248_v31 = vpop.f32.mrf.mxu1 }
0x5891   :  { %v13601_v3 = vadd.f32 %v22359_v47, %v13598_v23 }
0x5892   :  { %v13593_v52 = vpop.f32.mrf.mxu1 }
0x5893   :  { %v13599_v38 = vmul.f32 0.35355338, %v13593_v52  ;;  %v13606_v46 = vsel %vm505_vm5, %v13601_v3, -inf }
0x5894   :  { %13607 = vmax.xlane.f32.xlu1 %v13606_v46  ;;  %v18251_v20 = vpop.f32.mrf.mxu1 }
0x5895   :  { %v13602_v37 = vadd.f32 %v22366_v0, %v13599_v38 }
0x5897   :  { %v13609_v48 = vsel %vm512_vm6, %v13602_v37, -inf }
0x5898   :  { %13610 = vmax.xlane.f32.xlu0 %v13609_v48 }
0x5919   :  { %v13605_v60 = vpop.xlane.xlu0 %13604 }
0x591a   :  { %v13612_v33 = vsub.f32 %v13600_v14, %v13605_v60 }
0x591c   :  { %v13615_v1 = vmul.f32 1.442695, %v13612_v33 }
0x591d   :  { %v13608_v51 = vpop.xlane.xlu1 %13607 }
0x591e   :  { %18691 = vpow2.f32 %v13615_v1  ;;  %v13613_v43 = vsub.f32 %v13601_v3, %v13608_v51  ;;  %v15203_v1 = vld [vmem:[%s22996_s11 + $0x98] sm:$0xff]  ;;  %v15202_v51 = vld [vmem:[%s22996_s11 + $0x90] sm:$0xff] }
0x5920   :  { %v13617_v22 = vmul.f32 1.442695, %v13613_v43  ;;  %v15201_v43 = vld [vmem:[%s22996_s11 + $0x88] sm:$0xff] }
0x5921   :  { %v13611_v6 = vpop.xlane.xlu0 %13610 }
0x5922   :  { %18693 = vpow2.f32 %v13617_v22  ;;  %v13614_v47 = vsub.f32 %v13602_v37, %v13611_v6  ;;  %v15200_v22 = vld [vmem:[%s22996_s11 + $0x80] sm:$0xff] }
0x5924   :  { %v13619_v28 = vmul.f32 1.442695, %v13614_v47 }
0x5926   :  { %18695 = vpow2.f32 %v13619_v28 }
0x592b   :  { %v18692_v26 = vpop.eup %18691 }
0x592c   :  { %v13621_v30 = vsel %vm505_vm5, %v18692_v26, 0.0 }
0x592d   :  { %13622 = vadd.xlane.f32.xlu1 %v13621_v30 }
0x592f   :  { %v18694_v0 = vpop.eup %18693 }
0x5930   :  { %v13624_v55 = vsel %vm505_vm5, %v18694_v0, 0.0 }
0x5931   :  { %13625 = vadd.xlane.f32.xlu0 %v13624_v55 }
0x5933   :  { %v18696_v25 = vpop.eup %18695 }
0x5934   :  { %v13627_v19 = vsel %vm512_vm6, %v18696_v25, 0.0 }
0x5935   :  { %13628 = vadd.xlane.f32.xlu1 %v13627_v19 }
0x59b6   :  { %v13623_v9 = vpop.xlane.xlu1 %13622 }
0x59b7   :  { %18697 = vrcp.f32 %v13623_v9  ;;  %v15198_v9 = vld [vmem:[%s22997_s9 + $0x4] ss:$0 sm:$0xff] }
0x59ba   :  { %v13626_v41 = vpop.xlane.xlu0 %13625 }
0x59bb   :  { %18699 = vrcp.f32 %v13626_v41 }
0x59be   :  { %v13629_v27 = vpop.xlane.xlu1 %13628 }
0x59bf   :  { %18701 = vrcp.f32 %v13629_v27  ;;  %v15199_v27 = vld [vmem:[%s22998_s10 + $0x4] ss:$0 sm:$0xff] }
0x59c4   :  { %v18698_v5 = vpop.eup %18697 }
0x59c5   :  { %v13633_v29 = vmul.f32 %v18698_v5, %v18692_v26 }
0x59c7   :  { %18259 = vmatmul.mubr.msk.f32.vlgmr.msra.gmra.mxu0 %vm505_vm5, %v13633_v29 }
0x59c8   :  { %v18700_v34 = vpop.eup %18699  ;;  %18261 = vmatprep.mubr.msk.f32.mxu0 %vm18743_vm2, %v18742_v21  ;;  %18279 = vmatpush3.msra.mxu0 %v15203_v1 }
0x59c9   :  { %v13634_v50 = vmul.f32 %v18700_v34, %v18694_v0  ;;  %18280 = vmatprep.subr.mxu0 %v18742_v21 }
0x59ca   :  { %18281 = vmatpush3.msra.mxu0 %v15202_v51 }
0x59cb   :  { %18262 = vmatmul.mubr.msk.f32.gmra.mxu0 %vm505_vm5, %v13634_v50  ;;  %18282 = vmatprep.subr.mxu0 %v18742_v21 }
0x59cc   :  { %v18702_v44 = vpop.eup %18701  ;;  %18264 = vmatprep.mubr.msk.f32.mxu0 %vm18743_vm2, %v18742_v21  ;;  %18283 = vmatpush3.msra.mxu0 %v15201_v43 }
0x59cd   :  { %v13635_v24 = vmul.f32 %v18702_v44, %v18696_v25  ;;  %18284 = vmatprep.subr.mxu0 %v18742_v21 }
0x59ce   :  { %18285 = vmatpush3.msra.mxu0 %v15200_v22 }
0x59cf   :  { %18265 = vmatmul.mubr.msk.f32.gmra.mxu0 %vm505_vm5, %v13635_v24  ;;  %18336 = vmatprep.subr.mxu0 %v18742_v21 }
0x59d0   :  { %18286 = vmatprep.mubr.msk.f32.mxu0 %vm18743_vm2, %v18742_v21 }
0x5a87   :  { %v13714_v57 = vpop.f32.mrf.mxu0 }
0x5a88   :  { %18270 = vmatmul.mubr.msk.f32.vlgmr.msra.gmra.mxu1 %vm400_vm3, %v13714_v57 }
0x5a89   :  { %v18260_v18 = vpop.f32.mrf.mxu0  ;;  %18272 = vmatprep.mubr.msk.f32.mxu1 %vm18743_vm2, %v18742_v21 }
0x5a8b   :  { %v13719_v40 = vpop.f32.mrf.mxu0 }
0x5a8c   :  { %18273 = vmatmul.mubr.msk.f32.gmra.mxu1 %vm400_vm3, %v13719_v40 }
0x5a8d   :  { %v18263_v13 = vpop.f32.mrf.mxu0  ;;  %18275 = vmatprep.mubr.msk.f32.mxu1 %vm18743_vm2, %v18742_v21 }
0x5a8f   :  { %v13724_v62 = vpop.f32.mrf.mxu0 }
0x5a90   :  { %18276 = vmatmul.mubr.msk.f32.gmra.mxu1 %vm400_vm3, %v13724_v62  ;;  %v15224_v62 = vld [vmem:[%s22999_s13 + $0x278] sm:$0xff] }
0x5a91   :  { %v18266_v2 = vpop.f32.mrf.mxu0  ;;  %18327 = vmatprep.mubr.msk.f32.mxu1 %vm18743_vm2, %v18742_v21  ;;  %18296 = vmatpush3.msra.mxu1 %v15224_v62 }
0x5a92   :  { %18297 = vmatprep.subr.mxu1 %v18742_v21  ;;  %v15223_v2 = vld [vmem:[%s22999_s13 + $0x270] sm:$0xff] }
0x5a93   :  { %18298 = vmatpush3.msra.mxu1 %v15223_v2 }
0x5a94   :  { %18299 = vmatprep.subr.mxu1 %v18742_v21 }
0x5b48   :  { %v13805_v4 = vpop.f32.mrf.mxu1 }
0x5b49   :  { %v13819_v35 = vadd.f32 %v13805_v4, %v22727_v58  ;;  %v15222_v4 = vld [vmem:[%s22999_s13 + $0x268] sm:$0xff] }
0x5b4a   :  { %v18271_v39 = vpop.f32.mrf.mxu1  ;;  %18300 = vmatpush3.msra.mxu1 %v15222_v4 }
0x5b4b   :  { %v13822_v53 = vadd.f32 %v13819_v35, %v22158_v10  ;;  %18301 = vmatprep.subr.mxu1 %v18742_v21  ;;  %v15221_v35 = vld [vmem:[%s22999_s13 + $0x260] sm:$0xff]  ;;  %v15219_v39 = vld [vmem:[%s22999_s13 + $0x250] sm:$0xff] }
0x5b4c   :  { %v13810_v54 = vpop.f32.mrf.mxu1  ;;  %18302 = vmatpush3.msra.mxu1 %v15221_v35 }
0x5b4d   :  { %v22788_v7 = vadd.f32 %v15195_v42, %v13822_v53  ;;  %v13820_v61 = vadd.f32 %v13810_v54, %v22731_v15  ;;  %18303 = vmatprep.subr.mxu1 %v18742_v21  ;;  %v15218_v53 = vld [vmem:[%s22999_s13 + $0x248] sm:$0xff]  ;;  %v15217_v54 = vld [vmem:[%s22999_s13 + $0x240] sm:$0xff] }
0x5b4e   :  { %v18274_v56 = vpop.f32.mrf.mxu1 }
0x5b4f   :  { %v13823_v49 = vadd.f32 %v13820_v61, %v22163_v36  ;;  %v13840_v45 = vsel %vm79_vm0, %v22788_v7, 0.0  ;;  %v15216_v61 = vld [vmem:[%s22999_s13 + $0x238] sm:$0xff]  ;;  %v15215_v56 = vld [vmem:[%s22999_s13 + $0x230] sm:$0xff] }
0x5b50   :  { %13841 = vadd.xlane.f32.xlu0 %v13840_v45  ;;  %v13815_v58 = vpop.f32.mrf.mxu1  ;;  %v15213_v45 = vld [vmem:[%s22999_s13 + $0x220] sm:$0xff] }
0x5b51   :  { %v22794_v11 = vadd.f32 %v15195_v42, %v13823_v49  ;;  %v13821_v8 = vadd.f32 %v13815_v58, %v22735_v32  ;;  %v15214_v49 = vld [vmem:[%s22999_s13 + $0x228] sm:$0xff]  ;;  %v15212_v58 = vld [vmem:[%s22999_s13 + $0x218] sm:$0xff] }
0x5b52   :  { %v18277_v16 = vpop.f32.mrf.mxu1 }
0x5b53   :  { %v13824_v10 = vadd.f32 %v13821_v8, %v22168_v12  ;;  %v13843_v14 = vsel %vm79_vm0, %v22794_v11, 0.0  ;;  %v15211_v8 = vld [vmem:[%s22999_s13 + $0x210] sm:$0xff]  ;;  %v15210_v16 = vld [vmem:[%s22999_s13 + $0x208] sm:$0xff] }
0x5b54   :  { %13844 = vadd.xlane.f32.xlu1 %v13843_v14  ;;  %v15205_v14 = vld [vmem:[%s23000_s12 + $0x4] ss:$0 sm:$0xff] }
0x5b55   :  { %v22800_v15 = vadd.f32 %v15195_v42, %v13824_v10  ;;  %v15220_v42 = vld [vmem:[%s22999_s13 + $0x258] sm:$0xff]  ;;  %v15209_v10 = vld [vmem:[%s22999_s13 + $0x200] sm:$0xff] }
0x5b56   :  { %18304 = vmatpush3.msra.mxu1 %v15220_v42 }
0x5b57   :  { %v13846_v36 = vsel %vm86_vm1, %v22800_v15, 0.0  ;;  %18305 = vmatprep.subr.mxu1 %v18742_v21 }
0x5b58   :  { %13847 = vadd.xlane.f32.xlu0 %v13846_v36  ;;  %18306 = vmatpush3.msra.mxu1 %v15219_v39 }
0x5b59   :  { %18307 = vmatprep.subr.mxu1 %v18742_v21 }
0x5b5a   :  { %18308 = vmatpush3.msra.mxu1 %v15218_v53 }
0x5b5b   :  { %18309 = vmatprep.subr.mxu1 %v18742_v21 }
0x5b5c   :  { %18310 = vmatpush3.msra.mxu1 %v15217_v54 }
0x5b5d   :  { %18311 = vmatprep.subr.mxu1 %v18742_v21 }
0x5b5e   :  { %18312 = vmatpush3.msra.mxu1 %v15216_v61 }
0x5b5f   :  { %18313 = vmatprep.subr.mxu1 %v18742_v21 }
0x5b60   :  { %18314 = vmatpush3.msra.mxu1 %v15215_v56 }
0x5b61   :  { %18315 = vmatprep.subr.mxu1 %v18742_v21 }
0x5b62   :  { %18316 = vmatpush3.msra.mxu1 %v15214_v49 }
0x5b63   :  { %18317 = vmatprep.subr.mxu1 %v18742_v21 }
0x5b64   :  { %18318 = vmatpush3.msra.mxu1 %v15213_v45 }
0x5b65   :  { %18319 = vmatprep.subr.mxu1 %v18742_v21 }
0x5b66   :  { %18320 = vmatpush3.msra.mxu1 %v15212_v58 }
0x5b67   :  { %18321 = vmatprep.subr.mxu1 %v18742_v21 }
0x5b68   :  { %18322 = vmatpush3.msra.mxu1 %v15211_v8 }
0x5b69   :  { %18323 = vmatprep.subr.mxu1 %v18742_v21 }
0x5b6a   :  { %18324 = vmatpush3.msra.mxu1 %v15210_v16 }
0x5b6b   :  { %18325 = vmatprep.subr.mxu1 %v18742_v21 }
0x5b6c   :  { %18326 = vmatpush3.msra.mxu1 %v15209_v10 }
0x5bd9   :  { %v13842_v59 = vpop.xlane.xlu0 %13841 }
0x5bda   :  { %v13849_v23 = vmul.f32 0.03125, %v13842_v59 }
0x5bdc   :  { %v13852_v63 = vsub.f32 %v22788_v7, %v13849_v23 }
0x5bdd   :  { %v13845_v31 = vpop.xlane.xlu1 %13844 }
0x5bde   :  { %v13850_v3 = vmul.f32 0.03125, %v13845_v31  ;;  %v13855_v32 = vmul.f32 %v13852_v63, %v13852_v63 }
0x5be0   :  { %v13853_v52 = vsub.f32 %v22794_v11, %v13850_v3  ;;  %v13858_v12 = vsel %vm79_vm0, %v13855_v32, 0.0 }
0x5be1   :  { %13859 = vadd.xlane.f32.xlu1 %v13858_v12  ;;  %v13848_v38 = vpop.xlane.xlu0 %13847 }
0x5be2   :  { %v13851_v46 = vmul.f32 0.03125, %v13848_v38  ;;  %v13856_v20 = vmul.f32 %v13853_v52, %v13853_v52 }
0x5be4   :  { %v13854_v37 = vsub.f32 %v22800_v15, %v13851_v46  ;;  %v13861_v48 = vsel %vm79_vm0, %v13856_v20, 0.0 }
0x5be5   :  { %13862 = vadd.xlane.f32.xlu0 %v13861_v48 }
0x5be6   :  { %v13857_v60 = vmul.f32 %v13854_v37, %v13854_v37 }
0x5be8   :  { %v13864_v33 = vsel %vm86_vm1, %v13857_v60, 0.0 }
0x5be9   :  { %13865 = vadd.xlane.f32.xlu1 %v13864_v33 }
0x5c6a   :  { %v13860_v6 = vpop.xlane.xlu1 %13859 }
0x5c6b   :  { %v13867_v47 = vmul.f32 0.03125, %v13860_v6 }
0x5c6d   :  { %v13870_v28 = vadd.f32 1e-05, %v13867_v47 }
0x5c6e   :  { %v13863_v26 = vpop.xlane.xlu0 %13862 }
0x5c6f   :  { %18703 = vrsqrt.f32 %v13870_v28  ;;  %v13868_v30 = vmul.f32 0.03125, %v13863_v26 }
0x5c71   :  { %v13871_v0 = vadd.f32 1e-05, %v13868_v30 }
0x5c72   :  { %v13866_v55 = vpop.xlane.xlu1 %13865 }
0x5c73   :  { %18705 = vrsqrt.f32 %v13871_v0  ;;  %v13869_v25 = vmul.f32 0.03125, %v13866_v55 }
0x5c75   :  { %v13872_v19 = vadd.f32 1e-05, %v13869_v25 }
0x5c77   :  { %18707 = vrsqrt.f32 %v13872_v19 }
0x5c7c   :  { %v18704_v17 = vpop.eup %18703 }
0x5c7d   :  { %v13876_v41 = vmul.f32 %v18704_v17, %v13852_v63 }
0x5c7f   :  { %v13885_v5 = vmul.f32 %v15198_v9, %v13876_v41 }
0x5c80   :  { %v18706_v29 = vpop.eup %18705 }
0x5c81   :  { %v13894_v34 = vadd.f32 %v15199_v27, %v13885_v5  ;;  %v13877_v50 = vmul.f32 %v18706_v29, %v13853_v52 }
0x5c83   :  { %18287 = vmatmul.mubr.msk.f32.vlgmr.msra.gmra.mxu0 %vm79_vm0, %v13894_v34  ;;  %v13886_v44 = vmul.f32 %v15198_v9, %v13877_v50 }
0x5c84   :  { %v18708_v24 = vpop.eup %18707  ;;  %18289 = vmatprep.mubr.msk.f32.mxu0 %vm18743_vm2, %v18742_v21 }
0x5c85   :  { %v13878_v57 = vmul.f32 %v18708_v24, %v13854_v37  ;;  %v13895_v18 = vadd.f32 %v15199_v27, %v13886_v44 }
0x5c87   :  { %18290 = vmatmul.mubr.msk.f32.gmra.mxu0 %vm79_vm0, %v13895_v18  ;;  %v13887_v40 = vmul.f32 %v15198_v9, %v13878_v57 }
0x5c88   :  { %18292 = vmatprep.mubr.msk.f32.mxu0 %vm18743_vm2, %v18742_v21 }
0x5c89   :  { %v13896_v13 = vadd.f32 %v15199_v27, %v13887_v40 }
0x5c8b   :  { %18293 = vmatmul.mubr.msk.f32.gmra.mxu0 %vm79_vm0, %v13896_v13 }
0x5c8c   :  { %18344 = vmatprep.mubr.msk.f32.mxu0 %vm18743_vm2, %v18742_v21 }
0x5d43   :  { %v13985_v36 = vpop.f32.mrf.mxu0 }
0x5d44   :  { %v22907_v59 = vadd.f32 %v15205_v14, %v13985_v36 }
0x5d45   :  { %v18288_v23 = vpop.f32.mrf.mxu0 }
0x5d46   :  { %v22910_v63 = vmul.f32 0.70710677, %v22907_v59 }
0x5d47   :  { %v13990_v31 = vpop.f32.mrf.mxu0 }
0x5d48   :  { %v14005_v3 = vand.u32 2147483647, %v22910_v63  ;;  %v22913_v32 = vadd.f32 %v15205_v14, %v13990_v31  ;;  %vm14065_vm3 = vcmp.ge.f32.partialorder %v22910_v63, 0.0 }
0x5d49   :  { %v18291_v52 = vpop.f32.mrf.mxu0 }
0x5d4a   :  { %v14008_v12 = vmul.f32 0.3275911, %v14005_v3  ;;  %v22916_v38 = vmul.f32 0.70710677, %v22913_v32  ;;  %v14047_v6 = vsub.f32 0.0, %v14005_v3 }
0x5d4b   :  { %v13995_v46 = vpop.f32.mrf.mxu0 }
0x5d4c   :  { %v14011_v20 = vadd.f32 1.0, %v14008_v12  ;;  %v14006_v37 = vand.u32 2147483647, %v22916_v38  ;;  %v22919_v48 = vadd.f32 %v15205_v14, %v13995_v46  ;;  %v14050_v28 = vmul.f32 %v14047_v6, %v14005_v3 }
0x5d4d   :  { %v18294_v60 = vpop.f32.mrf.mxu0  ;;  %vm14066_vm4 = vcmp.ge.f32.partialorder %v22916_v38, 0.0 }
0x5d4e   :  { %18709 = vrcp.f32 %v14011_v20  ;;  %v14009_v33 = vmul.f32 0.3275911, %v14006_v37  ;;  %v22922_v1 = vmul.f32 0.70710677, %v22919_v48  ;;  %v14048_v26 = vsub.f32 0.0, %v14006_v37 }
0x5d4f   :  { %v14053_v55 = vmul.f32 1.442695, %v14050_v28  ;;  %v13999_v20 = vmul.f32 0.5, %v22907_v59 }
0x5d50   :  { %v14012_v51 = vadd.f32 1.0, %v14009_v33  ;;  %v14007_v43 = vand.u32 2147483647, %v22922_v1  ;;  %v14051_v25 = vmul.f32 %v14048_v26, %v14006_v37  ;;  %vm14067_vm5 = vcmp.ge.f32.partialorder %v22922_v1, 0.0 }
0x5d52   :  { %18711 = vrcp.f32 %v14012_v51  ;;  %v14010_v22 = vmul.f32 0.3275911, %v14007_v43  ;;  %v14049_v19 = vsub.f32 0.0, %v14007_v43  ;;  %v14055_v5 = vmul.f32 1.442695, %v14051_v25 }
0x5d53   :  { %v15226_v25 = vld [vmem:[%s23001_s14 + $0x4] ss:$0 sm:$0xff] }
0x5d54   :  { %v14013_v47 = vadd.f32 1.0, %v14010_v22  ;;  %v14052_v29 = vmul.f32 %v14049_v19, %v14007_v43 }
0x5d56   :  { %18713 = vrcp.f32 %v14013_v47  ;;  %v14057_v40 = vmul.f32 1.442695, %v14052_v29  ;;  %v14000_v47 = vmul.f32 0.5, %v22913_v32 }
0x5d57   :  { %18715 = vpow2.f32 %v14053_v55 }
0x5d58   :  { %18717 = vpow2.f32 %v14055_v5 }
0x5d59   :  { %18719 = vpow2.f32 %v14057_v40 }
0x5d5b   :  { %v18710_v30 = vpop.eup %18709 }
0x5d5c   :  { %v14020_v0 = vmul.f32 1.0614054, %v18710_v30 }
0x5d5e   :  { %v14023_v17 = vadd.f32 -1.4531521, %v14020_v0  ;;  %v14001_v0 = vmul.f32 0.5, %v22919_v48 }
0x5d5f   :  { %v18712_v9 = vpop.eup %18711 }
0x5d60   :  { %v14026_v41 = vmul.f32 %v18710_v30, %v14023_v17  ;;  %v14021_v27 = vmul.f32 1.0614054, %v18712_v9 }
0x5d62   :  { %v14029_v34 = vadd.f32 1.4214138, %v14026_v41  ;;  %v14024_v50 = vadd.f32 -1.4531521, %v14021_v27 }
0x5d63   :  { %v18714_v44 = vpop.eup %18713 }
0x5d64   :  { %v14032_v24 = vmul.f32 %v18710_v30, %v14029_v34  ;;  %v14027_v57 = vmul.f32 %v18712_v9, %v14024_v50  ;;  %v14022_v18 = vmul.f32 1.0614054, %v18714_v44  ;;  %v18716_v49 = vpop.eup %18715 }
0x5d65   :  { %v18718_v36 = vpop.eup %18717 }
0x5d66   :  { %v14035_v13 = vadd.f32 -0.28449672, %v14032_v24  ;;  %v14030_v62 = vadd.f32 1.4214138, %v14027_v57  ;;  %v14025_v2 = vadd.f32 -1.4531521, %v14022_v18  ;;  %v18720_v33 = vpop.eup %18719 }
0x5d68   :  { %v14038_v4 = vmul.f32 %v18710_v30, %v14035_v13  ;;  %v14033_v35 = vmul.f32 %v18712_v9, %v14030_v62  ;;  %v14028_v42 = vmul.f32 %v18714_v44, %v14025_v2 }
0x5d6a   :  { %v14041_v39 = vadd.f32 0.2548296, %v14038_v4  ;;  %v14036_v53 = vadd.f32 -0.28449672, %v14033_v35  ;;  %v14031_v54 = vadd.f32 1.4214138, %v14028_v42 }
0x5d6c   :  { %v14044_v61 = vmul.f32 %v18710_v30, %v14041_v39  ;;  %v14039_v56 = vmul.f32 %v18712_v9, %v14036_v53  ;;  %v14034_v45 = vmul.f32 %v18714_v44, %v14031_v54 }
0x5d6e   :  { %v14059_v58 = vmul.f32 %v18716_v49, %v14044_v61  ;;  %v14042_v8 = vadd.f32 0.2548296, %v14039_v56  ;;  %v14037_v16 = vadd.f32 -0.28449672, %v14034_v45  ;;  %v14253_v56 = vld [vmem:[%s23005_s20 + $0x18] sm:$0xff]  ;;  %v14252_v49 = vld [vmem:[%s23005_s20 + $0x10] sm:$0xff] }
0x5d6f   :  { %18337 = vmatpush3.msra.mxu0 %v14253_v56  ;;  %v14251_v45 = vld [vmem:[%s23005_s20 + $0x8] sm:$0xff] }
0x5d70   :  { %v14062_v10 = vsub.f32 1.0, %v14059_v58  ;;  %v14045_v14 = vmul.f32 %v18712_v9, %v14042_v8  ;;  %v14040_v23 = vmul.f32 %v18714_v44, %v14037_v16  ;;  %18338 = vmatprep.subr.mxu0 %v18742_v21  ;;  %v14250_v58 = vld [vmem:[%s23005_s20] sm:$0xff] }
0x5d71   :  { %18339 = vmatpush3.msra.mxu0 %v14252_v49 }
0x5d72   :  { %v14068_v31 = vsub.f32 0.0, %v14062_v10  ;;  %v14060_v3 = vmul.f32 %v18718_v36, %v14045_v14  ;;  %v14043_v52 = vadd.f32 0.2548296, %v14040_v23  ;;  %18340 = vmatprep.subr.mxu0 %v18742_v21 }
0x5d73   :  { %18341 = vmatpush3.msra.mxu0 %v14251_v45 }
0x5d74   :  { %v14071_v12 = vsel %vm14065_vm3, %v14062_v10, %v14068_v31  ;;  %v14063_v46 = vsub.f32 1.0, %v14060_v3  ;;  %v14046_v60 = vmul.f32 %v18714_v44, %v14043_v52  ;;  %18342 = vmatprep.subr.mxu0 %v18742_v21 }
0x5d75   :  { %v14074_v37 = vadd.f32 1.0, %v14071_v12  ;;  %18343 = vmatpush3.msra.mxu0 %v14250_v58 }
0x5d76   :  { %v14069_v51 = vsub.f32 0.0, %v14063_v46  ;;  %v14061_v22 = vmul.f32 %v18720_v33, %v14046_v60 }
0x5d77   :  { %v14077_v43 = vmul.f32 %v14074_v37, %v13999_v20  ;;  %v15228_v37 = vld [vmem:[%s23007_s19] ss:$0 sm:$0xff] }
0x5d78   :  { %v14072_v6 = vsel %vm14066_vm4, %v14063_v46, %v14069_v51  ;;  %v14064_v26 = vsub.f32 1.0, %v14061_v22  ;;  %v15227_v46 = vld [vmem:[%s23006_s18] ss:$0 sm:$0xff] }
0x5d79   :  { %v14075_v28 = vadd.f32 1.0, %v14072_v6  ;;  %18328 = vmatmul.mubr.f32.vlgmr.msra.gmra.mxu1 %v14077_v43 }
0x5d7a   :  { %18330 = vmatprep.mubr.msk.f32.mxu1 %vm18743_vm2, %v18742_v21  ;;  %v14070_v30 = vsub.f32 0.0, %v14064_v26 }
0x5d7b   :  { %v14078_v63 = vmul.f32 %v14075_v28, %v14000_v47 }
0x5d7c   :  { %v14073_v59 = vsel %vm14067_vm5, %v14064_v26, %v14070_v30  ;;  %v15229_v30 = vld [vmem:[%s23008_s21] ss:$0 sm:$0xff] }
0x5d7d   :  { %18331 = vmatmul.mubr.f32.gmra.mxu1 %v14078_v63  ;;  %v14076_v55 = vadd.f32 1.0, %v14073_v59 }
0x5d7e   :  { %18333 = vmatprep.mubr.msk.f32.mxu1 %vm18743_vm2, %v18742_v21 }
0x5d7f   :  { %v14079_v38 = vmul.f32 %v14076_v55, %v14001_v0 }
0x5d81   :  { %18334 = vmatmul.mubr.f32.gmra.mxu1 %v14079_v38 }
0x5e39   :  { %v14163_v32 = vpop.f32.mrf.mxu1 }
0x5e3a   :  { %v14177_v19 = vadd.f32 %v14163_v32, %v22788_v7 }
0x5e3b   :  { %v18329_v17 = vpop.f32.mrf.mxu1 }
0x5e3c   :  { %v14188_v9 = vadd.f32 %v15226_v25, %v14177_v19 }
0x5e3d   :  { %v14168_v1 = vpop.f32.mrf.mxu1 }
0x5e3e   :  { %v14178_v41 = vadd.f32 %v14168_v1, %v22794_v11  ;;  %v14193_v48 = vsel %vm79_vm0, %v14188_v9, 0.0 }
0x5e3f   :  { %14194 = vadd.xlane.f32.xlu0 %v14193_v48  ;;  %v18332_v27 = vpop.f32.mrf.mxu1 }
0x5e40   :  { %v14189_v5 = vadd.f32 %v15226_v25, %v14178_v41 }
0x5e41   :  { %v14173_v29 = vpop.f32.mrf.mxu1 }
0x5e42   :  { %v14196_v34 = vsel %vm79_vm0, %v14189_v5, 0.0  ;;  %v14179_v50 = vadd.f32 %v14173_v29, %v22800_v15 }
0x5e43   :  { %14197 = vadd.xlane.f32.xlu1 %v14196_v34  ;;  %v18335_v44 = vpop.f32.mrf.mxu1 }
0x5e44   :  { %v14190_v24 = vadd.f32 %v15226_v25, %v14179_v50 }
0x5e46   :  { %v14199_v7 = vsel %vm86_vm1, %v14190_v24, 0.0 }
0x5e47   :  { %14200 = vadd.xlane.f32.xlu0 %v14199_v7 }
0x5ec8   :  { %v14195_v57 = vpop.xlane.xlu0 %14194 }
0x5ec9   :  { %v14202_v18 = vmul.f32 0.03125, %v14195_v57 }
0x5ecb   :  { %v14205_v40 = vsub.f32 %v14188_v9, %v14202_v18 }
0x5ecc   :  { %v14198_v11 = vpop.xlane.xlu1 %14197 }
0x5ecd   :  { %v14203_v13 = vmul.f32 0.03125, %v14198_v11  ;;  %v14208_v62 = vmul.f32 %v14205_v40, %v14205_v40 }
0x5ecf   :  { %v14206_v2 = vsub.f32 %v14189_v5, %v14203_v13  ;;  %v14211_v4 = vsel %vm79_vm0, %v14208_v62, 0.0 }
0x5ed0   :  { %14212 = vadd.xlane.f32.xlu1 %v14211_v4  ;;  %v14201_v35 = vpop.xlane.xlu0 %14200 }
0x5ed1   :  { %v14209_v42 = vmul.f32 %v14206_v2, %v14206_v2  ;;  %v14204_v39 = vmul.f32 0.03125, %v14201_v35 }
0x5ed3   :  { %v14214_v15 = vsel %vm79_vm0, %v14209_v42, 0.0  ;;  %v14207_v53 = vsub.f32 %v14190_v24, %v14204_v39 }
0x5ed4   :  { %14215 = vadd.xlane.f32.xlu0 %v14214_v15 }
0x5ed5   :  { %v14210_v54 = vmul.f32 %v14207_v53, %v14207_v53 }
0x5ed7   :  { %v14217_v61 = vsel %vm86_vm1, %v14210_v54, 0.0  ;;  %vm14350_vm1 = vcmask 31744  }
0x5ed8   :  { %14218 = vadd.xlane.f32.xlu1 %v14217_v61 }
0x5f59   :  { %v14213_v8 = vpop.xlane.xlu1 %14212 }
0x5f5a   :  { %v14220_v16 = vmul.f32 0.03125, %v14213_v8 }
0x5f5c   :  { %v14223_v10 = vadd.f32 1e-05, %v14220_v16 }
0x5f5d   :  { %v14216_v14 = vpop.xlane.xlu0 %14215 }
0x5f5e   :  { %18721 = vrsqrt.f32 %v14223_v10  ;;  %v14221_v36 = vmul.f32 0.03125, %v14216_v14 }
0x5f60   :  { %v14224_v23 = vadd.f32 1e-05, %v14221_v36 }
0x5f61   :  { %v14219_v31 = vpop.xlane.xlu1 %14218 }
0x5f62   :  { %18723 = vrsqrt.f32 %v14224_v23  ;;  %v14222_v3 = vmul.f32 0.03125, %v14219_v31 }
0x5f64   :  { %v14225_v52 = vadd.f32 1e-05, %v14222_v3 }
0x5f66   :  { %18725 = vrsqrt.f32 %v14225_v52 }
0x5f6b   :  { %v18722_v12 = vpop.eup %18721 }
0x5f6c   :  { %v14229_v20 = vmul.f32 %v18722_v12, %v14205_v40 }
0x5f6e   :  { %v14238_v60 = vmul.f32 %v15227_v46, %v14229_v20 }
0x5f6f   :  { %v18724_v33 = vpop.eup %18723 }
0x5f70   :  { %v14247_v51 = vadd.f32 %v15228_v37, %v14238_v60  ;;  %v14230_v43 = vmul.f32 %v18724_v33, %v14206_v2 }
0x5f72   :  { %18345 = vmatmul.mubr.msk.f32.vlgmr.msra.gmra.mxu0 %vm79_vm0, %v14247_v51  ;;  %v14239_v22 = vmul.f32 %v15227_v46, %v14230_v43 }
0x5f73   :  { %18347 = vmatprep.mubr.msk.f32.mxu0 %vm18743_vm2, %v18742_v21  ;;  %v18726_v6 = vpop.eup %18725 }
0x5f74   :  { %v14248_v47 = vadd.f32 %v15228_v37, %v14239_v22  ;;  %v14231_v28 = vmul.f32 %v18726_v6, %v14207_v53 }
0x5f76   :  { %18348 = vmatmul.mubr.msk.f32.gmra.mxu0 %vm79_vm0, %v14248_v47  ;;  %v14240_v26 = vmul.f32 %v15227_v46, %v14231_v28 }
0x5f77   :  { %18350 = vmatprep.mubr.msk.f32.mxu0 %vm18743_vm2, %v18742_v21 }
0x5f78   :  { %v14249_v63 = vadd.f32 %v15228_v37, %v14240_v26 }
0x5f7a   :  { %18351 = vmatmul.mubr.msk.f32.gmra.mxu0 %vm79_vm0, %v14249_v63  ;;  %vm14353_vm0 = vcmask 29696  }
0x6032   :  { %v14336_v59 = vpop.f32.mrf.mxu0 }
0x6033   :  { %v14337_v0 = vadd.f32 %v15229_v30, %v14336_v59 }
0x6034   :  { %v18346_v55 = vpop.f32.mrf.mxu0 }
0x6035   :  { %14351 = vst.msk [vmem:[%s23009_s22] sm:$0xff] %vm14350_vm1, %v14337_v0 }
0x6036   :  { %v14341_v38 = vpop.f32.mrf.mxu0 }
0x6037   :  { %v14342_v32 = vadd.f32 %v15229_v30, %v14341_v38 }
0x6038   :  { %v18349_v25 = vpop.f32.mrf.mxu0 }
0x6039   :  { %14352 = vst.msk [vmem:[%s23009_s22 + $0x8] sm:$0xff] %vm14350_vm1, %v14342_v32 }
0x603a   :  { %v14346_v21 = vpop.f32.mrf.mxu0 }
0x603b   :  { %v14347_v19 = vadd.f32 %v15229_v30, %v14346_v21 }
0x603c   :  { %v18352_v17 = vpop.f32.mrf.mxu0 }
0x603d   :  { %14354 = vst.msk [vmem:[%s23009_s22 + $0x10] sm:$0x3f] %vm14353_vm0, %v14347_v19 }

</bundles_post_ra>
